<compile_context>
chip_gen: v5e
topology: v5e:2x2
jax: 0.10.0
libtpu: 0.0.40
codegen_flags: <defaults>
</compile_context>

<pallas_src>
import math
import functools

import jax
import jax.numpy as jnp
from jax.experimental import pallas as pl
from jax.experimental.pallas import tpu as pltpu


def qkv_proj_kernel(x_ref, wqkv_ref, bqkv_ref, q_ref, k_ref, v_ref, *, n_head):
    """One (tm, C) tile of x -> fused QKV projection.

    Output layouts: Q -> (H, tm, D) (the 'hqd' operand); K -> (H, D, tm);
    V -> (H, D+1, tm) with an all-ones feature row appended so the attention kernel's
    PV matmul also produces the softmax row-sum.  K/V keep the token axis minor
    (lane-dense, tm >= 128), avoiding the 4x lane padding of a D=32 minor dim.
    """
    x = x_ref[0]                                                       # (tm, C) bf16
    qkv = jnp.dot(x, wqkv_ref[...],
                  preferred_element_type=jnp.float32) + bqkv_ref[...]  # (tm, 3C) f32
    tm, three_c = qkv.shape
    C = three_c // 3
    D = C // n_head

    q = qkv[:, :C].astype(q_ref.dtype)
    k = qkv[:, C:2 * C].astype(k_ref.dtype)
    v = qkv[:, 2 * C:].astype(v_ref.dtype)

    # Q: (tm, C) -> (H, tm, D).
    q_ref[0] = jnp.transpose(q.reshape(tm, n_head, D), (1, 0, 2))
    # K: (tm, C) -> (C, tm) -> (H, D, tm)  (token axis stays minor => lane-dense store).
    k_ref[0] = k.T.reshape(n_head, D, tm)
    # V: same as K, plus an all-ones row per head (row index D) for the fused row-sum.
    v_heads = v.T.reshape(n_head, D, tm)
    ones = jnp.ones((n_head, 1, tm), dtype=v_ref.dtype)
    v_ref[0] = jnp.concatenate([v_heads, ones], axis=1)                # (H, D+1, tm)


def flash_attn_kernel(q_ref, k_ref, v_ref, wp_ref, bp_ref, o_ref,
                      m_sc, acc_sc, *, n_head):
    """Online-softmax attention over KV tiles; output projection fused on last KV step.

    acc_sc is (H, tq, D+1): columns [0, D) hold the running numerator, column D holds
    the running softmax denominator (the all-ones row of V makes the PV matmul emit
    sum_k p on the MXU, so there is no per-step cross-lane sum and no separate l scratch).
    """
    kv = pl.program_id(2)

    @pl.when(kv == 0)
    def _():
        m_sc[...] = jnp.full_like(m_sc, -jnp.inf)
        acc_sc[...] = jnp.zeros_like(acc_sc)

    q = q_ref[0]                                                     # (H, tq, D)   bf16 (pre-scaled)
    k = k_ref[0]                                                     # (H, D, tk)   bf16
    v = v_ref[0]                                                     # (H, D+1, tk) bf16, row D == 1

    # Heads are the batch dim; contraction over D with K already in (D, tk) layout.
    s = jnp.einsum('hqd,hdk->hqk', q, k,
                   preferred_element_type=jnp.float32)               # (H, tq, tk) f32

    m_prev = m_sc[...]
    m_new = jnp.maximum(m_prev, s.max(axis=-1, keepdims=True))
    alpha = jnp.exp(m_prev - m_new)                                  # (H, tq, 1)
    # TODO(synk): if profiling shows the EUP slot saturated on v6e/v7x, compute this exp
    # in bf16 (p feeds a bf16 matmul anyway); keep f32 on v5e (no bf16 EUP).
    p = jnp.exp(s - m_new)                                           # (H, tq, tk) f32
    # PV matmul over the ones-extended V: column D of pv is the softmax row-sum.
    pv = jnp.einsum('hqk,hdk->hqd', p.astype(v.dtype), v,
                    preferred_element_type=jnp.float32)              # (H, tq, D+1) f32
    acc_sc[...] = alpha * acc_sc[...] + pv
    m_sc[...] = m_new
    # TODO(synk): attn_drop / resid_drop are identity (eval mode); no in-kernel RNG dropout.

    @pl.when(kv == pl.num_programs(2) - 1)
    def _():
        acc = acc_sc[...]
        D = acc.shape[-1] - 1
        l = acc[..., D:]                                             # (H, tq, 1) denominator
        y = acc[..., :D] * pl.reciprocal(l, approx=True)             # (H, tq, D)
        H, tq, _ = y.shape
        # Matches torch's y.transpose(1, 2).contiguous().view(B, T, C) head ordering.
        # (Runs once per q tile; the review marks replacing this relayout as optional.)
        y2d = jnp.transpose(y, (1, 0, 2)).reshape(tq, H * D)         # (tq, C)
        out = jnp.dot(y2d.astype(wp_ref.dtype), wp_ref[...],
                      preferred_element_type=jnp.float32) + bp_ref[...]
        o_ref[0] = out.astype(o_ref.dtype)                           # lane-dense (tq, C) store


def self_attention(x, wq, bq, wk, bk, wv, bv, wp, bp, *, n_head,
                   block_m=256, block_q=256, block_kv=256):
    B, T, C = x.shape
    assert C % n_head == 0
    D = C // n_head
    scale = 1.0 / math.sqrt(D)

    block_m = min(block_m, T)
    block_q = min(block_q, T)
    block_kv = min(block_kv, T)   # NOTE: on v5e prefer block_kv=128 for long T (HBM-bound).
    assert T % block_m == 0 and T % block_q == 0 and T % block_kv == 0

    # Host-side prep: fold softmax scale into the query projection, fuse QKV weights,
    # cast matmul operands to bf16 (f32 accumulation inside kernels), keep biases f32.
    wqkv = jnp.concatenate([wq * scale, wk, wv], axis=1).astype(jnp.bfloat16)   # (C, 3C)
    bqkv = jnp.concatenate([bq * scale, bk, bv], axis=1).astype(jnp.float32)    # (1, 3C)
    x_bf = x.astype(jnp.bfloat16)
    wp_bf = wp.astype(jnp.bfloat16)
    bp_f32 = bp.astype(jnp.float32)

    # Explicit VMEM budget: fits v7x's 64 MiB/TC with headroom, safe on v5e/v6e (128 MiB).
    vmem_limit = 32 * 1024 * 1024

    # ---- Kernel 1: fused QKV projection, K/V stored token-minor ----
    proj_cost = pl.CostEstimate(
        flops=2 * B * T * C * 3 * C,
        transcendentals=0,
        bytes_accessed=(B * T * C * 2 + 3 * C * C * 2 + 3 * C * 4
                        + 3 * B * T * C * 2),
    )
    q, k, v = pl.pallas_call(
        functools.partial(qkv_proj_kernel, n_head=n_head),
        out_shape=(
            jax.ShapeDtypeStruct((B, n_head, T, D), jnp.bfloat16),      # Q: (B,H,T,D)
            jax.ShapeDtypeStruct((B, n_head, D, T), jnp.bfloat16),      # K: (B,H,D,T)
            jax.ShapeDtypeStruct((B, n_head, D + 1, T), jnp.bfloat16),  # V+ones: (B,H,D+1,T)
        ),
        grid_spec=pltpu.PrefetchScalarGridSpec(
            num_scalar_prefetch=0,
            grid=(B, T // block_m),
            in_specs=[
                pl.BlockSpec((1, block_m, C), lambda b, i: (b, i, 0)),   # x tile
                pl.BlockSpec((C, 3 * C), lambda b, i: (0, 0)),           # fused W_qkv (resident)
                pl.BlockSpec((1, 3 * C), lambda b, i: (0, 0)),           # fused bias  (resident)
            ],
            out_specs=[
                pl.BlockSpec((1, n_head, block_m, D), lambda b, i: (b, 0, i, 0)),
                pl.BlockSpec((1, n_head, D, block_m), lambda b, i: (b, 0, 0, i)),
                pl.BlockSpec((1, n_head, D + 1, block_m), lambda b, i: (b, 0, 0, i)),
            ],
        ),
        compiler_params=pltpu.CompilerParams(
            dimension_semantics=("parallel", "parallel"),
            vmem_limit_bytes=vmem_limit),
        cost_estimate=proj_cost,
    )(x_bf, wqkv, bqkv)

    # ---- Kernel 2: flash attention + fused output projection ----
    attn_cost = pl.CostEstimate(
        flops=2 * B * n_head * T * T * (2 * D + 1) + 2 * B * T * C * C,
        transcendentals=B * n_head * T * T,
        bytes_accessed=(B * T * C * 2                          # Q (read once per q tile)
                        + 2 * (T // block_q) * B * T * C * 2   # K/V re-streamed per q pass
                        + C * C * 2 + C * 4
                        + B * T * C * 4),
    )
    out = pl.pallas_call(
        functools.partial(flash_attn_kernel, n_head=n_head),
        out_shape=jax.ShapeDtypeStruct((B, T, C), x.dtype),
        grid_spec=pltpu.PrefetchScalarGridSpec(
            num_scalar_prefetch=0,
            grid=(B, T // block_q, T // block_kv),
            in_specs=[
                pl.BlockSpec((1, n_head, block_q, D), lambda b, qi, ki: (b, 0, qi, 0)),
                pl.BlockSpec((1, n_head, D, block_kv), lambda b, qi, ki: (b, 0, 0, ki)),
                pl.BlockSpec((1, n_head, D + 1, block_kv), lambda b, qi, ki: (b, 0, 0, ki)),
                pl.BlockSpec((C, C), lambda b, qi, ki: (0, 0)),          # W_proj (resident)
                pl.BlockSpec((1, C), lambda b, qi, ki: (0, 0)),          # b_proj (resident)
            ],
            out_specs=pl.BlockSpec((1, block_q, C), lambda b, qi, ki: (b, qi, 0)),
            scratch_shapes=[
                pltpu.VMEM((n_head, block_q, 1), jnp.float32),       # running max
                pltpu.VMEM((n_head, block_q, D + 1), jnp.float32),   # numerator + denom (col D)
            ],
        ),
        compiler_params=pltpu.CompilerParams(
            dimension_semantics=("parallel", "parallel", "arbitrary"),
            vmem_limit_bytes=vmem_limit),
        cost_estimate=attn_cost,
    )(q, k, v, wp_bf, bp_f32)
    return out


def _reference(x, wq, bq, wk, bk, wv, bv, wp, bp, n_head):
    """Plain-JAX replica of the PyTorch forward (eval mode, no mask/rel_pos)."""
    B, T, C = x.shape
    D = C // n_head
    q = (x @ wq + bq).reshape(B, T, n_head, D).transpose(0, 2, 1, 3)
    k = (x @ wk + bk).reshape(B, T, n_head, D).transpose(0, 2, 1, 3)
    v = (x @ wv + bv).reshape(B, T, n_head, D).transpose(0, 2, 1, 3)
    att = (q @ k.transpose(0, 1, 3, 2)) * (1.0 / math.sqrt(D))
    att = jax.nn.softmax(att, axis=-1)
    y = (att @ v).transpose(0, 2, 1, 3).reshape(B, T, C)
    return y @ wp + bp


if __name__ == "__main__":
    # Module-default hyperparameters (n_embd=256, n_head=8), small sequence.
    B, T, C, n_head = 2, 256, 256, 8

    key = jax.random.PRNGKey(0)
    kx, kwq, kbq, kwk, kbk, kwv, kbv, kwp, kbp = jax.random.split(key, 9)

    init = 1.0 / math.sqrt(C)   # Linear-like init scale
    x = jax.random.normal(kx, (B, T, C), dtype=jnp.float32)
    wq = jax.random.normal(kwq, (C, C), dtype=jnp.float32) * init
    wk = jax.random.normal(kwk, (C, C), dtype=jnp.float32) * init
    wv = jax.random.normal(kwv, (C, C), dtype=jnp.float32) * init
    wp = jax.random.normal(kwp, (C, C), dtype=jnp.float32) * init
    bq = jax.random.normal(kbq, (1, C), dtype=jnp.float32) * init
    bk = jax.random.normal(kbk, (1, C), dtype=jnp.float32) * init
    bv = jax.random.normal(kbv, (1, C), dtype=jnp.float32) * init
    bp = jax.random.normal(kbp, (1, C), dtype=jnp.float32) * init

    out = self_attention(x, wq, bq, wk, bk, wv, bv, wp, bp, n_head=n_head)
    out = jax.block_until_ready(out)

    # Reference uses the same bf16-rounded matmul operands the kernel consumes;
    # remaining diffs come from bf16 P/V and projection matmuls (f32-accumulated)
    # and the approx reciprocal (~2^-12 relative).
    bf = lambda a: a.astype(jnp.bfloat16).astype(jnp.float32)
    ref = _reference(bf(x), bf(wq), bq, bf(wk), bk, bf(wv), bv, bf(wp), bp, n_head)

    assert out.shape == (B, T, C)
    assert jnp.allclose(out, ref, atol=5e-2, rtol=5e-2), (
        "Pallas kernel mismatch vs reference, max abs err = "
        f"{float(jnp.max(jnp.abs(out - ref)))}")

    print("KERNEL_OK")
</pallas_src>

<mosaic_0001>
module attributes {stable_mosaic.version = 11 : i64} {
  func.func @qkv_proj_kernel(%arg0: i32, %arg1: i32, %arg2: memref<1x256x256xbf16, #tpu.memory_space<vmem>>, %arg3: memref<256x768xbf16, #tpu.memory_space<vmem>>, %arg4: memref<1x768xf32, #tpu.memory_space<vmem>>, %arg5: memref<1x8x256x32xbf16, #tpu.memory_space<vmem>>, %arg6: memref<1x8x32x256xbf16, #tpu.memory_space<vmem>>, %arg7: memref<1x8x33x256xbf16, #tpu.memory_space<vmem>>) attributes {dimension_semantics = [#tpu.dimension_semantics<parallel>, #tpu.dimension_semantics<parallel>], iteration_bounds = array<i64: 2, 1>, scalar_prefetch = 0 : i64, scratch_operands = 0 : i64, tpu.core_type = #tpu.core_type<tc>, window_params = [{transform_indices = @transform_0, window_bounds = array<i64: 1, 256, 256>}, {pipeline_mode = #tpu.pipeline_mode<synchronous>, transform_indices = @transform_1, window_bounds = array<i64: 256, 768>}, {pipeline_mode = #tpu.pipeline_mode<synchronous>, transform_indices = @transform_2, window_bounds = array<i64: 1, 768>}, {transform_indices = @transform_3, window_bounds = array<i64: 1, 8, 256, 32>}, {transform_indices = @transform_4, window_bounds = array<i64: 1, 8, 32, 256>}, {transform_indices = @transform_5, window_bounds = array<i64: 1, 8, 33, 256>}]} {
    %c0 = arith.constant 0 : index
    %c0_0 = arith.constant 0 : index
    %c0_1 = arith.constant 0 : index
    %0 = vector.load %arg2[%c0, %c0_0, %c0_1] : memref<1x256x256xbf16, #tpu.memory_space<vmem>>, vector<1x256x256xbf16>
    %1 = vector.shape_cast %0 : vector<1x256x256xbf16> to vector<256x256xbf16>
    %c0_2 = arith.constant 0 : index
    %c0_3 = arith.constant 0 : index
    %2 = vector.load %arg3[%c0_2, %c0_3] : memref<256x768xbf16, #tpu.memory_space<vmem>>, vector<256x768xbf16>
    %cst = arith.constant dense<0.000000e+00> : vector<256x768xf32>
    %3 = tpu.matmul %1, %2, %cst {dimension_numbers = #tpu.dot_dimension_numbers<[1], [0], [0], [1], [0, 0, 1, 1], [], []>} : vector<256x256xbf16>, vector<256x768xbf16>, vector<256x768xf32> -> vector<256x768xf32>
    %c0_4 = arith.constant 0 : index
    %c0_5 = arith.constant 0 : index
    %4 = vector.load %arg4[%c0_4, %c0_5] : memref<1x768xf32, #tpu.memory_space<vmem>>, vector<1x768xf32>
    %5 = vector.broadcast %4 : vector<1x768xf32> to vector<256x768xf32>
    %6 = arith.addf %3, %5 : vector<256x768xf32>
    %7 = vector.extract_strided_slice %6 {offsets = [0, 0], sizes = [256, 256], strides = [1, 1]} : vector<256x768xf32> to vector<256x256xf32>
    %8 = arith.truncf %7 : vector<256x256xf32> to vector<256x256xbf16>
    %9 = vector.extract_strided_slice %6 {offsets = [0, 256], sizes = [256, 256], strides = [1, 1]} : vector<256x768xf32> to vector<256x256xf32>
    %10 = arith.truncf %9 : vector<256x256xf32> to vector<256x256xbf16>
    %11 = vector.extract_strided_slice %6 {offsets = [0, 512], sizes = [256, 256], strides = [1, 1]} : vector<256x768xf32> to vector<256x256xf32>
    %12 = arith.truncf %11 : vector<256x256xf32> to vector<256x256xbf16>
    %13 = vector.shape_cast %8 : vector<256x256xbf16> to vector<256x8x32xbf16>
    %14 = tpu.transpose %13, [1, 0, 2] : vector<256x8x32xbf16> -> vector<8x256x32xbf16>
    %c0_6 = arith.constant 0 : index
    %c0_7 = arith.constant 0 : index
    %c0_8 = arith.constant 0 : index
    %c0_9 = arith.constant 0 : index
    %15 = vector.load %arg5[%c0_6, %c0_7, %c0_8, %c0_9] : memref<1x8x256x32xbf16, #tpu.memory_space<vmem>>, vector<1x8x256x32xbf16>
    %16 = vector.shape_cast %15 : vector<1x8x256x32xbf16> to vector<8x256x32xbf16>
    %17 = vector.shape_cast %14 : vector<8x256x32xbf16> to vector<1x8x256x32xbf16>
    tpu.vector_store %arg5[%c0_6, %c0_7, %c0_8, %c0_9], %17 {strides = array<i32>} : memref<1x8x256x32xbf16, #tpu.memory_space<vmem>>, vector<1x8x256x32xbf16>,
    %18 = tpu.transpose %10, [1, 0] : vector<256x256xbf16> -> vector<256x256xbf16>
    %19 = vector.shape_cast %18 : vector<256x256xbf16> to vector<8x32x256xbf16>
    %c0_10 = arith.constant 0 : index
    %c0_11 = arith.constant 0 : index
    %c0_12 = arith.constant 0 : index
    %c0_13 = arith.constant 0 : index
    %20 = vector.load %arg6[%c0_10, %c0_11, %c0_12, %c0_13] : memref<1x8x32x256xbf16, #tpu.memory_space<vmem>>, vector<1x8x32x256xbf16>
    %21 = vector.shape_cast %20 : vector<1x8x32x256xbf16> to vector<8x32x256xbf16>
    %22 = vector.shape_cast %19 : vector<8x32x256xbf16> to vector<1x8x32x256xbf16>
    tpu.vector_store %arg6[%c0_10, %c0_11, %c0_12, %c0_13], %22 {strides = array<i32>} : memref<1x8x32x256xbf16, #tpu.memory_space<vmem>>, vector<1x8x32x256xbf16>,
    %23 = tpu.transpose %12, [1, 0] : vector<256x256xbf16> -> vector<256x256xbf16>
    %24 = vector.shape_cast %23 : vector<256x256xbf16> to vector<8x32x256xbf16>
    %cst_14 = arith.constant 1.000000e+00 : bf16
    %25 = vector.broadcast %cst_14 : bf16 to vector<8x1x256xbf16>
    %26 = tpu.concatenate %24, %25 in 1 : vector<8x32x256xbf16>, vector<8x1x256xbf16> -> vector<8x33x256xbf16>
    %c0_15 = arith.constant 0 : index
    %c0_16 = arith.constant 0 : index
    %c0_17 = arith.constant 0 : index
    %c0_18 = arith.constant 0 : index
    %27 = vector.load %arg7[%c0_15, %c0_16, %c0_17, %c0_18] : memref<1x8x33x256xbf16, #tpu.memory_space<vmem>>, vector<1x8x33x256xbf16>
    %28 = vector.shape_cast %27 : vector<1x8x33x256xbf16> to vector<8x33x256xbf16>
    %29 = vector.shape_cast %26 : vector<8x33x256xbf16> to vector<1x8x33x256xbf16>
    tpu.vector_store %arg7[%c0_15, %c0_16, %c0_17, %c0_18], %29 {strides = array<i32>} : memref<1x8x33x256xbf16, #tpu.memory_space<vmem>>, vector<1x8x33x256xbf16>,
    return
  }
  func.func @transform_0(%arg0: i32, %arg1: i32) -> (i32, i32, i32) {
    %c0_i32 = arith.constant 0 : i32
    %c0_i32_0 = arith.constant 0 : i32
    return %arg0, %arg1, %c0_i32 : i32, i32, i32
  }
  func.func @transform_1(%arg0: i32, %arg1: i32) -> (i32, i32) {
    %c0_i32 = arith.constant 0 : i32
    %c0_i32_0 = arith.constant 0 : i32
    %c0_i32_1 = arith.constant 0 : i32
    return %c0_i32, %c0_i32_0 : i32, i32
  }
  func.func @transform_2(%arg0: i32, %arg1: i32) -> (i32, i32) {
    %c0_i32 = arith.constant 0 : i32
    %c0_i32_0 = arith.constant 0 : i32
    %c0_i32_1 = arith.constant 0 : i32
    return %c0_i32, %c0_i32_0 : i32, i32
  }
  func.func @transform_3(%arg0: i32, %arg1: i32) -> (i32, i32, i32, i32) {
    %c0_i32 = arith.constant 0 : i32
    %c0_i32_0 = arith.constant 0 : i32
    %c0_i32_1 = arith.constant 0 : i32
    return %arg0, %c0_i32, %arg1, %c0_i32_0 : i32, i32, i32, i32
  }
  func.func @transform_4(%arg0: i32, %arg1: i32) -> (i32, i32, i32, i32) {
    %c0_i32 = arith.constant 0 : i32
    %c0_i32_0 = arith.constant 0 : i32
    %c0_i32_1 = arith.constant 0 : i32
    return %arg0, %c0_i32, %c0_i32_0, %arg1 : i32, i32, i32, i32
  }
  func.func @transform_5(%arg0: i32, %arg1: i32) -> (i32, i32, i32, i32) {
    %c0_i32 = arith.constant 0 : i32
    %c0_i32_0 = arith.constant 0 : i32
    %c0_i32_1 = arith.constant 0 : i32
    return %arg0, %c0_i32, %c0_i32_0, %arg1 : i32, i32, i32, i32
  }
}

</mosaic_0001>

<bundles_post_ra>
// kernel: tpu_custom_call.1
= control target key start
LH: loop header
LB: loop body
LE: loop exit
PB: predicated region body
PF: predicated region fallthrough
CT: control target
= control target key end

     0   :  { %s14710_s0 = inlined_call_operand.hbm [shape: bf16[2,256,256], index: 0, kind: input, shape index: {}]   ;;  %s14711_s1 = inlined_call_operand.hbm [shape: bf16[256,768], index: 1, kind: input, shape index: {}]   ;;  %s14712_s2 = inlined_call_operand.hbm [shape: f32[1,768], index: 2, kind: input, shape index: {}]   ;;  %s14713_s3 = inlined_call_operand.vmem [shape: bf16[2,8,256,32], index: 3, kind: output, shape index: {0}]   ;;  %s14714_s4 = inlined_call_operand.hbm [shape: bf16[2,8,32,256], index: 4, kind: output, shape index: {1}]   ;;  %s14715_s5 = inlined_call_operand.vmem [shape: bf16[2,8,33,256], index: 5, kind: output, shape index: {2}]  }
   0x1   :  { %14787 = sst [smem:[#allocation45_spill]] %s14711_s1 }
   0x2   :  { %14788 = sst [smem:[#allocation46_spill]] %s14712_s2 }
   0x3   :  { %11 = vsyncpa [#allocation3], 0 }
   0x4   :  { %13 = vsyncpa [#allocation3 + $0x1], 0 }
   0x5   :  { %14 = vsyncpa [#allocation6], 0 }
   0x6   :  { %15 = vsyncpa [#allocation4], 0 }
   0x7   :  { %17 = vsyncpa [#allocation4 + $0x1], 0  ;;  %s10610_s18 = smov 0   ;;  %s10612_s19 = smov 0  }
   0x8   :  { %s10614_s20 = smov 0   ;;  %s10616_s21 = smov 0  }
   0x9   :  { %s10618_s22 = smov 0   ;;  %s10620_s23 = smov 0  }
   0xa LB: > { %s9497_s24 = sadd.s32 4294967295, %s10564_s23   ;;  %s9498_s25 = sadd.s32 4294967294, %s10564_s23   ;;  %s10564_s23 = sphi %s10620_s23, %s23_s23   ;;  %s10560_s22 = sphi %s10618_s22, %s14967_s22   ;;  %s10556_s21 = sphi %s10616_s21, %s14966_s21   ;;  %s10552_s20 = sphi %s10614_s20, %s14965_s20   ;;  %s10548_s19 = sphi %s10612_s19, %s14964_s19   ;;  %s10544_s18 = sphi %s10610_s18, %s14963_s18  }
   0xb   : > { %p57_p0 = scmp.ne.s32.totalorder %s10548_s19, %s10544_s18  ;;  %p10644_p1 = scmp.eq.s32.totalorder %s9497_s24, 0 }
   0xc   : > { %p10648_p2 = scmp.eq.s32.totalorder %s9497_s24, 1  ;;  %p159_p3 = scmp.eq.s32.totalorder %s9498_s25, 1 }
   0xd   : > { %p10654_p4 = por %p10644_p1, %p57_p0  ;;  %p9499_p5 = scmp.ge.s32.totalorder %s10564_s23, 1 }
   0xe   : > { %p10659_p6 = por %p159_p3, %p57_p0  ;;  %p194_p7 = scmp.lt.s32.totalorder %s10564_s23, 3 }
   0xf   : > { %s14793_s1 = sld [smem:[#allocation45_spill]]  ;;  %s10566_s9 = smov [#allocation5]  }
  0x10   : > { %p10667_p8 = pnand %p9499_p5, %p194_p7  ;;  %s207_s10 = sshll.u32 %s10566_s9, 4  ;;  %s208_s10 = int_to_ptr.vmem [resolvable:$true] %s207_s10 }
  0x11   : > { %p9502_p11 = scmp.ge.s32.totalorder %s10564_s23, 2  ;;  %s14795_s2 = sld [smem:[#allocation46_spill]] }
  0x12   : > { %p10303_p9 = pneg %p10667_p8  ;;  %s10567_s14 = smov 384  }
  0x13   : > { %s10568_s15 = smov 24   ;;  %s10569_s16 = smov [#allocation7]  }
  0x14   : > { %p10304_p10 = pnand %p10303_p9, %p10644_p1  ;;  %s222_s17 = sshll.u32 %s10569_s16, 4  ;;  %s223_s17 = int_to_ptr.vmem [resolvable:$true] %s222_s17 }
  0x15   : > { %s205_s7 = sshll.u32 %s14793_s1, 4  ;;  %s35_s24 = sadd.s32 1, %s10560_s22  ;;  %s206_s7 = int_to_ptr.hbm [resolvable:$true] %s205_s7 }
  0x16   : > { %10306 = dma.hbm_to_vmem [thread:$0]  (!%p10304_p10), %s206_s7, 12288, %s208_s10, [#allocation6], %s10567_s14, %s10567_s14, %s10568_s15  }
  0x17   : > { %s220_s13 = sshll.u32 %s14795_s2, 4  ;;  %s44_s25 = sadd.s32 1, %s10552_s20  ;;  %s221_s13 = int_to_ptr.hbm [resolvable:$true] %s220_s13 }
  0x18   : > { %10309 = dma.hbm_to_vmem [thread:$0]  (!%p10304_p10), %s221_s13, 96, %s223_s17, [#allocation6]  }
  0x19   : > { %p37_p12 = scmp.ge.s32.totalorder %s35_s24, 2  ;;  %p51_p13 = scmp.ne.s32.totalorder %s10552_s20, %s10548_s19 }
  0x1a   : > { %p52_p0 = scmp.eq.s32.totalorder %s10564_s23, 0  ;;  %p10320_p3 = scmp.lt.s32.totalorder %s10564_s23, 2 }
  0x1b   : > { %s14969_s24 = smov (%p37_p12, %s35_s24), 0  ;;  %p10693_p7 = por %p10648_p2, %p51_p13 }
  0x1c   : > { %14796 = sst [smem:[#allocation12_spill]] %s14969_s24  ;;  %p10687_p5 = por %p52_p0, %p51_p13 }
  0x1d   : > { %s39_s7 = ssub.s32 %s10560_s22, %s14969_s24  ;;  %s233_s9 = sand.u32 1, %s10552_s20  }
  0x1e   : > { %p42_p9 = scmp.eq.s32.totalorder %s39_s7, 0  ;;  %s9503_s10 = sshll.u32 %s233_s9, 8 }
  0x1f   : > { %s10159_s11 = sshll.u32 %s10560_s22, 8  ;;  %s237_s17 = scalar_lea.vmem [#allocation2], %s9503_s10 }
  0x20   : > { %s10702_s12 = scalar_select %p42_p9, %s10552_s20, %s44_s25  }
  0x21   : > { %s245_s15 = scalar_lea.hbm %s14710_s0, %s10159_s11  ;;  %s248_s1 = sshll.u32 %s237_s17, 4  ;;  %s249_s1 = int_to_ptr.vmem [resolvable:$true] %s248_s1 }
  0x22   : > { %s246_s16 = sshll.u32 %s245_s15, 4  ;;  %p10311_p2 = pnand %p10320_p3, %p10687_p5  ;;  %s247_s16 = int_to_ptr.hbm [resolvable:$true] %s246_s16 }
  0x23   : > { %s234_s27 = scalar_lea.sflag [#allocation3], %s233_s9  ;;  %s10570_s2 = smov 128  }
  0x24   : > { %s10571_s24 = smov 8   ;;  %260 = sbr.rel (%p10667_p8) target bundleno = 1632 (0x660), region = 32 }
  0x25   : > { %10313 = dma.hbm_to_vmem [thread:$0]  (!%p10311_p2), %s247_s16, 4096, %s249_s1, %s234_s27, %s10570_s2, %s10570_s2, %s10571_s24  }
  0x29   : > { %s10714_s25 = sand.u32 1, %s10548_s19  }
  0x2a   : > { %s9507_s7 = sshll.u32 %s10714_s25, 8  ;;  %s263_s10 = scalar_lea.sflag [#allocation3], %s10714_s25 }
  0x2b   : > { %s10720_s30 = scalar_lea.vmem [#allocation2], %s9507_s7 }
  0x2c   : > { %10531 = dma.done.wait (%p10654_p4), %s263_s10, 4096  }
  0x2d   : > { %10533 = vsyncadd (%p10654_p4), %s263_s10, 4294963200 }
  0x2e   : > { %10535 = dma.done.wait (%p10644_p1), [#allocation6], 12384  }
  0x2f   : > { %10537 = vsyncadd (%p10644_p1), [#allocation6], 4294954912  ;;  %p324_p8 = scmp.lt.s32.totalorder %s10556_s21, 1  ;;  %vm9214_vm0 = vcmask 1040384   ;;  %v10572_v0 = vmov 1065369472  }
  0x30   : > { %v9087_v1 = vunpack.c.l.b16 %v10572_v0  ;;  %vm9215_vm1 = vsmask.f32 256  ;;  %vm9217_vm2 = vcmask 1044484   ;;  %vm9218_vm3 = vsmask.f32 4352  ;;  %s10573_s24 = smov 32  }
  0x31   : > { %s10732_s1 = scalar_select %p324_p8, %s10556_s21, 1  ;;  %vm9216_vm4 = vmand %vm9214_vm0, %vm9215_vm1  ;;  %v9812_v17 = vld [vmem:[#allocation5 + $0x150] sm:$0xf]  ;;  %v10238_v18 = vld [vmem:[#allocation5 + $0x164] sm:$0xf0]  ;;  %vm2869_vm7 = vcmask 1047556  }
  0x32   : > { %vm9219_vm5 = vmand %vm9217_vm2, %vm9218_vm3  ;;  %v9148_v2 = vpack.c.b16 %v9087_v1, %v9087_v1  ;;  %v9813_v20 = vor.u32 %v10238_v18, %v9812_v17  ;;  %v10004_v21 = vld [vmem:[#allocation5 + $0x2d0] sm:$0xf]  ;;  %v10286_v22 = vld [vmem:[#allocation5 + $0x2e4] sm:$0xf0]  ;;  %s10574_s9 = smov 64   ;;  %s10575_s11 = smov 96  }
  0x33   : > { %s10290_s2 = smul.u32 320, %s10732_s1  ;;  %vm10735_vm6 = vmor %vm9219_vm5, %vm9216_vm4  ;;  %v10005_v24 = vor.u32 %v10286_v22, %v10004_v21  ;;  %v10235_v25 = vld [vmem:[#allocation5 + $0x154] sm:$0xf]  ;;  %v9814_v26 = vld [vmem:[#allocation5 + $0x168] sm:$0xf0]  ;;  %vm8501_vm8 = vcmask 257024  }
  0x34   : > { %1128 = vmatpush.bf16.msra.mxu0 %v9813_v20  ;;  %v9817_v28 = vor.u32 %v10235_v25, %v9814_v26  ;;  %v10283_v29 = vld [vmem:[#allocation5 + $0x2d4] sm:$0xf]  ;;  %v10006_v30 = vld [vmem:[#allocation5 + $0x2e8] sm:$0xf0]  ;;  %v9788_v32 = vld [vmem:[#allocation5 + $0x120] sm:$0xf] }
  0x35   : > { %s10742_s8 = scalar_lea.vmem %s14715_s5, %s10290_s2  ;;  %1217 = vmatpush.bf16.msra.mxu1 %v10005_v24  ;;  %v10009_v31 = vor.u32 %v10283_v29, %v10006_v30  ;;  %v10232_v33 = vld [vmem:[#allocation5 + $0x134] sm:$0xf0]  ;;  %v9980_v35 = vld [vmem:[#allocation5 + $0x2a0] sm:$0xf]  ;;  %v10229_v38 = vld [vmem:[#allocation5 + $0x124] sm:$0xf] }
  0x36   : > { %v9221_v4 = vld [vmem:[%s10742_s8 + $0x20] sm:$0x11]  ;;  %v9228_v5 = vld [vmem:[%s10742_s8 + $0x48] sm:$0x11]  ;;  %v9235_v6 = vld [vmem:[%s10742_s8 + $0x70] sm:$0x11]  ;;  %1306 = vmatpush.bf16.msra.mxu2 %v9817_v28  ;;  %v9789_v34 = vor.u32 %v10232_v33, %v9788_v32 }
  0x37   : > { %v9222_v7 = vsel %vm10735_vm6, %v9148_v2, %v9221_v4  ;;  %v9229_v8 = vsel %vm10735_vm6, %v9148_v2, %v9228_v5  ;;  %v9236_v9 = vsel %vm10735_vm6, %v9148_v2, %v9235_v6  ;;  %v9242_v10 = vld [vmem:[%s10742_s8 + $0x98] sm:$0x11]  ;;  %v9249_v11 = vld [vmem:[%s10742_s8 + $0xc0] sm:$0x11]  ;;  %v9256_v12 = vld [vmem:[%s10742_s8 + $0xe8] sm:$0x11]  ;;  %1395 = vmatpush.bf16.msra.mxu3 %v10009_v31 }
  0x38   : > { %9223 = vst [vmem:[%s10742_s8 + $0x20] sm:$0x11] %v9222_v7  ;;  %v9243_v13 = vsel %vm10735_vm6, %v9148_v2, %v9242_v10  ;;  %v9263_v14 = vld [vmem:[%s10742_s8 + $0x110] sm:$0x11]  ;;  %v9270_v15 = vld [vmem:[%s10742_s8 + $0x138] sm:$0x11]  ;;  %v9250_v16 = vsel %vm10735_vm6, %v9148_v2, %v9249_v11  ;;  %v9257_v19 = vsel %vm10735_vm6, %v9148_v2, %v9256_v12  ;;  %1129 = vmatpush.bf16.msra.mxu0 %v9789_v34 }
  0x39   : > { %9230 = vst [vmem:[%s10742_s8 + $0x48] sm:$0x11] %v9229_v8  ;;  %v9264_v23 = vsel %vm10735_vm6, %v9148_v2, %v9263_v14  ;;  %v9271_v27 = vsel %vm10735_vm6, %v9148_v2, %v9270_v15  ;;  %v10280_v36 = vld [vmem:[#allocation5 + $0x2b4] sm:$0xf0]  ;;  %v9790_v39 = vld [vmem:[#allocation5 + $0x138] sm:$0xf0] }
  0x3a   : > { %9237 = vst [vmem:[%s10742_s8 + $0x70] sm:$0x11] %v9236_v9  ;;  %v9981_v37 = vor.u32 %v10280_v36, %v9980_v35  ;;  %v9793_v40 = vor.u32 %v10229_v38, %v9790_v39  ;;  %v10277_v41 = vld [vmem:[#allocation5 + $0x2a4] sm:$0xf]  ;;  %v9982_v42 = vld [vmem:[#allocation5 + $0x2b8] sm:$0xf0] }
  0x3b   : > { %9244 = vst [vmem:[%s10742_s8 + $0x98] sm:$0x11] %v9243_v13  ;;  %v9764_v43 = vld [vmem:[#allocation5 + $0xf0] sm:$0xf]  ;;  %v9985_v44 = vor.u32 %v10277_v41, %v9982_v42  ;;  %v10226_v45 = vld [vmem:[#allocation5 + $0x104] sm:$0xf0] }
  0x3c   : > { %9251 = vst [vmem:[%s10742_s8 + $0xc0] sm:$0x11] %v9250_v16  ;;  %1218 = vmatpush.bf16.msra.mxu1 %v9981_v37  ;;  %v9956_v46 = vld [vmem:[#allocation5 + $0x270] sm:$0xf]  ;;  %v10274_v47 = vld [vmem:[#allocation5 + $0x284] sm:$0xf0]  ;;  %1307 = vmatpush.bf16.msra.mxu2 %v9793_v40  ;;  %v9765_v48 = vor.u32 %v10226_v45, %v9764_v43 }
  0x3d   : > { %9258 = vst [vmem:[%s10742_s8 + $0xe8] sm:$0x11] %v9257_v19  ;;  %v9957_v49 = vor.u32 %v10274_v47, %v9956_v46  ;;  %v10223_v50 = vld [vmem:[#allocation5 + $0xf4] sm:$0xf]  ;;  %v9766_v51 = vld [vmem:[#allocation5 + $0x108] sm:$0xf0]  ;;  %1396 = vmatpush.bf16.msra.mxu3 %v9985_v44 }
  0x3e   : > { %9265 = vst [vmem:[%s10742_s8 + $0x110] sm:$0x11] %v9264_v23  ;;  %v10271_v52 = vld [vmem:[#allocation5 + $0x274] sm:$0xf]  ;;  %v9769_v53 = vor.u32 %v10223_v50, %v9766_v51  ;;  %v9958_v54 = vld [vmem:[#allocation5 + $0x288] sm:$0xf0]  ;;  %1130 = vmatpush.bf16.msra.mxu0 %v9765_v48 }
  0x3f   : > { %9272 = vst [vmem:[%s10742_s8 + $0x138] sm:$0x11] %v9271_v27  ;;  %v9740_v55 = vld [vmem:[#allocation5 + $0xc0] sm:$0xf]  ;;  %v10220_v56 = vld [vmem:[#allocation5 + $0xd4] sm:$0xf0]  ;;  %v9961_v57 = vor.u32 %v10271_v52, %v9958_v54 }
  0x40   : > { %v9741_v58 = vor.u32 %v10220_v56, %v9740_v55  ;;  %v9932_v59 = vld [vmem:[#allocation5 + $0x240] sm:$0xf]  ;;  %v10268_v60 = vld [vmem:[#allocation5 + $0x254] sm:$0xf0]  ;;  %v10217_v61 = vld [vmem:[#allocation5 + $0xc4] sm:$0xf]  ;;  %1219 = vmatpush.bf16.msra.mxu1 %v9957_v49  ;;  %1308 = vmatpush.bf16.msra.mxu2 %v9769_v53 }
  0x41   : > { %v9933_v62 = vor.u32 %v10268_v60, %v9932_v59  ;;  %v9742_v63 = vld [vmem:[#allocation5 + $0xd8] sm:$0xf0]  ;;  %v10265_v0 = vld [vmem:[#allocation5 + $0x244] sm:$0xf]  ;;  %v9716_v3 = vld [vmem:[#allocation5 + $0x90] sm:$0xf]  ;;  %1397 = vmatpush.bf16.msra.mxu3 %v9961_v57 }
  0x42   : > { %v9934_v1 = vld [vmem:[#allocation5 + $0x258] sm:$0xf0]  ;;  %v9745_v2 = vor.u32 %v10217_v61, %v9742_v63  ;;  %v10214_v4 = vld [vmem:[#allocation5 + $0xa4] sm:$0xf0]  ;;  %v9908_v5 = vld [vmem:[#allocation5 + $0x210] sm:$0xf]  ;;  %1131 = vmatpush.bf16.msra.mxu0 %v9741_v58 }
  0x43   : > { %v9937_v6 = vor.u32 %v10265_v0, %v9934_v1  ;;  %v10262_v7 = vld [vmem:[#allocation5 + $0x224] sm:$0xf0]  ;;  %v10211_v8 = vld [vmem:[#allocation5 + $0x94] sm:$0xf]  ;;  %v9718_v9 = vld [vmem:[#allocation5 + $0xa8] sm:$0xf0]  ;;  %v9717_v10 = vor.u32 %v10214_v4, %v9716_v3 }
  0x44   : > { %v10259_v11 = vld [vmem:[#allocation5 + $0x214] sm:$0xf]  ;;  %v9910_v12 = vld [vmem:[#allocation5 + $0x228] sm:$0xf0]  ;;  %1220 = vmatpush.bf16.msra.mxu1 %v9933_v62  ;;  %v9909_v13 = vor.u32 %v10262_v7, %v9908_v5  ;;  %v9692_v14 = vld [vmem:[#allocation5 + $0x60] sm:$0xf]  ;;  %1309 = vmatpush.bf16.msra.mxu2 %v9745_v2  ;;  %v9721_v16 = vor.u32 %v10211_v8, %v9718_v9 }
  0x45   : > { %v10208_v15 = vld [vmem:[#allocation5 + $0x74] sm:$0xf0]  ;;  %v9884_v17 = vld [vmem:[#allocation5 + $0x1e0] sm:$0xf]  ;;  %1398 = vmatpush.bf16.msra.mxu3 %v9937_v6  ;;  %v9913_v19 = vor.u32 %v10259_v11, %v9910_v12  ;;  %v10205_v20 = vld [vmem:[#allocation5 + $0x64] sm:$0xf] }
  0x46   : > { %v10256_v18 = vld [vmem:[#allocation5 + $0x1f4] sm:$0xf0]  ;;  %v9694_v21 = vld [vmem:[#allocation5 + $0x78] sm:$0xf0]  ;;  %1132 = vmatpush.bf16.msra.mxu0 %v9717_v10  ;;  %v9693_v22 = vor.u32 %v10208_v15, %v9692_v14  ;;  %v10253_v23 = vld [vmem:[#allocation5 + $0x1e4] sm:$0xf] }
  0x47   : > { %v9886_v24 = vld [vmem:[#allocation5 + $0x1f8] sm:$0xf0]  ;;  %v9885_v25 = vor.u32 %v10256_v18, %v9884_v17  ;;  %v9668_v26 = vld [vmem:[#allocation5 + $0x30] sm:$0xf]  ;;  %v10202_v27 = vld [vmem:[#allocation5 + $0x44] sm:$0xf0]  ;;  %v9697_v28 = vor.u32 %v10205_v20, %v9694_v21 }
  0x48   : > { %1221 = vmatpush.bf16.msra.mxu1 %v9909_v13  ;;  %1310 = vmatpush.bf16.msra.mxu2 %v9721_v16  ;;  %v9860_v29 = vld [vmem:[#allocation5 + $0x1b0] sm:$0xf]  ;;  %v10250_v30 = vld [vmem:[#allocation5 + $0x1c4] sm:$0xf0]  ;;  %v10199_v31 = vld [vmem:[#allocation5 + $0x34] sm:$0xf]  ;;  %v9889_v32 = vor.u32 %v10253_v23, %v9886_v24  ;;  %v9669_v36 = vor.u32 %v10202_v27, %v9668_v26 }
  0x49   : > { %1399 = vmatpush.bf16.msra.mxu3 %v9913_v19  ;;  %v9670_v33 = vld [vmem:[#allocation5 + $0x48] sm:$0xf0]  ;;  %v10247_v34 = vld [vmem:[#allocation5 + $0x1b4] sm:$0xf]  ;;  %v9644_v37 = vld [vmem:[#allocation5] sm:$0xf]  ;;  %v9861_v40 = vor.u32 %v10250_v30, %v9860_v29 }
  0x4a   : > { %v9862_v35 = vld [vmem:[#allocation5 + $0x1c8] sm:$0xf0]  ;;  %1133 = vmatpush.bf16.msra.mxu0 %v9693_v22  ;;  %v10196_v38 = vld [vmem:[#allocation5 + $0x14] sm:$0xf0]  ;;  %v9836_v39 = vld [vmem:[#allocation5 + $0x180] sm:$0xf]  ;;  %v9673_v44 = vor.u32 %v10199_v31, %v9670_v33 }
  0x4b   : > { %v10244_v41 = vld [vmem:[#allocation5 + $0x194] sm:$0xf0]  ;;  %v10193_v42 = vld [vmem:[#allocation5 + $0x4] sm:$0xf]  ;;  %v9646_v43 = vld [vmem:[#allocation5 + $0x18] sm:$0xf0]  ;;  %v9865_v48 = vor.u32 %v10247_v34, %v9862_v35  ;;  %v9645_v52 = vor.u32 %v10196_v38, %v9644_v37 }
  0x4c   : > { %1222 = vmatpush.bf16.msra.mxu1 %v9885_v25  ;;  %1311 = vmatpush.bf16.msra.mxu2 %v9697_v28  ;;  %v10241_v45 = vld [vmem:[#allocation5 + $0x184] sm:$0xf]  ;;  %v9838_v46 = vld [vmem:[#allocation5 + $0x198] sm:$0xf0]  ;;  %v9516_v47 = vld [vmem:[%s10720_s30] sm:$0xf]  ;;  %v9837_v56 = vor.u32 %v10244_v41, %v9836_v39  ;;  %v9649_v61 = vor.u32 %v10193_v42, %v9646_v43 }
  0x4d   : > { %1400 = vmatpush.bf16.msra.mxu3 %v9889_v32  ;;  %v10162_v49 = vld [vmem:[%s10720_s30 + $0x4] sm:$0xf0]  ;;  %v9820_v50 = vld [vmem:[#allocation5 + $0x158] sm:$0xf]  ;;  %v10239_v51 = vld [vmem:[#allocation5 + $0x16c] sm:$0xf0]  ;;  %v9841_v1 = vor.u32 %v10241_v45, %v9838_v46 }
  0x4e   : > { %1134 = vmatpush.bf16.msra.mxu0 %v9669_v36  ;;  %v10161_v53 = vld [vmem:[%s10720_s30 + $0x4] sm:$0xf]  ;;  %v10012_v54 = vld [vmem:[#allocation5 + $0x2d8] sm:$0xf]  ;;  %v10287_v55 = vld [vmem:[#allocation5 + $0x2ec] sm:$0xf0]  ;;  %v9821_v60 = vor.u32 %v10239_v51, %v9820_v50  ;;  %v10780_v2 = vor.u32 %v10162_v49, %v9516_v47 }
  0x4f   : > { %v9518_v57 = vld [vmem:[%s10720_s30 + $0x8] sm:$0xf0]  ;;  %v10236_v58 = vld [vmem:[#allocation5 + $0x15c] sm:$0xf]  ;;  %v9822_v59 = vld [vmem:[#allocation5 + $0x170] sm:$0xf0]  ;;  %v10013_v0 = vor.u32 %v10287_v55, %v10012_v54 }
  0x50   : > { %1223 = vmatpush.bf16.msra.mxu1 %v9861_v40  ;;  %1312 = vmatpush.bf16.msra.mxu2 %v9673_v44  ;;  %v10284_v62 = vld [vmem:[#allocation5 + $0x2dc] sm:$0xf]  ;;  %v10014_v63 = vld [vmem:[#allocation5 + $0x2f0] sm:$0xf0]  ;;  %14801 = vst [vmem:[#allocation13_spill] sm:$0xff] %v10780_v2  ;;  %v10782_v3 = vor.u32 %v10161_v53, %v9518_v57  ;;  %v9825_v4 = vor.u32 %v10236_v58, %v9822_v59  ;;  %s10160_s13 = sshll.u32 %s10732_s1, 10 }
  0x51   : > { %1401 = vmatpush.bf16.msra.mxu3 %v9865_v48  ;;  %v10017_v5 = vor.u32 %v10284_v62, %v10014_v63  ;;  %v10230_v6 = vld [vmem:[#allocation5 + $0x12c] sm:$0xf]  ;;  %v9798_v7 = vld [vmem:[#allocation5 + $0x140] sm:$0xf0]  ;;  %v9796_v11 = vld [vmem:[#allocation5 + $0x128] sm:$0xf]  ;;  %s11304_s16 = scalar_lea.vmem %s14713_s3, %s10160_s13 }
  0x52   : > { %1135 = vmatpush.bf16.msra.mxu0 %v9645_v52  ;;  %14802 = vst [vmem:[#allocation14_spill] sm:$0xff] %v10782_v3  ;;  %v10278_v8 = vld [vmem:[#allocation5 + $0x2ac] sm:$0xf]  ;;  %v9801_v9 = vor.u32 %v10230_v6, %v9798_v7  ;;  %v9990_v10 = vld [vmem:[#allocation5 + $0x2c0] sm:$0xf0]  ;;  %s14581_s17 = scalar_lea.vmem [#allocation8], %s9507_s7 }
  0x53   : > { %v10233_v12 = vld [vmem:[#allocation5 + $0x13c] sm:$0xf0]  ;;  %v9993_v13 = vor.u32 %v10278_v8, %v9990_v10  ;;  %v9988_v15 = vld [vmem:[#allocation5 + $0x2a8] sm:$0xf]  ;;  %v9524_v18 = vld [vmem:[%s10720_s30 + $0x10] sm:$0xf] }
  0x54   : > { %1224 = vmatpush.bf16.msra.mxu1 %v9837_v56  ;;  %1313 = vmatpush.bf16.msra.mxu2 %v9649_v61  ;;  %v9797_v14 = vor.u32 %v10233_v12, %v9796_v11  ;;  %v10281_v16 = vld [vmem:[#allocation5 + $0x2bc] sm:$0xf0]  ;;  %v10164_v19 = vld [vmem:[%s10720_s30 + $0x14] sm:$0xf0]  ;;  %v10163_v20 = vld [vmem:[%s10720_s30 + $0x14] sm:$0xf] }
  0x55   : > { %1402 = vmatpush.bf16.msra.mxu3 %v9841_v1  ;;  %1136 = vmatmul.bf16.vlgmr.msra.gmra.mxu0 %v10780_v2  ;;  %v9989_v17 = vor.u32 %v10281_v16, %v9988_v15  ;;  %v9526_v21 = vld [vmem:[%s10720_s30 + $0x18] sm:$0xf0]  ;;  %v10792_v22 = vor.u32 %v10164_v19, %v9524_v18  ;;  %v9532_v24 = vld [vmem:[%s10720_s30 + $0x20] sm:$0xf]  ;;  %v10166_v25 = vld [vmem:[%s10720_s30 + $0x24] sm:$0xf0] }
  0x56   : > { %1484 = vmatpush.bf16.msrb.mxu0 %v9821_v60  ;;  %v10794_v23 = vor.u32 %v10163_v20, %v9526_v21  ;;  %v10165_v26 = vld [vmem:[%s10720_s30 + $0x24] sm:$0xf]  ;;  %v9534_v27 = vld [vmem:[%s10720_s30 + $0x28] sm:$0xf0]  ;;  %v10804_v28 = vor.u32 %v10166_v25, %v9532_v24  ;;  %v10224_v30 = vld [vmem:[#allocation5 + $0xfc] sm:$0xf] }
  0x57   : > { %1225 = vmatmul.bf16.vlgmr.msra.gmra.mxu1 %v10782_v3  ;;  %1314 = vmatmul.bf16.vlgmr.msra.gmra.mxu2 %v10780_v2  ;;  %14803 = vst [vmem:[#allocation15_spill] sm:$0xff] %v10792_v22  ;;  %v10806_v29 = vor.u32 %v10165_v26, %v9534_v27  ;;  %v9774_v31 = vld [vmem:[#allocation5 + $0x110] sm:$0xf0]  ;;  %v10272_v32 = vld [vmem:[#allocation5 + $0x27c] sm:$0xf]  ;;  %s10289_s27 = sshll.u32 %s10556_s21, 8 }
  0x58   : > { %1573 = vmatpush.bf16.msrb.mxu1 %v10013_v0  ;;  %1662 = vmatpush.bf16.msrb.mxu2 %v9825_v4  ;;  %14804 = vst [vmem:[#allocation16_spill] sm:$0xff] %v10794_v23  ;;  %v9777_v33 = vor.u32 %v10224_v30, %v9774_v31  ;;  %v9966_v34 = vld [vmem:[#allocation5 + $0x290] sm:$0xf0]  ;;  %v9772_v35 = vld [vmem:[#allocation5 + $0xf8] sm:$0xf]  ;;  %s9310_s1 = sshll.u32 %s14581_s17, 4  ;;  %s9311_s1 = int_to_ptr.vmem [resolvable:$true] %s9310_s1 }
  0x59   : > { %1751 = vmatpush.bf16.msrb.mxu3 %v10017_v5  ;;  %14805 = vst [vmem:[#allocation17_spill] sm:$0xff] %v10804_v28  ;;  %v10227_v36 = vld [vmem:[#allocation5 + $0x10c] sm:$0xf0]  ;;  %v9969_v37 = vor.u32 %v10272_v32, %v9966_v34  ;;  %v9964_v39 = vld [vmem:[#allocation5 + $0x278] sm:$0xf]  ;;  %s9283_s26 = scalar_lea.sflag [#allocation4], %s10714_s25 }
  0x5a   : > { %1403 = vmatmul.bf16.vlgmr.msra.gmra.mxu3 %v10782_v3  ;;  %1485 = vmatpush.bf16.msrb.mxu0 %v9797_v14  ;;  %14806 = vst [vmem:[#allocation18_spill] sm:$0xff] %v10806_v29  ;;  %v9773_v38 = vor.u32 %v10227_v36, %v9772_v35  ;;  %v10275_v40 = vld [vmem:[#allocation5 + $0x28c] sm:$0xf0]  ;;  %v10168_v43 = vld [vmem:[%s10720_s30 + $0x34] sm:$0xf0] }
  0x5b   : > { %v9965_v41 = vor.u32 %v10275_v40, %v9964_v39  ;;  %v9540_v42 = vld [vmem:[%s10720_s30 + $0x30] sm:$0xf]  ;;  %v10167_v44 = vld [vmem:[%s10720_s30 + $0x34] sm:$0xf]  ;;  %v9542_v45 = vld [vmem:[%s10720_s30 + $0x38] sm:$0xf0] }
  0x5c   : > { %1663 = vmatpush.bf16.msrb.mxu2 %v9801_v9  ;;  %1574 = vmatpush.bf16.msrb.mxu1 %v9989_v17  ;;  %v10816_v46 = vor.u32 %v10168_v43, %v9540_v42  ;;  %v10818_v47 = vor.u32 %v10167_v44, %v9542_v45  ;;  %v9548_v48 = vld [vmem:[%s10720_s30 + $0x40] sm:$0xf]  ;;  %v10170_v49 = vld [vmem:[%s10720_s30 + $0x44] sm:$0xf0]  ;;  %v10169_v50 = vld [vmem:[%s10720_s30 + $0x44] sm:$0xf] }
  0x5d   : > { %1752 = vmatpush.bf16.msrb.mxu3 %v9993_v13  ;;  %v9550_v51 = vld [vmem:[%s10720_s30 + $0x48] sm:$0xf0]  ;;  %v10828_v52 = vor.u32 %v10170_v49, %v9548_v48  ;;  %v9750_v55 = vld [vmem:[#allocation5 + $0xe0] sm:$0xf0]  ;;  %v9748_v59 = vld [vmem:[#allocation5 + $0xc8] sm:$0xf] }
  0x5e   : > { %1486 = vmatpush.bf16.msrb.mxu0 %v9773_v38  ;;  %v10830_v53 = vor.u32 %v10169_v50, %v9550_v51  ;;  %v10218_v54 = vld [vmem:[#allocation5 + $0xcc] sm:$0xf]  ;;  %v9942_v58 = vld [vmem:[#allocation5 + $0x260] sm:$0xf0]  ;;  %v10221_v60 = vld [vmem:[#allocation5 + $0xdc] sm:$0xf0] }
  0x5f   : > { %v10266_v56 = vld [vmem:[#allocation5 + $0x24c] sm:$0xf]  ;;  %v9753_v57 = vor.u32 %v10218_v54, %v9750_v55  ;;  %v9749_v62 = vor.u32 %v10221_v60, %v9748_v59  ;;  %v9940_v63 = vld [vmem:[#allocation5 + $0x248] sm:$0xf]  ;;  %v10269_v0 = vld [vmem:[#allocation5 + $0x25c] sm:$0xf0] }
  0x60   : > { %1664 = vmatpush.bf16.msrb.mxu2 %v9777_v33  ;;  %1575 = vmatpush.bf16.msrb.mxu1 %v9965_v41  ;;  %v9945_v61 = vor.u32 %v10266_v56, %v9942_v58  ;;  %v9941_v1 = vor.u32 %v10269_v0, %v9940_v63  ;;  %v9556_v4 = vld [vmem:[%s10720_s30 + $0x50] sm:$0xf]  ;;  %v10172_v5 = vld [vmem:[%s10720_s30 + $0x54] sm:$0xf0]  ;;  %v10171_v6 = vld [vmem:[%s10720_s30 + $0x54] sm:$0xf] }
  0x61   : > { %1753 = vmatpush.bf16.msrb.mxu3 %v9969_v37  ;;  %v9558_v7 = vld [vmem:[%s10720_s30 + $0x58] sm:$0xf0]  ;;  %v10840_v8 = vor.u32 %v10172_v5, %v9556_v4  ;;  %v9564_v10 = vld [vmem:[%s10720_s30 + $0x60] sm:$0xf]  ;;  %v10174_v11 = vld [vmem:[%s10720_s30 + $0x64] sm:$0xf0] }
  0x62   : > { %1487 = vmatpush.bf16.msrb.mxu0 %v9749_v62  ;;  %v10842_v9 = vor.u32 %v10171_v6, %v9558_v7  ;;  %v10173_v12 = vld [vmem:[%s10720_s30 + $0x64] sm:$0xf]  ;;  %v9566_v13 = vld [vmem:[%s10720_s30 + $0x68] sm:$0xf0]  ;;  %v10852_v14 = vor.u32 %v10174_v11, %v9564_v10  ;;  %v10212_v16 = vld [vmem:[#allocation5 + $0x9c] sm:$0xf] }
  0x63   : > { %v10854_v15 = vor.u32 %v10173_v12, %v9566_v13  ;;  %v9726_v17 = vld [vmem:[#allocation5 + $0xb0] sm:$0xf0]  ;;  %v10260_v18 = vld [vmem:[#allocation5 + $0x21c] sm:$0xf]  ;;  %v9572_v24 = vld [vmem:[%s10720_s30 + $0x70] sm:$0xf] }
  0x64   : > { %1665 = vmatpush.bf16.msrb.mxu2 %v9753_v57  ;;  %1576 = vmatpush.bf16.msrb.mxu1 %v9941_v1  ;;  %14807 = vst [vmem:[#allocation19_spill] sm:$0xff] %v10842_v9  ;;  %v9729_v19 = vor.u32 %v10212_v16, %v9726_v17  ;;  %v9918_v20 = vld [vmem:[#allocation5 + $0x230] sm:$0xf0]  ;;  %v10176_v25 = vld [vmem:[%s10720_s30 + $0x74] sm:$0xf0] }
  0x65   : > { %1141 = vmatmul.bf16.gmra.mxu0 %v10792_v22  ;;  %1754 = vmatpush.bf16.msrb.mxu3 %v9945_v61  ;;  %14808 = vst [vmem:[#allocation20_spill] sm:$0xff] %v10852_v14  ;;  %v9921_v21 = vor.u32 %v10260_v18, %v9918_v20  ;;  %v10175_v26 = vld [vmem:[%s10720_s30 + $0x74] sm:$0xf]  ;;  %v9574_v27 = vld [vmem:[%s10720_s30 + $0x78] sm:$0xf0]  ;;  %v10864_v30 = vor.u32 %v10176_v25, %v9572_v24 }
  0x66   : > { %14809 = vst [vmem:[#allocation21_spill] sm:$0xff] %v10854_v15  ;;  %v9724_v31 = vld [vmem:[#allocation5 + $0x98] sm:$0xf]  ;;  %v10215_v32 = vld [vmem:[#allocation5 + $0xac] sm:$0xf0]  ;;  %v10866_v34 = vor.u32 %v10175_v26, %v9574_v27 }
  0x67   : > { %1230 = vmatmul.bf16.gmra.mxu1 %v10794_v23  ;;  %1319 = vmatmul.bf16.gmra.mxu2 %v10792_v22  ;;  %14810 = vst [vmem:[#allocation22_spill] sm:$0xff] %v10864_v30  ;;  %v9916_v33 = vld [vmem:[#allocation5 + $0x218] sm:$0xf]  ;;  %v9725_v35 = vor.u32 %v10215_v32, %v9724_v31  ;;  %v10263_v36 = vld [vmem:[#allocation5 + $0x22c] sm:$0xf0] }
  0x68   : > { %1666 = vmatpush.bf16.msrb.mxu2 %v9729_v19  ;;  %14811 = vst [vmem:[#allocation23_spill] sm:$0xff] %v10866_v34  ;;  %v9917_v37 = vor.u32 %v10263_v36, %v9916_v33  ;;  %v9580_v38 = vld [vmem:[%s10720_s30 + $0x80] sm:$0xf]  ;;  %v10178_v39 = vld [vmem:[%s10720_s30 + $0x84] sm:$0xf0] }
  0x69   : > { %1755 = vmatpush.bf16.msrb.mxu3 %v9921_v21  ;;  %1488 = vmatpush.bf16.msrb.mxu0 %v9725_v35  ;;  %v10177_v40 = vld [vmem:[%s10720_s30 + $0x84] sm:$0xf]  ;;  %v9582_v41 = vld [vmem:[%s10720_s30 + $0x88] sm:$0xf0]  ;;  %v10876_v43 = vor.u32 %v10178_v39, %v9580_v38  ;;  %v9588_v5 = vld [vmem:[%s10720_s30 + $0x90] sm:$0xf] }
  0x6a   : > { %1408 = vmatmul.bf16.gmra.mxu3 %v10794_v23  ;;  %1577 = vmatpush.bf16.msrb.mxu1 %v9917_v37  ;;  %v474_v42 = vld [vmem:[#allocation7] sm:$0x3f]  ;;  %v10878_v45 = vor.u32 %v10177_v40, %v9582_v41  ;;  %v10206_v54 = vld [vmem:[#allocation5 + $0x6c] sm:$0xf]  ;;  %v10180_v6 = vld [vmem:[%s10720_s30 + $0x94] sm:$0xf0] }
  0x6b   : > { %14812 = vst [vmem:[#allocation24_spill] sm:$0xff] %v10876_v43  ;;  %v10880_v48 = vperm.slane %v474_v42, 0  ;;  %v10886_v51 = vperm.slane %v474_v42, 1  ;;  %v9702_v55 = vld [vmem:[#allocation5 + $0x80] sm:$0xf0]  ;;  %v10901_v13 = vor.u32 %v10180_v6, %v9588_v5 }
  0x6c   : > { %14813 = vst [vmem:[#allocation25_spill] sm:$0xff] %v10878_v45  ;;  %v10254_v56 = vld [vmem:[#allocation5 + $0x1ec] sm:$0xf]  ;;  %v9705_v57 = vor.u32 %v10206_v54, %v9702_v55  ;;  %v9894_v58 = vld [vmem:[#allocation5 + $0x200] sm:$0xf0] }
  0x6d   : > { %v9897_v61 = vor.u32 %v10254_v56, %v9894_v58  ;;  %v10179_v10 = vld [vmem:[%s10720_s30 + $0x94] sm:$0xf]  ;;  %v9590_v11 = vld [vmem:[%s10720_s30 + $0x98] sm:$0xf0]  ;;  %14814 = vst [vmem:[#allocation26_spill] sm:$0xff] %v10901_v13 }
  0x6e   : > { %1667 = vmatpush.bf16.msrb.mxu2 %v9705_v57  ;;  %v9700_v16 = vld [vmem:[#allocation5 + $0x68] sm:$0xf]  ;;  %v10209_v17 = vld [vmem:[#allocation5 + $0x7c] sm:$0xf0]  ;;  %v10905_v21 = vor.u32 %v10179_v10, %v9590_v11  ;;  %v10181_v56 = vld [vmem:[%s10720_s30 + $0xa4] sm:$0xf] }
  0x6f   : > { %1756 = vmatpush.bf16.msrb.mxu3 %v9897_v61  ;;  %v9892_v18 = vld [vmem:[#allocation5 + $0x1e8] sm:$0xf]  ;;  %v9701_v24 = vor.u32 %v10209_v17, %v9700_v16  ;;  %v10257_v25 = vld [vmem:[#allocation5 + $0x1fc] sm:$0xf0]  ;;  %v9598_v57 = vld [vmem:[%s10720_s30 + $0xa8] sm:$0xf0] }
  0x70   : > { %14815 = vst [vmem:[#allocation27_spill] sm:$0xff] %v10905_v21  ;;  %v9893_v32 = vor.u32 %v10257_v25, %v9892_v18  ;;  %v10182_v54 = vld [vmem:[%s10720_s30 + $0xa4] sm:$0xf0]  ;;  %v10200_v11 = vld [vmem:[#allocation5 + $0x3c] sm:$0xf] }
  0x71   : > { %1489 = vmatpush.bf16.msrb.mxu0 %v9701_v24  ;;  %v10248_v16 = vld [vmem:[#allocation5 + $0x1bc] sm:$0xf]  ;;  %v9870_v18 = vld [vmem:[#allocation5 + $0x1d0] sm:$0xf0] }
  0x72   : > { %1578 = vmatpush.bf16.msrb.mxu1 %v9893_v32  ;;  %v9873_v24 = vor.u32 %v10248_v16, %v9870_v18 }
  0x74   : > { %1757 = vmatpush.bf16.msrb.mxu3 %v9873_v24  ;;  %v9612_v24 = vld [vmem:[%s10720_s30 + $0xc0] sm:$0xf] }
  0x75   : > { %1146 = vmatmul.bf16.gmra.mxu0 %v10804_v28 }
  0x77   : > { %1235 = vmatmul.bf16.gmra.mxu1 %v10806_v29  ;;  %1324 = vmatmul.bf16.gmra.mxu2 %v10804_v28 }
  0x7a   : > { %1413 = vmatmul.bf16.gmra.mxu3 %v10806_v29 }
  0x85   : > { %1151 = vmatmul.bf16.gmra.mxu0 %v10816_v46 }
  0x87   : > { %1240 = vmatmul.bf16.gmra.mxu1 %v10818_v47  ;;  %1329 = vmatmul.bf16.gmra.mxu2 %v10816_v46 }
  0x8a   : > { %1418 = vmatmul.bf16.gmra.mxu3 %v10818_v47 }
  0x95   : > { %1156 = vmatmul.bf16.gmra.mxu0 %v10828_v52 }
  0x97   : > { %1245 = vmatmul.bf16.gmra.mxu1 %v10830_v53  ;;  %1334 = vmatmul.bf16.gmra.mxu2 %v10828_v52 }
  0x9a   : > { %1423 = vmatmul.bf16.gmra.mxu3 %v10830_v53 }
  0xa5   : > { %1161 = vmatmul.bf16.gmra.mxu0 %v10840_v8 }
  0xa7   : > { %1250 = vmatmul.bf16.gmra.mxu1 %v10842_v9  ;;  %1339 = vmatmul.bf16.gmra.mxu2 %v10840_v8 }
  0xaa   : > { %1428 = vmatmul.bf16.gmra.mxu3 %v10842_v9 }
  0xb5   : > { %1166 = vmatmul.bf16.gmra.mxu0 %v10852_v14 }
  0xb7   : > { %1255 = vmatmul.bf16.gmra.mxu1 %v10854_v15  ;;  %1344 = vmatmul.bf16.gmra.mxu2 %v10852_v14 }
  0xba   : > { %1433 = vmatmul.bf16.gmra.mxu3 %v10854_v15 }
  0xc5   : > { %1171 = vmatmul.bf16.gmra.mxu0 %v10864_v30 }
  0xc7   : > { %1260 = vmatmul.bf16.gmra.mxu1 %v10866_v34  ;;  %1349 = vmatmul.bf16.gmra.mxu2 %v10864_v30 }
  0xca   : > { %1438 = vmatmul.bf16.gmra.mxu3 %v10866_v34 }
  0xd2   : > { %v1137_v44 = vpop.f32.mrf.mxu0 }
  0xd3   : > { %v1138_v50 = vadd.f32 %v1137_v44, %v10880_v48 }
  0xd4   : > { %v1226_v49 = vpop.f32.mrf.mxu1 }
  0xd5   : > { %1176 = vmatmul.bf16.gmra.mxu0 %v10876_v43  ;;  %v1227_v62 = vadd.f32 %v1226_v49, %v1138_v50  ;;  %v9596_v50 = vld [vmem:[%s10720_s30 + $0xa0] sm:$0xf] }
  0xd7   : > { %1265 = vmatmul.bf16.gmra.mxu1 %v10878_v45  ;;  %1354 = vmatmul.bf16.gmra.mxu2 %v10876_v43 }
  0xda   : > { %1443 = vmatmul.bf16.gmra.mxu3 %v10878_v45  ;;  %v1315_v59 = vpop.f32.mrf.mxu2  ;;  %v1139_v60 = vpop.f32.mrf.mxu0 }
  0xdb   : > { %v1316_v63 = vadd.f32 %v1315_v59, %v10886_v51  ;;  %v1140_v12 = vadd.f32 %v1139_v60, %v10880_v48  ;;  %v10929_v59 = vor.u32 %v10182_v54, %v9596_v50 }
  0xdc   : > { %v1228_v1 = vpop.f32.mrf.mxu1 }
  0xdd   : > { %v1404_v0 = vpop.f32.mrf.mxu3  ;;  %v1229_v33 = vadd.f32 %v1228_v1, %v1140_v12  ;;  %14816 = vst [vmem:[#allocation28_spill] sm:$0xff] %v10929_v59  ;;  %v9678_v12 = vld [vmem:[#allocation5 + $0x50] sm:$0xf0] }
  0xde   : > { %v1405_v4 = vadd.f32 %v1404_v0, %v1316_v63  ;;  %v9681_v17 = vor.u32 %v10200_v11, %v9678_v12 }
  0xe0   : > { %v10892_v7 = vpack.c.bf16 %v1405_v4, %v1227_v62  ;;  %v10933_v62 = vor.u32 %v10181_v56, %v9598_v57  ;;  %1668 = vmatpush.bf16.msrb.mxu2 %v9681_v17 }
  0xe2   : > { %2644 = vrot.lane.b32.xlu1 %v10892_v7, %s10573_s24  ;;  %2516 = vrot.lane.b32.xlu2 %v10892_v7, %s10574_s9  ;;  %v1317_v19 = vpop.f32.mrf.mxu2  ;;  %v1142_v20 = vpop.f32.mrf.mxu0  ;;  %14817 = vst [vmem:[#allocation29_spill] sm:$0xff] %v10933_v62 }
  0xe3   : > { %2388 = vrot.lane.b32.xlu0 %v10892_v7, %s10575_s11  ;;  %v1318_v26 = vadd.f32 %v1317_v19, %v10886_v51  ;;  %v1143_v37 = vadd.f32 %v1142_v20, %v10880_v48 }
  0xe4   : > { %v1231_v31 = vpop.f32.mrf.mxu1 }
  0xe5   : > { %v1406_v27 = vpop.f32.mrf.mxu3  ;;  %1181 = vmatmul.bf16.gmra.mxu0 %v10901_v13  ;;  %v1232_v40 = vadd.f32 %v1231_v31, %v1143_v37 }
  0xe6   : > { %v1407_v35 = vadd.f32 %v1406_v27, %v1318_v26 }
  0xe7   : > { %1270 = vmatmul.bf16.gmra.mxu1 %v10905_v21  ;;  %1359 = vmatmul.bf16.gmra.mxu2 %v10901_v13 }
  0xe8   : > { %v10910_v36 = vpack.c.bf16 %v1407_v35, %v1229_v33  ;;  %v9604_v33 = vld [vmem:[%s10720_s30 + $0xb0] sm:$0xf]  ;;  %v10184_v35 = vld [vmem:[%s10720_s30 + $0xb4] sm:$0xf0] }
  0xea   : > { %1448 = vmatmul.bf16.gmra.mxu3 %v10905_v21  ;;  %2646 = vrot.lane.b32.xlu2 %v10910_v36, %s10573_s24  ;;  %v1320_v38 = vpop.f32.mrf.mxu2  ;;  %v1144_v39 = vpop.f32.mrf.mxu0 }
  0xeb   : > { %2390 = vrot.lane.b32.xlu0 %v10910_v36, %s10575_s11  ;;  %v1321_v41 = vadd.f32 %v1320_v38, %v10886_v51  ;;  %v1145_v58 = vadd.f32 %v1144_v39, %v10880_v48  ;;  %v10183_v38 = vld [vmem:[%s10720_s30 + $0xb4] sm:$0xf]  ;;  %v9606_v39 = vld [vmem:[%s10720_s30 + $0xb8] sm:$0xf0] }
  0xec   : > { %v1233_v44 = vpop.f32.mrf.mxu1  ;;  %v10965_v56 = vor.u32 %v10183_v38, %v9606_v39 }
  0xed   : > { %v1409_v42 = vpop.f32.mrf.mxu3  ;;  %v1234_v4 = vadd.f32 %v1233_v44, %v1145_v58  ;;  %v10203_v44 = vld [vmem:[#allocation5 + $0x4c] sm:$0xf0] }
  0xee   : > { %v1410_v49 = vadd.f32 %v1409_v42, %v1321_v41  ;;  %v10961_v41 = vor.u32 %v10184_v35, %v9604_v33  ;;  %v9676_v42 = vld [vmem:[#allocation5 + $0x38] sm:$0xf]  ;;  %14819 = vst [vmem:[#allocation31_spill] sm:$0xff] %v10965_v56  ;;  %v10251_v58 = vld [vmem:[#allocation5 + $0x1cc] sm:$0xf0] }
  0xef   : > { %v9677_v57 = vor.u32 %v10203_v44, %v9676_v42 }
  0xf0   : > { %v10922_v55 = vpack.c.bf16 %v1410_v49, %v1232_v40  ;;  %14818 = vst [vmem:[#allocation30_spill] sm:$0xff] %v10961_v41  ;;  %v9868_v49 = vld [vmem:[#allocation5 + $0x1b8] sm:$0xf] }
  0xf1   : > { %1490 = vmatpush.bf16.msrb.mxu0 %v9677_v57 }
  0xf2   : > { %2392 = vrot.lane.b32.xlu1 %v10922_v55, %s10575_s11  ;;  %v1322_v60 = vpop.f32.mrf.mxu2  ;;  %v1147_v61 = vpop.f32.mrf.mxu0 }
  0xf3   : > { %2518 = vrot.lane.b32.xlu0 %v10910_v36, %s10574_s9  ;;  %v1323_v63 = vadd.f32 %v1322_v60, %v10886_v51  ;;  %v1148_v10 = vadd.f32 %v1147_v61, %v10880_v48 }
  0xf4   : > { %v1236_v1 = vpop.f32.mrf.mxu1 }
  0xf5   : > { %v1411_v0 = vpop.f32.mrf.mxu3  ;;  %1186 = vmatmul.bf16.gmra.mxu0 %v10929_v59  ;;  %v1237_v25 = vadd.f32 %v1236_v1, %v1148_v10 }
  0xf6   : > { %v1412_v5 = vadd.f32 %v1411_v0, %v1323_v63  ;;  %v9869_v0 = vor.u32 %v10251_v58, %v9868_v49  ;;  %v10194_v58 = vld [vmem:[#allocation5 + $0xc] sm:$0xf] }
  0xf7   : > { %1275 = vmatmul.bf16.gmra.mxu1 %v10933_v62  ;;  %1364 = vmatmul.bf16.gmra.mxu2 %v10929_v59 }
  0xf8   : > { %v10938_v6 = vpack.c.bf16 %v1412_v5, %v1234_v4  ;;  %1579 = vmatpush.bf16.msrb.mxu1 %v9869_v0  ;;  %v9846_v0 = vld [vmem:[#allocation5 + $0x1a0] sm:$0xf0] }
  0xfa   : > { %1453 = vmatmul.bf16.gmra.mxu3 %v10933_v62  ;;  %2520 = vrot.lane.b32.xlu1 %v10922_v55, %s10574_s9  ;;  %v1325_v19 = vpop.f32.mrf.mxu2  ;;  %v1149_v20 = vpop.f32.mrf.mxu0 }
  0xfb   : > { %2522 = vrot.lane.b32.xlu2 %v10938_v6, %s10574_s9  ;;  %2648 = vrot.lane.b32.xlu0 %v10922_v55, %s10573_s24  ;;  %v1326_v26 = vadd.f32 %v1325_v19, %v10886_v51  ;;  %v1150_v40 = vadd.f32 %v1149_v20, %v10880_v48 }
  0xfc   : > { %v1238_v31 = vpop.f32.mrf.mxu1 }
  0xfd   : > { %v1414_v27 = vpop.f32.mrf.mxu3  ;;  %v1239_v1 = vadd.f32 %v1238_v31, %v1150_v40  ;;  %v9614_v31 = vld [vmem:[%s10720_s30 + $0xc8] sm:$0xf0] }
  0xfe   : > { %v1415_v32 = vadd.f32 %v1414_v27, %v1326_v26  ;;  %v10185_v27 = vld [vmem:[%s10720_s30 + $0xc4] sm:$0xf] }
  0xff   : > { %v10997_v39 = vor.u32 %v10185_v27, %v9614_v31  ;;  %v9622_v27 = vld [vmem:[%s10720_s30 + $0xd8] sm:$0xf0] }
 0x100   : > { %v10952_v37 = vpack.c.bf16 %v1415_v32, %v1237_v25  ;;  %v10186_v25 = vld [vmem:[%s10720_s30 + $0xc4] sm:$0xf0] }
 0x101   : > { %v10993_v33 = vor.u32 %v10186_v25, %v9612_v24  ;;  %14821 = vst [vmem:[#allocation33_spill] sm:$0xff] %v10997_v39  ;;  %v10187_v25 = vld [vmem:[%s10720_s30 + $0xd4] sm:$0xf] }
 0x102   : > { %2394 = vrot.lane.b32.xlu1 %v10938_v6, %s10575_s11  ;;  %v1327_v50 = vpop.f32.mrf.mxu2  ;;  %v1152_v54 = vpop.f32.mrf.mxu0 }
 0x103   : > { %2396 = vrot.lane.b32.xlu2 %v10952_v37, %s10575_s11  ;;  %2524 = vrot.lane.b32.xlu0 %v10952_v37, %s10574_s9  ;;  %v1328_v60 = vadd.f32 %v1327_v50, %v10886_v51  ;;  %v1153_v10 = vadd.f32 %v1152_v54, %v10880_v48  ;;  %14820 = vst [vmem:[#allocation32_spill] sm:$0xff] %v10993_v33 }
 0x104   : > { %v1241_v63 = vpop.f32.mrf.mxu1 }
 0x105   : > { %v1416_v61 = vpop.f32.mrf.mxu3  ;;  %1191 = vmatmul.bf16.gmra.mxu0 %v10961_v41  ;;  %v1242_v16 = vadd.f32 %v1241_v63, %v1153_v10 }
 0x106   : > { %v1417_v4 = vadd.f32 %v1416_v61, %v1328_v60  ;;  %v9654_v60 = vld [vmem:[#allocation5 + $0x20] sm:$0xf0]  ;;  %v10242_v61 = vld [vmem:[#allocation5 + $0x18c] sm:$0xf] }
 0x107   : > { %1280 = vmatmul.bf16.gmra.mxu1 %v10965_v56  ;;  %1369 = vmatmul.bf16.gmra.mxu2 %v10961_v41  ;;  %v9657_v63 = vor.u32 %v10194_v58, %v9654_v60  ;;  %v9849_v10 = vor.u32 %v10242_v61, %v9846_v0  ;;  %v9844_v58 = vld [vmem:[#allocation5 + $0x188] sm:$0xf]  ;;  %v10245_v0 = vld [vmem:[#allocation5 + $0x19c] sm:$0xf0] }
 0x108   : > { %v10970_v5 = vpack.c.bf16 %v1417_v4, %v1239_v1 }
 0x109   : > { %1669 = vmatpush.bf16.msrb.mxu2 %v9657_v63  ;;  %1758 = vmatpush.bf16.msrb.mxu3 %v9849_v10 }
 0x10a   : > { %1458 = vmatmul.bf16.gmra.mxu3 %v10965_v56  ;;  %2650 = vrot.lane.b32.xlu1 %v10938_v6, %s10573_s24  ;;  %v1330_v11 = vpop.f32.mrf.mxu2  ;;  %v1154_v12 = vpop.f32.mrf.mxu0 }
 0x10b   : > { %2652 = vrot.lane.b32.xlu2 %v10952_v37, %s10573_s24  ;;  %2654 = vrot.lane.b32.xlu0 %v10970_v5, %s10573_s24  ;;  %v1331_v17 = vadd.f32 %v1330_v11, %v10886_v51  ;;  %v1155_v32 = vadd.f32 %v1154_v12, %v10880_v48 }
 0x10c   : > { %v1243_v19 = vpop.f32.mrf.mxu1 }
 0x10d   : > { %v1419_v18 = vpop.f32.mrf.mxu3  ;;  %v1244_v49 = vadd.f32 %v1243_v19, %v1155_v32  ;;  %v9620_v19 = vld [vmem:[%s10720_s30 + $0xd0] sm:$0xf] }
 0x10e   : > { %v1420_v20 = vadd.f32 %v1419_v18, %v1331_v17 }
 0x110   : > { %v10984_v26 = vpack.c.bf16 %v1420_v20, %v1242_v16  ;;  %v10188_v20 = vld [vmem:[%s10720_s30 + $0xd4] sm:$0xf0] }
 0x111   : > { %v11025_v32 = vor.u32 %v10188_v20, %v9620_v19 }
 0x112   : > { %2526 = vrot.lane.b32.xlu1 %v10970_v5, %s10574_s9  ;;  %v1332_v35 = vpop.f32.mrf.mxu2  ;;  %v1157_v38 = vpop.f32.mrf.mxu0 }
 0x113   : > { %2398 = vrot.lane.b32.xlu2 %v10970_v5, %s10575_s11  ;;  %2400 = vrot.lane.b32.xlu0 %v10984_v26, %s10575_s11  ;;  %v1333_v40 = vadd.f32 %v1332_v35, %v10886_v51  ;;  %v1158_v57 = vadd.f32 %v1157_v38, %v10880_v48  ;;  %14822 = vst [vmem:[#allocation34_spill] sm:$0xff] %v11025_v32 }
 0x114   : > { %v1246_v44 = vpop.f32.mrf.mxu1 }
 0x115   : > { %v1421_v42 = vpop.f32.mrf.mxu3  ;;  %1196 = vmatmul.bf16.gmra.mxu0 %v10993_v33  ;;  %v1247_v11 = vadd.f32 %v1246_v44, %v1158_v57  ;;  %v10197_v57 = vld [vmem:[#allocation5 + $0x1c] sm:$0xf0] }
 0x116   : > { %v1422_v50 = vadd.f32 %v1421_v42, %v1333_v40  ;;  %v11029_v40 = vor.u32 %v10187_v25, %v9622_v27  ;;  %v9628_v25 = vld [vmem:[%s10720_s30 + $0xe0] sm:$0xf]  ;;  %v10190_v27 = vld [vmem:[%s10720_s30 + $0xe4] sm:$0xf0] }
 0x117   : > { %1285 = vmatmul.bf16.gmra.mxu1 %v10997_v39  ;;  %1374 = vmatmul.bf16.gmra.mxu2 %v10993_v33 }
 0x118   : > { %v11002_v54 = vpack.c.bf16 %v1422_v50, %v1244_v49  ;;  %14823 = vst [vmem:[#allocation35_spill] sm:$0xff] %v11029_v40  ;;  %v9652_v50 = vld [vmem:[#allocation5 + $0x8] sm:$0xf] }
 0x119   : > { %v9653_v63 = vor.u32 %v10197_v57, %v9652_v50 }
 0x11a   : > { %1463 = vmatmul.bf16.gmra.mxu3 %v10997_v39  ;;  %2656 = vrot.lane.b32.xlu1 %v10984_v26, %s10573_s24  ;;  %v1335_v1 = vpop.f32.mrf.mxu2  ;;  %v1159_v4 = vpop.f32.mrf.mxu0 }
 0x11b   : > { %2528 = vrot.lane.b32.xlu2 %v10984_v26, %s10574_s9  ;;  %2530 = vrot.lane.b32.xlu0 %v11002_v54, %s10574_s9  ;;  %v1336_v12 = vadd.f32 %v1335_v1, %v10886_v51  ;;  %v1160_v31 = vadd.f32 %v1159_v4, %v10880_v48  ;;  %v9845_v1 = vor.u32 %v10245_v0, %v9844_v58 }
 0x11c   : > { %v1248_v17 = vpop.f32.mrf.mxu1  ;;  %1491 = vmatpush.bf16.msrb.mxu0 %v9653_v63 }
 0x11d   : > { %v1424_v16 = vpop.f32.mrf.mxu3  ;;  %v1249_v60 = vadd.f32 %v1248_v17, %v1160_v31  ;;  %1580 = vmatpush.bf16.msrb.mxu1 %v9845_v1 }
 0x11e   : > { %v1425_v18 = vadd.f32 %v1424_v16, %v1336_v12 }
 0x120   : > { %v11016_v24 = vpack.c.bf16 %v1425_v18, %v1247_v11 }
 0x122   : > { %2402 = vrot.lane.b32.xlu1 %v11002_v54, %s10575_s11  ;;  %v1337_v35 = vpop.f32.mrf.mxu2  ;;  %v1162_v38 = vpop.f32.mrf.mxu0 }
 0x123   : > { %2658 = vrot.lane.b32.xlu2 %v11002_v54, %s10573_s24  ;;  %2660 = vrot.lane.b32.xlu0 %v11016_v24, %s10573_s24  ;;  %v1338_v42 = vadd.f32 %v1337_v35, %v10886_v51  ;;  %v1163_v10 = vadd.f32 %v1162_v38, %v10880_v48  ;;  %v10189_v35 = vld [vmem:[%s10720_s30 + $0xe4] sm:$0xf]  ;;  %v9630_v38 = vld [vmem:[%s10720_s30 + $0xe8] sm:$0xf0] }
 0x124   : > { %v1251_v49 = vpop.f32.mrf.mxu1  ;;  %v11061_v57 = vor.u32 %v10189_v35, %v9630_v38  ;;  %v9636_v38 = vld [vmem:[%s10720_s30 + $0xf0] sm:$0xf] }
 0x125   : > { %v1426_v44 = vpop.f32.mrf.mxu3  ;;  %1201 = vmatmul.bf16.gmra.mxu0 %v11025_v32  ;;  %v1252_v16 = vadd.f32 %v1251_v49, %v1163_v10 }
 0x126   : > { %v1427_v61 = vadd.f32 %v1426_v44, %v1338_v42  ;;  %v11057_v44 = vor.u32 %v10190_v27, %v9628_v25  ;;  %14825 = vst [vmem:[#allocation37_spill] sm:$0xff] %v11061_v57 }
 0x127   : > { %1290 = vmatmul.bf16.gmra.mxu1 %v11029_v40  ;;  %1379 = vmatmul.bf16.gmra.mxu2 %v11025_v32 }
 0x128   : > { %v11034_v4 = vpack.c.bf16 %v1427_v61, %v1249_v60  ;;  %14824 = vst [vmem:[#allocation36_spill] sm:$0xff] %v11057_v44 }
 0x12a   : > { %1468 = vmatmul.bf16.gmra.mxu3 %v11029_v40  ;;  %2532 = vrot.lane.b32.xlu1 %v11016_v24, %s10574_s9  ;;  %v1340_v11 = vpop.f32.mrf.mxu2  ;;  %v1164_v12 = vpop.f32.mrf.mxu0 }
 0x12b   : > { %2404 = vrot.lane.b32.xlu2 %v11016_v24, %s10575_s11  ;;  %2406 = vrot.lane.b32.xlu0 %v11034_v4, %s10575_s11  ;;  %v1341_v17 = vadd.f32 %v1340_v11, %v10886_v51  ;;  %v1165_v42 = vadd.f32 %v1164_v12, %v10880_v48  ;;  %v10576_v11 = vmov 1983009808  }
 0x12c   : > { %v1253_v19 = vpop.f32.mrf.mxu1  ;;  %v2872_v12 = vunpack.c.l.s4 %v10576_v11 }
 0x12d   : > { %v1429_v18 = vpop.f32.mrf.mxu3  ;;  %v1254_v63 = vadd.f32 %v1253_v19, %v1165_v42  ;;  %v10192_v42 = vld [vmem:[%s10720_s30 + $0xf4] sm:$0xf0] }
 0x12e   : > { %v1430_v20 = vadd.f32 %v1429_v18, %v1341_v17  ;;  %v11078_v35 = vunpack.c.0.s8 %v2872_v12 }
 0x130   : > { %v11048_v31 = vpack.c.bf16 %v1430_v20, %v1252_v16 }
 0x132   : > { %2662 = vrot.lane.b32.xlu1 %v11034_v4, %s10573_s24  ;;  %v1342_v49 = vpop.f32.mrf.mxu2  ;;  %v1167_v50 = vpop.f32.mrf.mxu0 }
 0x133   : > { %2534 = vrot.lane.b32.xlu2 %v11034_v4, %s10574_s9  ;;  %2536 = vrot.lane.b32.xlu0 %v11048_v31, %s10574_s9  ;;  %v1343_v58 = vadd.f32 %v1342_v49, %v10886_v51  ;;  %v1168_v10 = vadd.f32 %v1167_v50, %v10880_v48  ;;  %v10191_v50 = vld [vmem:[%s10720_s30 + $0xf4] sm:$0xf] }
 0x134   : > { %v1256_v61 = vpop.f32.mrf.mxu1 }
 0x135   : > { %v1431_v60 = vpop.f32.mrf.mxu3  ;;  %1206 = vmatmul.bf16.gmra.mxu0 %v11057_v44  ;;  %v1257_v18 = vadd.f32 %v1256_v61, %v1168_v10  ;;  %v11091_v61 = vor.u32 %v10192_v42, %v9636_v38 }
 0x136   : > { %v1432_v0 = vadd.f32 %v1431_v60, %v1343_v58  ;;  %v9638_v58 = vld [vmem:[%s10720_s30 + $0xf8] sm:$0xf0]  ;;  %s9309_s30 = scalar_lea.hbm %s14714_s4, %s10289_s27 }
 0x137   : > { %1295 = vmatmul.bf16.gmra.mxu1 %v11061_v57  ;;  %1384 = vmatmul.bf16.gmra.mxu2 %v11057_v44  ;;  %14827 = vst [vmem:[#allocation39_spill] sm:$0xff] %v11091_v61  ;;  %v11097_v12 = vor.u32 %v10191_v50, %v9638_v58  ;;  %s9312_s2 = sshll.u32 %s9309_s30, 4  ;;  %s9313_s2 = int_to_ptr.hbm [resolvable:$true] %s9312_s2 }
 0x138   : > { %v11066_v1 = vpack.c.bf16 %v1432_v0, %v1254_v63  ;;  %v2874_v0 = vperm.slane %v10892_v7, %v11078_v35  ;;  %s10492_s28 = sshra.s32 %s9313_s2, 4  ;;  %s10493_s28 = int_to_ptr.hbm [resolvable:$true] %s10492_s28 }
 0x139   : > { %14828 = vst [vmem:[#allocation40_spill] sm:$0xff] %v11097_v12  ;;  %s10494_s21 = scalar_lea.hbm %s10493_s28, 256  ;;  %p10499_p12 = scmp.lt.s32.totalorder %s10493_s28, %s14714_s4 }
 0x13a   : > { %14826 = vst [vmem:[#allocation38_spill] sm:$0xff] %v11066_v1  ;;  %1473 = vmatmul.bf16.gmra.mxu3 %v11061_v57  ;;  %2408 = vrot.lane.b32.xlu1 %v11048_v31, %s10575_s11  ;;  %v1345_v16 = vpop.f32.mrf.mxu2  ;;  %v1169_v17 = vpop.f32.mrf.mxu0  ;;  %v2883_v7 = vrot.slane %v2874_v0, 4  ;;  %p10495_p1 = scmp.ne.s32.totalorder %s10493_s28, %s10494_s21 }
 0x13b   : > { %2664 = vrot.lane.b32.xlu2 %v11048_v31, %s10573_s24  ;;  %2666 = vrot.lane.b32.xlu0 %v11066_v1, %s10573_s24  ;;  %v1346_v19 = vadd.f32 %v1345_v16, %v10886_v51  ;;  %v1170_v63 = vadd.f32 %v1169_v17, %v10880_v48  ;;  %v10577_v16 = vmov 1934713408  }
 0x13c   : > { %v1258_v25 = vpop.f32.mrf.mxu1  ;;  %v2517_v60 = vpop.permute.xlu2 %2516  ;;  %v2886_v17 = vunpack.c.l.s4 %v10577_v16  ;;  %p10496_p4 = pnand %p10495_p1, %p10693_p7 }
 0x13d   : > { %v1434_v20 = vpop.f32.mrf.mxu3 }
 0x13e   : > { %v1435_v27 = vadd.f32 %v1434_v20, %v1346_v19  ;;  %v11103_v57 = vunpack.c.0.s8 %v2886_v17  ;;  %p10497_p10 = pneg %p10496_p4 }
 0x140   : > { %v11082_v49 = vpack.c.bf16 %v1435_v27, %v1257_v18  ;;  %v2880_v18 = vperm.slane %v2517_v60, %v11078_v35  ;;  %v1259_v27 = vadd.f32 %v1258_v25, %v1170_v63 }
 0x142   : > { %2538 = vrot.lane.b32.xlu1 %v11066_v1, %s10574_s9  ;;  %v1347_v10 = vpop.f32.mrf.mxu2  ;;  %v1172_v11 = vpop.f32.mrf.mxu0  ;;  %v2881_v50 = vrot.slane %v2880_v18, 4  ;;  %v2884_v60 = vsel %vm2869_vm7, %v2880_v18, %v2883_v7 }
 0x143   : > { %2410 = vrot.lane.b32.xlu2 %v11066_v1, %s10575_s11  ;;  %2412 = vrot.lane.b32.xlu0 %v11082_v49, %s10575_s11  ;;  %v1348_v19 = vadd.f32 %v1347_v10, %v10886_v51  ;;  %v1173_v16 = vadd.f32 %v1172_v11, %v10880_v48  ;;  %v11119_v10 = vperm.slane %v2884_v60, %v11103_v57 }
 0x144   : > { %v1261_v42 = vpop.f32.mrf.mxu1  ;;  %v2882_v63 = vsel %vm2869_vm7, %v2881_v50, %v2874_v0  ;;  %v11132_v0 = vperm.slane %v10952_v37, %v11078_v35  ;;  %v11138_v50 = vperm.slane %v10984_v26, %v11078_v35 }
 0x145   : > { %v1436_v20 = vpop.f32.mrf.mxu3  ;;  %1211 = vmatmul.bf16.gmra.mxu0 %v11091_v61  ;;  %v1262_v11 = vadd.f32 %v1261_v42, %v1173_v16  ;;  %v3042_v42 = vperm.slane %v10938_v6, %v11078_v35  ;;  %v11141_v16 = vperm.slane %v2882_v63, %v11103_v57  ;;  %v11172_v63 = vperm.slane %v11082_v49, %v11078_v35 }
 0x146   : > { %v1437_v38 = vadd.f32 %v1436_v20, %v1348_v19  ;;  %v2647_v20 = vpop.permute.xlu2 %2646 }
 0x147   : > { %1300 = vmatmul.bf16.gmra.mxu1 %v11097_v12  ;;  %1389 = vmatmul.bf16.gmra.mxu2 %v11091_v61  ;;  %v3051_v26 = vrot.slane %v3042_v42, 4  ;;  %v11182_v40 = vperm.slane %v2647_v20, %v11078_v35  ;;  %v14832_v62 = vshrl.u32 %v11141_v16, 16 }
 0x148   : > { %v11105_v58 = vpack.c.bf16 %v1437_v38, %v1259_v27  ;;  %v11124_v27 = vperm.slane %v10910_v36, %v11078_v35  ;;  %v11128_v38 = vperm.slane %v10922_v55, %v11078_v35  ;;  %v2895_v36 = vrot.slane %v11119_v10, 4 }
 0x149   : > { %v11148_v55 = vperm.slane %v10970_v5, %v11078_v35  ;;  %v11160_v5 = vperm.slane %v11016_v24, %v11078_v35 }
 0x14a   : > { %14829 = vst [vmem:[#allocation41_spill] sm:$0xff] %v11105_v58  ;;  %1478 = vmatmul.bf16.gmra.mxu3 %v11097_v12  ;;  %2668 = vrot.lane.b32.xlu1 %v11082_v49, %s10573_s24  ;;  %v1350_v25 = vpop.f32.mrf.mxu2  ;;  %v1174_v19 = vpop.f32.mrf.mxu0 }
 0x14b   : > { %2540 = vrot.lane.b32.xlu2 %v11082_v49, %s10574_s9  ;;  %2542 = vrot.lane.b32.xlu0 %v11105_v58, %s10574_s9  ;;  %v1351_v17 = vadd.f32 %v1350_v25, %v10886_v51  ;;  %v1175_v6 = vadd.f32 %v1174_v19, %v10880_v48 }
 0x14c   : > { %v1263_v37 = vpop.f32.mrf.mxu1 }
 0x14d   : > { %v1439_v18 = vpop.f32.mrf.mxu3  ;;  %v1264_v39 = vadd.f32 %v1263_v37, %v1175_v6 }
 0x14e   : > { %v1440_v7 = vadd.f32 %v1439_v18, %v1351_v17  ;;  %v11164_v17 = vperm.slane %v11048_v31, %v11078_v35  ;;  %v2893_v18 = vrot.slane %v11141_v16, 4 }
 0x150   : > { %v11144_v60 = vpack.c.bf16 %v1440_v7, %v1262_v11  ;;  %14830 = vst [vmem:[#allocation42_spill] sm:$0xff] %v11164_v17  ;;  %v11175_v11 = vsel %vm2869_vm7, 0, %v2895_v36  ;;  %v11190_v44 = vsel %vm2869_vm7, 0, %v2893_v18 }
 0x151   : > { %v4689_v12 = vshrl.u32 %v11175_v11, 16 }
 0x152   : > { %2414 = vrot.lane.b32.xlu1 %v11105_v58, %s10575_s11  ;;  %v1352_v19 = vpop.f32.mrf.mxu2  ;;  %v1177_v56 = vpop.f32.mrf.mxu0 }
 0x153   : > { %2670 = vrot.lane.b32.xlu2 %v11105_v58, %s10573_s24  ;;  %2672 = vrot.lane.b32.xlu0 %v11144_v60, %s10573_s24  ;;  %v1353_v24 = vadd.f32 %v1352_v19, %v10886_v51  ;;  %v1178_v20 = vadd.f32 %v1177_v56, %v10880_v48 }
 0x154   : > { %v2645_v31 = vpop.permute.xlu1 %2644 }
 0x155   : > { %v1441_v25 = vpop.f32.mrf.mxu3  ;;  %v2908_v7 = vperm.slane %v2645_v31, %v11078_v35  ;;  %v2523_v49 = vpop.permute.xlu2 %2522  ;;  %1492 = vmatmul.bf16.vlgmr.msrb.gmra.mxu0 %v10780_v2 }
 0x156   : > { %v2389_v32 = vpop.permute.xlu0 %2388  ;;  %v1442_v36 = vadd.f32 %v1441_v25, %v1353_v24  ;;  %v3048_v33 = vperm.slane %v2523_v49, %v11078_v35  ;;  %v9830_v24 = vld [vmem:[#allocation5 + $0x178] sm:$0xf0] }
 0x157   : > { %v2902_v19 = vperm.slane %v2389_v32, %v11078_v35  ;;  %v2909_v61 = vrot.slane %v2908_v7, 4  ;;  %1581 = vmatmul.bf16.vlgmr.msrb.gmra.mxu1 %v10782_v3  ;;  %1670 = vmatmul.bf16.vlgmr.msrb.gmra.mxu2 %v10780_v2  ;;  %v10237_v32 = vld [vmem:[#allocation5 + $0x164] sm:$0xf] }
 0x158   : > { %v11194_v31 = vpack.c.bf16 %v1442_v36, %v1264_v39  ;;  %v3049_v37 = vrot.slane %v3048_v33, 4  ;;  %v3052_v25 = vsel %vm2869_vm7, %v3048_v33, %v3051_v26  ;;  %v9833_v56 = vor.u32 %v10237_v32, %v9830_v24  ;;  %v10285_v39 = vld [vmem:[#allocation5 + $0x2e4] sm:$0xf]  ;;  %v10022_v36 = vld [vmem:[#allocation5 + $0x2f8] sm:$0xf0]  ;;  %v1266_v24 = vpop.f32.mrf.mxu1 }
 0x159   : > { %v2911_v6 = vrot.slane %v2902_v19, 4  ;;  %v11200_v41 = vperm.slane %v3052_v25, %v11103_v57  ;;  %v2910_v18 = vsel %vm2869_vm7, %v2909_v61, %v2902_v19  ;;  %v10025_v2 = vor.u32 %v10285_v39, %v10022_v36 }
 0x15a   : > { %1759 = vmatmul.bf16.vlgmr.msrb.gmra.mxu3 %v10782_v3  ;;  %v3050_v58 = vsel %vm2869_vm7, %v3049_v37, %v3042_v42  ;;  %v2916_v26 = vperm.slane %v2910_v18, %v11103_v57  ;;  %2544 = vrot.lane.b32.xlu1 %v11144_v60, %s10574_s9  ;;  %v4673_v32 = vshrl.u32 %v11190_v44, 16  ;;  %v1355_v42 = vpop.f32.mrf.mxu2 }
 0x15b   : > { %v2912_v33 = vsel %vm2869_vm7, %v2908_v7, %v2911_v6  ;;  %v11210_v25 = vperm.slane %v3050_v58, %v11103_v57  ;;  %v3063_v61 = vrot.slane %v11200_v41, 4  ;;  %2018 = vmatpush.bf16.msra.mxu2 %v9833_v56  ;;  %2416 = vrot.lane.b32.xlu2 %v11144_v60, %s10575_s11  ;;  %v11219_v7 = vperm.slane %v11144_v60, %v11078_v35 }
 0x15c   : > { %v2920_v19 = vperm.slane %v2912_v33, %v11103_v57  ;;  %v2921_v37 = vrot.slane %v2916_v26, 4  ;;  %v4666_v6 = vshrl.u32 %v2916_v26, 16  ;;  %v1267_v58 = vadd.f32 %v1266_v24, %v1178_v20  ;;  %2107 = vmatpush.bf16.msra.mxu3 %v10025_v2  ;;  %2418 = vrot.lane.b32.xlu0 %v11194_v31, %s10575_s11 }
 0x15d   : > { %14831 = vst [vmem:[#allocation43_spill] sm:$0xff] %v11219_v7  ;;  %v3061_v18 = vrot.slane %v11210_v25, 4  ;;  %v11225_v39 = vsel %vm2869_vm7, 0, %v3063_v61  ;;  %v1356_v36 = vadd.f32 %v1355_v42, %v10886_v51  ;;  %v4663_v49 = vpack.i.b16 %v2916_v26, %v11141_v16  ;;  %v2397_v21 = vpop.permute.xlu2 %2396 }
 0x15e   : > { %v2923_v56 = vrot.slane %v2920_v19, 4  ;;  %v2922_v60 = vsel %vm2869_vm7, 0, %v2921_v37  ;;  %v4679_v20 = vpack.i.b16 %v2920_v19, %v11119_v10  ;;  %v2391_v61 = vpop.permute.xlu0 %2390  ;;  %v4667_v59 = vpack.i.b16 %v4666_v6, %v14832_v62  ;;  %v1444_v37 = vpop.f32.mrf.mxu3 }
 0x15f   : > { %v4674_v7 = vshrl.u32 %v2922_v60, 16  ;;  %v4682_v42 = vshrl.u32 %v2920_v19, 16  ;;  %v11239_v26 = vsel %vm2869_vm7, 0, %v3061_v18  ;;  %v4671_v2 = vpack.i.b16 %v2922_v60, %v11190_v44  ;;  %v1179_v60 = vpop.f32.mrf.mxu0 }
 0x160   : > { %v2924_v3 = vsel %vm2869_vm7, 0, %v2923_v56  ;;  %v5685_v13 = vrot.slane %v4679_v20, 4  ;;  %v1445_v24 = vadd.f32 %v1444_v37, %v1356_v36  ;;  %v14833_v56 = vshrl.u32 %v11119_v10, 16 }
 0x161   : > { %v4687_v33 = vpack.i.b16 %v2924_v3, %v11175_v11  ;;  %v4690_v1 = vshrl.u32 %v2924_v3, 16  ;;  %v2958_v62 = vperm.slane %v2391_v61, %v11078_v35  ;;  %v4675_v3 = vpack.i.b16 %v4674_v7, %v4673_v32 }
 0x162   : > { %v4683_v17 = vpack.i.b16 %v4682_v42, %v14833_v56  ;;  %2674 = vrot.lane.b32.xlu1 %v11194_v31, %s10573_s24  ;;  %v5686_v16 = vsel %vm2869_vm7, %v5685_v13, %v4663_v49  ;;  %v2212_v11 = vpack.c.bf16 %v1445_v24, %v1267_v58  ;;  %v11249_v19 = vperm.slane %v2397_v21, %v11078_v35 }
 0x163   : > { %v4691_v45 = vpack.i.b16 %v4690_v1, %v4689_v12  ;;  %v5691_v43 = vrot.slane %v4687_v33, 4  ;;  %2546 = vrot.lane.b32.xlu2 %v11194_v31, %s10574_s9  ;;  %v5690_v44 = vperm.slane %v5686_v16, %v11078_v35  ;;  %v14834_v32 = vrot.slane %v11182_v40, 4 }
 0x164   : > { %v5713_v12 = vrot.slane %v4683_v17, 4  ;;  %v2967_v49 = vrot.slane %v2958_v62, 4  ;;  %2548 = vrot.lane.b32.xlu0 %v2212_v11, %s10574_s9  ;;  %v1180_v16 = vadd.f32 %v1179_v60, %v10880_v48 }
 0x165   : > { %v5692_v1 = vsel %vm2869_vm7, %v5691_v43, %v4671_v2  ;;  %v5719_v10 = vrot.slane %v4691_v45, 4  ;;  %v2966_v13 = vsel %vm2869_vm7, %v14834_v32, %v2958_v62  ;;  %v5699_v21 = vrot.slane %v5690_v44, 4  ;;  %1497 = vmatmul.bf16.gmra.mxu0 %v10792_v22 }
 0x166   : > { %v5696_v18 = vperm.slane %v5692_v1, %v11078_v35  ;;  %v5714_v7 = vsel %vm2869_vm7, %v5713_v12, %v4667_v59  ;;  %v11264_v43 = vperm.slane %v2966_v13, %v11103_v57  ;;  %v2968_v33 = vsel %vm2869_vm7, %v11182_v40, %v2967_v49  ;;  %v9828_v1 = vld [vmem:[#allocation5 + $0x160] sm:$0xf]  ;;  %v10240_v12 = vld [vmem:[#allocation5 + $0x174] sm:$0xf0] }
 0x167   : > { %v5720_v58 = vsel %vm2869_vm7, %v5719_v10, %v4675_v3  ;;  %v5718_v17 = vperm.slane %v5714_v7, %v11078_v35  ;;  %1586 = vmatmul.bf16.gmra.mxu1 %v10794_v23  ;;  %v11275_v2 = vperm.slane %v2968_v33, %v11103_v57  ;;  %1675 = vmatmul.bf16.gmra.mxu2 %v10792_v22  ;;  %v2393_v33 = vpop.permute.xlu1 %2392  ;;  %v1268_v3 = vpop.f32.mrf.mxu1 }
 0x168   : > { %v5697_v45 = vrot.slane %v5696_v18, 4  ;;  %v5724_v36 = vperm.slane %v5720_v58, %v11078_v35  ;;  %v5700_v59 = vsel %vm2869_vm7, %v5696_v18, %v5699_v21  ;;  %v2977_v24 = vrot.slane %v11264_v43, 4  ;;  %v10020_v58 = vld [vmem:[#allocation5 + $0x2e0] sm:$0xf] }
 0x169   : > { %v5708_v42 = vperm.slane %v5700_v59, %v11103_v57  ;;  %v5727_v37 = vrot.slane %v5718_v17, 4  ;;  %v11284_v62 = vperm.slane %v2212_v11, %v11078_v35  ;;  %v2979_v7 = vrot.slane %v11275_v2, 4 }
 0x16a   : > { %v5698_v61 = vsel %vm2869_vm7, %v5697_v45, %v5690_v44  ;;  %v5725_v40 = vrot.slane %v5724_v36, 4  ;;  %1764 = vmatmul.bf16.gmra.mxu3 %v10794_v23  ;;  %2420 = vrot.lane.b32.xlu1 %v2212_v11, %s10575_s11  ;;  %v11293_v32 = vsel %vm2869_vm7, 0, %v2977_v24  ;;  %v1357_v45 = vpop.f32.mrf.mxu2  ;;  %v9829_v59 = vor.u32 %v10240_v12, %v9828_v1  ;;  %v10288_v24 = vld [vmem:[#allocation5 + $0x2f4] sm:$0xf0]  ;;  %v2519_v23 = vpop.permute.xlu0 %2518 }
 0x16b   : > { %v5704_v56 = vperm.slane %v5698_v61, %v11103_v57  ;;  %14835 = vst [vmem:[#allocation44_spill] sm:$0xff] %v11284_v62  ;;  %v5711_v44 = vrot.slane %v5708_v42, 4  ;;  %v5728_v18 = vsel %vm2869_vm7, %v5724_v36, %v5727_v37  ;;  %2676 = vrot.lane.b32.xlu2 %v2212_v11, %s10573_s24  ;;  %v10021_v20 = vor.u32 %v10288_v24, %v10020_v58  ;;  %v1446_v58 = vpop.f32.mrf.mxu3 }
 0x16c   : > { %v5726_v10 = vsel %vm2869_vm7, %v5725_v40, %v5718_v17  ;;  %v5736_v21 = vperm.slane %v5728_v18, %v11103_v57  ;;  %v7497_v17 = vshrl.u32 %v5708_v42, 16  ;;  %1840 = vmatpush.bf16.msra.mxu0 %v9829_v59  ;;  %v11317_v24 = vperm.slane %v2393_v33, %v11078_v35 }
 0x16d   : > { %v5709_v13 = vrot.slane %v5704_v56, 4  ;;  %v5732_v49 = vperm.slane %v5726_v10, %v11103_v57  ;;  %v5712_v60 = vsel %vm2869_vm7, 0, %v5711_v44  ;;  %v7481_v10 = vshrl.u32 %v5704_v56, 16  ;;  %1929 = vmatpush.bf16.msra.mxu1 %v10021_v20 }
 0x16e   : > { %v5739_v40 = vrot.slane %v5736_v21, 4  ;;  %v7495_v44 = vpack.i.b16 %v5736_v21, %v5708_v42  ;;  %v7498_v6 = vshrl.u32 %v5736_v21, 16 }
 0x16f   : > { %v5710_v11 = vsel %vm2869_vm7, 0, %v5709_v13  ;;  %v5737_v61 = vrot.slane %v5732_v49, 4  ;;  %v7479_v37 = vpack.i.b16 %v5732_v49, %v5704_v56  ;;  %v7482_v18 = vshrl.u32 %v5732_v49, 16  ;;  %v2653_v13 = vpop.permute.xlu2 %2652 }
 0x170   : > { %v5740_v12 = vsel %vm2869_vm7, 0, %v5739_v40  ;;  %v7489_v36 = vshrl.u32 %v5710_v11, 16  ;;  %v7505_v49 = vshrl.u32 %v5712_v60, 16  ;;  %8630 = vst.msk [vmem:[%s11304_s16 + $0x200] sm:$0xf] %vm8501_vm8, %v7495_v44  ;;  %v7499_v42 = vpack.i.b16 %v7498_v6, %v7497_v17 }
 0x171   : > { %v5738_v1 = vsel %vm2869_vm7, 0, %v5737_v61  ;;  %8502 = vst.msk [vmem:[%s11304_s16] sm:$0xf] %vm8501_vm8, %v7479_v37  ;;  %v7483_v22 = vpack.i.b16 %v7482_v18, %v7481_v10  ;;  %v7503_v21 = vpack.i.b16 %v5740_v12, %v5712_v60  ;;  %v7506_v59 = vshrl.u32 %v5740_v12, 16  ;;  %v1182_v18 = vpop.f32.mrf.mxu0 }
 0x172   : > { %v7487_v62 = vpack.i.b16 %v5738_v1, %v5710_v11  ;;  %v7490_v56 = vshrl.u32 %v5738_v1, 16  ;;  %v1358_v61 = vadd.f32 %v1357_v45, %v10886_v51  ;;  %v3132_v11 = vperm.slane %v2653_v13, %v11078_v35  ;;  %8662 = vst.msk [vmem:[%s11304_s16 + $0x280] sm:$0xf] %vm8501_vm8, %v7499_v42  ;;  %v1360_v44 = vpop.f32.mrf.mxu2  ;;  %v2521_v1 = vpop.permute.xlu1 %2520 }
 0x173   : > { %8534 = vst.msk [vmem:[%s11304_s16 + $0x80] sm:$0xf] %vm8501_vm8, %v7483_v22  ;;  %v2936_v37 = vperm.slane %v2519_v23, %v11078_v35  ;;  %v7507_v10 = vpack.i.b16 %v7506_v59, %v7505_v49  ;;  %v1269_v6 = vadd.f32 %v1268_v3, %v1180_v16  ;;  %v2980_v45 = vsel %vm2869_vm7, 0, %v2979_v7 }
 0x174   : > { %v7491_v40 = vpack.i.b16 %v7490_v56, %v7489_v36  ;;  %8566 = vst.msk [vmem:[%s11304_s16 + $0x100] sm:$0xf] %vm8501_vm8, %v7487_v62  ;;  %v1447_v20 = vadd.f32 %v1446_v58, %v1358_v61  ;;  %v3133_v22 = vrot.slane %v3132_v11, 4  ;;  %v14836_v60 = vrot.slane %v11249_v19, 4 }
 0x175   : > { %v2937_v17 = vrot.slane %v2936_v37, 4  ;;  %v14837_v36 = vrot.slane %v11124_v27, 4  ;;  %v4706_v62 = vshrl.u32 %v11293_v32, 16  ;;  %8694 = vst.msk [vmem:[%s11304_s16 + $0x300] sm:$0xf] %vm8501_vm8, %v7503_v21  ;;  %v1183_v49 = vadd.f32 %v1182_v18, %v10880_v48  ;;  %1502 = vmatmul.bf16.gmra.mxu0 %v10804_v28 }
 0x176   : > { %8598 = vst.msk [vmem:[%s11304_s16 + $0x180] sm:$0xf] %vm8501_vm8, %v7491_v40  ;;  %v3136_v33 = vsel %vm2869_vm7, %v3132_v11, %v14836_v60  ;;  %v11335_v3 = vpack.c.bf16 %v1447_v20, %v1269_v6  ;;  %v3134_v13 = vsel %vm2869_vm7, %v3133_v22, %v11249_v19  ;;  %v4722_v61 = vshrl.u32 %v2980_v45, 16  ;;  %v1271_v20 = vpop.f32.mrf.mxu1 }
 0x177   : > { %v2940_v23 = vsel %vm2869_vm7, %v2936_v37, %v14837_v36  ;;  %v11338_v16 = vperm.slane %v3136_v33, %v11103_v57  ;;  %v2938_v56 = vsel %vm2869_vm7, %v2937_v17, %v11124_v27  ;;  %8726 = vst.msk [vmem:[%s11304_s16 + $0x380] sm:$0xf] %vm8501_vm8, %v7507_v10  ;;  %v11352_v42 = vperm.slane %v3134_v13, %v11103_v57 }
 0x178   : > { %v2948_v7 = vperm.slane %v2940_v23, %v11103_v57  ;;  %v2944_v21 = vperm.slane %v2938_v56, %v11103_v57  ;;  %2678 = vrot.lane.b32.xlu0 %v11335_v3, %s10573_s24  ;;  %2550 = vrot.lane.b32.xlu1 %v11335_v3, %s10574_s9  ;;  %v1361_v40 = vadd.f32 %v1360_v44, %v10886_v51  ;;  %v14838_v18 = vshrl.u32 %v11275_v2, 16 }
 0x179   : > { %v3147_v59 = vrot.slane %v11338_v16, 4  ;;  %v2992_v58 = vperm.slane %v2521_v1, %v11078_v35  ;;  %2422 = vrot.lane.b32.xlu2 %v11335_v3, %s10575_s11  ;;  %v3145_v11 = vrot.slane %v11352_v42, 4  ;;  %1591 = vmatmul.bf16.gmra.mxu1 %v10806_v29  ;;  %v1272_v17 = vadd.f32 %v1271_v20, %v1183_v49 }
 0x17a   : > { %v2951_v19 = vrot.slane %v2948_v7, 4  ;;  %v4713_v27 = vshrl.u32 %v2948_v7, 16  ;;  %v2949_v10 = vrot.slane %v2944_v21, 4  ;;  %v4711_v6 = vpack.i.b16 %v11275_v2, %v2948_v7  ;;  %1680 = vmatmul.bf16.gmra.mxu2 %v10804_v28  ;;  %1769 = vmatmul.bf16.gmra.mxu3 %v10806_v29 }
 0x17b   : > { %v11371_v22 = vsel %vm2869_vm7, 0, %v3147_v59  ;;  %v4697_v33 = vshrl.u32 %v2944_v21, 16  ;;  %v4695_v23 = vpack.i.b16 %v11264_v43, %v2944_v21  ;;  %v11380_v1 = vsel %vm2869_vm7, 0, %v3145_v11 }
 0x17c   : > { %v2952_v60 = vsel %vm2869_vm7, 0, %v2951_v19  ;;  %v2950_v36 = vsel %vm2869_vm7, 0, %v2949_v10  ;;  %v4715_v7 = vpack.i.b16 %v14838_v18, %v4713_v27  ;;  %v14839_v13 = vshrl.u32 %v11264_v43, 16  ;;  %v1449_v10 = vpop.f32.mrf.mxu3 }
 0x17d   : > { %v4719_v44 = vpack.i.b16 %v2980_v45, %v2952_v60  ;;  %v4703_v59 = vpack.i.b16 %v11293_v32, %v2950_v36  ;;  %v4705_v19 = vshrl.u32 %v2950_v36, 16  ;;  %v4721_v49 = vshrl.u32 %v2952_v60, 16 }
 0x17e   : > { %v4699_v56 = vpack.i.b16 %v14839_v13, %v4697_v33  ;;  %v5741_v20 = vrot.slane %v4711_v6, 4  ;;  %v5769_v12 = vrot.slane %v4715_v7, 4  ;;  %v1450_v21 = vadd.f32 %v1449_v10, %v1361_v40 }
 0x17f   : > { %v5747_v37 = vrot.slane %v4719_v44, 4  ;;  %v4707_v29 = vpack.i.b16 %v4706_v62, %v4705_v19  ;;  %v2993_v28 = vrot.slane %v2992_v58, 4  ;;  %v14840_v2 = vrot.slane %v11128_v38, 4 }
 0x180   : > { %v4723_v27 = vpack.i.b16 %v4722_v61, %v4721_v49  ;;  %v5742_v11 = vsel %vm2869_vm7, %v5741_v20, %v4695_v23  ;;  %v5770_v32 = vsel %vm2869_vm7, %v5769_v12, %v4699_v56  ;;  %v11394_v62 = vpack.c.bf16 %v1450_v21, %v1272_v17  ;;  %v2649_v21 = vpop.permute.xlu0 %2648 }
 0x181   : > { %v2996_v45 = vsel %vm2869_vm7, %v2992_v58, %v14840_v2  ;;  %v5748_v43 = vsel %vm2869_vm7, %v5747_v37, %v4703_v59  ;;  %v5746_v60 = vperm.slane %v5742_v11, %v11078_v35  ;;  %v5774_v33 = vperm.slane %v5770_v32, %v11078_v35  ;;  %v2399_v37 = vpop.permute.xlu2 %2398 }
 0x182   : > { %v5752_v6 = vperm.slane %v5748_v43, %v11078_v35  ;;  %v5775_v36 = vrot.slane %v4723_v27, 4  ;;  %v2994_v61 = vsel %vm2869_vm7, %v2993_v28, %v11128_v38  ;;  %v11400_v58 = vperm.slane %v2996_v45, %v11103_v57  ;;  %2424 = vrot.lane.b32.xlu0 %v11394_v62, %s10575_s11  ;;  %2680 = vrot.lane.b32.xlu1 %v11394_v62, %s10573_s24 }
 0x183   : > { %v5755_v18 = vrot.slane %v5746_v60, 4  ;;  %v5783_v7 = vrot.slane %v5774_v33, 4  ;;  %v11410_v28 = vperm.slane %v2994_v61, %v11103_v57  ;;  %2552 = vrot.lane.b32.xlu2 %v11394_v62, %s10574_s9  ;;  %v11419_v19 = vperm.slane %v2399_v37, %v11078_v35 }
 0x184   : > { %v5753_v23 = vrot.slane %v5752_v6, 4  ;;  %v5776_v44 = vsel %vm2869_vm7, %v5775_v36, %v4707_v29  ;;  %v3007_v38 = vrot.slane %v11400_v58, 4  ;;  %v4745_v10 = vshrl.u32 %v11400_v58, 16 }
 0x185   : > { %v5756_v56 = vsel %vm2869_vm7, %v5752_v6, %v5755_v18  ;;  %v5780_v59 = vperm.slane %v5776_v44, %v11078_v35  ;;  %v3005_v27 = vrot.slane %v11410_v28, 4  ;;  %v4729_v11 = vshrl.u32 %v11410_v28, 16  ;;  %1507 = vmatmul.bf16.gmra.mxu0 %v10816_v46 }
 0x186   : > { %v5754_v13 = vsel %vm2869_vm7, %v5753_v23, %v5746_v60  ;;  %v5764_v29 = vperm.slane %v5756_v56, %v11103_v57  ;;  %v11424_v20 = vsel %vm2869_vm7, 0, %v3007_v38  ;;  %v3020_v23 = vperm.slane %v2649_v21, %v11078_v35 }
 0x187   : > { %v5760_v49 = vperm.slane %v5754_v13, %v11103_v57  ;;  %v5781_v2 = vrot.slane %v5780_v59, 4  ;;  %v5784_v45 = vsel %vm2869_vm7, %v5780_v59, %v5783_v7  ;;  %v11441_v59 = vsel %vm2869_vm7, 0, %v3005_v27 }
 0x188   : > { %v5767_v32 = vrot.slane %v5764_v29, 4  ;;  %v5792_v60 = vperm.slane %v5784_v45, %v11103_v57  ;;  %v7529_v37 = vshrl.u32 %v5764_v29, 16  ;;  %v3021_v6 = vrot.slane %v3020_v23, 4 }
 0x189   : > { %v5765_v43 = vrot.slane %v5760_v49, 4  ;;  %v5782_v36 = vsel %vm2869_vm7, %v5781_v2, %v5774_v33  ;;  %v7513_v61 = vshrl.u32 %v5760_v49, 16  ;;  %1596 = vmatmul.bf16.gmra.mxu1 %v10818_v47 }
 0x18a   : > { %v5768_v7 = vsel %vm2869_vm7, 0, %v5767_v32  ;;  %v5788_v44 = vperm.slane %v5782_v36, %v11103_v57  ;;  %v5795_v38 = vrot.slane %v5792_v60, 4  ;;  %1685 = vmatmul.bf16.gmra.mxu2 %v10816_v46  ;;  %v7527_v33 = vpack.i.b16 %v5792_v60, %v5764_v29  ;;  %1774 = vmatmul.bf16.gmra.mxu3 %v10818_v47  ;;  %v1184_v29 = vpop.f32.mrf.mxu0 }
 0x18b   : > { %v5766_v18 = vsel %vm2869_vm7, 0, %v5765_v43  ;;  %v7530_v56 = vshrl.u32 %v5792_v60, 16  ;;  %v7537_v17 = vshrl.u32 %v5768_v7, 16  ;;  %v1362_v60 = vpop.f32.mrf.mxu2 }
 0x18c   : > { %v7521_v13 = vshrl.u32 %v5766_v18, 16  ;;  %v5793_v21 = vrot.slane %v5788_v44, 4  ;;  %v5796_v2 = vsel %vm2869_vm7, 0, %v5795_v38  ;;  %v7511_v45 = vpack.i.b16 %v5788_v44, %v5760_v49  ;;  %8631 = vst.msk [vmem:[%s11304_s16 + $0x204] sm:$0xf] %vm8501_vm8, %v7527_v33 }
 0x18d   : > { %v7514_v43 = vshrl.u32 %v5788_v44, 16  ;;  %v7531_v32 = vpack.i.b16 %v7530_v56, %v7529_v37  ;;  %v7535_v36 = vpack.i.b16 %v5796_v2, %v5768_v7  ;;  %v7538_v12 = vshrl.u32 %v5796_v2, 16  ;;  %v2395_v56 = vpop.permute.xlu1 %2394 }
 0x18e   : > { %v5794_v27 = vsel %vm2869_vm7, 0, %v5793_v21  ;;  %8503 = vst.msk [vmem:[%s11304_s16 + $0x4] sm:$0xf] %vm8501_vm8, %v7511_v45  ;;  %v14841_v49 = vrot.slane %v11317_v24, 4  ;;  %v4737_v7 = vshrl.u32 %v11441_v59, 16  ;;  %v1185_v2 = vadd.f32 %v1184_v29, %v10880_v48 }
 0x18f   : > { %v7515_v40 = vpack.i.b16 %v7514_v43, %v7513_v61  ;;  %v7519_v37 = vpack.i.b16 %v5794_v27, %v5766_v18  ;;  %v7522_v38 = vshrl.u32 %v5794_v27, 16  ;;  %8663 = vst.msk [vmem:[%s11304_s16 + $0x284] sm:$0xf] %vm8501_vm8, %v7531_v32  ;;  %v7539_v21 = vpack.i.b16 %v7538_v12, %v7537_v17  ;;  %v1273_v12 = vpop.f32.mrf.mxu1  ;;  %v1451_v17 = vpop.f32.mrf.mxu3 }
 0x190   : > { %v3024_v44 = vsel %vm2869_vm7, %v3020_v23, %v14841_v49  ;;  %v3022_v61 = vsel %vm2869_vm7, %v3021_v6, %v11317_v24  ;;  %v1363_v23 = vadd.f32 %v1362_v60, %v10886_v51  ;;  %8695 = vst.msk [vmem:[%s11304_s16 + $0x304] sm:$0xf] %vm8501_vm8, %v7535_v36  ;;  %v1274_v24 = vadd.f32 %v1273_v12, %v1185_v2  ;;  %v2529_v60 = vpop.permute.xlu2 %2528 }
 0x191   : > { %v3032_v33 = vperm.slane %v3024_v44, %v11103_v57  ;;  %8535 = vst.msk [vmem:[%s11304_s16 + $0x84] sm:$0xf] %vm8501_vm8, %v7515_v40  ;;  %v7523_v18 = vpack.i.b16 %v7522_v38, %v7521_v13  ;;  %v3028_v45 = vperm.slane %v3022_v61, %v11103_v57  ;;  %v11470_v29 = vperm.slane %v2395_v56, %v11078_v35 }
 0x192   : > { %8567 = vst.msk [vmem:[%s11304_s16 + $0x104] sm:$0xf] %vm8501_vm8, %v7519_v37  ;;  %v1452_v6 = vadd.f32 %v1451_v17, %v1363_v23  ;;  %v3216_v23 = vperm.slane %v2529_v60, %v11078_v35 }
 0x193   : > { %v3035_v43 = vrot.slane %v3032_v33, 4  ;;  %v4743_v32 = vpack.i.b16 %v3032_v33, %v11400_v58  ;;  %v4746_v40 = vshrl.u32 %v3032_v33, 16  ;;  %8599 = vst.msk [vmem:[%s11304_s16 + $0x184] sm:$0xf] %vm8501_vm8, %v7523_v18  ;;  %v3033_v13 = vrot.slane %v3028_v45, 4  ;;  %v2525_v18 = vpop.permute.xlu0 %2524 }
 0x194   : > { %v4727_v49 = vpack.i.b16 %v3028_v45, %v11410_v28  ;;  %v4730_v44 = vshrl.u32 %v3028_v45, 16  ;;  %8727 = vst.msk [vmem:[%s11304_s16 + $0x384] sm:$0xf] %vm8501_vm8, %v7539_v21  ;;  %v11484_v2 = vpack.c.bf16 %v1452_v6, %v1274_v24  ;;  %v14842_v58 = vshrl.u32 %v11424_v20, 16 }
 0x195   : > { %v3036_v27 = vsel %vm2869_vm7, 0, %v3035_v43  ;;  %v4747_v36 = vpack.i.b16 %v4746_v40, %v4745_v10  ;;  %v5797_v33 = vrot.slane %v4743_v32, 4  ;;  %v3034_v56 = vsel %vm2869_vm7, 0, %v3033_v13  ;;  %1512 = vmatmul.bf16.gmra.mxu0 %v10828_v52 }
 0x196   : > { %v4751_v37 = vpack.i.b16 %v3036_v27, %v11424_v20  ;;  %v4754_v38 = vshrl.u32 %v3036_v27, 16  ;;  %v4731_v61 = vpack.i.b16 %v4730_v44, %v4729_v11  ;;  %v4735_v45 = vpack.i.b16 %v3034_v56, %v11441_v59  ;;  %2554 = vrot.lane.b32.xlu0 %v11484_v2, %s10574_s9  ;;  %2426 = vrot.lane.b32.xlu1 %v11484_v2, %s10575_s11 }
 0x197   : > { %v4738_v21 = vshrl.u32 %v3034_v56, 16  ;;  %v5798_v43 = vsel %vm2869_vm7, %v5797_v33, %v4727_v49  ;;  %v5825_v17 = vrot.slane %v4747_v36, 4  ;;  %v3217_v40 = vrot.slane %v3216_v23, 4  ;;  %2682 = vrot.lane.b32.xlu2 %v11484_v2, %s10573_s24 }
 0x198   : > { %v4755_v10 = vpack.i.b16 %v4754_v38, %v14842_v58  ;;  %v5802_v32 = vperm.slane %v5798_v43, %v11078_v35  ;;  %v5803_v12 = vrot.slane %v4751_v37, 4  ;;  %v14843_v59 = vrot.slane %v11138_v50, 4 }
 0x199   : > { %v4739_v28 = vpack.i.b16 %v4738_v21, %v4737_v7  ;;  %v11500_v24 = vperm.slane %v2525_v18, %v11078_v35  ;;  %v5826_v13 = vsel %vm2869_vm7, %v5825_v17, %v4731_v61  ;;  %v3218_v27 = vsel %vm2869_vm7, %v3217_v40, %v11138_v50  ;;  %1601 = vmatmul.bf16.gmra.mxu1 %v10830_v53 }
 0x19a   : > { %v5831_v11 = vrot.slane %v4755_v10, 4  ;;  %v3220_v20 = vsel %vm2869_vm7, %v3216_v23, %v14843_v59  ;;  %v5804_v6 = vsel %vm2869_vm7, %v5803_v12, %v4735_v45  ;;  %v5811_v60 = vrot.slane %v5802_v32, 4  ;;  %1690 = vmatmul.bf16.gmra.mxu2 %v10828_v52  ;;  %1779 = vmatmul.bf16.gmra.mxu3 %v10830_v53 }
 0x19b   : > { %v5808_v7 = vperm.slane %v5804_v6, %v11078_v35  ;;  %v5830_v49 = vperm.slane %v5826_v13, %v11078_v35  ;;  %v11513_v36 = vperm.slane %v3218_v27, %v11103_v57  ;;  %v11518_v37 = vperm.slane %v11394_v62, %v11078_v35 }
 0x19c   : > { %v5832_v44 = vsel %vm2869_vm7, %v5831_v11, %v4739_v28  ;;  %v11523_v33 = vperm.slane %v3220_v20, %v11103_v57  ;;  %v3105_v58 = vrot.slane %v11500_v24, 4  ;;  %v14844_v17 = vrot.slane %v11132_v0, 4 }
 0x19d   : > { %v5836_v50 = vperm.slane %v5832_v44, %v11078_v35  ;;  %v5809_v56 = vrot.slane %v5808_v7, 4  ;;  %v5812_v61 = vsel %vm2869_vm7, %v5808_v7, %v5811_v60  ;;  %v5839_v23 = vrot.slane %v5830_v49, 4 }
 0x19e   : > { %v3229_v18 = vrot.slane %v11513_v36, 4  ;;  %v5820_v62 = vperm.slane %v5812_v61, %v11103_v57  ;;  %v3231_v12 = vrot.slane %v11523_v33, 4  ;;  %v3108_v40 = vsel %vm2869_vm7, %v11500_v24, %v14844_v17  ;;  %v9806_v17 = vld [vmem:[#allocation5 + $0x148] sm:$0xf0] }
 0x19f   : > { %v5837_v45 = vrot.slane %v5836_v50, 4  ;;  %v5810_v10 = vsel %vm2869_vm7, %v5809_v56, %v5802_v32  ;;  %v5840_v43 = vsel %vm2869_vm7, %v5836_v50, %v5839_v23  ;;  %v10231_v23 = vld [vmem:[#allocation5 + $0x134] sm:$0xf] }
 0x1a0   : > { %v5816_v28 = vperm.slane %v5810_v10, %v11103_v57  ;;  %v5823_v11 = vrot.slane %v5820_v62, 4  ;;  %v5848_v20 = vperm.slane %v5840_v43, %v11103_v57  ;;  %v11544_v32 = vsel %vm2869_vm7, 0, %v3229_v18 }
 0x1a1   : > { %v5838_v59 = vsel %vm2869_vm7, %v5837_v45, %v5830_v49  ;;  %v7561_v10 = vshrl.u32 %v5820_v62, 16 }
 0x1a2   : > { %v5844_v6 = vperm.slane %v5838_v59, %v11103_v57  ;;  %v5821_v27 = vrot.slane %v5816_v28, 4  ;;  %v5824_v7 = vsel %vm2869_vm7, 0, %v5823_v11  ;;  %v5851_v24 = vrot.slane %v5848_v20, 4 }
 0x1a3   : > { %v7545_v44 = vshrl.u32 %v5816_v28, 16  ;;  %v7559_v61 = vpack.i.b16 %v5848_v20, %v5820_v62  ;;  %v7562_v43 = vshrl.u32 %v5848_v20, 16  ;;  %v7569_v60 = vshrl.u32 %v5824_v7, 16 }
 0x1a4   : > { %v5849_v50 = vrot.slane %v5844_v6, 4  ;;  %v7543_v56 = vpack.i.b16 %v5844_v6, %v5816_v28  ;;  %v7546_v49 = vshrl.u32 %v5844_v6, 16  ;;  %v5822_v45 = vsel %vm2869_vm7, 0, %v5821_v27  ;;  %v1187_v27 = vpop.f32.mrf.mxu0 }
 0x1a5   : > { %v5852_v18 = vsel %vm2869_vm7, 0, %v5851_v24  ;;  %v7553_v13 = vshrl.u32 %v5822_v45, 16  ;;  %v7563_v38 = vpack.i.b16 %v7562_v43, %v7561_v10  ;;  %8632 = vst.msk [vmem:[%s11304_s16 + $0x208] sm:$0xf] %vm8501_vm8, %v7559_v61  ;;  %v3106_v62 = vsel %vm2869_vm7, %v3105_v58, %v11132_v0  ;;  %v1365_v10 = vpop.f32.mrf.mxu2  ;;  %1517 = vmatmul.bf16.gmra.mxu0 %v10840_v8 }
 0x1a6   : > { %v5850_v59 = vsel %vm2869_vm7, 0, %v5849_v50  ;;  %v7547_v11 = vpack.i.b16 %v7546_v49, %v7545_v44  ;;  %8504 = vst.msk [vmem:[%s11304_s16 + $0x8] sm:$0xf] %vm8501_vm8, %v7543_v56  ;;  %v7570_v21 = vshrl.u32 %v5852_v18, 16  ;;  %v7567_v24 = vpack.i.b16 %v5852_v18, %v5824_v7  ;;  %v10279_v50 = vld [vmem:[#allocation5 + $0x2b4] sm:$0xf]  ;;  %v1276_v7 = vpop.f32.mrf.mxu1 }
 0x1a7   : > { %v7551_v28 = vpack.i.b16 %v5850_v59, %v5822_v45  ;;  %v7554_v6 = vshrl.u32 %v5850_v59, 16  ;;  %v3116_v20 = vperm.slane %v3108_v40, %v11103_v57  ;;  %v1188_v44 = vadd.f32 %v1187_v27, %v10880_v48  ;;  %v9998_v56 = vld [vmem:[#allocation5 + $0x2c8] sm:$0xf0]  ;;  %8664 = vst.msk [vmem:[%s11304_s16 + $0x288] sm:$0xf] %vm8501_vm8, %v7563_v38 }
 0x1a8   : > { %8536 = vst.msk [vmem:[%s11304_s16 + $0x88] sm:$0xf] %vm8501_vm8, %v7547_v11  ;;  %v7571_v45 = vpack.i.b16 %v7570_v21, %v7569_v60  ;;  %v3112_v61 = vperm.slane %v3106_v62, %v11103_v57  ;;  %v9809_v18 = vor.u32 %v10231_v23, %v9806_v17  ;;  %v10001_v59 = vor.u32 %v10279_v50, %v9998_v56 }
 0x1a9   : > { %v7555_v49 = vpack.i.b16 %v7554_v6, %v7553_v13  ;;  %8568 = vst.msk [vmem:[%s11304_s16 + $0x108] sm:$0xf] %vm8501_vm8, %v7551_v28  ;;  %v3119_v0 = vrot.slane %v3116_v20, 4  ;;  %v4807_v58 = vpack.i.b16 %v11338_v16, %v3116_v20  ;;  %v4809_v40 = vshrl.u32 %v3116_v20, 16  ;;  %1606 = vmatmul.bf16.gmra.mxu1 %v10842_v9 }
 0x1aa   : > { %v1277_v43 = vadd.f32 %v1276_v7, %v1188_v44  ;;  %v3117_v13 = vrot.slane %v3112_v61, 4  ;;  %v4791_v21 = vpack.i.b16 %v11352_v42, %v3112_v61  ;;  %v4793_v60 = vshrl.u32 %v3112_v61, 16  ;;  %2019 = vmatpush.bf16.msra.mxu2 %v9809_v18  ;;  %8696 = vst.msk [vmem:[%s11304_s16 + $0x308] sm:$0xf] %vm8501_vm8, %v7567_v24  ;;  %2108 = vmatpush.bf16.msra.mxu3 %v10001_v59  ;;  %v2651_v44 = vpop.permute.xlu1 %2650  ;;  %v1454_v61 = vpop.f32.mrf.mxu3 }
 0x1ab   : > { %8600 = vst.msk [vmem:[%s11304_s16 + $0x188] sm:$0xf] %vm8501_vm8, %v7555_v49  ;;  %v3120_v38 = vsel %vm2869_vm7, 0, %v3119_v0  ;;  %v14845_v23 = vshrl.u32 %v11338_v16, 16  ;;  %v5909_v11 = vrot.slane %v4807_v58, 4  ;;  %v1366_v28 = vadd.f32 %v1365_v10, %v10886_v51  ;;  %1695 = vmatmul.bf16.gmra.mxu2 %v10840_v8  ;;  %1784 = vmatmul.bf16.gmra.mxu3 %v10842_v9 }
 0x1ac   : > { %8728 = vst.msk [vmem:[%s11304_s16 + $0x388] sm:$0xf] %vm8501_vm8, %v7571_v45  ;;  %v3118_v6 = vsel %vm2869_vm7, 0, %v3117_v13  ;;  %v14846_v27 = vshrl.u32 %v11352_v42, 16  ;;  %v4815_v20 = vpack.i.b16 %v11371_v22, %v3120_v38  ;;  %v4817_v24 = vshrl.u32 %v3120_v38, 16 }
 0x1ad   : > { %v4811_v17 = vpack.i.b16 %v14845_v23, %v4809_v40  ;;  %v4799_v16 = vpack.i.b16 %v11380_v1, %v3118_v6  ;;  %v4801_v50 = vshrl.u32 %v3118_v6, 16  ;;  %v5910_v56 = vsel %vm2869_vm7, %v5909_v11, %v4791_v21 }
 0x1ae   : > { %v4795_v62 = vpack.i.b16 %v14846_v27, %v4793_v60  ;;  %v14847_v45 = vshrl.u32 %v11371_v22, 16  ;;  %v5914_v7 = vperm.slane %v5910_v56, %v11078_v35  ;;  %v5915_v18 = vrot.slane %v4815_v20, 4 }
 0x1af   : > { %v5937_v49 = vrot.slane %v4811_v17, 4  ;;  %v1455_v10 = vadd.f32 %v1454_v61, %v1366_v28  ;;  %v11595_v0 = vsel %vm2869_vm7, 0, %v3231_v12  ;;  %v14848_v58 = vshrl.u32 %v11380_v1, 16  ;;  %v2659_v28 = vpop.permute.xlu2 %2658 }
 0x1b0   : > { %v4819_v42 = vpack.i.b16 %v14847_v45, %v4817_v24  ;;  %v3076_v21 = vperm.slane %v2651_v44, %v11078_v35  ;;  %v5916_v60 = vsel %vm2869_vm7, %v5915_v18, %v4799_v16  ;;  %v5923_v22 = vrot.slane %v5914_v7, 4 }
 0x1b1   : > { %v4803_v40 = vpack.i.b16 %v14848_v58, %v4801_v50  ;;  %v5938_v13 = vsel %vm2869_vm7, %v5937_v49, %v4795_v62  ;;  %v5920_v23 = vperm.slane %v5916_v60, %v11078_v35  ;;  %v11604_v17 = vpack.c.bf16 %v1455_v10, %v1277_v43 }
 0x1b2   : > { %v5942_v59 = vperm.slane %v5938_v13, %v11078_v35  ;;  %v5943_v38 = vrot.slane %v4819_v42, 4  ;;  %v3077_v11 = vrot.slane %v3076_v21, 4  ;;  %v14849_v12 = vrot.slane %v11470_v29, 4 }
 0x1b3   : > { %v5921_v44 = vrot.slane %v5920_v23, 4  ;;  %v5924_v43 = vsel %vm2869_vm7, %v5920_v23, %v5923_v22  ;;  %2684 = vrot.lane.b32.xlu0 %v11604_v17, %s10573_s24  ;;  %2556 = vrot.lane.b32.xlu1 %v11604_v17, %s10574_s9  ;;  %v11626_v61 = vperm.slane %v2659_v28, %v11078_v35 }
 0x1b4   : > { %v3080_v1 = vsel %vm2869_vm7, %v3076_v21, %v14849_v12  ;;  %v5944_v27 = vsel %vm2869_vm7, %v5943_v38, %v4803_v40  ;;  %v5951_v62 = vrot.slane %v5942_v59, 4  ;;  %v5932_v50 = vperm.slane %v5924_v43, %v11103_v57  ;;  %2428 = vrot.lane.b32.xlu2 %v11604_v17, %s10575_s11 }
 0x1b5   : > { %v11612_v20 = vperm.slane %v3080_v1, %v11103_v57  ;;  %v5948_v16 = vperm.slane %v5944_v27, %v11078_v35  ;;  %v3078_v56 = vsel %vm2869_vm7, %v3077_v11, %v11470_v29  ;;  %v5922_v45 = vsel %vm2869_vm7, %v5921_v44, %v5914_v7 }
 0x1b6   : > { %v11633_v10 = vperm.slane %v3078_v56, %v11103_v57  ;;  %v5928_v58 = vperm.slane %v5922_v45, %v11103_v57  ;;  %v5935_v40 = vrot.slane %v5932_v50, 4  ;;  %v7625_v60 = vshrl.u32 %v5932_v50, 16  ;;  %v1189_v56 = vpop.f32.mrf.mxu0  ;;  %1522 = vmatmul.bf16.gmra.mxu0 %v10852_v14 }
 0x1b7   : > { %v3091_v49 = vrot.slane %v11612_v20, 4  ;;  %v5949_v42 = vrot.slane %v5948_v16, 4  ;;  %v5952_v18 = vsel %vm2869_vm7, %v5948_v16, %v5951_v62  ;;  %v4775_v13 = vpack.i.b16 %v11612_v20, %v11200_v41 }
 0x1b8   : > { %v5960_v29 = vperm.slane %v5952_v18, %v11103_v57  ;;  %v3089_v22 = vrot.slane %v11633_v10, 4  ;;  %v5933_v38 = vrot.slane %v5928_v58, 4  ;;  %v5936_v23 = vsel %vm2869_vm7, 0, %v5935_v40 }
 0x1b9   : > { %v5950_v21 = vsel %vm2869_vm7, %v5949_v42, %v5942_v59  ;;  %v3092_v7 = vsel %vm2869_vm7, 0, %v3091_v49  ;;  %v7609_v1 = vshrl.u32 %v5928_v58, 16  ;;  %v4759_v62 = vpack.i.b16 %v11633_v10, %v11210_v25 }
 0x1ba   : > { %v5956_v11 = vperm.slane %v5950_v21, %v11103_v57  ;;  %v5963_v12 = vrot.slane %v5960_v29, 4  ;;  %v7623_v28 = vpack.i.b16 %v5960_v29, %v5932_v50  ;;  %v7626_v27 = vshrl.u32 %v5960_v29, 16  ;;  %v11651_v50 = vpop.f32.mrf.mxu1  ;;  %1611 = vmatmul.bf16.gmra.mxu1 %v10854_v15 }
 0x1bb   : > { %v5934_v59 = vsel %vm2869_vm7, 0, %v5933_v38  ;;  %v7633_v18 = vshrl.u32 %v5936_v23, 16  ;;  %v4762_v21 = vshrl.u32 %v11633_v10, 16 }
 0x1bc   : > { %v5961_v44 = vrot.slane %v5956_v11, 4  ;;  %v5964_v43 = vsel %vm2869_vm7, 0, %v5963_v12  ;;  %v7607_v16 = vpack.i.b16 %v5956_v11, %v5928_v58  ;;  %v7610_v49 = vshrl.u32 %v5956_v11, 16  ;;  %8634 = vst.msk [vmem:[%s11304_s16 + $0x210] sm:$0xf] %vm8501_vm8, %v7623_v28  ;;  %v2655_v28 = vpop.permute.xlu0 %2654 }
 0x1bd   : > { %v7627_v45 = vpack.i.b16 %v7626_v27, %v7625_v60  ;;  %v7631_v42 = vpack.i.b16 %v5964_v43, %v5936_v23  ;;  %v7634_v29 = vshrl.u32 %v5964_v43, 16  ;;  %v3090_v58 = vsel %vm2869_vm7, 0, %v3089_v22  ;;  %v11659_v60 = vpop.f32.mrf.mxu2  ;;  %1700 = vmatmul.bf16.gmra.mxu2 %v10852_v14  ;;  %v9804_v27 = vld [vmem:[#allocation5 + $0x130] sm:$0xf] }
 0x1be   : > { %v5962_v40 = vsel %vm2869_vm7, 0, %v5961_v44  ;;  %8506 = vst.msk [vmem:[%s11304_s16 + $0x10] sm:$0xf] %vm8501_vm8, %v7607_v16  ;;  %v7611_v38 = vpack.i.b16 %v7610_v49, %v7609_v1  ;;  %v7617_v11 = vshrl.u32 %v5934_v59, 16  ;;  %v11664_v44 = vpop.f32.mrf.mxu3  ;;  %1789 = vmatmul.bf16.gmra.mxu3 %v10854_v15  ;;  %v4767_v10 = vpack.i.b16 %v3090_v58, %v11239_v26 }
 0x1bf   : > { %v7615_v23 = vpack.i.b16 %v5962_v40, %v5934_v59  ;;  %v7618_v12 = vshrl.u32 %v5962_v40, 16  ;;  %8666 = vst.msk [vmem:[%s11304_s16 + $0x290] sm:$0xf] %vm8501_vm8, %v7627_v45  ;;  %v7635_v22 = vpack.i.b16 %v7634_v29, %v7633_v18  ;;  %v4770_v1 = vshrl.u32 %v3090_v58, 16  ;;  %v10234_v59 = vld [vmem:[#allocation5 + $0x144] sm:$0xf0] }
 0x1c0   : > { %8698 = vst.msk [vmem:[%s11304_s16 + $0x310] sm:$0xf] %vm8501_vm8, %v7631_v42  ;;  %v4778_v43 = vshrl.u32 %v11612_v20, 16  ;;  %v4783_v49 = vpack.i.b16 %v3092_v7, %v11225_v39  ;;  %v4786_v45 = vshrl.u32 %v3092_v7, 16  ;;  %v5853_v40 = vrot.slane %v4775_v13, 4 }
 0x1c1   : > { %v7619_v16 = vpack.i.b16 %v7618_v12, %v7617_v11  ;;  %8538 = vst.msk [vmem:[%s11304_s16 + $0x90] sm:$0xf] %vm8501_vm8, %v7611_v38  ;;  %v14850_v18 = vshrl.u32 %v11210_v25, 16  ;;  %v14851_v42 = vshrl.u32 %v11239_v26, 16  ;;  %v14852_v58 = vshrl.u32 %v11200_v41, 16 }
 0x1c2   : > { %8570 = vst.msk [vmem:[%s11304_s16 + $0x110] sm:$0xf] %vm8501_vm8, %v7615_v23  ;;  %v3188_v6 = vperm.slane %v2655_v28, %v11078_v35  ;;  %v14853_v38 = vshrl.u32 %v11225_v39, 16  ;;  %v5854_v13 = vsel %vm2869_vm7, %v5853_v40, %v4759_v62  ;;  %v5859_v7 = vrot.slane %v4783_v49, 4 }
 0x1c3   : > { %v4763_v29 = vpack.i.b16 %v4762_v21, %v14850_v18  ;;  %v4771_v24 = vpack.i.b16 %v4770_v1, %v14851_v42  ;;  %v4779_v20 = vpack.i.b16 %v4778_v43, %v14852_v58  ;;  %8602 = vst.msk [vmem:[%s11304_s16 + $0x190] sm:$0xf] %vm8501_vm8, %v7619_v16  ;;  %v9805_v23 = vor.u32 %v10234_v59, %v9804_v27  ;;  %v9996_v58 = vld [vmem:[#allocation5 + $0x2b0] sm:$0xf] }
 0x1c4   : > { %v4787_v11 = vpack.i.b16 %v4786_v45, %v14853_v38  ;;  %8730 = vst.msk [vmem:[%s11304_s16 + $0x390] sm:$0xf] %vm8501_vm8, %v7635_v22  ;;  %v5858_v25 = vperm.slane %v5854_v13, %v11078_v35  ;;  %v3189_v21 = vrot.slane %v3188_v6, 4  ;;  %v14854_v41 = vrot.slane %v11419_v19, 4  ;;  %v2527_v38 = vpop.permute.xlu1 %2526 }
 0x1c5   : > { %v5881_v26 = vrot.slane %v4779_v20, 4  ;;  %v5860_v28 = vsel %vm2869_vm7, %v5859_v7, %v4767_v10  ;;  %v1190_v62 = vadd.f32 %v1189_v56, %v10880_v48  ;;  %1841 = vmatpush.bf16.msra.mxu0 %v9805_v23  ;;  %v10282_v20 = vld [vmem:[#allocation5 + $0x2c4] sm:$0xf0] }
 0x1c6   : > { %v3192_v12 = vsel %vm2869_vm7, %v3188_v6, %v14854_v41  ;;  %v5887_v1 = vrot.slane %v4787_v11, 4  ;;  %v5864_v27 = vperm.slane %v5860_v28, %v11078_v35  ;;  %v5867_v22 = vrot.slane %v5858_v25, 4 }
 0x1c7   : > { %v11696_v39 = vperm.slane %v3192_v12, %v11103_v57  ;;  %v5882_v43 = vsel %vm2869_vm7, %v5881_v26, %v4763_v29  ;;  %v3190_v59 = vsel %vm2869_vm7, %v3189_v21, %v11419_v19  ;;  %v11714_v29 = vperm.slane %v11604_v17, %v11078_v35 }
 0x1c8   : > { %v5886_v16 = vperm.slane %v5882_v43, %v11078_v35  ;;  %v5888_v6 = vsel %vm2869_vm7, %v5887_v1, %v4771_v24  ;;  %v11706_v10 = vperm.slane %v3190_v59, %v11103_v57  ;;  %v5865_v45 = vrot.slane %v5864_v27, 4 }
 0x1c9   : > { %v3203_v49 = vrot.slane %v11696_v39, 4  ;;  %v5868_v56 = vsel %vm2869_vm7, %v5864_v27, %v5867_v22  ;;  %v5892_v40 = vperm.slane %v5888_v6, %v11078_v35  ;;  %v11718_v24 = vadd.f32 %v11651_v50, %v1190_v62 }
 0x1ca   : > { %v5876_v19 = vperm.slane %v5868_v56, %v11103_v57  ;;  %v5895_v42 = vrot.slane %v5886_v16, 4  ;;  %v5866_v11 = vsel %vm2869_vm7, %v5865_v45, %v5858_v25  ;;  %v3201_v7 = vrot.slane %v11706_v10, 4 }
 0x1cb   : > { %v5893_v13 = vrot.slane %v5892_v40, 4  ;;  %v4842_v23 = vshrl.u32 %v11696_v39, 16  ;;  %v5872_v26 = vperm.slane %v5866_v11, %v11103_v57  ;;  %v11726_v41 = vsel %vm2869_vm7, 0, %v3203_v49 }
 0x1cc   : > { %v5879_v17 = vrot.slane %v5876_v19, 4  ;;  %v5896_v21 = vsel %vm2869_vm7, %v5892_v40, %v5895_v42  ;;  %v4826_v28 = vshrl.u32 %v11706_v10, 16  ;;  %v9997_v25 = vor.u32 %v10282_v20, %v9996_v58 }
 0x1cd   : > { %v5894_v50 = vsel %vm2869_vm7, %v5893_v13, %v5886_v16  ;;  %v5904_v12 = vperm.slane %v5896_v21, %v11103_v57  ;;  %v5877_v1 = vrot.slane %v5872_v26, 4  ;;  %v7593_v22 = vshrl.u32 %v5876_v19, 16  ;;  %v2401_v13 = vpop.permute.xlu0 %2400 }
 0x1ce   : > { %v5880_v62 = vsel %vm2869_vm7, 0, %v5879_v17  ;;  %v5900_v27 = vperm.slane %v5894_v50, %v11103_v57  ;;  %v7577_v59 = vshrl.u32 %v5872_v26, 16  ;;  %1930 = vmatpush.bf16.msra.mxu1 %v9997_v25  ;;  %v1368_v25 = vadd.f32 %v11659_v60, %v10886_v51 }
 0x1cf   : > { %v5907_v43 = vrot.slane %v5904_v12, 4  ;;  %v7591_v6 = vpack.i.b16 %v5904_v12, %v5876_v19  ;;  %v7594_v45 = vshrl.u32 %v5904_v12, 16  ;;  %v5878_v16 = vsel %vm2869_vm7, 0, %v5877_v1 }
 0x1d0   : > { %v5905_v49 = vrot.slane %v5900_v27, 4  ;;  %v7575_v56 = vpack.i.b16 %v5900_v27, %v5872_v26  ;;  %v7578_v40 = vshrl.u32 %v5900_v27, 16  ;;  %v7585_v58 = vshrl.u32 %v5878_v16, 16  ;;  %v1192_v27 = vpop.f32.mrf.mxu0 }
 0x1d1   : > { %v5908_v42 = vsel %vm2869_vm7, 0, %v5907_v43  ;;  %v7595_v20 = vpack.i.b16 %v7594_v45, %v7593_v22  ;;  %v7601_v11 = vshrl.u32 %v5880_v62, 16  ;;  %8633 = vst.msk [vmem:[%s11304_s16 + $0x20c] sm:$0xf] %vm8501_vm8, %v7591_v6  ;;  %v3160_v1 = vperm.slane %v2527_v38, %v11078_v35  ;;  %v1370_v6 = vpop.f32.mrf.mxu2  ;;  %v2657_v45 = vpop.permute.xlu1 %2656 }
 0x1d2   : > { %v5906_v19 = vsel %vm2869_vm7, 0, %v5905_v49  ;;  %v7579_v17 = vpack.i.b16 %v7578_v40, %v7577_v59  ;;  %v7599_v21 = vpack.i.b16 %v5908_v42, %v5880_v62  ;;  %v7602_v50 = vshrl.u32 %v5908_v42, 16  ;;  %8505 = vst.msk [vmem:[%s11304_s16 + $0xc] sm:$0xf] %vm8501_vm8, %v7575_v56  ;;  %v1281_v40 = vpop.f32.mrf.mxu1 }
 0x1d3   : > { %v7583_v12 = vpack.i.b16 %v5906_v19, %v5878_v16  ;;  %v7586_v26 = vshrl.u32 %v5906_v19, 16  ;;  %8665 = vst.msk [vmem:[%s11304_s16 + $0x28c] sm:$0xf] %vm8501_vm8, %v7595_v20  ;;  %v4850_v62 = vshrl.u32 %v11726_v41, 16  ;;  %v3238_v43 = vperm.slane %v2401_v13, %v11078_v35 }
 0x1d4   : > { %v7603_v22 = vpack.i.b16 %v7602_v50, %v7601_v11  ;;  %8537 = vst.msk [vmem:[%s11304_s16 + $0x8c] sm:$0xf] %vm8501_vm8, %v7579_v17  ;;  %v1193_v59 = vadd.f32 %v1192_v27, %v10880_v48  ;;  %v1457_v60 = vadd.f32 %v11664_v44, %v1368_v25  ;;  %v3161_v38 = vrot.slane %v3160_v1, 4 }
 0x1d5   : > { %v7587_v16 = vpack.i.b16 %v7586_v26, %v7585_v58  ;;  %8569 = vst.msk [vmem:[%s11304_s16 + $0x10c] sm:$0xf] %vm8501_vm8, %v7583_v12  ;;  %v14855_v49 = vrot.slane %v11148_v55, 4  ;;  %v3202_v42 = vsel %vm2869_vm7, 0, %v3201_v7  ;;  %v3247_v11 = vrot.slane %v3238_v43, 4  ;;  %v1459_v26 = vpop.f32.mrf.mxu3 }
 0x1d6   : > { %8697 = vst.msk [vmem:[%s11304_s16 + $0x30c] sm:$0xf] %vm8501_vm8, %v7599_v21  ;;  %v1282_v13 = vadd.f32 %v1281_v40, %v1193_v59  ;;  %v11763_v58 = vpack.c.bf16 %v1457_v60, %v11718_v24  ;;  %v3162_v44 = vsel %vm2869_vm7, %v3161_v38, %v11148_v55  ;;  %v1371_v19 = vadd.f32 %v1370_v6, %v10886_v51 }
 0x1d7   : > { %v3164_v56 = vsel %vm2869_vm7, %v3160_v1, %v14855_v49  ;;  %8601 = vst.msk [vmem:[%s11304_s16 + $0x18c] sm:$0xf] %vm8501_vm8, %v7587_v16  ;;  %v3244_v17 = vperm.slane %v2657_v45, %v11078_v35  ;;  %v3168_v7 = vperm.slane %v3162_v44, %v11103_v57  ;;  %v4834_v25 = vshrl.u32 %v3202_v42, 16 }
 0x1d8   : > { %v3172_v20 = vperm.slane %v3164_v56, %v11103_v57  ;;  %8729 = vst.msk [vmem:[%s11304_s16 + $0x38c] sm:$0xf] %vm8501_vm8, %v7603_v22  ;;  %2430 = vrot.lane.b32.xlu0 %v11763_v58, %s10575_s11  ;;  %v1460_v24 = vadd.f32 %v1459_v26, %v1371_v19  ;;  %2686 = vrot.lane.b32.xlu1 %v11763_v58, %s10573_s24 }
 0x1d9   : > { %v3245_v1 = vrot.slane %v3244_v17, 4  ;;  %v3248_v55 = vsel %vm2869_vm7, %v3244_v17, %v3247_v11  ;;  %v3173_v27 = vrot.slane %v3168_v7, 4  ;;  %v4823_v59 = vpack.i.b16 %v11706_v10, %v3168_v7  ;;  %2558 = vrot.lane.b32.xlu2 %v11763_v58, %s10574_s9 }
 0x1da   : > { %v3175_v21 = vrot.slane %v3172_v20, 4  ;;  %v4839_v50 = vpack.i.b16 %v11696_v39, %v3172_v20  ;;  %v4841_v12 = vshrl.u32 %v3172_v20, 16  ;;  %v4825_v6 = vshrl.u32 %v3168_v7, 16  ;;  %v2405_v39 = vpop.permute.xlu2 %2404 }
 0x1db   : > { %v3174_v49 = vsel %vm2869_vm7, 0, %v3173_v27  ;;  %v11788_v40 = vpack.c.bf16 %v1460_v24, %v1282_v13  ;;  %v3246_v20 = vsel %vm2869_vm7, %v3245_v1, %v3238_v43  ;;  %v11801_v43 = vperm.slane %v3248_v55, %v11103_v57 }
 0x1dc   : > { %v3176_v22 = vsel %vm2869_vm7, 0, %v3175_v21  ;;  %v4843_v45 = vpack.i.b16 %v4842_v23, %v4841_v12  ;;  %v5965_v38 = vrot.slane %v4839_v50, 4  ;;  %v4827_v56 = vpack.i.b16 %v4826_v28, %v4825_v6 }
 0x1dd   : > { %v4847_v16 = vpack.i.b16 %v11726_v41, %v3176_v22  ;;  %v4849_v60 = vshrl.u32 %v3176_v22, 16  ;;  %v4831_v11 = vpack.i.b16 %v3202_v42, %v3174_v49  ;;  %v4833_v44 = vshrl.u32 %v3174_v49, 16 }
 0x1de   : > { %v5966_v17 = vsel %vm2869_vm7, %v5965_v38, %v4823_v59  ;;  %v5993_v7 = vrot.slane %v4843_v45, 4  ;;  %v11795_v21 = vperm.slane %v11034_v4, %v11078_v35  ;;  %v11798_v13 = vperm.slane %v3246_v20, %v11103_v57 }
 0x1df   : > { %v4851_v19 = vpack.i.b16 %v4850_v62, %v4849_v60  ;;  %v5970_v23 = vperm.slane %v5966_v17, %v11078_v35  ;;  %v5971_v41 = vrot.slane %v4847_v16, 4  ;;  %v4835_v10 = vpack.i.b16 %v4834_v25, %v4833_v44 }
 0x1e0   : > { %v5994_v50 = vsel %vm2869_vm7, %v5993_v7, %v4827_v56  ;;  %v11806_v12 = vperm.slane %v2405_v39, %v11078_v35  ;;  %v3257_v24 = vrot.slane %v11798_v13, 4  ;;  %2560 = vrot.lane.b32.xlu0 %v11788_v40, %s10574_s9  ;;  %2432 = vrot.lane.b32.xlu1 %v11788_v40, %s10575_s11  ;;  %v3259_v55 = vrot.slane %v11801_v43, 4 }
 0x1e1   : > { %v5999_v28 = vrot.slane %v4851_v19, 4  ;;  %v5972_v62 = vsel %vm2869_vm7, %v5971_v41, %v4831_v11  ;;  %v5979_v42 = vrot.slane %v5970_v23, 4  ;;  %v5998_v4 = vperm.slane %v5994_v50, %v11078_v35  ;;  %2688 = vrot.lane.b32.xlu2 %v11788_v40, %s10573_s24  ;;  %v11851_v50 = vpop.f32.mrf.mxu2  ;;  %1705 = vmatmul.bf16.gmra.mxu2 %v10864_v30 }
 0x1e2   : > { %v5976_v26 = vperm.slane %v5972_v62, %v11078_v35  ;;  %v4858_v27 = vshrl.u32 %v11798_v13, 16  ;;  %v11824_v16 = vsel %vm2869_vm7, 0, %v3257_v24  ;;  %v3260_v49 = vsel %vm2869_vm7, 0, %v3259_v55  ;;  %v2535_v18 = vpop.permute.xlu2 %2534 }
 0x1e3   : > { %v6000_v25 = vsel %vm2869_vm7, %v5999_v28, %v4835_v10  ;;  %v6007_v45 = vrot.slane %v5998_v4, 4  ;;  %v4855_v56 = vpack.i.b16 %v11798_v13, %v11513_v36  ;;  %v14856_v44 = vshrl.u32 %v11513_v36, 16  ;;  %v11841_v28 = vpop.f32.mrf.mxu0  ;;  %v11843_v13 = vpop.f32.mrf.mxu1  ;;  %1527 = vmatmul.bf16.gmra.mxu0 %v10864_v30  ;;  %1616 = vmatmul.bf16.gmra.mxu1 %v10866_v34 }
 0x1e4   : > { %v6004_v1 = vperm.slane %v6000_v25, %v11078_v35  ;;  %v5977_v59 = vrot.slane %v5976_v26, 4  ;;  %v5980_v6 = vsel %vm2869_vm7, %v5976_v26, %v5979_v42  ;;  %v4863_v17 = vpack.i.b16 %v11824_v16, %v11544_v32  ;;  %v11853_v26 = vpop.f32.mrf.mxu3  ;;  %1794 = vmatmul.bf16.gmra.mxu3 %v10866_v34 }
 0x1e5   : > { %v5988_v60 = vperm.slane %v5980_v6, %v11103_v57  ;;  %v11834_v19 = vpack.i.b16 %v4858_v27, %v14856_v44  ;;  %v4866_v62 = vshrl.u32 %v11824_v16, 16  ;;  %v4871_v42 = vpack.i.b16 %v11801_v43, %v11523_v33 }
 0x1e6   : > { %v6005_v38 = vrot.slane %v6004_v1, 4  ;;  %v5978_v20 = vsel %vm2869_vm7, %v5977_v59, %v5970_v23  ;;  %v6008_v11 = vsel %vm2869_vm7, %v6004_v1, %v6007_v45 }
 0x1e7   : > { %v5984_v39 = vperm.slane %v5978_v20, %v11103_v57  ;;  %v5991_v41 = vrot.slane %v5988_v60, 4  ;;  %v6016_v10 = vperm.slane %v6008_v11, %v11103_v57  ;;  %v7657_v23 = vshrl.u32 %v5988_v60, 16 }
 0x1e8   : > { %v6006_v7 = vsel %vm2869_vm7, %v6005_v38, %v5998_v4 }
 0x1e9   : > { %v6012_v36 = vperm.slane %v6006_v7, %v11103_v57  ;;  %v5989_v4 = vrot.slane %v5984_v39, 4  ;;  %v5992_v25 = vsel %vm2869_vm7, 0, %v5991_v41  ;;  %v6019_v24 = vrot.slane %v6016_v10, 4 }
 0x1ea   : > { %v7641_v1 = vshrl.u32 %v5984_v39, 16  ;;  %v7655_v6 = vpack.i.b16 %v6016_v10, %v5988_v60  ;;  %v7658_v38 = vshrl.u32 %v6016_v10, 16  ;;  %v7665_v20 = vshrl.u32 %v5992_v25, 16 }
 0x1eb   : > { %v6017_v55 = vrot.slane %v6012_v36, 4  ;;  %v7639_v27 = vpack.i.b16 %v6012_v36, %v5984_v39  ;;  %v7642_v59 = vshrl.u32 %v6012_v36, 16  ;;  %v5990_v45 = vsel %vm2869_vm7, 0, %v5989_v4 }
 0x1ec   : > { %v6020_v16 = vsel %vm2869_vm7, 0, %v6019_v24  ;;  %v7649_v7 = vshrl.u32 %v5990_v45, 16  ;;  %v7659_v60 = vpack.i.b16 %v7658_v38, %v7657_v23  ;;  %8635 = vst.msk [vmem:[%s11304_s16 + $0x214] sm:$0xf] %vm8501_vm8, %v7655_v6  ;;  %v4874_v10 = vshrl.u32 %v11801_v43, 16 }
 0x1ed   : > { %v6018_v11 = vsel %vm2869_vm7, 0, %v6017_v55  ;;  %v7643_v44 = vpack.i.b16 %v7642_v59, %v7641_v1  ;;  %v7663_v41 = vpack.i.b16 %v6020_v16, %v5992_v25  ;;  %8507 = vst.msk [vmem:[%s11304_s16 + $0x14] sm:$0xf] %vm8501_vm8, %v7639_v27  ;;  %v7666_v22 = vshrl.u32 %v6020_v16, 16 }
 0x1ee   : > { %v7647_v39 = vpack.i.b16 %v6018_v11, %v5990_v45  ;;  %v7650_v36 = vshrl.u32 %v6018_v11, 16  ;;  %v4879_v4 = vpack.i.b16 %v3260_v49, %v11595_v0  ;;  %v4882_v24 = vshrl.u32 %v3260_v49, 16  ;;  %8667 = vst.msk [vmem:[%s11304_s16 + $0x294] sm:$0xf] %vm8501_vm8, %v7659_v60 }
 0x1ef   : > { %8539 = vst.msk [vmem:[%s11304_s16 + $0x94] sm:$0xf] %vm8501_vm8, %v7643_v44  ;;  %v6021_v1 = vrot.slane %v4871_v42, 4  ;;  %v7667_v55 = vpack.i.b16 %v7666_v22, %v7665_v20  ;;  %v14857_v27 = vshrl.u32 %v11544_v32, 16  ;;  %v3384_v59 = vperm.slane %v2535_v18, %v11078_v35 }
 0x1f0   : > { %v7651_v25 = vpack.i.b16 %v7650_v36, %v7649_v7  ;;  %8571 = vst.msk [vmem:[%s11304_s16 + $0x114] sm:$0xf] %vm8501_vm8, %v7647_v39  ;;  %v14858_v6 = vshrl.u32 %v11523_v33, 16  ;;  %v14859_v45 = vshrl.u32 %v11595_v0, 16  ;;  %v6027_v16 = vrot.slane %v4879_v4, 4 }
 0x1f1   : > { %v4867_v23 = vpack.i.b16 %v4866_v62, %v14857_v27  ;;  %v6022_v42 = vsel %vm2869_vm7, %v6021_v1, %v4855_v56  ;;  %v3385_v32 = vrot.slane %v3384_v59, 4  ;;  %v14860_v62 = vrot.slane %v11795_v21, 4  ;;  %8699 = vst.msk [vmem:[%s11304_s16 + $0x314] sm:$0xf] %vm8501_vm8, %v7663_v41 }
 0x1f2   : > { %v4875_v43 = vpack.i.b16 %v4874_v10, %v14858_v6  ;;  %v4883_v49 = vpack.i.b16 %v4882_v24, %v14859_v45  ;;  %8603 = vst.msk [vmem:[%s11304_s16 + $0x194] sm:$0xf] %vm8501_vm8, %v7651_v25  ;;  %v6026_v22 = vperm.slane %v6022_v42, %v11078_v35  ;;  %v3266_v38 = vperm.slane %v11002_v54, %v11078_v35  ;;  %v2531_v54 = vpop.permute.xlu0 %2530 }
 0x1f3   : > { %v3388_v18 = vsel %vm2869_vm7, %v3384_v59, %v14860_v62  ;;  %v6028_v33 = vsel %vm2869_vm7, %v6027_v16, %v4863_v17  ;;  %8731 = vst.msk [vmem:[%s11304_s16 + $0x394] sm:$0xf] %vm8501_vm8, %v7667_v55  ;;  %v3359_v11 = vrot.slane %v11806_v12, 4  ;;  %v3386_v39 = vsel %vm2869_vm7, %v3385_v32, %v11795_v21 }
 0x1f4   : > { %v6049_v0 = vrot.slane %v4875_v43, 4  ;;  %v6055_v20 = vrot.slane %v4883_v49, 4  ;;  %v11893_v56 = vperm.slane %v3388_v18, %v11103_v57  ;;  %v6032_v44 = vperm.slane %v6028_v33, %v11078_v35 }
 0x1f5   : > { %v6035_v7 = vrot.slane %v6026_v22, 4  ;;  %v11905_v36 = vperm.slane %v3386_v39, %v11103_v57  ;;  %v3275_v55 = vrot.slane %v3266_v38, 4 }
 0x1f6   : > { %v6050_v41 = vsel %vm2869_vm7, %v6049_v0, %v11834_v19  ;;  %v6056_v17 = vsel %vm2869_vm7, %v6055_v20, %v4867_v23  ;;  %v3399_v60 = vrot.slane %v11893_v56, 4  ;;  %v6033_v10 = vrot.slane %v6032_v44, 4 }
 0x1f7   : > { %v6036_v4 = vsel %vm2869_vm7, %v6032_v44, %v6035_v7  ;;  %v6054_v24 = vperm.slane %v6050_v41, %v11078_v35  ;;  %v6060_v1 = vperm.slane %v6056_v17, %v11078_v35  ;;  %v3397_v25 = vrot.slane %v11905_v36, 4  ;;  %v1375_v7 = vpop.f32.mrf.mxu2 }
 0x1f8   : > { %v6044_v21 = vperm.slane %v6036_v4, %v11103_v57  ;;  %v3272_v19 = vperm.slane %v2531_v54, %v11078_v35  ;;  %v6034_v27 = vsel %vm2869_vm7, %v6033_v10, %v6026_v22  ;;  %v11916_v6 = vsel %vm2869_vm7, 0, %v3399_v60 }
 0x1f9   : > { %v6061_v23 = vrot.slane %v6060_v1, 4  ;;  %v6063_v59 = vrot.slane %v6054_v24, 4  ;;  %v6040_v43 = vperm.slane %v6034_v27, %v11103_v57  ;;  %v11920_v49 = vsel %vm2869_vm7, 0, %v3397_v25 }
 0x1fa   : > { %v6047_v45 = vrot.slane %v6044_v21, 4  ;;  %v7689_v62 = vshrl.u32 %v6044_v21, 16  ;;  %v3273_v39 = vrot.slane %v3272_v19, 4  ;;  %v3276_v54 = vsel %vm2869_vm7, %v3272_v19, %v3275_v55 }
 0x1fb   : > { %v6062_v16 = vsel %vm2869_vm7, %v6061_v23, %v6054_v24  ;;  %v6064_v32 = vsel %vm2869_vm7, %v6060_v1, %v6063_v59  ;;  %v6045_v18 = vrot.slane %v6040_v43, 4  ;;  %v7673_v44 = vshrl.u32 %v6040_v43, 16 }
 0x1fc   : > { %v6048_v33 = vsel %vm2869_vm7, 0, %v6047_v45  ;;  %v6068_v0 = vperm.slane %v6062_v16, %v11103_v57  ;;  %v6072_v20 = vperm.slane %v6064_v32, %v11103_v57  ;;  %v3274_v59 = vsel %vm2869_vm7, %v3273_v39, %v3266_v38 }
 0x1fd   : > { %v6046_v41 = vsel %vm2869_vm7, 0, %v6045_v18  ;;  %v7697_v25 = vshrl.u32 %v6048_v33, 16  ;;  %v11938_v55 = vperm.slane %v3276_v54, %v11103_v57  ;;  %v11943_v18 = vperm.slane %v3274_v59, %v11103_v57 }
 0x1fe   : > { %v6073_v17 = vrot.slane %v6068_v0, 4  ;;  %v6075_v60 = vrot.slane %v6072_v20, 4  ;;  %v7671_v10 = vpack.i.b16 %v6068_v0, %v6040_v43  ;;  %v7674_v4 = vshrl.u32 %v6068_v0, 16 }
 0x1ff   : > { %v7687_v24 = vpack.i.b16 %v6072_v20, %v6044_v21  ;;  %v7690_v1 = vshrl.u32 %v6072_v20, 16  ;;  %v7681_v43 = vshrl.u32 %v6046_v41, 16  ;;  %v3287_v0 = vrot.slane %v11938_v55, 4  ;;  %v2403_v20 = vpop.permute.xlu1 %2402 }
 0x200   : > { %v6074_v27 = vsel %vm2869_vm7, 0, %v6073_v17  ;;  %v6076_v23 = vsel %vm2869_vm7, 0, %v6075_v60  ;;  %8508 = vst.msk [vmem:[%s11304_s16 + $0x18] sm:$0xf] %vm8501_vm8, %v7671_v10  ;;  %v7675_v19 = vpack.i.b16 %v7674_v4, %v7673_v44  ;;  %v1195_v44 = vadd.f32 %v11841_v28, %v10880_v48  ;;  %v2665_v4 = vpop.permute.xlu2 %2664 }
 0x201   : > { %v7679_v45 = vpack.i.b16 %v6074_v27, %v6046_v41  ;;  %v7682_v16 = vshrl.u32 %v6074_v27, 16  ;;  %8636 = vst.msk [vmem:[%s11304_s16 + $0x218] sm:$0xf] %vm8501_vm8, %v7687_v24  ;;  %v7691_v21 = vpack.i.b16 %v7690_v1, %v7689_v62  ;;  %v7698_v32 = vshrl.u32 %v6076_v23, 16  ;;  %v2661_v24 = vpop.permute.xlu0 %2660  ;;  %v10225_v1 = vld [vmem:[#allocation5 + $0x104] sm:$0xf] }
 0x202   : > { %v7695_v39 = vpack.i.b16 %v6076_v23, %v6048_v33  ;;  %8540 = vst.msk [vmem:[%s11304_s16 + $0x98] sm:$0xf] %vm8501_vm8, %v7675_v19  ;;  %v1373_v54 = vadd.f32 %v11851_v50, %v10886_v51  ;;  %v3285_v17 = vrot.slane %v11943_v18, 4  ;;  %v4905_v60 = vshrl.u32 %v11938_v55, 16 }
 0x203   : > { %v7683_v38 = vpack.i.b16 %v7682_v16, %v7681_v43  ;;  %v7699_v41 = vpack.i.b16 %v7698_v32, %v7697_v25  ;;  %8572 = vst.msk [vmem:[%s11304_s16 + $0x118] sm:$0xf] %vm8501_vm8, %v7679_v45  ;;  %v11960_v33 = vsel %vm2869_vm7, 0, %v3287_v0  ;;  %v1284_v28 = vadd.f32 %v11843_v13, %v1195_v44 }
 0x204   : > { %v1462_v10 = vadd.f32 %v11853_v26, %v1373_v54  ;;  %v3294_v50 = vperm.slane %v2403_v20, %v11078_v35  ;;  %v11967_v25 = vperm.slane %v11788_v40, %v11078_v35  ;;  %8668 = vst.msk [vmem:[%s11304_s16 + $0x298] sm:$0xf] %vm8501_vm8, %v7691_v21  ;;  %v4889_v27 = vshrl.u32 %v11943_v18, 16  ;;  %v9782_v26 = vld [vmem:[#allocation5 + $0x118] sm:$0xf0]  ;;  %v1197_v20 = vpop.f32.mrf.mxu0 }
 0x205   : > { %8604 = vst.msk [vmem:[%s11304_s16 + $0x198] sm:$0xf] %vm8501_vm8, %v7683_v38  ;;  %v11973_v23 = vsel %vm2869_vm7, 0, %v3285_v17  ;;  %v3356_v13 = vperm.slane %v2661_v24, %v11078_v35  ;;  %v14861_v19 = vrot.slane %v11626_v61, 4  ;;  %v11984_v43 = vperm.slane %v2665_v4, %v11078_v35  ;;  %v10273_v24 = vld [vmem:[#allocation5 + $0x284] sm:$0xf] }
 0x206   : > { %8700 = vst.msk [vmem:[%s11304_s16 + $0x318] sm:$0xf] %vm8501_vm8, %v7695_v39  ;;  %v11978_v59 = vpack.c.bf16 %v1462_v10, %v1284_v28  ;;  %v3303_v40 = vrot.slane %v3294_v50, 4  ;;  %v4913_v16 = vshrl.u32 %v11960_v33, 16  ;;  %v1198_v44 = vadd.f32 %v1197_v20, %v10880_v48 }
 0x207   : > { %v3302_v45 = vsel %vm2869_vm7, %v14861_v19, %v3294_v50  ;;  %8732 = vst.msk [vmem:[%s11304_s16 + $0x398] sm:$0xf] %vm8501_vm8, %v7699_v41  ;;  %v3357_v32 = vrot.slane %v3356_v13, 4  ;;  %v3360_v0 = vsel %vm2869_vm7, %v3356_v13, %v3359_v11  ;;  %v9785_v54 = vor.u32 %v10225_v1, %v9782_v26  ;;  %v9974_v1 = vld [vmem:[#allocation5 + $0x298] sm:$0xf0]  ;;  %v2533_v22 = vpop.permute.xlu1 %2532 }
 0x208   : > { %v3308_v21 = vperm.slane %v3302_v45, %v11103_v57  ;;  %v3304_v38 = vsel %vm2869_vm7, %v11626_v61, %v3303_v40  ;;  %v11996_v39 = vperm.slane %v3360_v0, %v11103_v57  ;;  %2690 = vrot.lane.b32.xlu0 %v11978_v59, %s10573_s24  ;;  %v4897_v28 = vshrl.u32 %v11973_v23, 16  ;;  %2562 = vrot.lane.b32.xlu1 %v11978_v59, %s10574_s9  ;;  %v1286_v40 = vpop.f32.mrf.mxu1 }
 0x209   : > { %v3312_v41 = vperm.slane %v3304_v38, %v11103_v57  ;;  %v3331_v11 = vrot.slane %v11160_v5, 4  ;;  %2434 = vrot.lane.b32.xlu2 %v11978_v59, %s10575_s11  ;;  %v3358_v4 = vsel %vm2869_vm7, %v3357_v32, %v11806_v12  ;;  %2020 = vmatpush.bf16.msra.mxu2 %v9785_v54  ;;  %v1287_v20 = vadd.f32 %v1286_v40, %v1198_v44 }
 0x20a   : > { %v3313_v17 = vrot.slane %v3308_v21, 4  ;;  %v4887_v61 = vpack.i.b16 %v3308_v21, %v11943_v18  ;;  %v4890_v10 = vshrl.u32 %v3308_v21, 16  ;;  %v3371_v45 = vrot.slane %v11996_v39, 4 }
 0x20b   : > { %v3315_v26 = vrot.slane %v3312_v41, 4  ;;  %v4903_v19 = vpack.i.b16 %v3312_v41, %v11938_v55  ;;  %v4906_v0 = vshrl.u32 %v3312_v41, 16  ;;  %v12016_v18 = vperm.slane %v3358_v4, %v11103_v57 }
 0x20c   : > { %v3314_v13 = vsel %vm2869_vm7, 0, %v3313_v17  ;;  %v9977_v54 = vor.u32 %v10273_v24, %v9974_v1  ;;  %v4891_v50 = vpack.i.b16 %v4890_v10, %v4889_v27  ;;  %v12025_v44 = vsel %vm2869_vm7, 0, %v3371_v45 }
 0x20d   : > { %v3316_v12 = vsel %vm2869_vm7, 0, %v3315_v26  ;;  %v4898_v32 = vshrl.u32 %v3314_v13, 16  ;;  %v6077_v38 = vrot.slane %v4903_v19, 4  ;;  %v4907_v17 = vpack.i.b16 %v4906_v0, %v4905_v60  ;;  %v1464_v19 = vpop.f32.mrf.mxu3 }
 0x20e   : > { %v4911_v62 = vpack.i.b16 %v3316_v12, %v11960_v33  ;;  %v4914_v55 = vshrl.u32 %v3316_v12, 16  ;;  %v4895_v41 = vpack.i.b16 %v3314_v13, %v11973_v23  ;;  %v3369_v42 = vrot.slane %v12016_v18, 4  ;;  %2109 = vmatpush.bf16.msra.mxu3 %v9977_v54 }
 0x20f   : > { %v6078_v4 = vsel %vm2869_vm7, %v6077_v38, %v4887_v61  ;;  %v6105_v60 = vrot.slane %v4907_v17, 4  ;;  %v4899_v10 = vpack.i.b16 %v4898_v32, %v4897_v28  ;;  %v1376_v1 = vadd.f32 %v1375_v7, %v10886_v51 }
 0x210   : > { %v4915_v26 = vpack.i.b16 %v4914_v55, %v4913_v16  ;;  %v6082_v24 = vperm.slane %v6078_v4, %v11078_v35  ;;  %v6083_v27 = vrot.slane %v4911_v62, 4  ;;  %v3328_v23 = vperm.slane %v2533_v22, %v11078_v35 }
 0x211   : > { %v6106_v45 = vsel %vm2869_vm7, %v6105_v60, %v4891_v50  ;;  %v1465_v28 = vadd.f32 %v1464_v19, %v1376_v1  ;;  %v12038_v7 = vsel %vm2869_vm7, 0, %v3369_v42 }
 0x212   : > { %v6084_v61 = vsel %vm2869_vm7, %v6083_v27, %v4895_v41  ;;  %v6091_v13 = vrot.slane %v6082_v24, 4  ;;  %v6111_v40 = vrot.slane %v4915_v26, 4  ;;  %v6110_v0 = vperm.slane %v6106_v45, %v11078_v35 }
 0x213   : > { %v6088_v16 = vperm.slane %v6084_v61, %v11078_v35  ;;  %v3329_v32 = vrot.slane %v3328_v23, 4  ;;  %v3332_v22 = vsel %vm2869_vm7, %v3328_v23, %v3331_v11  ;;  %v12044_v41 = vpack.c.bf16 %v1465_v28, %v1287_v20  ;;  %v1199_v28 = vpop.f32.mrf.mxu0 }
 0x214   : > { %v6112_v12 = vsel %vm2869_vm7, %v6111_v40, %v4899_v10  ;;  %v6119_v17 = vrot.slane %v6110_v0, 4  ;;  %v12049_v26 = vperm.slane %v3332_v22, %v11103_v57 }
 0x215   : > { %v6089_v38 = vrot.slane %v6088_v16, 4  ;;  %v6092_v54 = vsel %vm2869_vm7, %v6088_v16, %v6091_v13  ;;  %v6116_v50 = vperm.slane %v6112_v12, %v11078_v35  ;;  %v3330_v4 = vsel %vm2869_vm7, %v3329_v32, %v11160_v5  ;;  %2436 = vrot.lane.b32.xlu0 %v12044_v41, %s10575_s11  ;;  %2692 = vrot.lane.b32.xlu1 %v12044_v41, %s10573_s24  ;;  %v12070_v12 = vpop.f32.mrf.mxu1  ;;  %v14862_v32 = vld [vmem:[#allocation24_spill] sm:$0xff] }
 0x216   : > { %v6100_v55 = vperm.slane %v6092_v54, %v11103_v57  ;;  %v12054_v60 = vperm.slane %v3330_v4, %v11103_v57  ;;  %v3343_v61 = vrot.slane %v12049_v26, 4  ;;  %2564 = vrot.lane.b32.xlu2 %v12044_v41, %s10574_s9  ;;  %1532 = vmatmul.bf16.gmra.mxu0 %v14862_v32  ;;  %v12076_v4 = vpop.f32.mrf.mxu3 }
 0x217   : > { %v6090_v42 = vsel %vm2869_vm7, %v6089_v38, %v6082_v24  ;;  %v6117_v27 = vrot.slane %v6116_v50, 4  ;;  %v6120_v11 = vsel %vm2869_vm7, %v6116_v50, %v6119_v17  ;;  %v12074_v17 = vpop.f32.mrf.mxu2  ;;  %1710 = vmatmul.bf16.gmra.mxu2 %v14862_v32 }
 0x218   : > { %v6096_v10 = vperm.slane %v6090_v42, %v11103_v57  ;;  %v6103_v1 = vrot.slane %v6100_v55, 4  ;;  %v6128_v20 = vperm.slane %v6120_v11, %v11103_v57  ;;  %v7721_v19 = vshrl.u32 %v6100_v55, 16 }
 0x219   : > { %v6118_v24 = vsel %vm2869_vm7, %v6117_v27, %v6110_v0  ;;  %v3341_v23 = vrot.slane %v12054_v60, 4  ;;  %v14863_v0 = vld [vmem:[#allocation25_spill] sm:$0xff]  ;;  %v3344_v33 = vsel %vm2869_vm7, 0, %v3343_v61  ;;  %v9780_v61 = vld [vmem:[#allocation5 + $0x100] sm:$0xf] }
 0x21a   : > { %v6101_v13 = vrot.slane %v6096_v10, 4  ;;  %v6104_v45 = vsel %vm2869_vm7, 0, %v6103_v1  ;;  %v6124_v40 = vperm.slane %v6118_v24, %v11103_v57  ;;  %v6131_v16 = vrot.slane %v6128_v20, 4  ;;  %1621 = vmatmul.bf16.gmra.mxu1 %v14863_v0  ;;  %1799 = vmatmul.bf16.gmra.mxu3 %v14863_v0 }
 0x21b   : > { %v7705_v22 = vshrl.u32 %v6096_v10, 16  ;;  %v7719_v38 = vpack.i.b16 %v6128_v20, %v6100_v55  ;;  %v7722_v54 = vshrl.u32 %v6128_v20, 16  ;;  %v7729_v50 = vshrl.u32 %v6104_v45, 16 }
 0x21c   : > { %v6102_v42 = vsel %vm2869_vm7, 0, %v6101_v13  ;;  %v6129_v27 = vrot.slane %v6124_v40, 4  ;;  %v6132_v11 = vsel %vm2869_vm7, 0, %v6131_v16  ;;  %v7703_v1 = vpack.i.b16 %v6124_v40, %v6096_v10 }
 0x21d   : > { %v7706_v24 = vshrl.u32 %v6124_v40, 16  ;;  %v7713_v55 = vshrl.u32 %v6102_v42, 16  ;;  %v7723_v20 = vpack.i.b16 %v7722_v54, %v7721_v19  ;;  %v7727_v5 = vpack.i.b16 %v6132_v11, %v6104_v45  ;;  %8637 = vst.msk [vmem:[%s11304_s16 + $0x21c] sm:$0xf] %vm8501_vm8, %v7719_v38  ;;  %v2407_v54 = vpop.permute.xlu0 %2406 }
 0x21e   : > { %v6130_v62 = vsel %vm2869_vm7, 0, %v6129_v27  ;;  %v7730_v21 = vshrl.u32 %v6132_v11, 16  ;;  %8509 = vst.msk [vmem:[%s11304_s16 + $0x1c] sm:$0xf] %vm8501_vm8, %v7703_v1  ;;  %v3342_v13 = vsel %vm2869_vm7, 0, %v3341_v23  ;;  %v4919_v19 = vpack.i.b16 %v12016_v18, %v12054_v60  ;;  %v14865_v1 = vld [vmem:[#allocation42_spill] sm:$0xff] }
 0x21f   : > { %v7707_v0 = vpack.i.b16 %v7706_v24, %v7705_v22  ;;  %v7711_v16 = vpack.i.b16 %v6130_v62, %v6102_v42  ;;  %v7714_v10 = vshrl.u32 %v6130_v62, 16  ;;  %8669 = vst.msk [vmem:[%s11304_s16 + $0x29c] sm:$0xf] %vm8501_vm8, %v7723_v20  ;;  %v4921_v40 = vshrl.u32 %v12054_v60, 16  ;;  %v2663_v24 = vpop.permute.xlu1 %2662 }
 0x220   : > { %v7731_v45 = vpack.i.b16 %v7730_v21, %v7729_v50  ;;  %8701 = vst.msk [vmem:[%s11304_s16 + $0x31c] sm:$0xf] %vm8501_vm8, %v7727_v5  ;;  %v4927_v38 = vpack.i.b16 %v12038_v7, %v3342_v13  ;;  %v4929_v23 = vshrl.u32 %v3342_v13, 16  ;;  %v4935_v62 = vpack.i.b16 %v11996_v39, %v12049_v26  ;;  %v10228_v5 = vld [vmem:[#allocation5 + $0x114] sm:$0xf0] }
 0x221   : > { %v7715_v22 = vpack.i.b16 %v7714_v10, %v7713_v55  ;;  %8541 = vst.msk [vmem:[%s11304_s16 + $0x9c] sm:$0xf] %vm8501_vm8, %v7707_v0  ;;  %v4937_v42 = vshrl.u32 %v12049_v26, 16  ;;  %v4943_v21 = vpack.i.b16 %v12025_v44, %v3344_v33  ;;  %v4930_v60 = vshrl.u32 %v12038_v7, 16 }
 0x222   : > { %8573 = vst.msk [vmem:[%s11304_s16 + $0x11c] sm:$0xf] %vm8501_vm8, %v7711_v16  ;;  %v14864_v50 = vshrl.u32 %v12016_v18, 16  ;;  %v4945_v11 = vshrl.u32 %v3344_v33, 16  ;;  %v14866_v0 = vshrl.u32 %v11996_v39, 16  ;;  %v6133_v20 = vrot.slane %v4935_v62, 4 }
 0x223   : > { %8605 = vst.msk [vmem:[%s11304_s16 + $0x19c] sm:$0xf] %vm8501_vm8, %v7715_v22  ;;  %v6139_v26 = vrot.slane %v4943_v21, 4  ;;  %v3406_v13 = vperm.slane %v2407_v54, %v11078_v35  ;;  %v4931_v16 = vpack.i.b16 %v4930_v60, %v4929_v23  ;;  %v14867_v7 = vshrl.u32 %v12025_v44, 16 }
 0x224   : > { %v4923_v27 = vpack.i.b16 %v14864_v50, %v4921_v40  ;;  %v4939_v55 = vpack.i.b16 %v14866_v0, %v4937_v42  ;;  %8733 = vst.msk [vmem:[%s11304_s16 + $0x39c] sm:$0xf] %vm8501_vm8, %v7731_v45  ;;  %v1200_v18 = vadd.f32 %v1199_v28, %v10880_v48  ;;  %v9781_v33 = vor.u32 %v10228_v5, %v9780_v61  ;;  %v9972_v40 = vld [vmem:[#allocation5 + $0x280] sm:$0xf]  ;;  %v10276_v50 = vld [vmem:[#allocation5 + $0x294] sm:$0xf0] }
 0x225   : > { %v4947_v10 = vpack.i.b16 %v14867_v7, %v4945_v11  ;;  %v6134_v22 = vsel %vm2869_vm7, %v6133_v20, %v4919_v19  ;;  %v6140_v39 = vsel %vm2869_vm7, %v6139_v26, %v4927_v38  ;;  %v3415_v42 = vrot.slane %v3406_v13, 4 }
 0x226   : > { %v6161_v62 = vrot.slane %v4939_v55, 4  ;;  %v6138_v54 = vperm.slane %v6134_v22, %v11078_v35  ;;  %v6144_v45 = vperm.slane %v6140_v39, %v11078_v35  ;;  %v1289_v44 = vadd.f32 %v12070_v12, %v1200_v18  ;;  %1842 = vmatpush.bf16.msra.mxu0 %v9781_v33 }
 0x227   : > { %v6167_v23 = vrot.slane %v4947_v10, 4  ;;  %v9973_v61 = vor.u32 %v10276_v50, %v9972_v40  ;;  %v1378_v21 = vadd.f32 %v12074_v17, %v10886_v51  ;;  %v3412_v19 = vperm.slane %v2663_v24, %v11078_v35  ;;  %v2411_v24 = vpop.permute.xlu2 %2410 }
 0x228   : > { %v6162_v28 = vsel %vm2869_vm7, %v6161_v62, %v4923_v27  ;;  %v6145_v5 = vrot.slane %v6144_v45, 4  ;;  %v6147_v38 = vrot.slane %v6138_v54, 4 }
 0x229   : > { %v6166_v60 = vperm.slane %v6162_v28, %v11078_v35  ;;  %v6168_v11 = vsel %vm2869_vm7, %v6167_v23, %v4931_v16  ;;  %1931 = vmatpush.bf16.msra.mxu1 %v9973_v61  ;;  %v1467_v12 = vadd.f32 %v12076_v4, %v1378_v21  ;;  %v3413_v55 = vrot.slane %v3412_v19, 4 }
 0x22a   : > { %v6172_v0 = vperm.slane %v6168_v11, %v11078_v35  ;;  %v3416_v27 = vsel %vm2869_vm7, %v3412_v19, %v3415_v42  ;;  %v6146_v20 = vsel %vm2869_vm7, %v6145_v5, %v6138_v54  ;;  %v6148_v17 = vsel %vm2869_vm7, %v6144_v45, %v6147_v38 }
 0x22b   : > { %v6175_v26 = vrot.slane %v6166_v60, 4  ;;  %v3424_v7 = vperm.slane %v3416_v27, %v11103_v57  ;;  %v6152_v10 = vperm.slane %v6146_v20, %v11103_v57  ;;  %v6156_v16 = vperm.slane %v6148_v17, %v11103_v57 }
 0x22c   : > { %v6173_v18 = vrot.slane %v6172_v0, 4  ;;  %v12138_v33 = vpack.c.bf16 %v1467_v12, %v1289_v44  ;;  %v12142_v4 = vperm.slane %v12044_v41, %v11078_v35  ;;  %v3414_v50 = vsel %vm2869_vm7, %v3413_v55, %v3406_v13 }
 0x22d   : > { %v6176_v40 = vsel %vm2869_vm7, %v6172_v0, %v6175_v26  ;;  %v3427_v22 = vrot.slane %v3424_v7, 4  ;;  %v6157_v39 = vrot.slane %v6152_v10, 4  ;;  %v6159_v62 = vrot.slane %v6156_v16, 4 }
 0x22e   : > { %v6174_v42 = vsel %vm2869_vm7, %v6173_v18, %v6166_v60  ;;  %v6184_v54 = vperm.slane %v6176_v40, %v11103_v57  ;;  %2566 = vrot.lane.b32.xlu0 %v12138_v33, %s10574_s9  ;;  %2438 = vrot.lane.b32.xlu1 %v12138_v33, %s10575_s11  ;;  %v7737_v45 = vshrl.u32 %v6152_v10, 16  ;;  %v3420_v23 = vperm.slane %v3414_v50, %v11103_v57 }
 0x22f   : > { %v6180_v41 = vperm.slane %v6174_v42, %v11103_v57  ;;  %v4967_v13 = vpack.i.b16 %v3424_v7, %v11893_v56  ;;  %2694 = vrot.lane.b32.xlu2 %v12138_v33, %s10573_s24  ;;  %v6158_v44 = vsel %vm2869_vm7, 0, %v6157_v39  ;;  %v6160_v28 = vsel %vm2869_vm7, 0, %v6159_v62 }
 0x230   : > { %v6187_v61 = vrot.slane %v6184_v54, 4  ;;  %v7751_v21 = vpack.i.b16 %v6184_v54, %v6156_v16  ;;  %v7753_v60 = vshrl.u32 %v6156_v16, 16  ;;  %v7745_v0 = vshrl.u32 %v6158_v44, 16 }
 0x231   : > { %v6185_v19 = vrot.slane %v6180_v41, 4  ;;  %v7735_v5 = vpack.i.b16 %v6180_v41, %v6152_v10  ;;  %v7738_v38 = vshrl.u32 %v6180_v41, 16  ;;  %v7754_v12 = vshrl.u32 %v6184_v54, 16  ;;  %v2541_v54 = vpop.permute.xlu2 %2540 }
 0x232   : > { %v6188_v11 = vsel %vm2869_vm7, 0, %v6187_v61  ;;  %8638 = vst.msk [vmem:[%s11304_s16 + $0x220] sm:$0xf] %vm8501_vm8, %v7751_v21  ;;  %v3425_v55 = vrot.slane %v3420_v23, 4  ;;  %v7761_v17 = vshrl.u32 %v6160_v28, 16  ;;  %v3428_v39 = vsel %vm2869_vm7, 0, %v3427_v22 }
 0x233   : > { %v6186_v27 = vsel %vm2869_vm7, 0, %v6185_v19  ;;  %v7739_v20 = vpack.i.b16 %v7738_v38, %v7737_v45  ;;  %v7762_v26 = vshrl.u32 %v6188_v11, 16  ;;  %8510 = vst.msk [vmem:[%s11304_s16 + $0x20] sm:$0xf] %vm8501_vm8, %v7735_v5  ;;  %v7755_v16 = vpack.i.b16 %v7754_v12, %v7753_v60 }
 0x234   : > { %v7743_v10 = vpack.i.b16 %v6186_v27, %v6158_v44  ;;  %v7746_v18 = vshrl.u32 %v6186_v27, 16  ;;  %v3426_v40 = vsel %vm2869_vm7, 0, %v3425_v55  ;;  %v7759_v50 = vpack.i.b16 %v6188_v11, %v6160_v28 }
 0x235   : > { %8542 = vst.msk [vmem:[%s11304_s16 + $0xa0] sm:$0xf] %vm8501_vm8, %v7739_v20  ;;  %v4951_v62 = vpack.i.b16 %v3420_v23, %v11905_v36  ;;  %v4954_v42 = vshrl.u32 %v3420_v23, 16  ;;  %v7763_v45 = vpack.i.b16 %v7762_v26, %v7761_v17  ;;  %v4962_v44 = vshrl.u32 %v3426_v40, 16 }
 0x236   : > { %v7747_v41 = vpack.i.b16 %v7746_v18, %v7745_v0  ;;  %8574 = vst.msk [vmem:[%s11304_s16 + $0x120] sm:$0xf] %vm8501_vm8, %v7743_v10  ;;  %v4970_v61 = vshrl.u32 %v3424_v7, 16  ;;  %v4959_v28 = vpack.i.b16 %v3426_v40, %v11920_v49  ;;  %v4975_v21 = vpack.i.b16 %v3428_v39, %v11916_v6  ;;  %v2537_v0 = vpop.permute.xlu0 %2536 }
 0x237   : > { %8670 = vst.msk [vmem:[%s11304_s16 + $0x2a0] sm:$0xf] %vm8501_vm8, %v7755_v16  ;;  %v4978_v19 = vshrl.u32 %v3428_v39, 16  ;;  %v6189_v22 = vrot.slane %v4967_v13, 4  ;;  %v12179_v23 = vperm.slane %v2411_v24, %v11078_v35  ;;  %v14868_v5 = vshrl.u32 %v11905_v36, 16 }
 0x238   : > { %8606 = vst.msk [vmem:[%s11304_s16 + $0x1a0] sm:$0xf] %vm8501_vm8, %v7747_v41  ;;  %v14869_v60 = vshrl.u32 %v11893_v56, 16  ;;  %v3552_v11 = vperm.slane %v2541_v54, %v11078_v35  ;;  %v14870_v12 = vshrl.u32 %v11920_v49, 16  ;;  %v14871_v13 = vshrl.u32 %v11916_v6, 16 }
 0x239   : > { %v4955_v38 = vpack.i.b16 %v4954_v42, %v14868_v5  ;;  %8702 = vst.msk [vmem:[%s11304_s16 + $0x320] sm:$0xf] %vm8501_vm8, %v7759_v50  ;;  %v6190_v24 = vsel %vm2869_vm7, %v6189_v22, %v4951_v62  ;;  %v6195_v20 = vrot.slane %v4975_v21, 4  ;;  %v14872_v26 = vrot.slane %v11172_v63, 4 }
 0x23a   : > { %v4971_v7 = vpack.i.b16 %v4970_v61, %v14869_v60  ;;  %v4963_v55 = vpack.i.b16 %v4962_v44, %v14870_v12  ;;  %v4979_v27 = vpack.i.b16 %v4978_v19, %v14871_v13  ;;  %8734 = vst.msk [vmem:[%s11304_s16 + $0x3a0] sm:$0xf] %vm8501_vm8, %v7763_v45  ;;  %v6194_v36 = vperm.slane %v6190_v24, %v11078_v35  ;;  %v1202_v19 = vpop.f32.mrf.mxu0  ;;  %v1291_v24 = vpop.f32.mrf.mxu1 }
 0x23b   : > { %v3553_v17 = vrot.slane %v3552_v11, 4  ;;  %v3556_v10 = vsel %vm2869_vm7, %v3552_v11, %v14872_v26  ;;  %v6196_v18 = vsel %vm2869_vm7, %v6195_v20, %v4959_v28  ;;  %v3440_v6 = vperm.slane %v2537_v0, %v11078_v35  ;;  %v1380_v26 = vpop.f32.mrf.mxu2 }
 0x23c   : > { %v6217_v56 = vrot.slane %v4971_v7, 4  ;;  %v6223_v49 = vrot.slane %v4979_v27, 4  ;;  %v12201_v16 = vperm.slane %v3556_v10, %v11103_v57  ;;  %v6200_v40 = vperm.slane %v6196_v18, %v11078_v35  ;;  %v1469_v10 = vpop.f32.mrf.mxu3 }
 0x23d   : > { %v6203_v50 = vrot.slane %v6194_v36, 4  ;;  %v3554_v62 = vsel %vm2869_vm7, %v3553_v17, %v11172_v63  ;;  %v3527_v44 = vrot.slane %v12179_v23, 4  ;;  %v3441_v5 = vrot.slane %v3440_v6, 4 }
 0x23e   : > { %v6218_v39 = vsel %vm2869_vm7, %v6217_v56, %v4955_v38  ;;  %v6224_v54 = vsel %vm2869_vm7, %v6223_v49, %v4963_v55  ;;  %v12211_v41 = vperm.slane %v3554_v62, %v11103_v57  ;;  %v3567_v45 = vrot.slane %v12201_v16, 4 }
 0x23f   : > { %v6222_v42 = vperm.slane %v6218_v39, %v11078_v35  ;;  %v6201_v61 = vrot.slane %v6200_v40, 4  ;;  %v6204_v28 = vsel %vm2869_vm7, %v6200_v40, %v6203_v50  ;;  %v6228_v21 = vperm.slane %v6224_v54, %v11078_v35 }
 0x240   : > { %v6212_v22 = vperm.slane %v6204_v28, %v11103_v57  ;;  %v1203_v38 = vadd.f32 %v1202_v19, %v10880_v48  ;;  %v3565_v11 = vrot.slane %v12211_v41, 4  ;;  %v12225_v27 = vsel %vm2869_vm7, 0, %v3567_v45 }
 0x241   : > { %v6231_v63 = vrot.slane %v6222_v42, 4  ;;  %v6202_v60 = vsel %vm2869_vm7, %v6201_v61, %v6194_v36  ;;  %v6229_v7 = vrot.slane %v6228_v21, 4  ;;  %v3442_v50 = vsel %vm2869_vm7, %v3441_v5, %v14865_v1 }
 0x242   : > { %v6208_v12 = vperm.slane %v6202_v60, %v11103_v57  ;;  %v6215_v55 = vrot.slane %v6212_v22, 4  ;;  %v7785_v17 = vshrl.u32 %v6212_v22, 16 }
 0x243   : > { %v6232_v13 = vsel %vm2869_vm7, %v6228_v21, %v6231_v63  ;;  %v6230_v20 = vsel %vm2869_vm7, %v6229_v7, %v6222_v42 }
 0x244   : > { %v6240_v56 = vperm.slane %v6232_v13, %v11103_v57  ;;  %v6213_v18 = vrot.slane %v6208_v12, 4  ;;  %v6216_v49 = vsel %vm2869_vm7, 0, %v6215_v55  ;;  %v6236_v40 = vperm.slane %v6230_v20, %v11103_v57  ;;  %v2409_v20 = vpop.permute.xlu1 %2408 }
 0x245   : > { %v7769_v62 = vshrl.u32 %v6208_v12, 16  ;;  %v7793_v7 = vshrl.u32 %v6216_v49, 16 }
 0x246   : > { %v6243_v39 = vrot.slane %v6240_v56, 4  ;;  %v7783_v42 = vpack.i.b16 %v6240_v56, %v6212_v22  ;;  %v7786_v54 = vshrl.u32 %v6240_v56, 16  ;;  %v6214_v45 = vsel %vm2869_vm7, 0, %v6213_v18 }
 0x247   : > { %v6241_v61 = vrot.slane %v6236_v40, 4  ;;  %v7767_v28 = vpack.i.b16 %v6236_v40, %v6208_v12  ;;  %v7770_v21 = vshrl.u32 %v6236_v40, 16  ;;  %v7777_v63 = vshrl.u32 %v6214_v45, 16 }
 0x248   : > { %v6244_v19 = vsel %vm2869_vm7, 0, %v6243_v39  ;;  %v7787_v60 = vpack.i.b16 %v7786_v54, %v7785_v17  ;;  %8639 = vst.msk [vmem:[%s11304_s16 + $0x224] sm:$0xf] %vm8501_vm8, %v7783_v42  ;;  %v14873_v18 = vrot.slane %v14865_v1, 4  ;;  %v12247_v40 = vperm.slane %v3442_v50, %v11103_v57  ;;  %v2671_v50 = vpop.permute.xlu2 %2670 }
 0x249   : > { %v6242_v5 = vsel %vm2869_vm7, 0, %v6241_v61  ;;  %v7771_v55 = vpack.i.b16 %v7770_v21, %v7769_v62  ;;  %v7791_v22 = vpack.i.b16 %v6244_v19, %v6216_v49  ;;  %v7794_v13 = vshrl.u32 %v6244_v19, 16  ;;  %8511 = vst.msk [vmem:[%s11304_s16 + $0x24] sm:$0xf] %vm8501_vm8, %v7767_v28  ;;  %v2667_v61 = vpop.permute.xlu0 %2666  ;;  %v1204_v21 = vpop.f32.mrf.mxu0 }
 0x24a   : > { %v7775_v56 = vpack.i.b16 %v6242_v5, %v6214_v45  ;;  %v7778_v12 = vshrl.u32 %v6242_v5, 16  ;;  %8671 = vst.msk [vmem:[%s11304_s16 + $0x2a4] sm:$0xf] %vm8501_vm8, %v7787_v60  ;;  %v3444_v17 = vsel %vm2869_vm7, %v3440_v6, %v14873_v18  ;;  %v1292_v62 = vadd.f32 %v1291_v24, %v1203_v38  ;;  %v12266_v19 = vpop.f32.mrf.mxu1 }
 0x24b   : > { %v7795_v39 = vpack.i.b16 %v7794_v13, %v7793_v7  ;;  %8543 = vst.msk [vmem:[%s11304_s16 + $0xa4] sm:$0xf] %vm8501_vm8, %v7771_v55  ;;  %v3452_v49 = vperm.slane %v3444_v17, %v11103_v57  ;;  %v1381_v42 = vadd.f32 %v1380_v26, %v10886_v51  ;;  %v12256_v45 = vsel %vm2869_vm7, 0, %v3565_v11  ;;  %v14874_v11 = vld [vmem:[#allocation26_spill] sm:$0xff]  ;;  %v12277_v13 = vpop.f32.mrf.mxu3 }
 0x24c   : > { %v7779_v54 = vpack.i.b16 %v7778_v12, %v7777_v63  ;;  %8575 = vst.msk [vmem:[%s11304_s16 + $0x124] sm:$0xf] %vm8501_vm8, %v7775_v56  ;;  %v3453_v1 = vrot.slane %v12247_v40, 4  ;;  %v3462_v6 = vperm.slane %v2409_v20, %v11078_v35  ;;  %v12264_v26 = vperm.slane %v2671_v50, %v11078_v35  ;;  %1537 = vmatmul.bf16.gmra.mxu0 %v14874_v11  ;;  %v14875_v63 = vld [vmem:[#allocation27_spill] sm:$0xff] }
 0x24d   : > { %8703 = vst.msk [vmem:[%s11304_s16 + $0x324] sm:$0xf] %vm8501_vm8, %v7791_v22  ;;  %v3455_v38 = vrot.slane %v3452_v49, 4  ;;  %v1470_v24 = vadd.f32 %v1469_v10, %v1381_v42  ;;  %1626 = vmatmul.bf16.gmra.mxu1 %v14875_v63  ;;  %v14876_v7 = vrot.slane %v11984_v43, 4  ;;  %v3524_v10 = vperm.slane %v2667_v61, %v11078_v35  ;;  %v1382_v22 = vpop.f32.mrf.mxu2  ;;  %1715 = vmatmul.bf16.gmra.mxu2 %v14874_v11 }
 0x24e   : > { %8607 = vst.msk [vmem:[%s11304_s16 + $0x1a4] sm:$0xf] %vm8501_vm8, %v7779_v54  ;;  %v3454_v60 = vsel %vm2869_vm7, 0, %v3453_v1  ;;  %v3471_v55 = vrot.slane %v3462_v6, 4  ;;  %1804 = vmatmul.bf16.gmra.mxu3 %v14875_v63  ;;  %v4985_v17 = vshrl.u32 %v12247_v40, 16  ;;  %v5001_v42 = vshrl.u32 %v3452_v49, 16 }
 0x24f   : > { %v3470_v5 = vsel %vm2869_vm7, %v14876_v7, %v3462_v6  ;;  %8735 = vst.msk [vmem:[%s11304_s16 + $0x3a4] sm:$0xf] %vm8501_vm8, %v7795_v39  ;;  %v3456_v56 = vsel %vm2869_vm7, 0, %v3455_v38  ;;  %v2222_v12 = vpack.c.bf16 %v1470_v24, %v1292_v62  ;;  %v3525_v1 = vrot.slane %v3524_v10, 4 }
 0x250   : > { %v3476_v18 = vperm.slane %v3470_v5, %v11103_v57  ;;  %v3472_v54 = vsel %vm2869_vm7, %v11984_v43, %v3471_v55  ;;  %v5009_v6 = vshrl.u32 %v3456_v56, 16  ;;  %v4993_v7 = vshrl.u32 %v3454_v60, 16 }
 0x251   : > { %v3480_v50 = vperm.slane %v3472_v54, %v11103_v57  ;;  %2696 = vrot.lane.b32.xlu0 %v2222_v12, %s10573_s24  ;;  %2568 = vrot.lane.b32.xlu1 %v2222_v12, %s10574_s9  ;;  %v3526_v38 = vsel %vm2869_vm7, %v3525_v1, %v12179_v23  ;;  %v3528_v43 = vsel %vm2869_vm7, %v3524_v10, %v3527_v44 }
 0x252   : > { %v3481_v61 = vrot.slane %v3476_v18, 4  ;;  %v4986_v39 = vshrl.u32 %v3476_v18, 16  ;;  %2440 = vrot.lane.b32.xlu2 %v2222_v12, %s10575_s11  ;;  %v12301_v28 = vperm.slane %v2222_v12, %v11078_v35  ;;  %v4983_v20 = vpack.i.b16 %v3476_v18, %v12247_v40 }
 0x253   : > { %v3483_v5 = vrot.slane %v3480_v50, 4  ;;  %v4999_v55 = vpack.i.b16 %v3480_v50, %v3452_v49  ;;  %v5002_v54 = vshrl.u32 %v3480_v50, 16  ;;  %v12305_v0 = vperm.slane %v3526_v38, %v11103_v57 }
 0x254   : > { %v3482_v24 = vsel %vm2869_vm7, 0, %v3481_v61  ;;  %v12309_v10 = vperm.slane %v3528_v43, %v11103_v57  ;;  %v1205_v12 = vadd.f32 %v1204_v21, %v10880_v48  ;;  %v4987_v50 = vpack.i.b16 %v4986_v39, %v4985_v17  ;;  %v2539_v21 = vpop.permute.xlu1 %2538 }
 0x255   : > { %v4994_v62 = vshrl.u32 %v3482_v24, 16  ;;  %v3484_v23 = vsel %vm2869_vm7, 0, %v3483_v5  ;;  %v5003_v1 = vpack.i.b16 %v5002_v54, %v5001_v42  ;;  %v6245_v44 = vrot.slane %v4999_v55, 4 }
 0x256   : > { %v5007_v61 = vpack.i.b16 %v3484_v23, %v3456_v56  ;;  %v5010_v36 = vshrl.u32 %v3484_v23, 16  ;;  %v3537_v49 = vrot.slane %v12305_v0, 4  ;;  %v3539_v38 = vrot.slane %v12309_v10, 4 }
 0x257   : > { %v6246_v40 = vsel %vm2869_vm7, %v6245_v44, %v4983_v20  ;;  %v6273_v18 = vrot.slane %v5003_v1, 4  ;;  %v4991_v63 = vpack.i.b16 %v3482_v24, %v3454_v60  ;;  %v4995_v55 = vpack.i.b16 %v4994_v62, %v4993_v7  ;;  %v14877_v1 = vld [vmem:[#allocation38_spill] sm:$0xff] }
 0x258   : > { %v5011_v11 = vpack.i.b16 %v5010_v36, %v5009_v6  ;;  %v6250_v42 = vperm.slane %v6246_v40, %v11078_v35  ;;  %v6251_v5 = vrot.slane %v5007_v61, 4  ;;  %v12318_v56 = vsel %vm2869_vm7, 0, %v3537_v49 }
 0x259   : > { %v6274_v43 = vsel %vm2869_vm7, %v6273_v18, %v4987_v50  ;;  %v5018_v54 = vshrl.u32 %v12305_v0, 16  ;;  %v12325_v60 = vsel %vm2869_vm7, 0, %v3539_v38  ;;  %v1294_v6 = vadd.f32 %v12266_v19, %v1205_v12 }
 0x25a   : > { %v6252_v17 = vsel %vm2869_vm7, %v6251_v5, %v4991_v63  ;;  %v6259_v20 = vrot.slane %v6250_v42, 4  ;;  %v6278_v39 = vperm.slane %v6274_v43, %v11078_v35  ;;  %v6279_v23 = vrot.slane %v5011_v11, 4 }
 0x25b   : > { %v6256_v36 = vperm.slane %v6252_v17, %v11078_v35  ;;  %v1383_v7 = vadd.f32 %v1382_v22, %v10886_v51  ;;  %v3490_v44 = vperm.slane %v14877_v1, %v11078_v35  ;;  %v3496_v63 = vperm.slane %v2539_v21, %v11078_v35 }
 0x25c   : > { %v6280_v62 = vsel %vm2869_vm7, %v6279_v23, %v4995_v55  ;;  %v6287_v24 = vrot.slane %v6278_v39, 4  ;;  %v5026_v19 = vshrl.u32 %v12318_v56, 16  ;;  %v5034_v22 = vshrl.u32 %v12309_v10, 16 }
 0x25d   : > { %v6257_v61 = vrot.slane %v6256_v36, 4  ;;  %v6260_v11 = vsel %vm2869_vm7, %v6256_v36, %v6259_v20  ;;  %v6284_v49 = vperm.slane %v6280_v62, %v11078_v35  ;;  %v1472_v50 = vadd.f32 %v12277_v13, %v1383_v7 }
 0x25e   : > { %v6268_v40 = vperm.slane %v6260_v11, %v11103_v57  ;;  %v3497_v12 = vrot.slane %v3496_v63, 4  ;;  %v5042_v13 = vshrl.u32 %v12325_v60, 16  ;;  %v3499_v36 = vrot.slane %v3490_v44, 4 }
 0x25f   : > { %v6258_v18 = vsel %vm2869_vm7, %v6257_v61, %v6250_v42  ;;  %v6285_v38 = vrot.slane %v6284_v49, 4  ;;  %v6288_v5 = vsel %vm2869_vm7, %v6284_v49, %v6287_v24  ;;  %v12341_v55 = vpack.c.bf16 %v1472_v50, %v1294_v6 }
 0x260   : > { %v6264_v43 = vperm.slane %v6258_v18, %v11103_v57  ;;  %v6271_v21 = vrot.slane %v6268_v40, 4  ;;  %v6296_v17 = vperm.slane %v6288_v5, %v11103_v57  ;;  %v7817_v23 = vshrl.u32 %v6268_v40, 16 }
 0x261   : > { %v6286_v20 = vsel %vm2869_vm7, %v6285_v38, %v6278_v39  ;;  %v3498_v7 = vsel %vm2869_vm7, %v3497_v12, %v3490_v44  ;;  %2442 = vrot.lane.b32.xlu0 %v12341_v55, %s10575_s11  ;;  %2698 = vrot.lane.b32.xlu1 %v12341_v55, %s10573_s24  ;;  %v3500_v61 = vsel %vm2869_vm7, %v3496_v63, %v3499_v36 }
 0x262   : > { %v6269_v42 = vrot.slane %v6264_v43, 4  ;;  %v6272_v6 = vsel %vm2869_vm7, 0, %v6271_v21  ;;  %v6292_v62 = vperm.slane %v6286_v20, %v11103_v57  ;;  %v6299_v24 = vrot.slane %v6296_v17, 4  ;;  %2570 = vrot.lane.b32.xlu2 %v12341_v55, %s10574_s9 }
 0x263   : > { %v7801_v39 = vshrl.u32 %v6264_v43, 16  ;;  %v7815_v1 = vpack.i.b16 %v6296_v17, %v6268_v40  ;;  %v7818_v44 = vshrl.u32 %v6296_v17, 16  ;;  %v7825_v21 = vshrl.u32 %v6272_v6, 16 }
 0x264   : > { %v6270_v11 = vsel %vm2869_vm7, 0, %v6269_v42  ;;  %v6297_v49 = vrot.slane %v6292_v62, 4  ;;  %v6300_v50 = vsel %vm2869_vm7, 0, %v6299_v24  ;;  %v7799_v12 = vpack.i.b16 %v6292_v62, %v6264_v43 }
 0x265   : > { %v7802_v18 = vshrl.u32 %v6292_v62, 16  ;;  %v7819_v38 = vpack.i.b16 %v7818_v44, %v7817_v23  ;;  %v7823_v5 = vpack.i.b16 %v6300_v50, %v6272_v6  ;;  %8640 = vst.msk [vmem:[%s11304_s16 + $0x228] sm:$0xf] %vm8501_vm8, %v7815_v1  ;;  %v7826_v40 = vshrl.u32 %v6300_v50, 16  ;;  %v2413_v6 = vpop.permute.xlu0 %2412  ;;  %v10219_v44 = vld [vmem:[#allocation5 + $0xd4] sm:$0xf] }
 0x266   : > { %v6298_v20 = vsel %vm2869_vm7, 0, %v6297_v49  ;;  %8512 = vst.msk [vmem:[%s11304_s16 + $0x28] sm:$0xf] %vm8501_vm8, %v7799_v12  ;;  %v3504_v63 = vperm.slane %v3498_v7, %v11103_v57  ;;  %v3508_v17 = vperm.slane %v3500_v61, %v11103_v57  ;;  %v7809_v43 = vshrl.u32 %v6270_v11, 16  ;;  %v9758_v50 = vld [vmem:[#allocation5 + $0xe8] sm:$0xf0] }
 0x267   : > { %v7803_v36 = vpack.i.b16 %v7802_v18, %v7801_v39  ;;  %v7807_v42 = vpack.i.b16 %v6298_v20, %v6270_v11  ;;  %v7810_v23 = vshrl.u32 %v6298_v20, 16  ;;  %8672 = vst.msk [vmem:[%s11304_s16 + $0x2a8] sm:$0xf] %vm8501_vm8, %v7819_v38  ;;  %v7827_v62 = vpack.i.b16 %v7826_v40, %v7825_v21 }
 0x268   : > { %8704 = vst.msk [vmem:[%s11304_s16 + $0x328] sm:$0xf] %vm8501_vm8, %v7823_v5  ;;  %v3509_v24 = vrot.slane %v3504_v63, 4  ;;  %v3511_v1 = vrot.slane %v3508_v17, 4  ;;  %v12372_v7 = vperm.slane %v11194_v31, %v11078_v35  ;;  %v5017_v39 = vshrl.u32 %v3504_v63, 16 }
 0x269   : > { %v7811_v61 = vpack.i.b16 %v7810_v23, %v7809_v43  ;;  %8544 = vst.msk [vmem:[%s11304_s16 + $0xa8] sm:$0xf] %vm8501_vm8, %v7803_v36  ;;  %v5031_v11 = vpack.i.b16 %v12309_v10, %v3508_v17  ;;  %v5033_v49 = vshrl.u32 %v3508_v17, 16  ;;  %v5015_v38 = vpack.i.b16 %v12305_v0, %v3504_v63  ;;  %v10267_v5 = vld [vmem:[#allocation5 + $0x254] sm:$0xf]  ;;  %v2669_v10 = vpop.permute.xlu1 %2668 }
 0x26a   : > { %8576 = vst.msk [vmem:[%s11304_s16 + $0x128] sm:$0xf] %vm8501_vm8, %v7807_v42  ;;  %v3510_v12 = vsel %vm2869_vm7, 0, %v3509_v24  ;;  %v3512_v18 = vsel %vm2869_vm7, 0, %v3511_v1  ;;  %v3574_v31 = vperm.slane %v2413_v6, %v11078_v35  ;;  %v5019_v21 = vpack.i.b16 %v5018_v54, %v5017_v39  ;;  %v9950_v36 = vld [vmem:[#allocation5 + $0x268] sm:$0xf0]  ;;  %v1207_v6 = vpop.f32.mrf.mxu0  ;;  %v1385_v24 = vpop.f32.mrf.mxu2 }
 0x26b   : > { %8608 = vst.msk [vmem:[%s11304_s16 + $0x1a8] sm:$0xf] %vm8501_vm8, %v7811_v61  ;;  %v5023_v20 = vpack.i.b16 %v12318_v56, %v3510_v12  ;;  %v5025_v40 = vshrl.u32 %v3510_v12, 16  ;;  %v5035_v17 = vpack.i.b16 %v5034_v22, %v5033_v49  ;;  %v5039_v42 = vpack.i.b16 %v12325_v60, %v3512_v18  ;;  %v1296_v61 = vpop.f32.mrf.mxu1  ;;  %v2417_v12 = vpop.permute.xlu2 %2416 }
 0x26c   : > { %8736 = vst.msk [vmem:[%s11304_s16 + $0x3a8] sm:$0xf] %vm8501_vm8, %v7827_v62  ;;  %v5041_v63 = vshrl.u32 %v3512_v18, 16  ;;  %v6301_v43 = vrot.slane %v5031_v11, 4  ;;  %v3583_v23 = vrot.slane %v3574_v31, 4  ;;  %v1208_v1 = vadd.f32 %v1207_v6, %v10880_v48  ;;  %v1474_v18 = vpop.f32.mrf.mxu3 }
 0x26d   : > { %v5027_v0 = vpack.i.b16 %v5026_v19, %v5025_v40  ;;  %v6329_v54 = vrot.slane %v5035_v17, 4  ;;  %v9761_v39 = vor.u32 %v10219_v44, %v9758_v50  ;;  %v6307_v49 = vrot.slane %v5039_v42, 4 }
 0x26e   : > { %v5043_v22 = vpack.i.b16 %v5042_v13, %v5041_v63  ;;  %v6302_v62 = vsel %vm2869_vm7, %v6301_v43, %v5015_v38  ;;  %v9953_v11 = vor.u32 %v10267_v5, %v9950_v36  ;;  %v1297_v19 = vadd.f32 %v1296_v61, %v1208_v1 }
 0x26f   : > { %v6306_v32 = vperm.slane %v6302_v62, %v11078_v35  ;;  %v6330_v56 = vsel %vm2869_vm7, %v6329_v54, %v5019_v21  ;;  %2021 = vmatpush.bf16.msra.mxu2 %v9761_v39  ;;  %v1386_v40 = vadd.f32 %v1385_v24, %v10886_v51  ;;  %v6308_v44 = vsel %vm2869_vm7, %v6307_v49, %v5023_v20 }
 0x270   : > { %v6334_v50 = vperm.slane %v6330_v56, %v11078_v35  ;;  %v6335_v60 = vrot.slane %v5043_v22, 4  ;;  %2110 = vmatpush.bf16.msra.mxu3 %v9953_v11  ;;  %v3580_v13 = vperm.slane %v2669_v10, %v11078_v35  ;;  %v6312_v38 = vperm.slane %v6308_v44, %v11078_v35 }
 0x271   : > { %v6315_v5 = vrot.slane %v6306_v32, 4  ;;  %v12407_v17 = vperm.slane %v2417_v12, %v11078_v35  ;;  %v1475_v36 = vadd.f32 %v1474_v18, %v1386_v40 }
 0x272   : > { %v6336_v21 = vsel %vm2869_vm7, %v6335_v60, %v5027_v0  ;;  %v6343_v42 = vrot.slane %v6334_v50, 4  ;;  %v3581_v63 = vrot.slane %v3580_v13, 4  ;;  %v3584_v43 = vsel %vm2869_vm7, %v3580_v13, %v3583_v23  ;;  %v12439_v40 = vpop.f32.mrf.mxu0  ;;  %v14878_v60 = vld [vmem:[#allocation28_spill] sm:$0xff]  ;;  %v14879_v13 = vld [vmem:[#allocation29_spill] sm:$0xff] }
 0x273   : > { %v6313_v20 = vrot.slane %v6312_v38, 4  ;;  %v6316_v6 = vsel %vm2869_vm7, %v6312_v38, %v6315_v5  ;;  %v6340_v24 = vperm.slane %v6336_v21, %v11078_v35  ;;  %v12413_v54 = vpack.c.bf16 %v1475_v36, %v1297_v19  ;;  %v12441_v44 = vpop.f32.mrf.mxu1  ;;  %1542 = vmatmul.bf16.gmra.mxu0 %v14878_v60  ;;  %1631 = vmatmul.bf16.gmra.mxu1 %v14879_v13  ;;  %v12447_v21 = vpop.f32.mrf.mxu2 }
 0x274   : > { %v6324_v1 = vperm.slane %v6316_v6, %v11103_v57  ;;  %v3582_v61 = vsel %vm2869_vm7, %v3581_v63, %v3574_v31  ;;  %v12418_v39 = vperm.slane %v3584_v43, %v11103_v57  ;;  %1720 = vmatmul.bf16.gmra.mxu2 %v14878_v60 }
 0x275   : > { %v6314_v10 = vsel %vm2869_vm7, %v6313_v20, %v6306_v32  ;;  %v6341_v22 = vrot.slane %v6340_v24, 4  ;;  %v6344_v23 = vsel %vm2869_vm7, %v6340_v24, %v6343_v42  ;;  %2572 = vrot.lane.b32.xlu0 %v12413_v54, %s10574_s9  ;;  %2444 = vrot.lane.b32.xlu1 %v12413_v54, %s10575_s11  ;;  %v12434_v18 = vperm.slane %v3582_v61, %v11103_v57  ;;  %v12449_v42 = vpop.f32.mrf.mxu3 }
 0x276   : > { %v6320_v31 = vperm.slane %v6314_v10, %v11103_v57  ;;  %v6327_v49 = vrot.slane %v6324_v1, 4  ;;  %v6352_v12 = vperm.slane %v6344_v23, %v11103_v57  ;;  %v7849_v11 = vshrl.u32 %v6324_v1, 16  ;;  %2700 = vrot.lane.b32.xlu2 %v12413_v54, %s10573_s24  ;;  %1809 = vmatmul.bf16.gmra.mxu3 %v14879_v13 }
 0x277   : > { %v6342_v32 = vsel %vm2869_vm7, %v6341_v22, %v6334_v50  ;;  %v3595_v56 = vrot.slane %v12418_v39, 4  ;;  %v5063_v19 = vpack.i.b16 %v12418_v39, %v12201_v16 }
 0x278   : > { %v6325_v38 = vrot.slane %v6320_v31, 4  ;;  %v6328_v5 = vsel %vm2869_vm7, 0, %v6327_v49  ;;  %v6348_v50 = vperm.slane %v6342_v32, %v11103_v57  ;;  %v6355_v36 = vrot.slane %v6352_v12, 4 }
 0x279   : > { %v7833_v63 = vshrl.u32 %v6320_v31, 16  ;;  %v7847_v43 = vpack.i.b16 %v6352_v12, %v6324_v1  ;;  %v7850_v20 = vshrl.u32 %v6352_v12, 16  ;;  %v7857_v6 = vshrl.u32 %v6328_v5, 16 }
 0x27a   : > { %v6326_v24 = vsel %vm2869_vm7, 0, %v6325_v38  ;;  %v6353_v61 = vrot.slane %v6348_v50, 4  ;;  %v6356_v10 = vsel %vm2869_vm7, 0, %v6355_v36  ;;  %v7831_v22 = vpack.i.b16 %v6348_v50, %v6320_v31 }
 0x27b   : > { %v7834_v23 = vshrl.u32 %v6348_v50, 16  ;;  %v7841_v49 = vshrl.u32 %v6326_v24, 16  ;;  %v7851_v32 = vpack.i.b16 %v7850_v20, %v7849_v11  ;;  %v7855_v62 = vpack.i.b16 %v6356_v10, %v6328_v5  ;;  %8641 = vst.msk [vmem:[%s11304_s16 + $0x22c] sm:$0xf] %vm8501_vm8, %v7847_v43 }
 0x27c   : > { %v6354_v0 = vsel %vm2869_vm7, 0, %v6353_v61  ;;  %v7858_v13 = vshrl.u32 %v6356_v10, 16  ;;  %8513 = vst.msk [vmem:[%s11304_s16 + $0x2c] sm:$0xf] %vm8501_vm8, %v7831_v22  ;;  %v3593_v1 = vrot.slane %v12434_v18, 4  ;;  %v3596_v12 = vsel %vm2869_vm7, 0, %v3595_v56  ;;  %v2547_v56 = vpop.permute.xlu2 %2546 }
 0x27d   : > { %v7835_v38 = vpack.i.b16 %v7834_v23, %v7833_v63  ;;  %v7839_v36 = vpack.i.b16 %v6354_v0, %v6326_v24  ;;  %v7842_v31 = vshrl.u32 %v6354_v0, 16  ;;  %8673 = vst.msk [vmem:[%s11304_s16 + $0x2ac] sm:$0xf] %vm8501_vm8, %v7851_v32  ;;  %v5047_v11 = vpack.i.b16 %v12434_v18, %v12211_v41 }
 0x27e   : > { %v7859_v5 = vpack.i.b16 %v7858_v13, %v7857_v6  ;;  %8705 = vst.msk [vmem:[%s11304_s16 + $0x32c] sm:$0xf] %vm8501_vm8, %v7855_v62  ;;  %v3594_v50 = vsel %vm2869_vm7, 0, %v3593_v1  ;;  %v5050_v43 = vshrl.u32 %v12434_v18, 16  ;;  %v5066_v20 = vshrl.u32 %v12418_v39, 16  ;;  %v2543_v13 = vpop.permute.xlu0 %2542 }
 0x27f   : > { %v7843_v63 = vpack.i.b16 %v7842_v31, %v7841_v49  ;;  %8545 = vst.msk [vmem:[%s11304_s16 + $0xac] sm:$0xf] %vm8501_vm8, %v7835_v38  ;;  %v5055_v0 = vpack.i.b16 %v3594_v50, %v12256_v45  ;;  %v5058_v24 = vshrl.u32 %v3594_v50, 16  ;;  %v5071_v61 = vpack.i.b16 %v3596_v12, %v12225_v27  ;;  %v14883_v38 = vld [vmem:[#allocation41_spill] sm:$0xff] }
 0x280   : > { %8577 = vst.msk [vmem:[%s11304_s16 + $0x12c] sm:$0xf] %vm8501_vm8, %v7839_v36  ;;  %v14880_v62 = vshrl.u32 %v12211_v41, 16  ;;  %v14881_v18 = vshrl.u32 %v12201_v16, 16  ;;  %v5074_v39 = vshrl.u32 %v3596_v12, 16  ;;  %v6357_v22 = vrot.slane %v5063_v19, 4 }
 0x281   : > { %8609 = vst.msk [vmem:[%s11304_s16 + $0x1ac] sm:$0xf] %vm8501_vm8, %v7843_v63  ;;  %v14882_v23 = vshrl.u32 %v12256_v45, 16  ;;  %v6363_v32 = vrot.slane %v5071_v61, 4  ;;  %v3720_v1 = vperm.slane %v2547_v56, %v11078_v35  ;;  %v12488_v31 = vperm.slane %v14883_v38, %v11078_v35 }
 0x282   : > { %v5051_v6 = vpack.i.b16 %v5050_v43, %v14880_v62  ;;  %v5067_v10 = vpack.i.b16 %v5066_v20, %v14881_v18  ;;  %8737 = vst.msk [vmem:[%s11304_s16 + $0x3ac] sm:$0xf] %vm8501_vm8, %v7859_v5  ;;  %v14884_v41 = vshrl.u32 %v12225_v27, 16  ;;  %v6358_v12 = vsel %vm2869_vm7, %v6357_v22, %v5047_v11 }
 0x283   : > { %v5059_v49 = vpack.i.b16 %v5058_v24, %v14882_v23  ;;  %v12496_v36 = vperm.slane %v2543_v13, %v11078_v35  ;;  %v6362_v45 = vperm.slane %v6358_v12, %v11078_v35  ;;  %v6364_v50 = vsel %vm2869_vm7, %v6363_v32, %v5055_v0 }
 0x284   : > { %v5075_v16 = vpack.i.b16 %v5074_v39, %v14884_v41  ;;  %v6385_v19 = vrot.slane %v5067_v10, 4  ;;  %v3721_v43 = vrot.slane %v3720_v1, 4  ;;  %v14885_v20 = vrot.slane %v12372_v7, 4 }
 0x285   : > { %v6368_v5 = vperm.slane %v6364_v50, %v11078_v35  ;;  %v6371_v24 = vrot.slane %v6362_v45, 4  ;;  %v3611_v0 = vrot.slane %v12488_v31, 4  ;;  %v12519_v39 = vperm.slane %v12413_v54, %v11078_v35 }
 0x286   : > { %v3724_v56 = vsel %vm2869_vm7, %v3720_v1, %v14885_v20  ;;  %v6386_v27 = vsel %vm2869_vm7, %v6385_v19, %v5051_v6  ;;  %v6391_v63 = vrot.slane %v5075_v16, 4  ;;  %v3722_v13 = vsel %vm2869_vm7, %v3721_v43, %v12372_v7 }
 0x287   : > { %v12506_v11 = vperm.slane %v3724_v56, %v11103_v57  ;;  %v6390_v61 = vperm.slane %v6386_v27, %v11078_v35  ;;  %v6369_v62 = vrot.slane %v6368_v5, 4  ;;  %v12514_v10 = vperm.slane %v3722_v13, %v11103_v57 }
 0x288   : > { %v6392_v18 = vsel %vm2869_vm7, %v6391_v63, %v5059_v49  ;;  %v6372_v22 = vsel %vm2869_vm7, %v6368_v5, %v6371_v24  ;;  %v3609_v49 = vrot.slane %v12496_v36, 4  ;;  %v1210_v38 = vadd.f32 %v12439_v40, %v10880_v48 }
 0x289   : > { %v3735_v6 = vrot.slane %v12506_v11, 4  ;;  %v6396_v23 = vperm.slane %v6392_v18, %v11078_v35  ;;  %v6399_v32 = vrot.slane %v6390_v61, 4  ;;  %v6370_v7 = vsel %vm2869_vm7, %v6369_v62, %v6362_v45  ;;  %v10270_v45 = vld [vmem:[#allocation5 + $0x264] sm:$0xf0] }
 0x28a   : > { %v6380_v1 = vperm.slane %v6372_v22, %v11103_v57  ;;  %v6376_v41 = vperm.slane %v6370_v7, %v11103_v57  ;;  %v3733_v12 = vrot.slane %v12514_v10, 4 }
 0x28b   : > { %v6397_v16 = vrot.slane %v6396_v23, 4  ;;  %v6400_v54 = vsel %vm2869_vm7, %v6396_v23, %v6399_v32  ;;  %v12533_v43 = vsel %vm2869_vm7, 0, %v3735_v6  ;;  %v9756_v23 = vld [vmem:[#allocation5 + $0xd0] sm:$0xf] }
 0x28c   : > { %v6383_v19 = vrot.slane %v6380_v1, 4  ;;  %v6408_v50 = vperm.slane %v6400_v54, %v11103_v57  ;;  %v6381_v20 = vrot.slane %v6376_v41, 4  ;;  %v7881_v5 = vshrl.u32 %v6380_v1, 16 }
 0x28d   : > { %v6398_v56 = vsel %vm2869_vm7, %v6397_v16, %v6390_v61  ;;  %v7865_v18 = vshrl.u32 %v6376_v41, 16  ;;  %v12542_v22 = vsel %vm2869_vm7, 0, %v3733_v12  ;;  %v10222_v61 = vld [vmem:[#allocation5 + $0xe4] sm:$0xf0] }
 0x28e   : > { %v6384_v27 = vsel %vm2869_vm7, 0, %v6383_v19  ;;  %v6404_v63 = vperm.slane %v6398_v56, %v11103_v57  ;;  %v6411_v24 = vrot.slane %v6408_v50, 4  ;;  %v7879_v13 = vpack.i.b16 %v6408_v50, %v6380_v1 }
 0x28f   : > { %v6382_v62 = vsel %vm2869_vm7, 0, %v6381_v20  ;;  %v7882_v6 = vshrl.u32 %v6408_v50, 16  ;;  %v7889_v56 = vshrl.u32 %v6384_v27, 16  ;;  %v9948_v50 = vld [vmem:[#allocation5 + $0x250] sm:$0xf] }
 0x290   : > { %v6409_v32 = vrot.slane %v6404_v63, 4  ;;  %v6412_v7 = vsel %vm2869_vm7, 0, %v6411_v24  ;;  %v7863_v16 = vpack.i.b16 %v6404_v63, %v6376_v41  ;;  %v7866_v54 = vshrl.u32 %v6404_v63, 16  ;;  %8642 = vst.msk [vmem:[%s11304_s16 + $0x230] sm:$0xf] %vm8501_vm8, %v7879_v13 }
 0x291   : > { %v7883_v19 = vpack.i.b16 %v7882_v6, %v7881_v5  ;;  %v7887_v1 = vpack.i.b16 %v6412_v7, %v6384_v27  ;;  %v7890_v20 = vshrl.u32 %v6412_v7, 16  ;;  %v3610_v41 = vsel %vm2869_vm7, %v3609_v49, %v12488_v31  ;;  %v2415_v6 = vpop.permute.xlu1 %2414 }
 0x292   : > { %v6410_v12 = vsel %vm2869_vm7, 0, %v6409_v32  ;;  %v7867_v40 = vpack.i.b16 %v7866_v54, %v7865_v18  ;;  %8514 = vst.msk [vmem:[%s11304_s16 + $0x30] sm:$0xf] %vm8501_vm8, %v7863_v16  ;;  %v3612_v63 = vsel %vm2869_vm7, %v12496_v36, %v3611_v0  ;;  %v7873_v5 = vshrl.u32 %v6382_v62, 16  ;;  %v2673_v54 = vpop.permute.xlu0 %2672 }
 0x293   : > { %v7871_v24 = vpack.i.b16 %v6410_v12, %v6382_v62  ;;  %v7874_v27 = vshrl.u32 %v6410_v12, 16  ;;  %8674 = vst.msk [vmem:[%s11304_s16 + $0x2b0] sm:$0xf] %vm8501_vm8, %v7883_v19  ;;  %v12557_v13 = vperm.slane %v3610_v41, %v11103_v57  ;;  %v7891_v18 = vpack.i.b16 %v7890_v20, %v7889_v56 }
 0x294   : > { %8546 = vst.msk [vmem:[%s11304_s16 + $0xb0] sm:$0xf] %vm8501_vm8, %v7867_v40  ;;  %v12562_v32 = vperm.slane %v3612_v63, %v11103_v57  ;;  %v9757_v31 = vor.u32 %v10222_v61, %v9756_v23  ;;  %v9949_v49 = vor.u32 %v10270_v45, %v9948_v50  ;;  %v1388_v7 = vadd.f32 %v12447_v21, %v10886_v51  ;;  %v2677_v61 = vpop.permute.xlu2 %2676 }
 0x295   : > { %v7875_v36 = vpack.i.b16 %v7874_v27, %v7873_v5  ;;  %8578 = vst.msk [vmem:[%s11304_s16 + $0x130] sm:$0xf] %vm8501_vm8, %v7871_v24  ;;  %v3621_v62 = vrot.slane %v12557_v13, 4  ;;  %v1299_v23 = vadd.f32 %v12441_v44, %v1210_v38  ;;  %v3630_v45 = vperm.slane %v2415_v6, %v11078_v35  ;;  %v1212_v24 = vpop.f32.mrf.mxu0  ;;  %v14887_v5 = vld [vmem:[#allocation43_spill] sm:$0xff] }
 0x296   : > { %8706 = vst.msk [vmem:[%s11304_s16 + $0x330] sm:$0xf] %vm8501_vm8, %v7887_v1  ;;  %v3623_v16 = vrot.slane %v12562_v32, 4  ;;  %1843 = vmatpush.bf16.msra.mxu0 %v9757_v31  ;;  %1932 = vmatpush.bf16.msra.mxu1 %v9949_v49  ;;  %v5081_v19 = vshrl.u32 %v12557_v13, 16  ;;  %v1477_v21 = vadd.f32 %v12449_v42, %v1388_v7  ;;  %v3692_v56 = vperm.slane %v2673_v54, %v11078_v35 }
 0x297   : > { %8610 = vst.msk [vmem:[%s11304_s16 + $0x1b0] sm:$0xf] %vm8501_vm8, %v7875_v36  ;;  %v3622_v1 = vsel %vm2869_vm7, 0, %v3621_v62  ;;  %v14886_v38 = vrot.slane %v12264_v26, 4  ;;  %v3639_v50 = vrot.slane %v3630_v45, 4  ;;  %v12589_v12 = vperm.slane %v2677_v61, %v11078_v35 }
 0x298   : > { %8738 = vst.msk [vmem:[%s11304_s16 + $0x3b0] sm:$0xf] %vm8501_vm8, %v7891_v18  ;;  %v3624_v44 = vsel %vm2869_vm7, 0, %v3623_v16  ;;  %v5097_v41 = vshrl.u32 %v12562_v32, 16  ;;  %v12592_v63 = vpack.c.bf16 %v1477_v21, %v1299_v23  ;;  %v3667_v27 = vrot.slane %v14887_v5, 4 }
 0x299   : > { %v3638_v20 = vsel %vm2869_vm7, %v14886_v38, %v3630_v45  ;;  %v3640_v6 = vsel %vm2869_vm7, %v12264_v26, %v3639_v50  ;;  %v3693_v18 = vrot.slane %v3692_v56, 4  ;;  %v14888_v31 = vrot.slane %v12407_v17, 4  ;;  %v1390_v45 = vpop.f32.mrf.mxu2 }
 0x29a   : > { %v3644_v42 = vperm.slane %v3638_v20, %v11103_v57  ;;  %v1213_v36 = vadd.f32 %v1212_v24, %v10880_v48  ;;  %v5105_v62 = vshrl.u32 %v3624_v44, 16  ;;  %v3648_v7 = vperm.slane %v3640_v6, %v11103_v57  ;;  %2702 = vrot.lane.b32.xlu0 %v12592_v63, %s10573_s24  ;;  %2574 = vrot.lane.b32.xlu1 %v12592_v63, %s10574_s9  ;;  %v1301_v24 = vpop.f32.mrf.mxu1 }
 0x29b   : > { %v3696_v49 = vsel %vm2869_vm7, %v3692_v56, %v14888_v31  ;;  %v5089_v23 = vshrl.u32 %v3622_v1, 16  ;;  %v3694_v54 = vsel %vm2869_vm7, %v3693_v18, %v12407_v17  ;;  %2446 = vrot.lane.b32.xlu2 %v12592_v63, %s10575_s11  ;;  %v1391_v17 = vadd.f32 %v1390_v45, %v10886_v51 }
 0x29c   : > { %v3649_v16 = vrot.slane %v3644_v42, 4  ;;  %v5082_v26 = vshrl.u32 %v3644_v42, 16  ;;  %v12611_v21 = vperm.slane %v3696_v49, %v11103_v57  ;;  %v3651_v38 = vrot.slane %v3648_v7, 4 }
 0x29d   : > { %v5079_v20 = vpack.i.b16 %v3644_v42, %v12557_v13  ;;  %v5095_v50 = vpack.i.b16 %v3648_v7, %v12562_v32  ;;  %v5098_v6 = vshrl.u32 %v3648_v7, 16  ;;  %v12619_v31 = vperm.slane %v3694_v54, %v11103_v57  ;;  %v2545_v42 = vpop.permute.xlu1 %2544 }
 0x29e   : > { %v3650_v56 = vsel %vm2869_vm7, 0, %v3649_v16  ;;  %v1302_v61 = vadd.f32 %v1301_v24, %v1213_v36  ;;  %v3652_v18 = vsel %vm2869_vm7, 0, %v3651_v38  ;;  %v3707_v0 = vrot.slane %v12611_v21, 4 }
 0x29f   : > { %v5090_v49 = vshrl.u32 %v3650_v56, 16  ;;  %v6413_v40 = vrot.slane %v5095_v50, 4  ;;  %v5083_v16 = vpack.i.b16 %v5082_v26, %v5081_v19  ;;  %v5099_v60 = vpack.i.b16 %v5098_v6, %v5097_v41  ;;  %v1479_v50 = vpop.f32.mrf.mxu3 }
 0x2a0   : > { %v5103_v34 = vpack.i.b16 %v3652_v18, %v3624_v44  ;;  %v5106_v13 = vshrl.u32 %v3652_v18, 16  ;;  %v5087_v32 = vpack.i.b16 %v3650_v56, %v3622_v1  ;;  %v3705_v54 = vrot.slane %v12619_v31, 4 }
 0x2a1   : > { %v6414_v7 = vsel %vm2869_vm7, %v6413_v40, %v5079_v20  ;;  %v6441_v30 = vrot.slane %v5099_v60, 4  ;;  %v5091_v15 = vpack.i.b16 %v5090_v49, %v5089_v23  ;;  %v12629_v19 = vsel %vm2869_vm7, 0, %v3707_v0 }
 0x2a2   : > { %v5107_v24 = vpack.i.b16 %v5106_v13, %v5105_v62  ;;  %v6418_v45 = vperm.slane %v6414_v7, %v11078_v35  ;;  %v6419_v38 = vrot.slane %v5103_v34, 4  ;;  %v1480_v44 = vadd.f32 %v1479_v50, %v1391_v17 }
 0x2a3   : > { %v3664_v41 = vperm.slane %v2545_v42, %v11078_v35  ;;  %v6442_v26 = vsel %vm2869_vm7, %v6441_v30, %v5083_v16  ;;  %v12641_v23 = vsel %vm2869_vm7, 0, %v3705_v54 }
 0x2a4   : > { %v6420_v1 = vsel %vm2869_vm7, %v6419_v38, %v5087_v32  ;;  %v6427_v40 = vrot.slane %v6418_v45, 4  ;;  %v6447_v56 = vrot.slane %v5107_v24, 4  ;;  %v6446_v20 = vperm.slane %v6442_v26, %v11078_v35  ;;  %v12670_v26 = vpop.f32.mrf.mxu1 }
 0x2a5   : > { %v6424_v62 = vperm.slane %v6420_v1, %v11078_v35  ;;  %v12637_v60 = vpack.c.bf16 %v1480_v44, %v1302_v61  ;;  %v3665_v6 = vrot.slane %v3664_v41, 4  ;;  %v3668_v17 = vsel %vm2869_vm7, %v3664_v41, %v3667_v27 }
 0x2a6   : > { %v6448_v0 = vsel %vm2869_vm7, %v6447_v56, %v5091_v15  ;;  %v6455_v16 = vrot.slane %v6446_v20, 4  ;;  %v12655_v27 = vperm.slane %v3668_v17, %v11103_v57  ;;  %v14889_v56 = vld [vmem:[#allocation30_spill] sm:$0xff] }
 0x2a7   : > { %v6425_v18 = vrot.slane %v6424_v62, 4  ;;  %v6428_v30 = vsel %vm2869_vm7, %v6424_v62, %v6427_v40  ;;  %v6452_v49 = vperm.slane %v6448_v0, %v11078_v35  ;;  %2448 = vrot.lane.b32.xlu0 %v12637_v60, %s10575_s11  ;;  %2704 = vrot.lane.b32.xlu1 %v12637_v60, %s10573_s24  ;;  %v3666_v13 = vsel %vm2869_vm7, %v3665_v6, %v14887_v5  ;;  %v1214_v40 = vpop.f32.mrf.mxu0  ;;  %v14890_v62 = vld [vmem:[#allocation31_spill] sm:$0xff] }
 0x2a8   : > { %v6436_v15 = vperm.slane %v6428_v30, %v11103_v57  ;;  %2576 = vrot.lane.b32.xlu2 %v12637_v60, %s10574_s9  ;;  %v12662_v54 = vperm.slane %v3666_v13, %v11103_v57  ;;  %1547 = vmatmul.bf16.gmra.mxu0 %v14889_v56  ;;  %v1392_v30 = vpop.f32.mrf.mxu2 }
 0x2a9   : > { %v6426_v42 = vsel %vm2869_vm7, %v6425_v18, %v6418_v45  ;;  %v6453_v32 = vrot.slane %v6452_v49, 4  ;;  %v6456_v7 = vsel %vm2869_vm7, %v6452_v49, %v6455_v16  ;;  %v3679_v45 = vrot.slane %v12655_v27, 4  ;;  %1636 = vmatmul.bf16.gmra.mxu1 %v14890_v62  ;;  %1725 = vmatmul.bf16.gmra.mxu2 %v14889_v56 }
 0x2aa   : > { %v6432_v24 = vperm.slane %v6426_v42, %v11103_v57  ;;  %v6439_v38 = vrot.slane %v6436_v15, 4  ;;  %v6464_v50 = vperm.slane %v6456_v7, %v11103_v57  ;;  %v7913_v41 = vshrl.u32 %v6436_v15, 16 }
 0x2ab   : > { %v6454_v44 = vsel %vm2869_vm7, %v6453_v32, %v6446_v20  ;;  %v3677_v1 = vrot.slane %v12662_v54, 4  ;;  %v1481_v20 = vpop.f32.mrf.mxu3  ;;  %1814 = vmatmul.bf16.gmra.mxu3 %v14890_v62 }
 0x2ac   : > { %v6437_v0 = vrot.slane %v6432_v24, 4  ;;  %v6440_v6 = vsel %vm2869_vm7, 0, %v6439_v38  ;;  %v6460_v17 = vperm.slane %v6454_v44, %v11103_v57  ;;  %v6467_v18 = vrot.slane %v6464_v50, 4 }
 0x2ad   : > { %v7897_v49 = vshrl.u32 %v6432_v24, 16  ;;  %v7911_v16 = vpack.i.b16 %v6464_v50, %v6436_v15  ;;  %v7914_v13 = vshrl.u32 %v6464_v50, 16  ;;  %v7921_v42 = vshrl.u32 %v6440_v6, 16 }
 0x2ae   : > { %v6438_v32 = vsel %vm2869_vm7, 0, %v6437_v0  ;;  %v6465_v7 = vrot.slane %v6460_v17, 4  ;;  %v6468_v38 = vsel %vm2869_vm7, 0, %v6467_v18  ;;  %v7895_v44 = vpack.i.b16 %v6460_v17, %v6432_v24 }
 0x2af   : > { %v7898_v61 = vshrl.u32 %v6460_v17, 16  ;;  %v7905_v5 = vshrl.u32 %v6438_v32, 16  ;;  %v7915_v36 = vpack.i.b16 %v7914_v13, %v7913_v41  ;;  %v7919_v34 = vpack.i.b16 %v6468_v38, %v6440_v6  ;;  %8643 = vst.msk [vmem:[%s11304_s16 + $0x234] sm:$0xf] %vm8501_vm8, %v7911_v16 }
 0x2b0   : > { %v6466_v62 = vsel %vm2869_vm7, 0, %v6465_v7  ;;  %v7922_v56 = vshrl.u32 %v6468_v38, 16  ;;  %8515 = vst.msk [vmem:[%s11304_s16 + $0x34] sm:$0xf] %vm8501_vm8, %v7895_v44  ;;  %v3678_v15 = vsel %vm2869_vm7, 0, %v3677_v1  ;;  %v3680_v50 = vsel %vm2869_vm7, 0, %v3679_v45  ;;  %v2419_v45 = vpop.permute.xlu0 %2418 }
 0x2b1   : > { %v7899_v0 = vpack.i.b16 %v7898_v61, %v7897_v49  ;;  %v7903_v24 = vpack.i.b16 %v6466_v62, %v6438_v32  ;;  %v7906_v17 = vshrl.u32 %v6466_v62, 16  ;;  %8675 = vst.msk [vmem:[%s11304_s16 + $0x2b4] sm:$0xf] %vm8501_vm8, %v7915_v36  ;;  %v5113_v41 = vshrl.u32 %v12662_v54, 16 }
 0x2b2   : > { %v7923_v6 = vpack.i.b16 %v7922_v56, %v7921_v42  ;;  %8707 = vst.msk [vmem:[%s11304_s16 + $0x334] sm:$0xf] %vm8501_vm8, %v7919_v34  ;;  %v5111_v18 = vpack.i.b16 %v12619_v31, %v12662_v54  ;;  %v5121_v16 = vshrl.u32 %v3678_v15, 16  ;;  %v5127_v1 = vpack.i.b16 %v12611_v21, %v12655_v27  ;;  %v2423_v42 = vpop.permute.xlu2 %2422 }
 0x2b3   : > { %v7907_v61 = vpack.i.b16 %v7906_v17, %v7905_v5  ;;  %8547 = vst.msk [vmem:[%s11304_s16 + $0xb4] sm:$0xf] %vm8501_vm8, %v7899_v0  ;;  %v5119_v36 = vpack.i.b16 %v12641_v23, %v3678_v15  ;;  %v5129_v62 = vshrl.u32 %v12655_v27, 16  ;;  %v5135_v56 = vpack.i.b16 %v12629_v19, %v3680_v50 }
 0x2b4   : > { %8579 = vst.msk [vmem:[%s11304_s16 + $0x134] sm:$0xf] %vm8501_vm8, %v7903_v24  ;;  %v14891_v34 = vshrl.u32 %v12619_v31, 16  ;;  %v5137_v49 = vshrl.u32 %v3680_v50, 16  ;;  %v6469_v13 = vrot.slane %v5127_v1, 4  ;;  %v3891_v32 = vrot.slane %v11518_v37, 4 }
 0x2b5   : > { %8611 = vst.msk [vmem:[%s11304_s16 + $0x1b4] sm:$0xf] %vm8501_vm8, %v7907_v61  ;;  %v14892_v5 = vshrl.u32 %v12611_v21, 16  ;;  %v6475_v38 = vrot.slane %v5135_v56, 4  ;;  %v3742_v27 = vperm.slane %v2419_v45, %v11078_v35  ;;  %v1215_v44 = vadd.f32 %v1214_v40, %v10880_v48 }
 0x2b6   : > { %v5115_v54 = vpack.i.b16 %v14891_v34, %v5113_v41  ;;  %8739 = vst.msk [vmem:[%s11304_s16 + $0x3b4] sm:$0xf] %vm8501_vm8, %v7923_v6  ;;  %v14893_v31 = vshrl.u32 %v12641_v23, 16  ;;  %v14894_v50 = vshrl.u32 %v12629_v19, 16  ;;  %v6470_v24 = vsel %vm2869_vm7, %v6469_v13, %v5111_v18  ;;  %v2675_v41 = vpop.permute.xlu1 %2674 }
 0x2b7   : > { %v5131_v7 = vpack.i.b16 %v14892_v5, %v5129_v62  ;;  %v1393_v17 = vadd.f32 %v1392_v30, %v10886_v51  ;;  %v6474_v21 = vperm.slane %v6470_v24, %v11078_v35  ;;  %v6476_v1 = vsel %vm2869_vm7, %v6475_v38, %v5119_v36 }
 0x2b8   : > { %v5123_v15 = vpack.i.b16 %v14893_v31, %v5121_v16  ;;  %v5139_v0 = vpack.i.b16 %v14894_v50, %v5137_v49  ;;  %v12723_v48 = vperm.slane %v2423_v42, %v11078_v35  ;;  %v6480_v40 = vperm.slane %v6476_v1, %v11078_v35 }
 0x2b9   : > { %v6497_v45 = vrot.slane %v5131_v7, 4  ;;  %v1304_v6 = vadd.f32 %v12670_v26, %v1215_v44  ;;  %v1482_v19 = vadd.f32 %v1481_v20, %v1393_v17  ;;  %v6483_v16 = vrot.slane %v6474_v21, 4 }
 0x2ba   : > { %v6503_v23 = vrot.slane %v5139_v0, 4  ;;  %v3751_v61 = vrot.slane %v3742_v27, 4  ;;  %v3748_v51 = vperm.slane %v2675_v41, %v11078_v35  ;;  %v6481_v30 = vrot.slane %v6480_v40, 4 }
 0x2bb   : > { %v6498_v18 = vsel %vm2869_vm7, %v6497_v45, %v5115_v54  ;;  %v12731_v56 = vpack.c.bf16 %v1482_v19, %v1304_v6  ;;  %v6484_v34 = vsel %vm2869_vm7, %v6480_v40, %v6483_v16  ;;  %v3863_v44 = vrot.slane %v12723_v48, 4 }
 0x2bc   : > { %v6502_v62 = vperm.slane %v6498_v18, %v11078_v35  ;;  %v6504_v36 = vsel %vm2869_vm7, %v6503_v23, %v5123_v15  ;;  %v3749_v13 = vrot.slane %v3748_v51, 4  ;;  %v3752_v26 = vsel %vm2869_vm7, %v3748_v51, %v3751_v61 }
 0x2bd   : > { %v6508_v49 = vperm.slane %v6504_v36, %v11078_v35  ;;  %v6482_v20 = vsel %vm2869_vm7, %v6481_v30, %v6474_v21  ;;  %v6492_v54 = vperm.slane %v6484_v34, %v11103_v57  ;;  %v3760_v5 = vperm.slane %v3752_v26, %v11103_v57  ;;  %2578 = vrot.lane.b32.xlu0 %v12731_v56, %s10574_s9 }
 0x2be   : > { %v6511_v42 = vrot.slane %v6502_v62, 4  ;;  %2450 = vrot.lane.b32.xlu1 %v12731_v56, %s10575_s11  ;;  %v6488_v7 = vperm.slane %v6482_v20, %v11103_v57  ;;  %v3750_v31 = vsel %vm2869_vm7, %v3749_v13, %v3742_v27  ;;  %2706 = vrot.lane.b32.xlu2 %v12731_v56, %s10573_s24  ;;  %s10498_s11 = scalar_lea.hbm %s14714_s4, 512 }
 0x2bf   : > { %v6509_v38 = vrot.slane %v6508_v49, 4  ;;  %v6495_v15 = vrot.slane %v6492_v54, 4  ;;  %v7945_v0 = vshrl.u32 %v6492_v54, 16  ;;  %v3756_v24 = vperm.slane %v3750_v31, %v11103_v57  ;;  %p10500_p13 = scmp.lt.s32.totalorder %s10498_s11, %s10494_s21 }
 0x2c0   : > { %v6512_v50 = vsel %vm2869_vm7, %v6508_v49, %v6511_v42  ;;  %v6493_v17 = vrot.slane %v6488_v7, 4  ;;  %v7929_v1 = vshrl.u32 %v6488_v7, 16  ;;  %v3763_v23 = vrot.slane %v3760_v5, 4 }
 0x2c1   : > { %v6510_v41 = vsel %vm2869_vm7, %v6509_v38, %v6502_v62  ;;  %v6520_v21 = vperm.slane %v6512_v50, %v11103_v57  ;;  %v6496_v45 = vsel %vm2869_vm7, 0, %v6495_v15  ;;  %v3761_v40 = vrot.slane %v3756_v24, 4  ;;  %v2553_v50 = vpop.permute.xlu2 %2552  ;;  %p10501_p0 = por %p10500_p13, %p10499_p12 }
 0x2c2   : > { %v6516_v27 = vperm.slane %v6510_v41, %v11103_v57  ;;  %v6494_v6 = vsel %vm2869_vm7, 0, %v6493_v17  ;;  %v7953_v49 = vshrl.u32 %v6496_v45, 16  ;;  %v3764_v31 = vsel %vm2869_vm7, 0, %v3763_v23 }
 0x2c3   : > { %v6523_v19 = vrot.slane %v6520_v21, 4  ;;  %v7943_v16 = vpack.i.b16 %v6520_v21, %v6492_v54  ;;  %v7946_v18 = vshrl.u32 %v6520_v21, 16  ;;  %v7937_v62 = vshrl.u32 %v6494_v6, 16  ;;  %p10502_p3 = pnand %p10501_p0, %p10497_p10 }
 0x2c4   : > { %v6521_v61 = vrot.slane %v6516_v27, 4  ;;  %v7927_v51 = vpack.i.b16 %v6516_v27, %v6488_v7  ;;  %v7930_v30 = vshrl.u32 %v6516_v27, 16  ;;  %v3762_v13 = vsel %vm2869_vm7, 0, %v3761_v40 }
 0x2c5   : > { %v6524_v36 = vsel %vm2869_vm7, 0, %v6523_v19  ;;  %v7947_v34 = vpack.i.b16 %v7946_v18, %v7945_v0  ;;  %8644 = vst.msk [vmem:[%s11304_s16 + $0x238] sm:$0xf] %vm8501_vm8, %v7943_v16  ;;  %v5143_v15 = vpack.i.b16 %v3756_v24, %v12514_v10  ;;  %v5146_v17 = vshrl.u32 %v3756_v24, 16  ;;  %v14895_v19 = vld [vmem:[#allocation44_spill] sm:$0xff] }
 0x2c6   : > { %v6522_v26 = vsel %vm2869_vm7, 0, %v6521_v61  ;;  %v7931_v20 = vpack.i.b16 %v7930_v30, %v7929_v1  ;;  %v7951_v54 = vpack.i.b16 %v6524_v36, %v6496_v45  ;;  %v7954_v42 = vshrl.u32 %v6524_v36, 16  ;;  %8516 = vst.msk [vmem:[%s11304_s16 + $0x38] sm:$0xf] %vm8501_vm8, %v7927_v51 }
 0x2c7   : > { %v7935_v7 = vpack.i.b16 %v6522_v26, %v6494_v6  ;;  %v7938_v38 = vshrl.u32 %v6522_v26, 16  ;;  %8676 = vst.msk [vmem:[%s11304_s16 + $0x2b8] sm:$0xf] %vm8501_vm8, %v7947_v34  ;;  %v5151_v41 = vpack.i.b16 %v3762_v13, %v12542_v22  ;;  %v5154_v21 = vshrl.u32 %v3762_v13, 16 }
 0x2c8   : > { %v7955_v0 = vpack.i.b16 %v7954_v42, %v7953_v49  ;;  %8548 = vst.msk [vmem:[%s11304_s16 + $0xb8] sm:$0xf] %vm8501_vm8, %v7931_v20  ;;  %v5159_v45 = vpack.i.b16 %v3760_v5, %v12506_v11  ;;  %v5162_v27 = vshrl.u32 %v3760_v5, 16  ;;  %v5167_v40 = vpack.i.b16 %v3764_v31, %v12533_v43 }
 0x2c9   : > { %v7939_v1 = vpack.i.b16 %v7938_v38, %v7937_v62  ;;  %8580 = vst.msk [vmem:[%s11304_s16 + $0x138] sm:$0xf] %vm8501_vm8, %v7935_v7  ;;  %v5170_v23 = vshrl.u32 %v3764_v31, 16  ;;  %v3888_v6 = vperm.slane %v2553_v50, %v11078_v35  ;;  %v3779_v16 = vrot.slane %v14895_v19, 4 }
 0x2ca   : > { %8708 = vst.msk [vmem:[%s11304_s16 + $0x338] sm:$0xf] %vm8501_vm8, %v7951_v54  ;;  %v12779_v24 = vperm.slane %v11335_v3, %v11078_v35  ;;  %v14896_v18 = vshrl.u32 %v12514_v10, 16  ;;  %v14897_v5 = vshrl.u32 %v12506_v11, 16  ;;  %v6525_v30 = vrot.slane %v5159_v45, 4  ;;  %v2549_v10 = vpop.permute.xlu0 %2548 }
 0x2cb   : > { %8612 = vst.msk [vmem:[%s11304_s16 + $0x1b8] sm:$0xf] %vm8501_vm8, %v7939_v1  ;;  %v6531_v62 = vrot.slane %v5167_v40, 4  ;;  %v14898_v36 = vshrl.u32 %v12542_v22, 16  ;;  %v14899_v49 = vshrl.u32 %v12533_v43, 16  ;;  %v3889_v3 = vrot.slane %v3888_v6, 4 }
 0x2cc   : > { %v5147_v61 = vpack.i.b16 %v5146_v17, %v14896_v18  ;;  %v5163_v51 = vpack.i.b16 %v5162_v27, %v14897_v5  ;;  %8740 = vst.msk [vmem:[%s11304_s16 + $0x3b8] sm:$0xf] %vm8501_vm8, %v7955_v0  ;;  %v3892_v26 = vsel %vm2869_vm7, %v3888_v6, %v3891_v32  ;;  %v6526_v20 = vsel %vm2869_vm7, %v6525_v30, %v5143_v15  ;;  %v12818_v27 = vld [vmem:[#allocation7] sm:$0x3f] }
 0x2cd   : > { %v5155_v34 = vpack.i.b16 %v5154_v21, %v14898_v36  ;;  %v5171_v13 = vpack.i.b16 %v5170_v23, %v14899_v49  ;;  %v6532_v11 = vsel %vm2869_vm7, %v6531_v62, %v5151_v41  ;;  %v12799_v42 = vperm.slane %v3892_v26, %v11103_v57  ;;  %v10264_v49 = vld [vmem:[#allocation5 + $0x234] sm:$0xf0] }
 0x2ce   : > { %v6553_v54 = vrot.slane %v5163_v51, 4  ;;  %v6530_v22 = vperm.slane %v6526_v20, %v11078_v35  ;;  %v6536_v7 = vperm.slane %v6532_v11, %v11078_v35  ;;  %v3890_v38 = vsel %vm2869_vm7, %v3889_v3, %v11518_v37 }
 0x2cf   : > { %v6559_v43 = vrot.slane %v5171_v13, 4  ;;  %v12807_v32 = vperm.slane %v3890_v38, %v11103_v57  ;;  %v3903_v15 = vrot.slane %v12799_v42, 4  ;;  %v3776_v50 = vperm.slane %v2549_v10, %v11078_v35 }
 0x2d0   : > { %v6554_v31 = vsel %vm2869_vm7, %v6553_v54, %v5147_v61  ;;  %v6537_v0 = vrot.slane %v6536_v7, 4  ;;  %v6539_v17 = vrot.slane %v6530_v22, 4  ;;  %v12821_v40 = vperm.slane %v12818_v27, 2 }
 0x2d1   : > { %v6558_v41 = vperm.slane %v6554_v31, %v11078_v35  ;;  %v6560_v21 = vsel %vm2869_vm7, %v6559_v43, %v5155_v34  ;;  %v3901_v45 = vrot.slane %v12807_v32, 4  ;;  %v12816_v37 = vsel %vm2869_vm7, 0, %v3903_v15  ;;  %v1493_v43 = vpop.f32.mrf.mxu0 }
 0x2d2   : > { %v6564_v1 = vperm.slane %v6560_v21, %v11078_v35  ;;  %v6538_v23 = vsel %vm2869_vm7, %v6537_v0, %v6530_v22  ;;  %v6540_v6 = vsel %vm2869_vm7, %v6536_v7, %v6539_v17  ;;  %v3777_v13 = vrot.slane %v3776_v50, 4 }
 0x2d3   : > { %v6567_v18 = vrot.slane %v6558_v41, 4  ;;  %v6544_v5 = vperm.slane %v6538_v23, %v11103_v57  ;;  %v6548_v51 = vperm.slane %v6540_v6, %v11103_v57  ;;  %v12831_v34 = vsel %vm2869_vm7, 0, %v3901_v45  ;;  %v1582_v45 = vpop.f32.mrf.mxu1  ;;  %v10213_v23 = vld [vmem:[#allocation5 + $0xa4] sm:$0xf]  ;;  %v9734_v6 = vld [vmem:[#allocation5 + $0xb8] sm:$0xf0] }
 0x2d4   : > { %v6565_v30 = vrot.slane %v6564_v1, 4  ;;  %v3778_v22 = vsel %vm2869_vm7, %v3777_v13, %v14895_v19  ;;  %v3780_v7 = vsel %vm2869_vm7, %v3776_v50, %v3779_v16 }
 0x2d5   : > { %v6568_v36 = vsel %vm2869_vm7, %v6564_v1, %v6567_v18  ;;  %v6549_v3 = vrot.slane %v6544_v5, 4  ;;  %v6551_v26 = vrot.slane %v6548_v51, 4  ;;  %v7961_v54 = vshrl.u32 %v6544_v5, 16  ;;  %v1671_v18 = vpop.f32.mrf.mxu2 }
 0x2d6   : > { %v6566_v10 = vsel %vm2869_vm7, %v6565_v30, %v6558_v41  ;;  %v6576_v20 = vperm.slane %v6568_v36, %v11103_v57  ;;  %v7977_v1 = vshrl.u32 %v6548_v51, 16  ;;  %v12846_v30 = vperm.slane %v3778_v22, %v11103_v57 }
 0x2d7   : > { %v6572_v11 = vperm.slane %v6566_v10, %v11103_v57  ;;  %v6550_v38 = vsel %vm2869_vm7, 0, %v6549_v3  ;;  %v6552_v31 = vsel %vm2869_vm7, 0, %v6551_v26 }
 0x2d8   : > { %v6579_v15 = vrot.slane %v6576_v20, 4  ;;  %v7975_v0 = vpack.i.b16 %v6576_v20, %v6548_v51  ;;  %v7969_v16 = vshrl.u32 %v6550_v38, 16  ;;  %v7978_v50 = vshrl.u32 %v6576_v20, 16  ;;  %v1760_v51 = vpop.f32.mrf.mxu3 }
 0x2d9   : > { %v6577_v17 = vrot.slane %v6572_v11, 4  ;;  %v7959_v41 = vpack.i.b16 %v6572_v11, %v6544_v5  ;;  %v7962_v21 = vshrl.u32 %v6572_v11, 16  ;;  %v7985_v13 = vshrl.u32 %v6552_v31, 16 }
 0x2da   : > { %v6580_v19 = vsel %vm2869_vm7, 0, %v6579_v15  ;;  %8645 = vst.msk [vmem:[%s11304_s16 + $0x23c] sm:$0xf] %vm8501_vm8, %v7975_v0  ;;  %v7979_v11 = vpack.i.b16 %v7978_v50, %v7977_v1  ;;  %v12852_v20 = vperm.slane %v3780_v7, %v11103_v57  ;;  %v10261_v15 = vld [vmem:[#allocation5 + $0x224] sm:$0xf]  ;;  %v9737_v1 = vor.u32 %v10213_v23, %v9734_v6 }
 0x2db   : > { %v6578_v36 = vsel %vm2869_vm7, 0, %v6577_v17  ;;  %v7963_v5 = vpack.i.b16 %v7962_v21, %v7961_v54  ;;  %v7986_v3 = vshrl.u32 %v6580_v19, 16  ;;  %8517 = vst.msk [vmem:[%s11304_s16 + $0x3c] sm:$0xf] %vm8501_vm8, %v7959_v41  ;;  %v9926_v0 = vld [vmem:[#allocation5 + $0x238] sm:$0xf0]  ;;  %v7983_v22 = vpack.i.b16 %v6580_v19, %v6552_v31  ;;  %v2421_v21 = vpop.permute.xlu1 %2420 }
 0x2dc   : > { %v7967_v26 = vpack.i.b16 %v6578_v36, %v6550_v38  ;;  %v7970_v10 = vshrl.u32 %v6578_v36, 16  ;;  %v3789_v17 = vrot.slane %v12846_v30, 4  ;;  %v1494_v41 = vadd.f32 %v1493_v43, %v12821_v40  ;;  %8677 = vst.msk [vmem:[%s11304_s16 + $0x2bc] sm:$0xf] %vm8501_vm8, %v7979_v11  ;;  %2022 = vmatpush.bf16.msra.mxu2 %v9737_v1 }
 0x2dd   : > { %8549 = vst.msk [vmem:[%s11304_s16 + $0xbc] sm:$0xf] %vm8501_vm8, %v7963_v5  ;;  %v7987_v36 = vpack.i.b16 %v7986_v3, %v7985_v13  ;;  %v3791_v7 = vrot.slane %v12852_v20, 4  ;;  %v5177_v31 = vshrl.u32 %v12846_v30, 16  ;;  %v9929_v19 = vor.u32 %v10261_v15, %v9926_v0  ;;  %v2683_v13 = vpop.permute.xlu2 %2682  ;;  %v2679_v3 = vpop.permute.xlu0 %2678  ;;  %v10216_v0 = vld [vmem:[#allocation5 + $0xb4] sm:$0xf0] }
 0x2de   : > { %v7971_v38 = vpack.i.b16 %v7970_v10, %v7969_v16  ;;  %8581 = vst.msk [vmem:[%s11304_s16 + $0x13c] sm:$0xf] %vm8501_vm8, %v7967_v26  ;;  %v12866_v50 = vperm.slane %v12818_v27, 3  ;;  %v12869_v5 = vsel %vm2869_vm7, 0, %v3789_v17  ;;  %v5193_v16 = vshrl.u32 %v12852_v20, 16  ;;  %v1673_v54 = vpop.f32.mrf.mxu2 }
 0x2df   : > { %v12874_v43 = vsel %vm2869_vm7, 0, %v3791_v7  ;;  %v12877_v23 = vadd.f32 %v1582_v45, %v1494_v41  ;;  %v3798_v6 = vperm.slane %v2421_v21, %v11078_v35  ;;  %v9732_v27 = vld [vmem:[#allocation5 + $0xa0] sm:$0xf]  ;;  %8709 = vst.msk [vmem:[%s11304_s16 + $0x33c] sm:$0xf] %vm8501_vm8, %v7983_v22  ;;  %2111 = vmatpush.bf16.msra.mxu3 %v9929_v19  ;;  %v5185_v10 = vshrl.u32 %v12869_v5, 16  ;;  %v1495_v45 = vpop.f32.mrf.mxu0 }
 0x2e0   : > { %8613 = vst.msk [vmem:[%s11304_s16 + $0x1bc] sm:$0xf] %vm8501_vm8, %v7971_v38  ;;  %v1672_v26 = vadd.f32 %v1671_v18, %v12866_v50  ;;  %v12885_v11 = vperm.slane %v2683_v13, %v11078_v35  ;;  %v3860_v15 = vperm.slane %v2679_v3, %v11078_v35  ;;  %v14900_v17 = vrot.slane %v12589_v12, 4  ;;  %v9924_v18 = vld [vmem:[#allocation5 + $0x220] sm:$0xf]  ;;  %v1584_v3 = vpop.f32.mrf.mxu1  ;;  %v1762_v14 = vpop.f32.mrf.mxu3 }
 0x2e1   : > { %8741 = vst.msk [vmem:[%s11304_s16 + $0x3bc] sm:$0xf] %vm8501_vm8, %v7987_v36  ;;  %v3807_v21 = vrot.slane %v3798_v6, 4  ;;  %v1496_v22 = vadd.f32 %v1495_v45, %v12821_v40  ;;  %v9733_v38 = vor.u32 %v10216_v0, %v9732_v27  ;;  %v14901_v7 = vld [vmem:[#allocation32_spill] sm:$0xff]  ;;  %v5201_v1 = vshrl.u32 %v12874_v43, 16 }
 0x2e2   : > { %v3806_v41 = vsel %vm2869_vm7, %v14900_v17, %v3798_v6  ;;  %1552 = vmatmul.bf16.gmra.mxu0 %v14901_v7  ;;  %v3861_v13 = vrot.slane %v3860_v15, 4  ;;  %v12899_v36 = vperm.slane %v11484_v2, %v11078_v35  ;;  %v14902_v17 = vld [vmem:[#allocation33_spill] sm:$0xff]  ;;  %1730 = vmatmul.bf16.gmra.mxu2 %v14901_v7  ;;  %v3864_v27 = vsel %vm2869_vm7, %v3860_v15, %v3863_v44 }
 0x2e3   : > { %v3812_v19 = vperm.slane %v3806_v41, %v11103_v57  ;;  %1641 = vmatmul.bf16.gmra.mxu1 %v14902_v17  ;;  %v3808_v6 = vsel %vm2869_vm7, %v12589_v12, %v3807_v21  ;;  %v1585_v45 = vadd.f32 %v1584_v3, %v1496_v22  ;;  %1844 = vmatpush.bf16.msra.mxu0 %v9733_v38  ;;  %v3973_v9 = vrot.slane %v12885_v11, 4 }
 0x2e4   : > { %v9925_v0 = vor.u32 %v10264_v49, %v9924_v18  ;;  %v1761_v41 = vadd.f32 %v1760_v51, %v1672_v26  ;;  %v3816_v61 = vperm.slane %v3808_v6, %v11103_v57  ;;  %1819 = vmatmul.bf16.gmra.mxu3 %v14902_v17  ;;  %v3862_v12 = vsel %vm2869_vm7, %v3861_v13, %v12723_v48 }
 0x2e5   : > { %v3817_v62 = vrot.slane %v3812_v19, 4  ;;  %v5178_v2 = vshrl.u32 %v3812_v19, 16  ;;  %v5175_v7 = vpack.i.b16 %v3812_v19, %v12846_v30  ;;  %v12915_v44 = vperm.slane %v3864_v27, %v11103_v57 }
 0x2e6   : > { %1933 = vmatpush.bf16.msra.mxu1 %v9925_v0  ;;  %v3819_v51 = vrot.slane %v3816_v61, 4  ;;  %v5191_v26 = vpack.i.b16 %v3816_v61, %v12852_v20  ;;  %v2228_v15 = vpack.c.bf16 %v1585_v45, %v12877_v23  ;;  %v5194_v22 = vshrl.u32 %v3816_v61, 16 }
 0x2e7   : > { %v3818_v49 = vsel %vm2869_vm7, 0, %v3817_v62  ;;  %v5179_v21 = vpack.i.b16 %v5178_v2, %v5177_v31  ;;  %v12921_v30 = vperm.slane %v3862_v12, %v11103_v57  ;;  %v1674_v38 = vadd.f32 %v1673_v54, %v12866_v50 }
 0x2e8   : > { %v3820_v48 = vsel %vm2869_vm7, 0, %v3819_v51  ;;  %v5186_v18 = vshrl.u32 %v3818_v49, 16  ;;  %v6581_v19 = vrot.slane %v5191_v26, 4  ;;  %v3875_v13 = vrot.slane %v12915_v44, 4 }
 0x2e9   : > { %v5183_v62 = vpack.i.b16 %v3818_v49, %v12869_v5  ;;  %v5195_v3 = vpack.i.b16 %v5194_v22, %v5193_v16  ;;  %v5199_v20 = vpack.i.b16 %v3820_v48, %v12874_v43  ;;  %v5202_v6 = vshrl.u32 %v3820_v48, 16 }
 0x2ea   : > { %v6582_v31 = vsel %vm2869_vm7, %v6581_v19, %v5175_v7  ;;  %v3873_v61 = vrot.slane %v12921_v30, 4  ;;  %v12931_v23 = vsel %vm2869_vm7, 0, %v3875_v13  ;;  %v5226_v54 = vshrl.u32 %v12915_v44, 16  ;;  %v2551_v7 = vpop.permute.xlu1 %2550 }
 0x2eb   : > { %v5203_v27 = vpack.i.b16 %v5202_v6, %v5201_v1  ;;  %v6586_v45 = vperm.slane %v6582_v31, %v11078_v35  ;;  %v6587_v0 = vrot.slane %v5199_v20, 4  ;;  %v6609_v2 = vrot.slane %v5195_v3, 4 }
 0x2ec   : > { %v5187_v12 = vpack.i.b16 %v5186_v18, %v5185_v10  ;;  %v12936_v5 = vsel %vm2869_vm7, 0, %v3873_v61  ;;  %v5210_v43 = vshrl.u32 %v12921_v30, 16  ;;  %v1763_v16 = vadd.f32 %v1762_v14, %v1674_v38 }
 0x2ed   : > { %v6588_v49 = vsel %vm2869_vm7, %v6587_v0, %v5183_v62  ;;  %v6595_v51 = vrot.slane %v6586_v45, 4  ;;  %v6610_v26 = vsel %vm2869_vm7, %v6609_v2, %v5179_v21  ;;  %v6615_v22 = vrot.slane %v5203_v27, 4 }
 0x2ee   : > { %v6592_v1 = vperm.slane %v6588_v49, %v11078_v35  ;;  %v6614_v48 = vperm.slane %v6610_v26, %v11078_v35  ;;  %v5234_v19 = vshrl.u32 %v12931_v23, 16  ;;  %v2229_v10 = vpack.c.bf16 %v1763_v16, %v1761_v41 }
 0x2ef   : > { %v6616_v18 = vsel %vm2869_vm7, %v6615_v22, %v5187_v12  ;;  %v5218_v13 = vshrl.u32 %v12936_v5, 16  ;;  %v3835_v14 = vrot.slane %v12779_v24, 4  ;;  %v3832_v38 = vperm.slane %v2551_v7, %v11078_v35 }
 0x2f0   : > { %v6593_v62 = vrot.slane %v6592_v1, 4  ;;  %v6596_v3 = vsel %vm2869_vm7, %v6592_v1, %v6595_v51  ;;  %v6620_v21 = vperm.slane %v6616_v18, %v11078_v35  ;;  %v6623_v20 = vrot.slane %v6614_v48, 4  ;;  %8758 = vxpose.binary.xlu0.c.b16.start [1/16] %v2229_v10, %v2228_v15, 128 }
 0x2f1   : > { %v6604_v6 = vperm.slane %v6596_v3, %v11103_v57  ;;  %v3833_v31 = vrot.slane %v3832_v38, 4  ;;  %v3836_v41 = vsel %vm2869_vm7, %v3832_v38, %v3835_v14  ;;  %v12954_v61 = vperm.slane %v11763_v58, %v11078_v35 }
 0x2f2   : > { %v6594_v27 = vsel %vm2869_vm7, %v6593_v62, %v6586_v45  ;;  %v6621_v0 = vrot.slane %v6620_v21, 4  ;;  %v6624_v2 = vsel %vm2869_vm7, %v6620_v21, %v6623_v20  ;;  %v3844_v12 = vperm.slane %v3836_v41, %v11103_v57 }
 0x2f3   : > { %v6600_v16 = vperm.slane %v6594_v27, %v11103_v57  ;;  %v6607_v7 = vrot.slane %v6604_v6, 4  ;;  %v6632_v15 = vperm.slane %v6624_v2, %v11103_v57  ;;  %v8009_v49 = vshrl.u32 %v6604_v6, 16 }
 0x2f4   : > { %v6622_v51 = vsel %vm2869_vm7, %v6621_v0, %v6614_v48  ;;  %v3834_v26 = vsel %vm2869_vm7, %v3833_v31, %v12779_v24  ;;  %v3847_v58 = vrot.slane %v3844_v12, 4  ;;  %v5223_v22 = vpack.i.b16 %v12915_v44, %v3844_v12 }
 0x2f5   : > { %v6605_v45 = vrot.slane %v6600_v16, 4  ;;  %v6608_v1 = vsel %vm2869_vm7, 0, %v6607_v7  ;;  %v6628_v10 = vperm.slane %v6622_v51, %v11103_v57  ;;  %v6635_v18 = vrot.slane %v6632_v15, 4 }
 0x2f6   : > { %v7993_v14 = vshrl.u32 %v6600_v16, 16  ;;  %v8007_v38 = vpack.i.b16 %v6632_v15, %v6604_v6  ;;  %v8010_v62 = vshrl.u32 %v6632_v15, 16  ;;  %v8017_v3 = vshrl.u32 %v6608_v1, 16 }
 0x2f7   : > { %v6606_v48 = vsel %vm2869_vm7, 0, %v6605_v45  ;;  %v6633_v21 = vrot.slane %v6628_v10, 4  ;;  %v6636_v24 = vsel %vm2869_vm7, 0, %v6635_v18  ;;  %v7991_v20 = vpack.i.b16 %v6628_v10, %v6600_v16 }
 0x2f8   : > { %v7994_v31 = vshrl.u32 %v6628_v10, 16  ;;  %v8001_v41 = vshrl.u32 %v6606_v48, 16  ;;  %v8011_v27 = vpack.i.b16 %v8010_v62, %v8009_v49  ;;  %v8015_v0 = vpack.i.b16 %v6636_v24, %v6608_v1  ;;  %8646 = vst.msk [vmem:[%s11304_s16 + $0x240] sm:$0xf] %vm8501_vm8, %v8007_v38 }
 0x2f9   : > { %v6634_v2 = vsel %vm2869_vm7, 0, %v6633_v21  ;;  %v8018_v6 = vshrl.u32 %v6636_v24, 16  ;;  %8518 = vst.msk [vmem:[%s11304_s16 + $0x40] sm:$0xf] %vm8501_vm8, %v7991_v20  ;;  %v3840_v7 = vperm.slane %v3834_v26, %v11103_v57  ;;  %v3848_v15 = vsel %vm2869_vm7, 0, %v3847_v58 }
 0x2fa   : > { %v7995_v51 = vpack.i.b16 %v7994_v31, %v7993_v14  ;;  %v7999_v45 = vpack.i.b16 %v6634_v2, %v6606_v48  ;;  %v8002_v16 = vshrl.u32 %v6634_v2, 16  ;;  %8678 = vst.msk [vmem:[%s11304_s16 + $0x2c0] sm:$0xf] %vm8501_vm8, %v8011_v27  ;;  %v5225_v49 = vshrl.u32 %v3844_v12, 16  ;;  %v2429_v48 = vpop.permute.xlu2 %2428  ;;  %v2425_v12 = vpop.permute.xlu0 %2424 }
 0x2fb   : > { %v8019_v1 = vpack.i.b16 %v8018_v6, %v8017_v3  ;;  %8710 = vst.msk [vmem:[%s11304_s16 + $0x340] sm:$0xf] %vm8501_vm8, %v8015_v0  ;;  %v3845_v10 = vrot.slane %v3840_v7, 4  ;;  %v5207_v18 = vpack.i.b16 %v12921_v30, %v3840_v7  ;;  %v5209_v38 = vshrl.u32 %v3840_v7, 16  ;;  %v1676_v2 = vpop.f32.mrf.mxu2 }
 0x2fc   : > { %v8003_v62 = vpack.i.b16 %v8002_v16, %v8001_v41  ;;  %8550 = vst.msk [vmem:[%s11304_s16 + $0xc0] sm:$0xf] %vm8501_vm8, %v7995_v51  ;;  %v5227_v26 = vpack.i.b16 %v5226_v54, %v5225_v49  ;;  %v5231_v58 = vpack.i.b16 %v12931_v23, %v3848_v15  ;;  %v5233_v14 = vshrl.u32 %v3848_v15, 16  ;;  %v1587_v15 = vpop.f32.mrf.mxu1  ;;  %v2681_v51 = vpop.permute.xlu1 %2680 }
 0x2fd   : > { %8582 = vst.msk [vmem:[%s11304_s16 + $0x140] sm:$0xf] %vm8501_vm8, %v7999_v45  ;;  %v3846_v3 = vsel %vm2869_vm7, 0, %v3845_v10  ;;  %v5211_v21 = vpack.i.b16 %v5210_v43, %v5209_v38  ;;  %v6637_v24 = vrot.slane %v5223_v22, 4  ;;  %v3947_v20 = vrot.slane %v12899_v36, 4  ;;  %v1498_v22 = vpop.f32.mrf.mxu0 }
 0x2fe   : > { %8614 = vst.msk [vmem:[%s11304_s16 + $0x1c0] sm:$0xf] %vm8501_vm8, %v8003_v62  ;;  %v5215_v44 = vpack.i.b16 %v12936_v5, %v3846_v3  ;;  %v5217_v54 = vshrl.u32 %v3846_v3, 16  ;;  %v5235_v31 = vpack.i.b16 %v5234_v19, %v5233_v14  ;;  %v6643_v41 = vrot.slane %v5231_v58, 4 }
 0x2ff   : > { %8742 = vst.msk [vmem:[%s11304_s16 + $0x3c0] sm:$0xf] %vm8501_vm8, %v8019_v1  ;;  %v6638_v27 = vsel %vm2869_vm7, %v6637_v24, %v5207_v18  ;;  %v6665_v0 = vrot.slane %v5227_v26, 4  ;;  %v13001_v30 = vperm.slane %v2429_v48, %v11078_v35  ;;  %v3910_v43 = vperm.slane %v2425_v12, %v11078_v35  ;;  %v1765_v1 = vpop.f32.mrf.mxu3 }
 0x300   : > { %v5219_v6 = vpack.i.b16 %v5218_v13, %v5217_v54  ;;  %v6642_v7 = vperm.slane %v6638_v27, %v11078_v35  ;;  %v6644_v23 = vsel %vm2869_vm7, %v6643_v41, %v5215_v44  ;;  %v6671_v19 = vrot.slane %v5235_v31, 4 }
 0x301   : > { %v6648_v45 = vperm.slane %v6644_v23, %v11078_v35  ;;  %v6666_v16 = vsel %vm2869_vm7, %v6665_v0, %v5211_v21  ;;  %v1499_v49 = vadd.f32 %v1498_v22, %v12821_v40  ;;  %v4059_v10 = vrot.slane %v12954_v61, 4 }
 0x302   : > { %v6651_v18 = vrot.slane %v6642_v7, 4  ;;  %v6670_v5 = vperm.slane %v6666_v16, %v11078_v35  ;;  %v6672_v13 = vsel %vm2869_vm7, %v6671_v19, %v5219_v6  ;;  %v1677_v38 = vadd.f32 %v1676_v2, %v12866_v50 }
 0x303   : > { %v6649_v62 = vrot.slane %v6648_v45, 4  ;;  %v6676_v26 = vperm.slane %v6672_v13, %v11078_v35  ;;  %v4031_v58 = vrot.slane %v13001_v30, 4  ;;  %v3916_v14 = vperm.slane %v2681_v51, %v11078_v35  ;;  %v2559_v13 = vpop.permute.xlu2 %2558 }
 0x304   : > { %v6652_v48 = vsel %vm2869_vm7, %v6648_v45, %v6651_v18  ;;  %v6679_v12 = vrot.slane %v6670_v5, 4  ;;  %v3919_v3 = vrot.slane %v3910_v43, 4  ;;  %v13019_v21 = vadd.f32 %v1587_v15, %v1499_v49 }
 0x305   : > { %v6650_v24 = vsel %vm2869_vm7, %v6649_v62, %v6642_v7  ;;  %v6660_v44 = vperm.slane %v6652_v48, %v11103_v57  ;;  %v6677_v54 = vrot.slane %v6676_v26, 4  ;;  %v3917_v31 = vrot.slane %v3916_v14, 4  ;;  %v13036_v48 = vpop.f32.mrf.mxu1 }
 0x306   : > { %v6656_v41 = vperm.slane %v6650_v24, %v11103_v57  ;;  %v6680_v27 = vsel %vm2869_vm7, %v6676_v26, %v6679_v12  ;;  %v13025_v0 = vadd.f32 %v1765_v1, %v1677_v38  ;;  %v3920_v22 = vsel %vm2869_vm7, %v3916_v14, %v3919_v3  ;;  %v13034_v14 = vpop.f32.mrf.mxu0  ;;  %v14903_v12 = vld [vmem:[#allocation34_spill] sm:$0xff] }
 0x307   : > { %v6663_v2 = vrot.slane %v6660_v44, 4  ;;  %v6678_v6 = vsel %vm2869_vm7, %v6677_v54, %v6670_v5  ;;  %v6688_v23 = vperm.slane %v6680_v27, %v11103_v57  ;;  %v8041_v19 = vshrl.u32 %v6660_v44, 16  ;;  %1557 = vmatmul.bf16.gmra.mxu0 %v14903_v12 }
 0x308   : > { %v6661_v15 = vrot.slane %v6656_v41, 4  ;;  %v6684_v7 = vperm.slane %v6678_v6, %v11103_v57  ;;  %v8025_v51 = vshrl.u32 %v6656_v41, 16  ;;  %v3918_v45 = vsel %vm2869_vm7, %v3917_v31, %v3910_v43  ;;  %v14904_v43 = vld [vmem:[#allocation35_spill] sm:$0xff]  ;;  %v13043_v31 = vpop.f32.mrf.mxu2  ;;  %1735 = vmatmul.bf16.gmra.mxu2 %v14903_v12 }
 0x309   : > { %v6664_v16 = vsel %vm2869_vm7, 0, %v6663_v2  ;;  %v6691_v49 = vrot.slane %v6688_v23, 4  ;;  %v8039_v1 = vpack.i.b16 %v6688_v23, %v6660_v44  ;;  %v8042_v18 = vshrl.u32 %v6688_v23, 16  ;;  %1646 = vmatmul.bf16.gmra.mxu1 %v14904_v43 }
 0x30a   : > { %v6662_v38 = vsel %vm2869_vm7, 0, %v6661_v15  ;;  %v6689_v62 = vrot.slane %v6684_v7, 4  ;;  %v8023_v5 = vpack.i.b16 %v6684_v7, %v6656_v41  ;;  %v8026_v26 = vshrl.u32 %v6684_v7, 16  ;;  %v13045_v41 = vpop.f32.mrf.mxu3  ;;  %1824 = vmatmul.bf16.gmra.mxu3 %v14904_v43 }
 0x30b   : > { %v6692_v3 = vsel %vm2869_vm7, 0, %v6691_v49  ;;  %v8033_v24 = vshrl.u32 %v6662_v38, 16  ;;  %v8043_v44 = vpack.i.b16 %v8042_v18, %v8041_v19  ;;  %v8049_v54 = vshrl.u32 %v6664_v16, 16  ;;  %8647 = vst.msk [vmem:[%s11304_s16 + $0x244] sm:$0xf] %vm8501_vm8, %v8039_v1  ;;  %v2555_v19 = vpop.permute.xlu0 %2554 }
 0x30c   : > { %v6690_v27 = vsel %vm2869_vm7, 0, %v6689_v62  ;;  %v8027_v2 = vpack.i.b16 %v8026_v26, %v8025_v51  ;;  %v8047_v6 = vpack.i.b16 %v6692_v3, %v6664_v16  ;;  %v8050_v23 = vshrl.u32 %v6692_v3, 16  ;;  %8519 = vst.msk [vmem:[%s11304_s16 + $0x44] sm:$0xf] %vm8501_vm8, %v8023_v5 }
 0x30d   : > { %v8031_v15 = vpack.i.b16 %v6690_v27, %v6662_v38  ;;  %v8034_v7 = vshrl.u32 %v6690_v27, 16  ;;  %8679 = vst.msk [vmem:[%s11304_s16 + $0x2c4] sm:$0xf] %vm8501_vm8, %v8043_v44  ;;  %v3924_v49 = vperm.slane %v3918_v45, %v11103_v57  ;;  %v3928_v1 = vperm.slane %v3920_v22, %v11103_v57 }
 0x30e   : > { %v8051_v18 = vpack.i.b16 %v8050_v23, %v8049_v54  ;;  %8551 = vst.msk [vmem:[%s11304_s16 + $0xc4] sm:$0xf] %vm8501_vm8, %v8027_v2  ;;  %v4056_v51 = vperm.slane %v2559_v13, %v11078_v35  ;;  %v4003_v16 = vrot.slane %v11714_v29, 4  ;;  %v3944_v45 = vperm.slane %v2555_v19, %v11078_v35 }
 0x30f   : > { %v8035_v5 = vpack.i.b16 %v8034_v7, %v8033_v24  ;;  %8583 = vst.msk [vmem:[%s11304_s16 + $0x144] sm:$0xf] %vm8501_vm8, %v8031_v15  ;;  %v3929_v38 = vrot.slane %v3924_v49, 4  ;;  %v3931_v26 = vrot.slane %v3928_v1, 4  ;;  %v5242_v22 = vshrl.u32 %v3924_v49, 16 }
 0x310   : > { %8711 = vst.msk [vmem:[%s11304_s16 + $0x344] sm:$0xf] %vm8501_vm8, %v8047_v6  ;;  %v5255_v3 = vpack.i.b16 %v3928_v1, %v12799_v42  ;;  %v5258_v44 = vshrl.u32 %v3928_v1, 16  ;;  %v4057_v54 = vrot.slane %v4056_v51, 4  ;;  %v5239_v24 = vpack.i.b16 %v3924_v49, %v12807_v32 }
 0x311   : > { %8615 = vst.msk [vmem:[%s11304_s16 + $0x1c4] sm:$0xf] %vm8501_vm8, %v8035_v5  ;;  %v3930_v13 = vsel %vm2869_vm7, 0, %v3929_v38  ;;  %v3932_v27 = vsel %vm2869_vm7, 0, %v3931_v26  ;;  %v4060_v2 = vsel %vm2869_vm7, %v4056_v51, %v4059_v10  ;;  %v14905_v6 = vshrl.u32 %v12807_v32, 16 }
 0x312   : > { %8743 = vst.msk [vmem:[%s11304_s16 + $0x3c4] sm:$0xf] %vm8501_vm8, %v8051_v18  ;;  %v5247_v19 = vpack.i.b16 %v3930_v13, %v12831_v34  ;;  %v5250_v15 = vshrl.u32 %v3930_v13, 16  ;;  %v14906_v7 = vshrl.u32 %v12799_v42, 16  ;;  %v5263_v5 = vpack.i.b16 %v3932_v27, %v12816_v37 }
 0x313   : > { %v5243_v23 = vpack.i.b16 %v5242_v22, %v14905_v6  ;;  %v5266_v38 = vshrl.u32 %v3932_v27, 16  ;;  %v6693_v26 = vrot.slane %v5255_v3, 4  ;;  %v4058_v49 = vsel %vm2869_vm7, %v4057_v54, %v12954_v61 }
 0x314   : > { %v5259_v1 = vpack.i.b16 %v5258_v44, %v14906_v7  ;;  %v13086_v10 = vperm.slane %v4058_v49, %v11103_v57  ;;  %v13089_v32 = vperm.slane %v4060_v2, %v11103_v57  ;;  %v3945_v18 = vrot.slane %v3944_v45, 4 }
 0x315   : > { %v14907_v51 = vshrl.u32 %v12831_v34, 16  ;;  %v14908_v42 = vshrl.u32 %v12816_v37, 16  ;;  %v6694_v13 = vsel %vm2869_vm7, %v6693_v26, %v5239_v24  ;;  %v6699_v3 = vrot.slane %v5263_v5, 4 }
 0x316   : > { %v6721_v62 = vrot.slane %v5259_v1, 4  ;;  %v6698_v27 = vperm.slane %v6694_v13, %v11078_v35  ;;  %v4069_v54 = vrot.slane %v13086_v10, 4  ;;  %v4071_v6 = vrot.slane %v13089_v32, 4 }
 0x317   : > { %v5251_v22 = vpack.i.b16 %v5250_v15, %v14907_v51  ;;  %v5267_v44 = vpack.i.b16 %v5266_v38, %v14908_v42  ;;  %v6700_v2 = vsel %vm2869_vm7, %v6699_v3, %v5247_v19  ;;  %v1501_v37 = vadd.f32 %v13034_v14, %v12821_v40 }
 0x318   : > { %v6722_v61 = vsel %vm2869_vm7, %v6721_v62, %v5243_v23  ;;  %v6704_v15 = vperm.slane %v6700_v2, %v11078_v35  ;;  %v6707_v24 = vrot.slane %v6698_v27, 4  ;;  %v13106_v1 = vsel %vm2869_vm7, 0, %v4069_v54 }
 0x319   : > { %v6726_v7 = vperm.slane %v6722_v61, %v11078_v35  ;;  %v6727_v34 = vrot.slane %v5267_v44, 4  ;;  %v3946_v62 = vsel %vm2869_vm7, %v3945_v18, %v12899_v36  ;;  %v13112_v19 = vsel %vm2869_vm7, 0, %v4071_v6 }
 0x31a   : > { %v6705_v26 = vrot.slane %v6704_v15, 4  ;;  %v6708_v14 = vsel %vm2869_vm7, %v6704_v15, %v6707_v24  ;;  %v3948_v18 = vsel %vm2869_vm7, %v3944_v45, %v3947_v20 }
 0x31b   : > { %v6728_v23 = vsel %vm2869_vm7, %v6727_v34, %v5251_v22  ;;  %v6735_v5 = vrot.slane %v6726_v7, 4  ;;  %v6716_v42 = vperm.slane %v6708_v14, %v11103_v57  ;;  %v13124_v22 = vperm.slane %v3946_v62, %v11103_v57 }
 0x31c   : > { %v6732_v49 = vperm.slane %v6728_v23, %v11078_v35  ;;  %v6706_v13 = vsel %vm2869_vm7, %v6705_v26, %v6698_v27  ;;  %v13129_v54 = vperm.slane %v3948_v18, %v11103_v57  ;;  %v13137_v27 = vadd.f32 %v13036_v48, %v1501_v37 }
 0x31d   : > { %v6712_v6 = vperm.slane %v6706_v13, %v11103_v57  ;;  %v6719_v2 = vrot.slane %v6716_v42, 4  ;;  %v8073_v45 = vshrl.u32 %v6716_v42, 16  ;;  %v3957_v15 = vrot.slane %v13124_v22, 4 }
 0x31e   : > { %v6733_v3 = vrot.slane %v6732_v49, 4  ;;  %v6736_v61 = vsel %vm2869_vm7, %v6732_v49, %v6735_v5  ;;  %v3959_v5 = vrot.slane %v13129_v54, 4 }
 0x31f   : > { %v6744_v34 = vperm.slane %v6736_v61, %v11103_v57  ;;  %v6717_v24 = vrot.slane %v6712_v6, 4  ;;  %v6720_v26 = vsel %vm2869_vm7, 0, %v6719_v2  ;;  %v8057_v61 = vshrl.u32 %v6712_v6, 16 }
 0x320   : > { %v6734_v20 = vsel %vm2869_vm7, %v6733_v3, %v6726_v7  ;;  %v5273_v7 = vshrl.u32 %v13124_v22, 16  ;;  %v2427_v3 = vpop.permute.xlu1 %2426  ;;  %v8081_v2 = vshrl.u32 %v6720_v26, 16 }
 0x321   : > { %v6740_v62 = vperm.slane %v6734_v20, %v11103_v57  ;;  %v6747_v23 = vrot.slane %v6744_v34, 4  ;;  %v8071_v14 = vpack.i.b16 %v6744_v34, %v6716_v42  ;;  %v8074_v49 = vshrl.u32 %v6744_v34, 16 }
 0x322   : > { %v6718_v18 = vsel %vm2869_vm7, 0, %v6717_v24  ;;  %v13151_v24 = vsel %vm2869_vm7, 0, %v3959_v5 }
 0x323   : > { %v6745_v13 = vrot.slane %v6740_v62, 4  ;;  %v6748_v48 = vsel %vm2869_vm7, 0, %v6747_v23  ;;  %v8055_v37 = vpack.i.b16 %v6740_v62, %v6712_v6  ;;  %v8058_v20 = vshrl.u32 %v6740_v62, 16  ;;  %8648 = vst.msk [vmem:[%s11304_s16 + $0x248] sm:$0xf] %vm8501_vm8, %v8071_v14 }
 0x324   : > { %v8075_v36 = vpack.i.b16 %v8074_v49, %v8073_v45  ;;  %v8079_v44 = vpack.i.b16 %v6748_v48, %v6720_v26  ;;  %v8082_v34 = vshrl.u32 %v6748_v48, 16  ;;  %v8065_v38 = vshrl.u32 %v6718_v18, 16  ;;  %v10207_v48 = vld [vmem:[#allocation5 + $0x74] sm:$0xf] }
 0x325   : > { %v6746_v42 = vsel %vm2869_vm7, 0, %v6745_v13  ;;  %8520 = vst.msk [vmem:[%s11304_s16 + $0x48] sm:$0xf] %vm8501_vm8, %v8055_v37  ;;  %v8059_v23 = vpack.i.b16 %v8058_v20, %v8057_v61  ;;  %v5289_v62 = vshrl.u32 %v13129_v54, 16  ;;  %v1679_v26 = vadd.f32 %v13043_v31, %v12866_v50  ;;  %v2689_v13 = vpop.permute.xlu2 %2688  ;;  %v1503_v61 = vpop.f32.mrf.mxu0  ;;  %v10255_v20 = vld [vmem:[#allocation5 + $0x1f4] sm:$0xf] }
 0x326   : > { %v8063_v51 = vpack.i.b16 %v6746_v42, %v6718_v18  ;;  %v8066_v6 = vshrl.u32 %v6746_v42, 16  ;;  %8680 = vst.msk [vmem:[%s11304_s16 + $0x2c8] sm:$0xf] %vm8501_vm8, %v8075_v36  ;;  %v8083_v45 = vpack.i.b16 %v8082_v34, %v8081_v2  ;;  %v13161_v14 = vsel %vm2869_vm7, 0, %v3957_v15 }
 0x327   : > { %8712 = vst.msk [vmem:[%s11304_s16 + $0x348] sm:$0xf] %vm8501_vm8, %v8079_v44  ;;  %v5297_v49 = vshrl.u32 %v13151_v24, 16  ;;  %v3966_v18 = vperm.slane %v2427_v3, %v11078_v35  ;;  %v5281_v36 = vshrl.u32 %v13161_v14, 16  ;;  %v2685_v44 = vpop.permute.xlu0 %2684  ;;  %v2230_v31 = vpack.c.bf16 %v13137_v27, %v13019_v21  ;;  %v9710_v3 = vld [vmem:[#allocation5 + $0x88] sm:$0xf0] }
 0x328   : > { %v8067_v5 = vpack.i.b16 %v8066_v6, %v8065_v38  ;;  %8552 = vst.msk [vmem:[%s11304_s16 + $0xc8] sm:$0xf] %vm8501_vm8, %v8059_v23  ;;  %v1768_v38 = vadd.f32 %v13045_v41, %v1679_v26  ;;  %v13174_v15 = vperm.slane %v2689_v13, %v11078_v35  ;;  %v4028_v37 = vperm.slane %v2685_v44, %v11078_v35  ;;  %v9902_v27 = vld [vmem:[#allocation5 + $0x208] sm:$0xf0] }
 0x329   : > { %8584 = vst.msk [vmem:[%s11304_s16 + $0x148] sm:$0xf] %vm8501_vm8, %v8063_v51  ;;  %v3974_v42 = vsel %vm2869_vm7, %v3973_v9, %v3966_v18  ;;  %v3975_v51 = vrot.slane %v3966_v18, 4  ;;  %v1504_v2 = vadd.f32 %v1503_v61, %v12821_v40  ;;  %v9713_v21 = vor.u32 %v10207_v48, %v9710_v3  ;;  %v1681_v18 = vpop.f32.mrf.mxu2  ;;  %v2557_v61 = vpop.permute.xlu1 %2556 }
 0x32a   : > { %8616 = vst.msk [vmem:[%s11304_s16 + $0x1c8] sm:$0xf] %vm8501_vm8, %v8067_v5  ;;  %v2231_v41 = vpack.c.bf16 %v1768_v38, %v13025_v0  ;;  %v3980_v34 = vperm.slane %v3974_v42, %v11103_v57  ;;  %v4029_v23 = vrot.slane %v4028_v37, 4  ;;  %v4032_v9 = vsel %vm2869_vm7, %v4028_v37, %v4031_v58  ;;  %v1592_v38 = vpop.f32.mrf.mxu1 }
 0x32b   : > { %8744 = vst.msk [vmem:[%s11304_s16 + $0x3c8] sm:$0xf] %vm8501_vm8, %v8083_v45  ;;  %v3976_v26 = vsel %vm2869_vm7, %v12885_v11, %v3975_v51  ;;  %2023 = vmatpush.bf16.msra.mxu2 %v9713_v21  ;;  %v9905_v5 = vor.u32 %v10255_v20, %v9902_v27  ;;  %v13195_v45 = vperm.slane %v11978_v59, %v11078_v35 }
 0x32c   : > { %v3984_v0 = vperm.slane %v3976_v26, %v11103_v57  ;;  %v3985_v13 = vrot.slane %v3980_v34, 4  ;;  %v5274_v44 = vshrl.u32 %v3980_v34, 16  ;;  %8759 = vxpose.binary.xlu0.c.b16.cont [2/16] %v2231_v41, %v2230_v31, 128  ;;  %v5271_v11 = vpack.i.b16 %v3980_v34, %v13124_v22 }
 0x32d   : > { %v4030_v58 = vsel %vm2869_vm7, %v4029_v23, %v13001_v30  ;;  %v13203_v37 = vperm.slane %v4032_v9, %v11103_v57  ;;  %v13205_v3 = vadd.f32 %v1592_v38, %v1504_v2  ;;  %2112 = vmatpush.bf16.msra.mxu3 %v9905_v5  ;;  %v1682_v51 = vadd.f32 %v1681_v18, %v12866_v50 }
 0x32e   : > { %v3986_v59 = vsel %vm2869_vm7, 0, %v3985_v13  ;;  %v3987_v20 = vrot.slane %v3984_v0, 4  ;;  %v5287_v42 = vpack.i.b16 %v3984_v0, %v13129_v54  ;;  %v5275_v31 = vpack.i.b16 %v5274_v44, %v5273_v7 }
 0x32f   : > { %v5290_v21 = vshrl.u32 %v3984_v0, 16  ;;  %v13213_v27 = vperm.slane %v4030_v58, %v11103_v57  ;;  %v4000_v30 = vperm.slane %v2557_v61, %v11078_v35  ;;  %v5282_v41 = vshrl.u32 %v3986_v59, 16 }
 0x330   : > { %v3988_v2 = vsel %vm2869_vm7, 0, %v3987_v20  ;;  %v6749_v34 = vrot.slane %v5287_v42, 4  ;;  %v4043_v23 = vrot.slane %v13203_v37, 4  ;;  %v5279_v26 = vpack.i.b16 %v3986_v59, %v13161_v14 }
 0x331   : > { %v5291_v54 = vpack.i.b16 %v5290_v21, %v5289_v62  ;;  %v5295_v9 = vpack.i.b16 %v3988_v2, %v13151_v24  ;;  %v5298_v5 = vshrl.u32 %v3988_v2, 16  ;;  %v4041_v7 = vrot.slane %v13213_v27, 4  ;;  %v1770_v62 = vpop.f32.mrf.mxu3 }
 0x332   : > { %v6750_v22 = vsel %vm2869_vm7, %v6749_v34, %v5271_v11  ;;  %v13223_v18 = vsel %vm2869_vm7, 0, %v4043_v23  ;;  %v5283_v58 = vpack.i.b16 %v5282_v41, %v5281_v36  ;;  %v4001_v20 = vrot.slane %v4000_v30, 4 }
 0x333   : > { %v5299_v13 = vpack.i.b16 %v5298_v5, %v5297_v49  ;;  %v6754_v44 = vperm.slane %v6750_v22, %v11078_v35  ;;  %v6755_v38 = vrot.slane %v5295_v9, 4  ;;  %v6777_v61 = vrot.slane %v5291_v54, 4 }
 0x334   : > { %v13232_v11 = vsel %vm2869_vm7, 0, %v4041_v7  ;;  %v4002_v14 = vsel %vm2869_vm7, %v4001_v20, %v11714_v29  ;;  %v13243_v41 = vadd.f32 %v1770_v62, %v1682_v51 }
 0x335   : > { %v6756_v42 = vsel %vm2869_vm7, %v6755_v38, %v5279_v26  ;;  %v6763_v21 = vrot.slane %v6754_v44, 4  ;;  %v6778_v24 = vsel %vm2869_vm7, %v6777_v61, %v5275_v31  ;;  %v6783_v49 = vrot.slane %v5299_v13, 4 }
 0x336   : > { %v6760_v2 = vperm.slane %v6756_v42, %v11078_v35  ;;  %v6782_v34 = vperm.slane %v6778_v24, %v11078_v35  ;;  %v4004_v26 = vsel %vm2869_vm7, %v4000_v30, %v4003_v16  ;;  %v13249_v31 = vperm.slane %v4002_v14, %v11103_v57  ;;  %v13271_v14 = vpop.f32.mrf.mxu1 }
 0x337   : > { %v6784_v36 = vsel %vm2869_vm7, %v6783_v49, %v5283_v58  ;;  %v13256_v51 = vperm.slane %v4004_v26, %v11103_v57  ;;  %v14910_v26 = vld [vmem:[#allocation37_spill] sm:$0xff] }
 0x338   : > { %v6761_v54 = vrot.slane %v6760_v2, 4  ;;  %v6764_v9 = vsel %vm2869_vm7, %v6760_v2, %v6763_v21  ;;  %v6788_v5 = vperm.slane %v6784_v36, %v11078_v35  ;;  %v6791_v22 = vrot.slane %v6782_v34, 4  ;;  %v1505_v2 = vpop.f32.mrf.mxu0  ;;  %v14909_v36 = vld [vmem:[#allocation36_spill] sm:$0xff]  ;;  %1651 = vmatmul.bf16.gmra.mxu1 %v14910_v26 }
 0x339   : > { %v6772_v7 = vperm.slane %v6764_v9, %v11103_v57  ;;  %v4013_v29 = vrot.slane %v13249_v31, 4  ;;  %v5305_v42 = vshrl.u32 %v13249_v31, 16  ;;  %1562 = vmatmul.bf16.gmra.mxu0 %v14909_v36 }
 0x33a   : > { %v6762_v16 = vsel %vm2869_vm7, %v6761_v54, %v6754_v44  ;;  %v6789_v30 = vrot.slane %v6788_v5, 4  ;;  %v6792_v38 = vsel %vm2869_vm7, %v6788_v5, %v6791_v22  ;;  %v4015_v44 = vrot.slane %v13256_v51, 4 }
 0x33b   : > { %v6768_v62 = vperm.slane %v6762_v16, %v11103_v57  ;;  %v6775_v58 = vrot.slane %v6772_v7, 4  ;;  %v6800_v20 = vperm.slane %v6792_v38, %v11103_v57  ;;  %v8105_v24 = vshrl.u32 %v6772_v7, 16 }
 0x33c   : > { %v6790_v21 = vsel %vm2869_vm7, %v6789_v30, %v6782_v34  ;;  %v13268_v49 = vsel %vm2869_vm7, 0, %v4013_v29  ;;  %v13277_v34 = vpop.f32.mrf.mxu2  ;;  %v13279_v29 = vpop.f32.mrf.mxu3  ;;  %1740 = vmatmul.bf16.gmra.mxu2 %v14909_v36  ;;  %1829 = vmatmul.bf16.gmra.mxu3 %v14910_v26 }
 0x33d   : > { %v6773_v54 = vrot.slane %v6768_v62, 4  ;;  %v6776_v9 = vsel %vm2869_vm7, 0, %v6775_v58  ;;  %v6796_v5 = vperm.slane %v6790_v21, %v11103_v57  ;;  %v6803_v22 = vrot.slane %v6800_v20, 4 }
 0x33e   : > { %v8089_v16 = vshrl.u32 %v6768_v62, 16  ;;  %v8103_v30 = vpack.i.b16 %v6800_v20, %v6772_v7  ;;  %v8106_v38 = vshrl.u32 %v6800_v20, 16  ;;  %v8113_v48 = vshrl.u32 %v6776_v9, 16 }
 0x33f   : > { %v6774_v6 = vsel %vm2869_vm7, 0, %v6773_v54  ;;  %v6801_v58 = vrot.slane %v6796_v5, 4  ;;  %v6804_v21 = vsel %vm2869_vm7, 0, %v6803_v22  ;;  %v8087_v61 = vpack.i.b16 %v6796_v5, %v6768_v62  ;;  %v9708_v22 = vld [vmem:[#allocation5 + $0x70] sm:$0xf] }
 0x340   : > { %v8090_v23 = vshrl.u32 %v6796_v5, 16  ;;  %v8097_v13 = vshrl.u32 %v6774_v6, 16  ;;  %v8107_v0 = vpack.i.b16 %v8106_v38, %v8105_v24  ;;  %v8111_v59 = vpack.i.b16 %v6804_v21, %v6776_v9  ;;  %8649 = vst.msk [vmem:[%s11304_s16 + $0x24c] sm:$0xf] %vm8501_vm8, %v8103_v30  ;;  %v2431_v9 = vpop.permute.xlu0 %2430 }
 0x341   : > { %v6802_v26 = vsel %vm2869_vm7, 0, %v6801_v58  ;;  %v8114_v36 = vshrl.u32 %v6804_v21, 16  ;;  %8521 = vst.msk [vmem:[%s11304_s16 + $0x4c] sm:$0xf] %vm8501_vm8, %v8087_v61  ;;  %v4016_v7 = vsel %vm2869_vm7, 0, %v4015_v44  ;;  %v5311_v20 = vpack.i.b16 %v13232_v11, %v13268_v49 }
 0x342   : > { %v8091_v54 = vpack.i.b16 %v8090_v23, %v8089_v16  ;;  %v8095_v62 = vpack.i.b16 %v6802_v26, %v6774_v6  ;;  %v8098_v5 = vshrl.u32 %v6802_v26, 16  ;;  %8681 = vst.msk [vmem:[%s11304_s16 + $0x2cc] sm:$0xf] %vm8501_vm8, %v8107_v0  ;;  %v5313_v24 = vshrl.u32 %v13268_v49, 16  ;;  %v10210_v6 = vld [vmem:[#allocation5 + $0x84] sm:$0xf0] }
 0x343   : > { %v8115_v30 = vpack.i.b16 %v8114_v36, %v8113_v48  ;;  %8713 = vst.msk [vmem:[%s11304_s16 + $0x34c] sm:$0xf] %vm8501_vm8, %v8111_v59  ;;  %v5319_v61 = vpack.i.b16 %v13203_v37, %v13256_v51  ;;  %v5321_v44 = vshrl.u32 %v13256_v51, 16  ;;  %v5327_v23 = vpack.i.b16 %v13223_v18, %v4016_v7  ;;  %v2687_v48 = vpop.permute.xlu1 %2686 }
 0x344   : > { %v8099_v26 = vpack.i.b16 %v8098_v5, %v8097_v13  ;;  %8553 = vst.msk [vmem:[%s11304_s16 + $0xcc] sm:$0xf] %vm8501_vm8, %v8091_v54  ;;  %v14911_v0 = vshrl.u32 %v13213_v27, 16  ;;  %v5329_v16 = vshrl.u32 %v4016_v7, 16  ;;  %v14912_v59 = vshrl.u32 %v13203_v37, 16 }
 0x345   : > { %8585 = vst.msk [vmem:[%s11304_s16 + $0x14c] sm:$0xf] %vm8501_vm8, %v8095_v62  ;;  %v6805_v38 = vrot.slane %v5319_v61, 4  ;;  %v6811_v51 = vrot.slane %v5327_v23, 4  ;;  %v4078_v58 = vperm.slane %v2431_v9, %v11078_v35  ;;  %v14913_v13 = vshrl.u32 %v13232_v11, 16 }
 0x346   : > { %v5307_v49 = vpack.i.b16 %v14911_v0, %v5305_v42  ;;  %v5323_v36 = vpack.i.b16 %v14912_v59, %v5321_v44  ;;  %8617 = vst.msk [vmem:[%s11304_s16 + $0x1cc] sm:$0xf] %vm8501_vm8, %v8099_v26  ;;  %v14914_v42 = vshrl.u32 %v13223_v18, 16  ;;  %v1506_v7 = vadd.f32 %v1505_v2, %v12821_v40  ;;  %v9900_v0 = vld [vmem:[#allocation5 + $0x1f0] sm:$0xf] }
 0x347   : > { %v5315_v21 = vpack.i.b16 %v14913_v13, %v5313_v24  ;;  %v9709_v5 = vor.u32 %v10210_v6, %v9708_v22  ;;  %v10258_v62 = vld [vmem:[#allocation5 + $0x204] sm:$0xf0]  ;;  %8745 = vst.msk [vmem:[%s11304_s16 + $0x3cc] sm:$0xf] %vm8501_vm8, %v8115_v30  ;;  %v14915_v37 = vpack.i.b16 %v13213_v27, %v13249_v31  ;;  %v6812_v61 = vsel %vm2869_vm7, %v6811_v51, %v5311_v20 }
 0x348   : > { %v5331_v54 = vpack.i.b16 %v14914_v42, %v5329_v16  ;;  %v6833_v11 = vrot.slane %v5323_v36, 4  ;;  %v4087_v24 = vrot.slane %v4078_v58, 4  ;;  %v6816_v44 = vperm.slane %v6812_v61, %v11078_v35  ;;  %v2435_v36 = vpop.permute.xlu2 %2434 }
 0x349   : > { %v6806_v9 = vsel %vm2869_vm7, %v6805_v38, %v14915_v37  ;;  %v1595_v22 = vadd.f32 %v13271_v14, %v1506_v7  ;;  %1845 = vmatpush.bf16.msra.mxu0 %v9709_v5  ;;  %v9901_v30 = vor.u32 %v10258_v62, %v9900_v0  ;;  %v1684_v27 = vadd.f32 %v13277_v34, %v12866_v50 }
 0x34a   : > { %v6810_v18 = vperm.slane %v6806_v9, %v11078_v35  ;;  %v6839_v2 = vrot.slane %v5331_v54, 4  ;;  %v6834_v23 = vsel %vm2869_vm7, %v6833_v11, %v5307_v49  ;;  %v4084_v31 = vperm.slane %v2687_v48, %v11078_v35 }
 0x34b   : > { %v6817_v6 = vrot.slane %v6816_v44, 4  ;;  %v6838_v26 = vperm.slane %v6834_v23, %v11078_v35  ;;  %v2232_v14 = vpack.c.bf16 %v1595_v22, %v13205_v3  ;;  %1934 = vmatpush.bf16.msra.mxu1 %v9901_v30  ;;  %v1773_v49 = vadd.f32 %v13279_v29, %v1684_v27 }
 0x34c   : > { %v6819_v20 = vrot.slane %v6810_v18, 4  ;;  %v6840_v16 = vsel %vm2869_vm7, %v6839_v2, %v5315_v21  ;;  %v4085_v38 = vrot.slane %v4084_v31, 4  ;;  %v4088_v13 = vsel %vm2869_vm7, %v4084_v31, %v4087_v24 }
 0x34d   : > { %v6844_v59 = vperm.slane %v6840_v16, %v11078_v35  ;;  %v6818_v51 = vsel %vm2869_vm7, %v6817_v6, %v6810_v18  ;;  %v6847_v48 = vrot.slane %v6838_v26, 4  ;;  %v2233_v7 = vpack.c.bf16 %v1773_v49, %v13243_v41 }
 0x34e   : > { %v6820_v34 = vsel %vm2869_vm7, %v6816_v44, %v6819_v20  ;;  %v6824_v42 = vperm.slane %v6818_v51, %v11103_v57  ;;  %v13346_v5 = vperm.slane %v2435_v36, %v11078_v35  ;;  %v4086_v29 = vsel %vm2869_vm7, %v4085_v38, %v4078_v58 }
 0x34f   : > { %v6828_v21 = vperm.slane %v6820_v34, %v11103_v57  ;;  %v6845_v54 = vrot.slane %v6844_v59, 4  ;;  %v6848_v3 = vsel %vm2869_vm7, %v6844_v59, %v6847_v48  ;;  %v4096_v0 = vperm.slane %v4088_v13, %v11103_v57  ;;  %8760 = vxpose.binary.xlu0.c.b16.cont [3/16] %v2233_v7, %v2232_v14, 128 }
 0x350   : > { %v6829_v62 = vrot.slane %v6824_v42, 4  ;;  %v6856_v61 = vperm.slane %v6848_v3, %v11103_v57  ;;  %v8121_v41 = vshrl.u32 %v6824_v42, 16  ;;  %v4092_v18 = vperm.slane %v4086_v29, %v11103_v57  ;;  %v2565_v13 = vpop.permute.xlu2 %2564 }
 0x351   : > { %v6831_v37 = vrot.slane %v6828_v21, 4  ;;  %v6846_v9 = vsel %vm2869_vm7, %v6845_v54, %v6838_v26  ;;  %v8137_v24 = vshrl.u32 %v6828_v21, 16 }
 0x352   : > { %v6852_v11 = vperm.slane %v6846_v9, %v11103_v57  ;;  %v6830_v44 = vsel %vm2869_vm7, 0, %v6829_v62  ;;  %v6859_v2 = vrot.slane %v6856_v61, 4  ;;  %v8135_v22 = vpack.i.b16 %v6856_v61, %v6828_v21  ;;  %v2561_v9 = vpop.permute.xlu0 %2560 }
 0x353   : > { %v6832_v58 = vsel %vm2869_vm7, 0, %v6831_v37  ;;  %v8129_v31 = vshrl.u32 %v6830_v44, 16  ;;  %v8138_v20 = vshrl.u32 %v6856_v61, 16  ;;  %v4097_v16 = vrot.slane %v4092_v18, 4 }
 0x354   : > { %v6857_v23 = vrot.slane %v6852_v11, 4  ;;  %v8119_v30 = vpack.i.b16 %v6852_v11, %v6824_v42  ;;  %v8122_v27 = vshrl.u32 %v6852_v11, 16  ;;  %v6860_v6 = vsel %vm2869_vm7, 0, %v6859_v2  ;;  %8650 = vst.msk [vmem:[%s11304_s16 + $0x250] sm:$0xf] %vm8501_vm8, %v8135_v22 }
 0x355   : > { %v8145_v26 = vshrl.u32 %v6832_v58, 16  ;;  %v8143_v14 = vpack.i.b16 %v6860_v6, %v6832_v58  ;;  %v8146_v49 = vshrl.u32 %v6860_v6, 16  ;;  %v8139_v34 = vpack.i.b16 %v8138_v20, %v8137_v24 }
 0x356   : > { %v6858_v59 = vsel %vm2869_vm7, 0, %v6857_v23  ;;  %v8123_v36 = vpack.i.b16 %v8122_v27, %v8121_v41  ;;  %8522 = vst.msk [vmem:[%s11304_s16 + $0x50] sm:$0xf] %vm8501_vm8, %v8119_v30  ;;  %v4098_v48 = vsel %vm2869_vm7, 0, %v4097_v16  ;;  %v4099_v21 = vrot.slane %v4096_v0, 4 }
 0x357   : > { %v8127_v38 = vpack.i.b16 %v6858_v59, %v6830_v44  ;;  %v8130_v51 = vshrl.u32 %v6858_v59, 16  ;;  %v8147_v42 = vpack.i.b16 %v8146_v49, %v8145_v26  ;;  %v5335_v54 = vpack.i.b16 %v4092_v18, %v13086_v10  ;;  %8682 = vst.msk [vmem:[%s11304_s16 + $0x2d0] sm:$0xf] %vm8501_vm8, %v8139_v34 }
 0x358   : > { %8554 = vst.msk [vmem:[%s11304_s16 + $0xd0] sm:$0xf] %vm8501_vm8, %v8123_v36  ;;  %v5338_v7 = vshrl.u32 %v4092_v18, 16  ;;  %v5343_v29 = vpack.i.b16 %v4098_v48, %v13106_v1  ;;  %v5346_v62 = vshrl.u32 %v4098_v48, 16  ;;  %v5351_v37 = vpack.i.b16 %v4096_v0, %v13089_v32 }
 0x359   : > { %v8131_v3 = vpack.i.b16 %v8130_v51, %v8129_v31  ;;  %8586 = vst.msk [vmem:[%s11304_s16 + $0x150] sm:$0xf] %vm8501_vm8, %v8127_v38  ;;  %v4100_v61 = vsel %vm2869_vm7, 0, %v4099_v21  ;;  %v14916_v11 = vshrl.u32 %v13086_v10, 16  ;;  %v5354_v24 = vshrl.u32 %v4096_v0, 16 }
 0x35a   : > { %v4224_v18 = vperm.slane %v2565_v13, %v11078_v35  ;;  %v14917_v44 = vshrl.u32 %v13106_v1, 16  ;;  %v5359_v2 = vpack.i.b16 %v4100_v61, %v13112_v19  ;;  %v5362_v22 = vshrl.u32 %v4100_v61, 16  ;;  %8714 = vst.msk [vmem:[%s11304_s16 + $0x350] sm:$0xf] %vm8501_vm8, %v8143_v14 }
 0x35b   : > { %v5339_v41 = vpack.i.b16 %v5338_v7, %v14916_v11  ;;  %8618 = vst.msk [vmem:[%s11304_s16 + $0x1d0] sm:$0xf] %vm8501_vm8, %v8131_v3  ;;  %v6861_v23 = vrot.slane %v5351_v37, 4  ;;  %v14918_v30 = vshrl.u32 %v13089_v32, 16  ;;  %v14919_v10 = vrot.slane %v12142_v4, 4 }
 0x35c   : > { %v5347_v58 = vpack.i.b16 %v5346_v62, %v14917_v44  ;;  %v4225_v31 = vrot.slane %v4224_v18, 4  ;;  %v4112_v6 = vperm.slane %v2561_v9, %v11078_v35  ;;  %8746 = vst.msk [vmem:[%s11304_s16 + $0x3d0] sm:$0xf] %vm8501_vm8, %v8147_v42  ;;  %v14920_v1 = vshrl.u32 %v13112_v19, 16 }
 0x35d   : > { %v5355_v27 = vpack.i.b16 %v5354_v24, %v14918_v30  ;;  %v4228_v0 = vsel %vm2869_vm7, %v4224_v18, %v14919_v10  ;;  %v6862_v26 = vsel %vm2869_vm7, %v6861_v23, %v5335_v54  ;;  %v6867_v16 = vrot.slane %v5359_v2, 4 }
 0x35e   : > { %v5363_v20 = vpack.i.b16 %v5362_v22, %v14920_v1  ;;  %v13395_v59 = vperm.slane %v4228_v0, %v11103_v57  ;;  %v4199_v32 = vrot.slane %v13346_v5, 4  ;;  %v6866_v36 = vperm.slane %v6862_v26, %v11078_v35 }
 0x35f   : > { %v6889_v14 = vrot.slane %v5355_v27, 4  ;;  %v4226_v49 = vsel %vm2869_vm7, %v4225_v31, %v12142_v4  ;;  %v6868_v38 = vsel %vm2869_vm7, %v6867_v16, %v5343_v29  ;;  %v4113_v21 = vrot.slane %v4112_v6, 4 }
 0x360   : > { %v6895_v51 = vrot.slane %v5363_v20, 4  ;;  %v13403_v19 = vperm.slane %v4226_v49, %v11103_v57  ;;  %v4239_v34 = vrot.slane %v13395_v59, 4  ;;  %v6872_v48 = vperm.slane %v6868_v38, %v11078_v35  ;;  %v1508_v20 = vpop.f32.mrf.mxu0  ;;  %v1597_v49 = vpop.f32.mrf.mxu1 }
 0x361   : > { %v6875_v13 = vrot.slane %v6866_v36, 4  ;;  %v6890_v42 = vsel %vm2869_vm7, %v6889_v14, %v5339_v41  ;;  %v13413_v3 = vperm.slane %v12341_v55, %v11078_v35  ;;  %v14921_v10 = vrot.slane %v11967_v25, 4  ;;  %v1686_v38 = vpop.f32.mrf.mxu2 }
 0x362   : > { %v6894_v54 = vperm.slane %v6890_v42, %v11078_v35  ;;  %v6896_v7 = vsel %vm2869_vm7, %v6895_v51, %v5347_v58  ;;  %v4237_v4 = vrot.slane %v13403_v19, 4  ;;  %v6873_v29 = vrot.slane %v6872_v48, 4 }
 0x363   : > { %v6876_v62 = vsel %vm2869_vm7, %v6872_v48, %v6875_v13  ;;  %v6900_v37 = vperm.slane %v6896_v7, %v11078_v35  ;;  %v13420_v41 = vsel %vm2869_vm7, 0, %v4239_v34  ;;  %v5433_v24 = vshrl.u32 %v13403_v19, 16  ;;  %v1775_v13 = vpop.f32.mrf.mxu3 }
 0x364   : > { %v6884_v61 = vperm.slane %v6876_v62, %v11103_v57  ;;  %v6903_v11 = vrot.slane %v6894_v54, 4  ;;  %v6874_v18 = vsel %vm2869_vm7, %v6873_v29, %v6866_v36  ;;  %v13425_v55 = vsel %vm2869_vm7, 0, %v4237_v4 }
 0x365   : > { %v6901_v44 = vrot.slane %v6900_v37, 4  ;;  %v4114_v58 = vsel %vm2869_vm7, %v4113_v21, %v11967_v25  ;;  %v6880_v2 = vperm.slane %v6874_v18, %v11103_v57  ;;  %v4116_v0 = vsel %vm2869_vm7, %v4112_v6, %v14921_v10 }
 0x366   : > { %v6887_v22 = vrot.slane %v6884_v61, 4  ;;  %v6904_v23 = vsel %vm2869_vm7, %v6900_v37, %v6903_v11  ;;  %v8169_v30 = vshrl.u32 %v6884_v61, 16  ;;  %v13437_v1 = vperm.slane %v4114_v58, %v11103_v57 }
 0x367   : > { %v6902_v27 = vsel %vm2869_vm7, %v6901_v44, %v6894_v54  ;;  %v6912_v31 = vperm.slane %v6904_v23, %v11103_v57  ;;  %v6885_v26 = vrot.slane %v6880_v2, 4  ;;  %v8153_v14 = vshrl.u32 %v6880_v2, 16  ;;  %v2433_v23 = vpop.permute.xlu1 %2432 }
 0x368   : > { %v6888_v16 = vsel %vm2869_vm7, 0, %v6887_v22  ;;  %v6908_v36 = vperm.slane %v6902_v27, %v11103_v57  ;;  %v13446_v62 = vperm.slane %v4116_v0, %v11103_v57  ;;  %v1509_v10 = vadd.f32 %v1508_v20, %v12821_v40 }
 0x369   : > { %v6915_v51 = vrot.slane %v6912_v31, 4  ;;  %v8167_v34 = vpack.i.b16 %v6912_v31, %v6884_v61  ;;  %v8170_v48 = vshrl.u32 %v6912_v31, 16  ;;  %v8177_v25 = vshrl.u32 %v6888_v16, 16 }
 0x36a   : > { %v6886_v6 = vsel %vm2869_vm7, 0, %v6885_v26  ;;  %v6913_v42 = vrot.slane %v6908_v36, 4  ;;  %v8151_v21 = vpack.i.b16 %v6908_v36, %v6880_v2  ;;  %v8154_v54 = vshrl.u32 %v6908_v36, 16 }
 0x36b   : > { %v6916_v7 = vsel %vm2869_vm7, 0, %v6915_v51  ;;  %v8161_v4 = vshrl.u32 %v6886_v6, 16  ;;  %v8171_v29 = vpack.i.b16 %v8170_v48, %v8169_v30  ;;  %8651 = vst.msk [vmem:[%s11304_s16 + $0x254] sm:$0xf] %vm8501_vm8, %v8167_v34  ;;  %v4125_v2 = vrot.slane %v13437_v1, 4  ;;  %v2695_v48 = vpop.permute.xlu2 %2694 }
 0x36c   : > { %v6914_v37 = vsel %vm2869_vm7, 0, %v6913_v42  ;;  %v8155_v61 = vpack.i.b16 %v8154_v54, %v8153_v14  ;;  %v8175_v11 = vpack.i.b16 %v6916_v7, %v6888_v16  ;;  %v8178_v18 = vshrl.u32 %v6916_v7, 16  ;;  %8523 = vst.msk [vmem:[%s11304_s16 + $0x54] sm:$0xf] %vm8501_vm8, %v8151_v21  ;;  %v1510_v54 = vpop.f32.mrf.mxu0  ;;  %v14922_v7 = vld [vmem:[#allocation39_spill] sm:$0xff] }
 0x36d   : > { %v8159_v44 = vpack.i.b16 %v6914_v37, %v6886_v6  ;;  %v8162_v58 = vshrl.u32 %v6914_v37, 16  ;;  %8683 = vst.msk [vmem:[%s11304_s16 + $0x2d4] sm:$0xf] %vm8501_vm8, %v8171_v29  ;;  %v4127_v22 = vrot.slane %v13446_v62, 4  ;;  %v1687_v16 = vadd.f32 %v1686_v38, %v12866_v50  ;;  %1567 = vmatmul.bf16.gmra.mxu0 %v14922_v7 }
 0x36e   : > { %v8179_v30 = vpack.i.b16 %v8178_v18, %v8177_v25  ;;  %8555 = vst.msk [vmem:[%s11304_s16 + $0xd4] sm:$0xf] %vm8501_vm8, %v8155_v61  ;;  %v13467_v36 = vsel %vm2869_vm7, 0, %v4125_v2  ;;  %v5369_v14 = vshrl.u32 %v13437_v1, 16  ;;  %v5385_v51 = vshrl.u32 %v13446_v62, 16  ;;  %v2691_v25 = vpop.permute.xlu0 %2690  ;;  %v14924_v18 = vld [vmem:[#allocation40_spill] sm:$0xff] }
 0x36f   : > { %v8163_v0 = vpack.i.b16 %v8162_v58, %v8161_v4  ;;  %8587 = vst.msk [vmem:[%s11304_s16 + $0x154] sm:$0xf] %vm8501_vm8, %v8159_v44  ;;  %v13463_v26 = vsel %vm2869_vm7, 0, %v4127_v22  ;;  %v4134_v34 = vperm.slane %v2433_v23, %v11078_v35  ;;  %v13477_v6 = vadd.f32 %v1597_v49, %v1509_v10  ;;  %v1777_v22 = vpop.f32.mrf.mxu3  ;;  %1834 = vmatmul.bf16.gmra.mxu3 %v14924_v18  ;;  %v2563_v31 = vpop.permute.xlu1 %2562 }
 0x370   : > { %8715 = vst.msk [vmem:[%s11304_s16 + $0x354] sm:$0xf] %vm8501_vm8, %v8175_v11  ;;  %v5393_v20 = vshrl.u32 %v13463_v26, 16  ;;  %v13479_v38 = vadd.f32 %v1775_v13, %v1687_v16  ;;  %v5377_v42 = vshrl.u32 %v13467_v36, 16  ;;  %v4196_v21 = vperm.slane %v2691_v25, %v11078_v35  ;;  %v1599_v13 = vpop.f32.mrf.mxu1  ;;  %v1688_v11 = vpop.f32.mrf.mxu2  ;;  %1656 = vmatmul.bf16.gmra.mxu1 %v14924_v18  ;;  %1745 = vmatmul.bf16.gmra.mxu2 %v14922_v7 }
 0x371   : > { %8619 = vst.msk [vmem:[%s11304_s16 + $0x1d4] sm:$0xf] %vm8501_vm8, %v8163_v0  ;;  %v14923_v4 = vrot.slane %v13174_v15, 4  ;;  %v4143_v37 = vrot.slane %v4134_v34, 4  ;;  %v13490_v61 = vperm.slane %v2695_v48, %v11078_v35  ;;  %v1511_v49 = vadd.f32 %v1510_v54, %v12821_v40 }
 0x372   : > { %8747 = vst.msk [vmem:[%s11304_s16 + $0x3d4] sm:$0xf] %vm8501_vm8, %v8179_v30  ;;  %v4197_v58 = vrot.slane %v4196_v21, 4  ;;  %v4200_v2 = vsel %vm2869_vm7, %v4196_v21, %v4199_v32  ;;  %v13508_v16 = vperm.slane %v12138_v33, %v11078_v35  ;;  %v1689_v25 = vadd.f32 %v1688_v11, %v12866_v50 }
 0x373   : > { %v4142_v29 = vsel %vm2869_vm7, %v14923_v4, %v4134_v34  ;;  %v4144_v30 = vsel %vm2869_vm7, %v13174_v15, %v4143_v37  ;;  %v13504_v10 = vperm.slane %v4200_v2, %v11103_v57  ;;  %v1600_v0 = vadd.f32 %v1599_v13, %v1511_v49 }
 0x374   : > { %v4148_v44 = vperm.slane %v4142_v29, %v11103_v57  ;;  %v4152_v32 = vperm.slane %v4144_v30, %v11103_v57  ;;  %v4198_v15 = vsel %vm2869_vm7, %v4197_v58, %v13346_v5  ;;  %v1778_v58 = vadd.f32 %v1777_v22, %v1689_v25 }
 0x375   : > { %v4211_v4 = vrot.slane %v13504_v10, 4  ;;  %v5418_v49 = vshrl.u32 %v13504_v10, 16  ;;  %v13521_v11 = vperm.slane %v4198_v15, %v11103_v57 }
 0x376   : > { %v4153_v34 = vrot.slane %v4148_v44, 4  ;;  %v5370_v48 = vshrl.u32 %v4148_v44, 16  ;;  %v5367_v21 = vpack.i.b16 %v4148_v44, %v13437_v1  ;;  %v4155_v37 = vrot.slane %v4152_v32, 4 }
 0x377   : > { %v5383_v33 = vpack.i.b16 %v4152_v32, %v13446_v62  ;;  %v5386_v2 = vshrl.u32 %v4152_v32, 16  ;;  %v2234_v1 = vpack.c.bf16 %v1600_v0, %v13477_v6  ;;  %v4209_v15 = vrot.slane %v13521_v11, 4 }
 0x378   : > { %v4154_v29 = vsel %vm2869_vm7, 0, %v4153_v34  ;;  %v4156_v44 = vsel %vm2869_vm7, 0, %v4155_v37  ;;  %v5371_v30 = vpack.i.b16 %v5370_v48, %v5369_v14  ;;  %v13530_v9 = vsel %vm2869_vm7, 0, %v4211_v4 }
 0x379   : > { %v5378_v13 = vshrl.u32 %v4154_v29, 16  ;;  %v6917_v5 = vrot.slane %v5383_v33, 4  ;;  %v5375_v54 = vpack.i.b16 %v4154_v29, %v13467_v36  ;;  %v5387_v34 = vpack.i.b16 %v5386_v2, %v5385_v51 }
 0x37a   : > { %v5391_v23 = vpack.i.b16 %v4156_v44, %v13463_v26  ;;  %v5394_v62 = vshrl.u32 %v4156_v44, 16  ;;  %v13534_v36 = vsel %vm2869_vm7, 0, %v4209_v15  ;;  %v5402_v26 = vshrl.u32 %v13521_v11, 16 }
 0x37b   : > { %v5379_v27 = vpack.i.b16 %v5378_v13, %v5377_v42  ;;  %v6918_v32 = vsel %vm2869_vm7, %v6917_v5, %v5367_v21  ;;  %v6945_v22 = vrot.slane %v5387_v34, 4  ;;  %v2235_v51 = vpack.c.bf16 %v1778_v58, %v13479_v38 }
 0x37c   : > { %v5395_v6 = vpack.i.b16 %v5394_v62, %v5393_v20  ;;  %v6922_v14 = vperm.slane %v6918_v32, %v11078_v35  ;;  %v6923_v0 = vrot.slane %v5391_v23, 4  ;;  %v4168_v42 = vperm.slane %v2563_v31, %v11078_v35 }
 0x37d   : > { %v6946_v21 = vsel %vm2869_vm7, %v6945_v22, %v5371_v30  ;;  %v5426_v29 = vshrl.u32 %v13530_v9, 16  ;;  %8761 = vxpose.binary.xlu0.c.b16.cont [4/16] %v2235_v51, %v2234_v1, 128  ;;  %v5410_v38 = vshrl.u32 %v13534_v36, 16  ;;  %v14925_v31 = vrot.slane %v13195_v45, 4 }
 0x37e   : > { %v6924_v48 = vsel %vm2869_vm7, %v6923_v0, %v5375_v54  ;;  %v6931_v25 = vrot.slane %v6922_v14, 4  ;;  %v6951_v4 = vrot.slane %v5395_v6, 4  ;;  %v6950_v23 = vperm.slane %v6946_v21, %v11078_v35 }
 0x37f   : > { %v6928_v20 = vperm.slane %v6924_v48, %v11078_v35  ;;  %v4169_v37 = vrot.slane %v4168_v42, 4  ;;  %v4172_v54 = vsel %vm2869_vm7, %v4168_v42, %v14925_v31  ;;  %v4283_v13 = vrot.slane %v13508_v16, 4 }
 0x380   : > { %v6952_v33 = vsel %vm2869_vm7, %v6951_v4, %v5379_v27  ;;  %v6959_v5 = vrot.slane %v6950_v23, 4  ;;  %v13556_v27 = vperm.slane %v4172_v54, %v11103_v57  ;;  %v4339_v34 = vrot.slane %v12301_v28, 4 }
 0x381   : > { %v6929_v2 = vrot.slane %v6928_v20, 4  ;;  %v6932_v44 = vsel %vm2869_vm7, %v6928_v20, %v6931_v25  ;;  %v6956_v30 = vperm.slane %v6952_v33, %v11078_v35  ;;  %v4170_v1 = vsel %vm2869_vm7, %v4169_v37, %v13195_v45 }
 0x382   : > { %v6940_v58 = vperm.slane %v6932_v44, %v11103_v57  ;;  %v13562_v6 = vperm.slane %v4170_v1, %v11103_v57 }
 0x383   : > { %v6930_v62 = vsel %vm2869_vm7, %v6929_v2, %v6922_v14  ;;  %v6957_v32 = vrot.slane %v6956_v30, 4  ;;  %v6960_v15 = vsel %vm2869_vm7, %v6956_v30, %v6959_v5  ;;  %v4183_v14 = vrot.slane %v13556_v27, 4 }
 0x384   : > { %v6936_v0 = vperm.slane %v6930_v62, %v11103_v57  ;;  %v6943_v22 = vrot.slane %v6940_v58, 4  ;;  %v6968_v51 = vperm.slane %v6960_v15, %v11103_v57  ;;  %v8201_v48 = vshrl.u32 %v6940_v58, 16 }
 0x385   : > { %v6958_v42 = vsel %vm2869_vm7, %v6957_v32, %v6950_v23  ;;  %v4181_v25 = vrot.slane %v13562_v6, 4 }
 0x386   : > { %v6941_v21 = vrot.slane %v6936_v0, 4  ;;  %v6944_v4 = vsel %vm2869_vm7, 0, %v6943_v22  ;;  %v6964_v20 = vperm.slane %v6958_v42, %v11103_v57  ;;  %v6971_v37 = vrot.slane %v6968_v51, 4 }
 0x387   : > { %v8185_v33 = vshrl.u32 %v6936_v0, 16  ;;  %v8199_v31 = vpack.i.b16 %v6968_v51, %v6940_v58  ;;  %v8202_v54 = vshrl.u32 %v6968_v51, 16  ;;  %v8209_v2 = vshrl.u32 %v6944_v4, 16 }
 0x388   : > { %v6942_v44 = vsel %vm2869_vm7, 0, %v6941_v21  ;;  %v6969_v23 = vrot.slane %v6964_v20, 4  ;;  %v6972_v30 = vsel %vm2869_vm7, 0, %v6971_v37  ;;  %v8183_v5 = vpack.i.b16 %v6964_v20, %v6936_v0 }
 0x389   : > { %v8186_v1 = vshrl.u32 %v6964_v20, 16  ;;  %v8193_v62 = vshrl.u32 %v6942_v44, 16  ;;  %v8203_v32 = vpack.i.b16 %v8202_v54, %v8201_v48  ;;  %v8207_v15 = vpack.i.b16 %v6972_v30, %v6944_v4  ;;  %8652 = vst.msk [vmem:[%s11304_s16 + $0x258] sm:$0xf] %vm8501_vm8, %v8199_v31 }
 0x38a   : > { %v6970_v22 = vsel %vm2869_vm7, 0, %v6969_v23  ;;  %v8210_v42 = vshrl.u32 %v6972_v30, 16  ;;  %8524 = vst.msk [vmem:[%s11304_s16 + $0x58] sm:$0xf] %vm8501_vm8, %v8183_v5  ;;  %v4182_v58 = vsel %vm2869_vm7, 0, %v4181_v25  ;;  %v4184_v51 = vsel %vm2869_vm7, 0, %v4183_v14  ;;  %v2437_v23 = vpop.permute.xlu0 %2436 }
 0x38b   : > { %v8187_v21 = vpack.i.b16 %v8186_v1, %v8185_v33  ;;  %v8191_v37 = vpack.i.b16 %v6970_v22, %v6942_v44  ;;  %v8194_v0 = vshrl.u32 %v6970_v22, 16  ;;  %8684 = vst.msk [vmem:[%s11304_s16 + $0x2d8] sm:$0xf] %vm8501_vm8, %v8203_v32  ;;  %v5401_v48 = vshrl.u32 %v13562_v6, 16  ;;  %v10201_v14 = vld [vmem:[#allocation5 + $0x44] sm:$0xf] }
 0x38c   : > { %v8211_v4 = vpack.i.b16 %v8210_v42, %v8209_v2  ;;  %8716 = vst.msk [vmem:[%s11304_s16 + $0x358] sm:$0xf] %vm8501_vm8, %v8207_v15  ;;  %v5399_v20 = vpack.i.b16 %v13521_v11, %v13562_v6  ;;  %v5409_v31 = vshrl.u32 %v4182_v58, 16  ;;  %v5415_v25 = vpack.i.b16 %v13504_v10, %v13556_v27  ;;  %v9686_v30 = vld [vmem:[#allocation5 + $0x58] sm:$0xf0]  ;;  %v2693_v11 = vpop.permute.xlu1 %2692 }
 0x38d   : > { %v8195_v33 = vpack.i.b16 %v8194_v0, %v8193_v62  ;;  %8556 = vst.msk [vmem:[%s11304_s16 + $0xd8] sm:$0xf] %vm8501_vm8, %v8187_v21  ;;  %v5407_v54 = vpack.i.b16 %v13534_v36, %v4182_v58  ;;  %v5417_v44 = vshrl.u32 %v13556_v27, 16  ;;  %v5423_v2 = vpack.i.b16 %v13530_v9, %v4184_v51  ;;  %v2441_v62 = vpop.permute.xlu2 %2440  ;;  %v10249_v32 = vld [vmem:[#allocation5 + $0x1c4] sm:$0xf] }
 0x38e   : > { %v13597_v6 = vperm.slane %v12637_v60, %v11078_v35  ;;  %8588 = vst.msk [vmem:[%s11304_s16 + $0x158] sm:$0xf] %vm8501_vm8, %v8191_v37  ;;  %v5425_v5 = vshrl.u32 %v4184_v51, 16  ;;  %v6973_v1 = vrot.slane %v5415_v25, 4  ;;  %v5403_v27 = vpack.i.b16 %v5402_v26, %v5401_v48  ;;  %v9878_v60 = vld [vmem:[#allocation5 + $0x1d8] sm:$0xf0]  ;;  %v1513_v48 = vpop.f32.mrf.mxu0 }
 0x38f   : > { %8620 = vst.msk [vmem:[%s11304_s16 + $0x1d8] sm:$0xf] %vm8501_vm8, %v8195_v33  ;;  %v5411_v15 = vpack.i.b16 %v5410_v38, %v5409_v31  ;;  %v5419_v22 = vpack.i.b16 %v5418_v49, %v5417_v44  ;;  %v6979_v42 = vrot.slane %v5423_v2, 4  ;;  %v4246_v21 = vperm.slane %v2437_v23, %v11078_v35 }
 0x390   : > { %8748 = vst.msk [vmem:[%s11304_s16 + $0x3d8] sm:$0xf] %vm8501_vm8, %v8211_v4  ;;  %v5427_v58 = vpack.i.b16 %v5426_v29, %v5425_v5  ;;  %v6974_v51 = vsel %vm2869_vm7, %v6973_v1, %v5399_v20  ;;  %v9689_v37 = vor.u32 %v10201_v14, %v9686_v30  ;;  %v13618_v10 = vperm.slane %v2441_v62, %v11078_v35 }
 0x391   : > { %v6978_v26 = vperm.slane %v6974_v51, %v11078_v35  ;;  %v6980_v36 = vsel %vm2869_vm7, %v6979_v42, %v5407_v54  ;;  %v7001_v38 = vrot.slane %v5419_v22, 4  ;;  %v9881_v9 = vor.u32 %v10249_v32, %v9878_v60 }
 0x392   : > { %v6984_v49 = vperm.slane %v6980_v36, %v11078_v35  ;;  %v7007_v0 = vrot.slane %v5427_v58, 4  ;;  %2024 = vmatpush.bf16.msra.mxu2 %v9689_v37  ;;  %v13623_v29 = vperm.slane %v12592_v63, %v11078_v35  ;;  %v13627_v31 = vadd.f32 %v1513_v48, %v12821_v40 }
 0x393   : > { %v6987_v4 = vrot.slane %v6978_v26, 4  ;;  %v7002_v20 = vsel %vm2869_vm7, %v7001_v38, %v5403_v27  ;;  %v4252_v25 = vperm.slane %v2693_v11, %v11078_v35  ;;  %v4255_v44 = vrot.slane %v4246_v21, 4  ;;  %2113 = vmatpush.bf16.msra.mxu3 %v9881_v9 }
 0x394   : > { %v6985_v14 = vrot.slane %v6984_v49, 4  ;;  %v7006_v33 = vperm.slane %v7002_v20, %v11078_v35  ;;  %v7008_v54 = vsel %vm2869_vm7, %v7007_v0, %v5411_v15  ;;  %v4367_v23 = vrot.slane %v13618_v10, 4 }
 0x395   : > { %v6988_v2 = vsel %vm2869_vm7, %v6984_v49, %v6987_v4  ;;  %v7012_v63 = vperm.slane %v7008_v54, %v11078_v35  ;;  %v4253_v30 = vrot.slane %v4252_v25, 4  ;;  %v4256_v32 = vsel %vm2869_vm7, %v4252_v25, %v4255_v44 }
 0x396   : > { %v6986_v5 = vsel %vm2869_vm7, %v6985_v14, %v6978_v26  ;;  %v6996_v1 = vperm.slane %v6988_v2, %v11103_v57  ;;  %v7015_v62 = vrot.slane %v7006_v33, 4  ;;  %v4264_v42 = vperm.slane %v4256_v32, %v11103_v57 }
 0x397   : > { %v6992_v27 = vperm.slane %v6986_v5, %v11103_v57  ;;  %v7013_v22 = vrot.slane %v7012_v63, 4  ;;  %v4254_v15 = vsel %vm2869_vm7, %v4253_v30, %v4246_v21 }
 0x398   : > { %v6999_v60 = vrot.slane %v6996_v1, 4  ;;  %v7016_v58 = vsel %vm2869_vm7, %v7012_v63, %v7015_v62  ;;  %v8233_v51 = vshrl.u32 %v6996_v1, 16  ;;  %v13643_v37 = vperm.slane %v4254_v15, %v11103_v57 }
 0x399   : > { %v6997_v11 = vrot.slane %v6992_v27, 4  ;;  %v7014_v26 = vsel %vm2869_vm7, %v7013_v22, %v7006_v33  ;;  %v7024_v36 = vperm.slane %v7016_v58, %v11103_v57  ;;  %v8217_v38 = vshrl.u32 %v6992_v27, 16 }
 0x39a   : > { %v7000_v49 = vsel %vm2869_vm7, 0, %v6999_v60  ;;  %v7020_v21 = vperm.slane %v7014_v26, %v11103_v57  ;;  %v4265_v0 = vrot.slane %v13643_v37, 4  ;;  %v4267_v48 = vrot.slane %v4264_v42, 4  ;;  %v1691_v60 = vpop.f32.mrf.mxu2 }
 0x39b   : > { %v6998_v9 = vsel %vm2869_vm7, 0, %v6997_v11  ;;  %v7027_v4 = vrot.slane %v7024_v36, 4  ;;  %v8231_v20 = vpack.i.b16 %v7024_v36, %v6996_v1  ;;  %v8234_v25 = vshrl.u32 %v7024_v36, 16  ;;  %v2571_v11 = vpop.permute.xlu2 %2570 }
 0x39c   : > { %v7025_v14 = vrot.slane %v7020_v21, 4  ;;  %v8215_v33 = vpack.i.b16 %v7020_v21, %v6992_v27  ;;  %v8218_v54 = vshrl.u32 %v7020_v21, 16  ;;  %v8225_v44 = vshrl.u32 %v6998_v9, 16 }
 0x39d   : > { %v7028_v2 = vsel %vm2869_vm7, 0, %v7027_v4  ;;  %v8235_v63 = vpack.i.b16 %v8234_v25, %v8233_v51  ;;  %v8241_v30 = vshrl.u32 %v7000_v49, 16  ;;  %8653 = vst.msk [vmem:[%s11304_s16 + $0x25c] sm:$0xf] %vm8501_vm8, %v8231_v20  ;;  %v4266_v5 = vsel %vm2869_vm7, 0, %v4265_v0  ;;  %v1602_v0 = vpop.f32.mrf.mxu1 }
 0x39e   : > { %v7026_v62 = vsel %vm2869_vm7, 0, %v7025_v14  ;;  %v8219_v32 = vpack.i.b16 %v8218_v54, %v8217_v38  ;;  %v8239_v22 = vpack.i.b16 %v7028_v2, %v7000_v49  ;;  %v8242_v1 = vshrl.u32 %v7028_v2, 16  ;;  %8525 = vst.msk [vmem:[%s11304_s16 + $0x5c] sm:$0xf] %vm8501_vm8, %v8215_v33 }
 0x39f   : > { %v8223_v27 = vpack.i.b16 %v7026_v62, %v6998_v9  ;;  %v8226_v15 = vshrl.u32 %v7026_v62, 16  ;;  %8685 = vst.msk [vmem:[%s11304_s16 + $0x2dc] sm:$0xf] %vm8501_vm8, %v8235_v63  ;;  %v4268_v58 = vsel %vm2869_vm7, 0, %v4267_v48  ;;  %v5431_v51 = vpack.i.b16 %v13643_v37, %v13403_v19  ;;  %v2567_v19 = vpop.permute.xlu0 %2566 }
 0x3a0   : > { %v8243_v26 = vpack.i.b16 %v8242_v1, %v8241_v30  ;;  %8557 = vst.msk [vmem:[%s11304_s16 + $0xdc] sm:$0xf] %vm8501_vm8, %v8219_v32  ;;  %v5434_v36 = vshrl.u32 %v13643_v37, 16  ;;  %v5439_v38 = vpack.i.b16 %v4266_v5, %v13425_v55  ;;  %v5442_v49 = vshrl.u32 %v4266_v5, 16 }
 0x3a1   : > { %v8227_v21 = vpack.i.b16 %v8226_v15, %v8225_v44  ;;  %8589 = vst.msk [vmem:[%s11304_s16 + $0x15c] sm:$0xf] %vm8501_vm8, %v8223_v27  ;;  %v5447_v48 = vpack.i.b16 %v4264_v42, %v13395_v59  ;;  %v5450_v9 = vshrl.u32 %v4264_v42, 16  ;;  %v5455_v4 = vpack.i.b16 %v4268_v58, %v13420_v41 }
 0x3a2   : > { %8717 = vst.msk [vmem:[%s11304_s16 + $0x35c] sm:$0xf] %vm8501_vm8, %v8239_v22  ;;  %v13674_v20 = vadd.f32 %v1602_v0, %v13627_v31  ;;  %v1692_v37 = vadd.f32 %v1691_v60, %v12866_v50  ;;  %v5458_v25 = vshrl.u32 %v4268_v58, 16  ;;  %v4392_v14 = vperm.slane %v2571_v11, %v11078_v35 }
 0x3a3   : > { %8621 = vst.msk [vmem:[%s11304_s16 + $0x1dc] sm:$0xf] %vm8501_vm8, %v8227_v21  ;;  %v5435_v33 = vpack.i.b16 %v5434_v36, %v5433_v24  ;;  %v14926_v54 = vshrl.u32 %v13395_v59, 16  ;;  %v7029_v44 = vrot.slane %v5447_v48, 4  ;;  %v7035_v2 = vrot.slane %v5455_v4, 4  ;;  %v1515_v36 = vpop.f32.mrf.mxu0 }
 0x3a4   : > { %8749 = vst.msk [vmem:[%s11304_s16 + $0x3dc] sm:$0xf] %vm8501_vm8, %v8243_v26  ;;  %v14927_v31 = vshrl.u32 %v13425_v55, 16  ;;  %v14928_v30 = vshrl.u32 %v13420_v41, 16  ;;  %v4393_v62 = vrot.slane %v4392_v14, 4  ;;  %v14929_v32 = vrot.slane %v13413_v3, 4 }
 0x3a5   : > { %v5451_v42 = vpack.i.b16 %v5450_v9, %v14926_v54  ;;  %v7030_v24 = vsel %vm2869_vm7, %v7029_v44, %v5431_v51  ;;  %v7036_v59 = vsel %vm2869_vm7, %v7035_v2, %v5439_v38  ;;  %v4280_v26 = vperm.slane %v2567_v19, %v11078_v35  ;;  %v1780_v38 = vpop.f32.mrf.mxu3 }
 0x3a6   : > { %v5443_v63 = vpack.i.b16 %v5442_v49, %v14927_v31  ;;  %v5459_v5 = vpack.i.b16 %v5458_v25, %v14928_v30  ;;  %v4396_v22 = vsel %vm2869_vm7, %v4392_v14, %v14929_v32  ;;  %v7034_v55 = vperm.slane %v7030_v24, %v11078_v35 }
 0x3a7   : > { %v7057_v1 = vrot.slane %v5451_v42, 4  ;;  %v13696_v27 = vperm.slane %v4396_v22, %v11103_v57  ;;  %v7040_v15 = vperm.slane %v7036_v59, %v11078_v35  ;;  %v4394_v60 = vsel %vm2869_vm7, %v4393_v62, %v13413_v3 }
 0x3a8   : > { %v7063_v41 = vrot.slane %v5459_v5, 4  ;;  %v13704_v11 = vperm.slane %v4394_v60, %v11103_v57  ;;  %v7043_v21 = vrot.slane %v7034_v55, 4  ;;  %v13710_v9 = vadd.f32 %v1780_v38, %v1692_v37 }
 0x3a9   : > { %v7058_v58 = vsel %vm2869_vm7, %v7057_v1, %v5435_v33  ;;  %v4407_v51 = vrot.slane %v13696_v27, 4  ;;  %v7041_v49 = vrot.slane %v7040_v15, 4  ;;  %v1516_v42 = vadd.f32 %v1515_v36, %v12821_v40 }
 0x3aa   : > { %v7062_v0 = vperm.slane %v7058_v58, %v11078_v35  ;;  %v7064_v48 = vsel %vm2869_vm7, %v7063_v41, %v5443_v63  ;;  %v4405_v4 = vrot.slane %v13704_v11, 4  ;;  %v7044_v33 = vsel %vm2869_vm7, %v7040_v15, %v7043_v21 }
 0x3ab   : > { %v7068_v3 = vperm.slane %v7064_v48, %v11078_v35  ;;  %v7042_v14 = vsel %vm2869_vm7, %v7041_v49, %v7034_v55  ;;  %v7052_v2 = vperm.slane %v7044_v33, %v11103_v57  ;;  %v5545_v37 = vshrl.u32 %v13696_v27, 16  ;;  %v10204_v48 = vld [vmem:[#allocation5 + $0x54] sm:$0xf0] }
 0x3ac   : > { %v7071_v54 = vrot.slane %v7062_v0, 4  ;;  %v7048_v44 = vperm.slane %v7042_v14, %v11103_v57  ;;  %v13723_v30 = vsel %vm2869_vm7, 0, %v4405_v4  ;;  %v13726_v5 = vsel %vm2869_vm7, 0, %v4407_v51 }
 0x3ad   : > { %v7069_v31 = vrot.slane %v7068_v3, 4  ;;  %v4281_v62 = vrot.slane %v4280_v26, 4  ;;  %v7055_v22 = vrot.slane %v7052_v2, 4  ;;  %v4284_v15 = vsel %vm2869_vm7, %v4280_v26, %v4283_v13  ;;  %v1693_v13 = vpop.f32.mrf.mxu2 }
 0x3ae   : > { %v7072_v63 = vsel %vm2869_vm7, %v7068_v3, %v7071_v54  ;;  %v7053_v32 = vrot.slane %v7048_v44, 4  ;;  %v8249_v1 = vshrl.u32 %v7048_v44, 16  ;;  %v8265_v21 = vshrl.u32 %v7052_v2, 16 }
 0x3af   : > { %v7070_v19 = vsel %vm2869_vm7, %v7069_v31, %v7062_v0  ;;  %v7080_v24 = vperm.slane %v7072_v63, %v11103_v57  ;;  %v4282_v55 = vsel %vm2869_vm7, %v4281_v62, %v13508_v16  ;;  %v7056_v60 = vsel %vm2869_vm7, 0, %v7055_v22  ;;  %v9684_v0 = vld [vmem:[#allocation5 + $0x40] sm:$0xf]  ;;  %v2439_v31 = vpop.permute.xlu1 %2438 }
 0x3b0   : > { %v7076_v59 = vperm.slane %v7070_v19, %v11103_v57  ;;  %v7054_v41 = vsel %vm2869_vm7, 0, %v7053_v32  ;;  %v13742_v16 = vperm.slane %v4282_v55, %v11103_v57  ;;  %v8273_v54 = vshrl.u32 %v7056_v60, 16  ;;  %v9876_v19 = vld [vmem:[#allocation5 + $0x1c0] sm:$0xf] }
 0x3b1   : > { %v7083_v58 = vrot.slane %v7080_v24, 4  ;;  %v8263_v51 = vpack.i.b16 %v7080_v24, %v7052_v2  ;;  %v8257_v4 = vshrl.u32 %v7054_v41, 16  ;;  %v8266_v14 = vshrl.u32 %v7080_v24, 16  ;;  %v1604_v2 = vpop.f32.mrf.mxu1  ;;  %v10252_v24 = vld [vmem:[#allocation5 + $0x1d4] sm:$0xf0] }
 0x3b2   : > { %v7081_v36 = vrot.slane %v7076_v59, 4  ;;  %v8247_v38 = vpack.i.b16 %v7076_v59, %v7048_v44  ;;  %v8250_v49 = vshrl.u32 %v7076_v59, 16  ;;  %v13748_v22 = vperm.slane %v4284_v15, %v11103_v57 }
 0x3b3   : > { %v7084_v3 = vsel %vm2869_vm7, 0, %v7083_v58  ;;  %8654 = vst.msk [vmem:[%s11304_s16 + $0x260] sm:$0xf] %vm8501_vm8, %v8263_v51  ;;  %v8267_v32 = vpack.i.b16 %v8266_v14, %v8265_v21  ;;  %v4293_v58 = vrot.slane %v13742_v16, 4  ;;  %v9685_v15 = vor.u32 %v10204_v48, %v9684_v0  ;;  %v2701_v48 = vpop.permute.xlu2 %2700 }
 0x3b4   : > { %v7082_v26 = vsel %vm2869_vm7, 0, %v7081_v36  ;;  %v8251_v33 = vpack.i.b16 %v8250_v49, %v8249_v1  ;;  %v8274_v44 = vshrl.u32 %v7084_v3, 16  ;;  %8526 = vst.msk [vmem:[%s11304_s16 + $0x60] sm:$0xf] %vm8501_vm8, %v8247_v38  ;;  %v8271_v59 = vpack.i.b16 %v7084_v3, %v7056_v60  ;;  %v1782_v3 = vpop.f32.mrf.mxu3 }
 0x3b5   : > { %v8255_v63 = vpack.i.b16 %v7082_v26, %v7054_v41  ;;  %v8258_v62 = vshrl.u32 %v7082_v26, 16  ;;  %v5529_v1 = vshrl.u32 %v13704_v11, 16  ;;  %v4295_v41 = vrot.slane %v13748_v22, 4  ;;  %8686 = vst.msk [vmem:[%s11304_s16 + $0x2e0] sm:$0xf] %vm8501_vm8, %v8267_v32  ;;  %1846 = vmatpush.bf16.msra.mxu0 %v9685_v15  ;;  %v2697_v26 = vpop.permute.xlu0 %2696 }
 0x3b6   : > { %v8275_v55 = vpack.i.b16 %v8274_v44, %v8273_v54  ;;  %8558 = vst.msk [vmem:[%s11304_s16 + $0xe0] sm:$0xf] %vm8501_vm8, %v8251_v33  ;;  %v1605_v36 = vadd.f32 %v1604_v2, %v1516_v42  ;;  %v5537_v60 = vshrl.u32 %v13723_v30, 16  ;;  %v9877_v49 = vor.u32 %v10252_v24, %v9876_v19  ;;  %v1518_v2 = vpop.f32.mrf.mxu0 }
 0x3b7   : > { %v8259_v51 = vpack.i.b16 %v8258_v62, %v8257_v4  ;;  %8590 = vst.msk [vmem:[%s11304_s16 + $0x160] sm:$0xf] %vm8501_vm8, %v8255_v63  ;;  %v1694_v21 = vadd.f32 %v1693_v13, %v12866_v50  ;;  %v5465_v4 = vshrl.u32 %v13742_v16, 16  ;;  %v5481_v14 = vshrl.u32 %v13748_v22, 16 }
 0x3b8   : > { %v13767_v42 = vsel %vm2869_vm7, 0, %v4293_v58  ;;  %v4302_v0 = vperm.slane %v2439_v31, %v11078_v35  ;;  %8718 = vst.msk [vmem:[%s11304_s16 + $0x360] sm:$0xf] %vm8501_vm8, %v8271_v59  ;;  %v4296_v13 = vsel %vm2869_vm7, 0, %v4295_v41  ;;  %1935 = vmatpush.bf16.msra.mxu1 %v9877_v49  ;;  %v13774_v54 = vperm.slane %v2701_v48, %v11078_v35 }
 0x3b9   : > { %8622 = vst.msk [vmem:[%s11304_s16 + $0x1e0] sm:$0xf] %vm8501_vm8, %v8259_v51  ;;  %v1783_v33 = vadd.f32 %v1782_v3, %v1694_v21  ;;  %v4364_v44 = vperm.slane %v2697_v26, %v11078_v35  ;;  %v2236_v63 = vpack.c.bf16 %v1605_v36, %v13674_v20  ;;  %v14930_v31 = vrot.slane %v13490_v61, 4  ;;  %v1696_v36 = vpop.f32.mrf.mxu2  ;;  %v1607_v3 = vpop.f32.mrf.mxu1 }
 0x3ba   : > { %8750 = vst.msk [vmem:[%s11304_s16 + $0x3e0] sm:$0xf] %vm8501_vm8, %v8275_v55  ;;  %v4311_v32 = vrot.slane %v4302_v0, 4  ;;  %v1519_v19 = vadd.f32 %v1518_v2, %v12821_v40  ;;  %v5473_v58 = vshrl.u32 %v13767_v42, 16  ;;  %v5489_v41 = vshrl.u32 %v4296_v13, 16 }
 0x3bb   : > { %v4310_v62 = vsel %vm2869_vm7, %v14930_v31, %v4302_v0  ;;  %v2237_v24 = vpack.c.bf16 %v1783_v33, %v13710_v9  ;;  %v4365_v51 = vrot.slane %v4364_v44, 4  ;;  %v4368_v20 = vsel %vm2869_vm7, %v4364_v44, %v4367_v23  ;;  %v2569_v0 = vpop.permute.xlu1 %2568 }
 0x3bc   : > { %v4316_v59 = vperm.slane %v4310_v62, %v11103_v57  ;;  %v4312_v55 = vsel %vm2869_vm7, %v13490_v61, %v4311_v32  ;;  %v13797_v48 = vperm.slane %v12731_v56, %v11078_v35  ;;  %v13802_v23 = vperm.slane %v4368_v20, %v11103_v57 }
 0x3bd   : > { %v4320_v49 = vperm.slane %v4312_v55, %v11103_v57  ;;  %8762 = vxpose.binary.xlu0.c.b16.cont [5/16] %v2237_v24, %v2236_v63, 128  ;;  %v4366_v26 = vsel %vm2869_vm7, %v4365_v51, %v13618_v10  ;;  %v13804_v33 = vadd.f32 %v1607_v3, %v1519_v19 }
 0x3be   : > { %v4321_v21 = vrot.slane %v4316_v59, 4  ;;  %v5466_v61 = vshrl.u32 %v4316_v59, 16  ;;  %v13809_v63 = vadd.f32 %v1696_v36, %v12866_v50  ;;  %v5463_v56 = vpack.i.b16 %v4316_v59, %v13742_v16 }
 0x3bf   : > { %v4323_v2 = vrot.slane %v4320_v49, 4  ;;  %v5479_v31 = vpack.i.b16 %v4320_v49, %v13748_v22  ;;  %v5482_v62 = vshrl.u32 %v4320_v49, 16  ;;  %v13813_v32 = vperm.slane %v4366_v26, %v11103_v57 }
 0x3c0   : > { %v4322_v44 = vsel %vm2869_vm7, 0, %v4321_v21  ;;  %v4336_v10 = vperm.slane %v2569_v0, %v11078_v35  ;;  %v4379_v55 = vrot.slane %v13802_v23, 4  ;;  %v5467_v20 = vpack.i.b16 %v5466_v61, %v5465_v4 }
 0x3c1   : > { %v4324_v24 = vsel %vm2869_vm7, 0, %v4323_v2  ;;  %v5474_v19 = vshrl.u32 %v4322_v44, 16  ;;  %v7085_v51 = vrot.slane %v5479_v31, 4  ;;  %v5483_v21 = vpack.i.b16 %v5482_v62, %v5481_v14 }
 0x3c2   : > { %v5487_v22 = vpack.i.b16 %v4324_v24, %v4296_v13  ;;  %v5490_v3 = vshrl.u32 %v4324_v24, 16  ;;  %v5471_v36 = vpack.i.b16 %v4322_v44, %v13767_v42  ;;  %v4377_v59 = vrot.slane %v13813_v32, 4 }
 0x3c3   : > { %v7086_v16 = vsel %vm2869_vm7, %v7085_v51, %v5463_v56  ;;  %v5514_v49 = vshrl.u32 %v13802_v23, 16  ;;  %v7113_v15 = vrot.slane %v5483_v21, 4  ;;  %v5475_v31 = vpack.i.b16 %v5474_v19, %v5473_v58 }
 0x3c4   : > { %v5491_v26 = vpack.i.b16 %v5490_v3, %v5489_v41  ;;  %v7090_v0 = vperm.slane %v7086_v16, %v11078_v35  ;;  %v7091_v2 = vrot.slane %v5487_v22, 4  ;;  %v13824_v9 = vsel %vm2869_vm7, 0, %v4379_v55 }
 0x3c5   : > { %v4337_v4 = vrot.slane %v4336_v10, 4  ;;  %v4340_v14 = vsel %vm2869_vm7, %v4336_v10, %v4339_v34  ;;  %v7114_v61 = vsel %vm2869_vm7, %v7113_v15, %v5467_v20  ;;  %v13834_v58 = vsel %vm2869_vm7, 0, %v4377_v59 }
 0x3c6   : > { %v7092_v42 = vsel %vm2869_vm7, %v7091_v2, %v5471_v36  ;;  %v7099_v13 = vrot.slane %v7090_v0, 4  ;;  %v7119_v44 = vrot.slane %v5491_v26, 4  ;;  %v7118_v56 = vperm.slane %v7114_v61, %v11078_v35 }
 0x3c7   : > { %v7096_v41 = vperm.slane %v7092_v42, %v11078_v35  ;;  %v4338_v62 = vsel %vm2869_vm7, %v4337_v4, %v12301_v28  ;;  %v5498_v34 = vshrl.u32 %v13813_v32, 16  ;;  %v13844_v15 = vperm.slane %v4340_v14, %v11103_v57 }
 0x3c8   : > { %v7120_v24 = vsel %vm2869_vm7, %v7119_v44, %v5475_v31  ;;  %v13841_v10 = vperm.slane %v4338_v62, %v11103_v57  ;;  %v7127_v20 = vrot.slane %v7118_v56, 4  ;;  %v5506_v28 = vshrl.u32 %v13834_v58, 16 }
 0x3c9   : > { %v7097_v19 = vrot.slane %v7096_v41, 4  ;;  %v7100_v51 = vsel %vm2869_vm7, %v7096_v41, %v7099_v13  ;;  %v7124_v55 = vperm.slane %v7120_v24, %v11078_v35  ;;  %v5522_v22 = vshrl.u32 %v13824_v9, 16 }
 0x3ca   : > { %v7108_v21 = vperm.slane %v7100_v51, %v11103_v57  ;;  %v4349_v3 = vrot.slane %v13841_v10, 4  ;;  %v4351_v26 = vrot.slane %v13844_v15, 4  ;;  %v5495_v14 = vpack.i.b16 %v13813_v32, %v13841_v10 }
 0x3cb   : > { %v7098_v36 = vsel %vm2869_vm7, %v7097_v19, %v7090_v0  ;;  %v7125_v16 = vrot.slane %v7124_v55, 4  ;;  %v7128_v59 = vsel %vm2869_vm7, %v7124_v55, %v7127_v20  ;;  %v5497_v0 = vshrl.u32 %v13841_v10, 16  ;;  %v1785_v19 = vpop.f32.mrf.mxu3 }
 0x3cc   : > { %v7104_v2 = vperm.slane %v7098_v36, %v11103_v57  ;;  %v7111_v31 = vrot.slane %v7108_v21, 4  ;;  %v7136_v4 = vperm.slane %v7128_v59, %v11103_v57  ;;  %v8297_v13 = vshrl.u32 %v7108_v21, 16 }
 0x3cd   : > { %v7126_v42 = vsel %vm2869_vm7, %v7125_v16, %v7118_v56  ;;  %v4350_v61 = vsel %vm2869_vm7, 0, %v4349_v3  ;;  %v4352_v32 = vsel %vm2869_vm7, 0, %v4351_v26 }
 0x3ce   : > { %v7109_v44 = vrot.slane %v7104_v2, 4  ;;  %v7112_v41 = vsel %vm2869_vm7, 0, %v7111_v31  ;;  %v7132_v62 = vperm.slane %v7126_v42, %v11103_v57  ;;  %v7139_v24 = vrot.slane %v7136_v4, 4 }
 0x3cf   : > { %v8281_v51 = vshrl.u32 %v7104_v2, 16  ;;  %v8295_v55 = vpack.i.b16 %v7136_v4, %v7108_v21  ;;  %v8298_v20 = vshrl.u32 %v7136_v4, 16  ;;  %v8305_v42 = vshrl.u32 %v7112_v41, 16 }
 0x3d0   : > { %v7110_v56 = vsel %vm2869_vm7, 0, %v7109_v44  ;;  %v7137_v36 = vrot.slane %v7132_v62, 4  ;;  %v7140_v10 = vsel %vm2869_vm7, 0, %v7139_v24  ;;  %v8279_v3 = vpack.i.b16 %v7132_v62, %v7104_v2 }
 0x3d1   : > { %v8282_v16 = vshrl.u32 %v7132_v62, 16  ;;  %v8299_v59 = vpack.i.b16 %v8298_v20, %v8297_v13  ;;  %v8303_v31 = vpack.i.b16 %v7140_v10, %v7112_v41  ;;  %8655 = vst.msk [vmem:[%s11304_s16 + $0x264] sm:$0xf] %vm8501_vm8, %v8295_v55  ;;  %v8289_v21 = vshrl.u32 %v7110_v56, 16  ;;  %v2443_v13 = vpop.permute.xlu0 %2442  ;;  %v1520_v41 = vpop.f32.mrf.mxu0 }
 0x3d2   : > { %v7138_v45 = vsel %vm2869_vm7, 0, %v7137_v36  ;;  %v8306_v4 = vshrl.u32 %v7140_v10, 16  ;;  %8527 = vst.msk [vmem:[%s11304_s16 + $0x64] sm:$0xf] %vm8501_vm8, %v8279_v3  ;;  %v5505_v26 = vshrl.u32 %v4350_v61, 16  ;;  %v5511_v2 = vpack.i.b16 %v13802_v23, %v13844_v15  ;;  %v1698_v20 = vpop.f32.mrf.mxu2 }
 0x3d3   : > { %v8283_v44 = vpack.i.b16 %v8282_v16, %v8281_v51  ;;  %v8287_v25 = vpack.i.b16 %v7138_v45, %v7110_v56  ;;  %v8290_v38 = vshrl.u32 %v7138_v45, 16  ;;  %8687 = vst.msk [vmem:[%s11304_s16 + $0x2e4] sm:$0xf] %vm8501_vm8, %v8299_v59  ;;  %v5503_v24 = vpack.i.b16 %v13834_v58, %v4350_v61  ;;  %v1609_v59 = vpop.f32.mrf.mxu1 }
 0x3d4   : > { %v8307_v62 = vpack.i.b16 %v8306_v4, %v8305_v42  ;;  %8719 = vst.msk [vmem:[%s11304_s16 + $0x364] sm:$0xf] %vm8501_vm8, %v8303_v31  ;;  %v5513_v55 = vshrl.u32 %v13844_v15, 16  ;;  %v5519_v51 = vpack.i.b16 %v13824_v9, %v4352_v32  ;;  %v5499_v56 = vpack.i.b16 %v5498_v34, %v5497_v0  ;;  %v2699_v0 = vpop.permute.xlu1 %2698  ;;  %v1787_v31 = vpop.f32.mrf.mxu3 }
 0x3d5   : > { %v8291_v45 = vpack.i.b16 %v8290_v38, %v8289_v21  ;;  %8559 = vst.msk [vmem:[%s11304_s16 + $0xe4] sm:$0xf] %vm8501_vm8, %v8283_v44  ;;  %v5521_v36 = vshrl.u32 %v4352_v32, 16  ;;  %v7141_v10 = vrot.slane %v5511_v2, 4  ;;  %v4414_v58 = vperm.slane %v2443_v13, %v11078_v35 }
 0x3d6   : > { %8591 = vst.msk [vmem:[%s11304_s16 + $0x164] sm:$0xf] %vm8501_vm8, %v8287_v25  ;;  %v5515_v3 = vpack.i.b16 %v5514_v49, %v5513_v55  ;;  %v7147_v16 = vrot.slane %v5519_v51, 4  ;;  %v1521_v15 = vadd.f32 %v1520_v41, %v12821_v40  ;;  %v5507_v9 = vpack.i.b16 %v5506_v28, %v5505_v26 }
 0x3d7   : > { %8623 = vst.msk [vmem:[%s11304_s16 + $0x1e4] sm:$0xf] %vm8501_vm8, %v8291_v45  ;;  %v5523_v38 = vpack.i.b16 %v5522_v22, %v5521_v36  ;;  %v7142_v61 = vsel %vm2869_vm7, %v7141_v10, %v5495_v14  ;;  %v1699_v34 = vadd.f32 %v1698_v20, %v12866_v50  ;;  %v1786_v25 = vadd.f32 %v1785_v19, %v13809_v63 }
 0x3d8   : > { %8751 = vst.msk [vmem:[%s11304_s16 + $0x3e4] sm:$0xf] %vm8501_vm8, %v8307_v62  ;;  %v7146_v23 = vperm.slane %v7142_v61, %v11078_v35  ;;  %v7148_v49 = vsel %vm2869_vm7, %v7147_v16, %v5503_v24  ;;  %v7169_v32 = vrot.slane %v5515_v3, 4  ;;  %v1610_v22 = vadd.f32 %v1609_v59, %v1521_v15  ;;  %v2447_v24 = vpop.permute.xlu2 %2446 }
 0x3d9   : > { %v7152_v42 = vperm.slane %v7148_v49, %v11078_v35  ;;  %v7175_v28 = vrot.slane %v5523_v38, 4  ;;  %v1788_v21 = vadd.f32 %v1787_v31, %v1699_v34  ;;  %v4423_v26 = vrot.slane %v4414_v58, 4 }
 0x3da   : > { %v7155_v14 = vrot.slane %v7146_v23, 4  ;;  %v7170_v4 = vsel %vm2869_vm7, %v7169_v32, %v5499_v56  ;;  %v4420_v44 = vperm.slane %v2699_v0, %v11078_v35  ;;  %v2238_v13 = vpack.c.bf16 %v1610_v22, %v13804_v33 }
 0x3db   : > { %v7153_v2 = vrot.slane %v7152_v42, 4  ;;  %v7174_v63 = vperm.slane %v7170_v4, %v11078_v35  ;;  %v7176_v19 = vsel %vm2869_vm7, %v7175_v28, %v5507_v9  ;;  %v2239_v55 = vpack.c.bf16 %v1788_v21, %v1786_v25 }
 0x3dc   : > { %v7156_v41 = vsel %vm2869_vm7, %v7152_v42, %v7155_v14  ;;  %v7180_v62 = vperm.slane %v7176_v19, %v11078_v35  ;;  %v4421_v51 = vrot.slane %v4420_v44, 4  ;;  %v4424_v36 = vsel %vm2869_vm7, %v4420_v44, %v4423_v26 }
 0x3dd   : > { %v7154_v20 = vsel %vm2869_vm7, %v7153_v2, %v7146_v23  ;;  %v7164_v45 = vperm.slane %v7156_v41, %v11103_v57  ;;  %v7183_v56 = vrot.slane %v7174_v63, 4  ;;  %v4432_v33 = vperm.slane %v4424_v36, %v11103_v57  ;;  %8763 = vxpose.binary.xlu0.c.b16.cont [6/16] %v2239_v55, %v2238_v13, 128 }
 0x3de   : > { %v7160_v10 = vperm.slane %v7154_v20, %v11103_v57  ;;  %v7181_v3 = vrot.slane %v7180_v62, 4  ;;  %v4422_v16 = vsel %vm2869_vm7, %v4421_v51, %v4414_v58 }
 0x3df   : > { %v7167_v15 = vrot.slane %v7164_v45, 4  ;;  %v7184_v9 = vsel %vm2869_vm7, %v7180_v62, %v7183_v56  ;;  %v8329_v38 = vshrl.u32 %v7164_v45, 16  ;;  %v4428_v61 = vperm.slane %v4422_v16, %v11103_v57 }
 0x3e0   : > { %v7165_v34 = vrot.slane %v7160_v10, 4  ;;  %v7182_v0 = vsel %vm2869_vm7, %v7181_v3, %v7174_v63  ;;  %v7192_v25 = vperm.slane %v7184_v9, %v11103_v57  ;;  %v8313_v23 = vshrl.u32 %v7160_v10, 16  ;;  %v2577_v36 = vpop.permute.xlu2 %2576 }
 0x3e1   : > { %v7168_v49 = vsel %vm2869_vm7, 0, %v7167_v15  ;;  %v7188_v58 = vperm.slane %v7182_v0, %v11103_v57  ;;  %v4433_v32 = vrot.slane %v4428_v61, 4  ;;  %v4435_v59 = vrot.slane %v4432_v33, 4 }
 0x3e2   : > { %v7166_v31 = vsel %vm2869_vm7, 0, %v7165_v34  ;;  %v7195_v42 = vrot.slane %v7192_v25, 4  ;;  %v8327_v28 = vpack.i.b16 %v7192_v25, %v7164_v45  ;;  %v8330_v22 = vshrl.u32 %v7192_v25, 16 }
 0x3e3   : > { %v7193_v21 = vrot.slane %v7188_v58, 4  ;;  %v8311_v14 = vpack.i.b16 %v7188_v58, %v7160_v10  ;;  %v8314_v4 = vshrl.u32 %v7188_v58, 16  ;;  %v8321_v26 = vshrl.u32 %v7166_v31, 16 }
 0x3e4   : > { %v7196_v44 = vsel %vm2869_vm7, 0, %v7195_v42  ;;  %v8331_v2 = vpack.i.b16 %v8330_v22, %v8329_v38  ;;  %v8337_v63 = vshrl.u32 %v7168_v49, 16  ;;  %8656 = vst.msk [vmem:[%s11304_s16 + $0x268] sm:$0xf] %vm8501_vm8, %v8327_v28  ;;  %v4434_v19 = vsel %vm2869_vm7, 0, %v4433_v32 }
 0x3e5   : > { %v7194_v13 = vsel %vm2869_vm7, 0, %v7193_v21  ;;  %v8315_v41 = vpack.i.b16 %v8314_v4, %v8313_v23  ;;  %v8335_v62 = vpack.i.b16 %v7196_v44, %v7168_v49  ;;  %v8338_v55 = vshrl.u32 %v7196_v44, 16  ;;  %8528 = vst.msk [vmem:[%s11304_s16 + $0x68] sm:$0xf] %vm8501_vm8, %v8311_v14 }
 0x3e6   : > { %v8319_v51 = vpack.i.b16 %v7194_v13, %v7166_v31  ;;  %v8322_v20 = vshrl.u32 %v7194_v13, 16  ;;  %8688 = vst.msk [vmem:[%s11304_s16 + $0x2e8] sm:$0xf] %vm8501_vm8, %v8331_v2  ;;  %v4436_v45 = vsel %vm2869_vm7, 0, %v4435_v59  ;;  %v5527_v56 = vpack.i.b16 %v4428_v61, %v13704_v11  ;;  %v2573_v11 = vpop.permute.xlu0 %2572 }
 0x3e7   : > { %v8339_v10 = vpack.i.b16 %v8338_v55, %v8337_v63  ;;  %8560 = vst.msk [vmem:[%s11304_s16 + $0xe8] sm:$0xf] %vm8501_vm8, %v8315_v41  ;;  %v5530_v3 = vshrl.u32 %v4428_v61, 16  ;;  %v5535_v16 = vpack.i.b16 %v4434_v19, %v13723_v30  ;;  %v5538_v15 = vshrl.u32 %v4434_v19, 16  ;;  %v1523_v55 = vpop.f32.mrf.mxu0 }
 0x3e8   : > { %v8323_v9 = vpack.i.b16 %v8322_v20, %v8321_v26  ;;  %8592 = vst.msk [vmem:[%s11304_s16 + $0x168] sm:$0xf] %vm8501_vm8, %v8319_v51  ;;  %v5543_v38 = vpack.i.b16 %v4432_v33, %v13696_v27  ;;  %v5546_v34 = vshrl.u32 %v4432_v33, 16  ;;  %v5551_v0 = vpack.i.b16 %v4436_v45, %v13726_v5 }
 0x3e9   : > { %8720 = vst.msk [vmem:[%s11304_s16 + $0x368] sm:$0xf] %vm8501_vm8, %v8335_v62  ;;  %v13940_v25 = vperm.slane %v2447_v24, %v11078_v35  ;;  %v5554_v23 = vshrl.u32 %v4436_v45, 16  ;;  %v4560_v61 = vperm.slane %v2577_v36, %v11078_v35  ;;  %v5531_v58 = vpack.i.b16 %v5530_v3, %v5529_v1 }
 0x3ea   : > { %8624 = vst.msk [vmem:[%s11304_s16 + $0x1e8] sm:$0xf] %vm8501_vm8, %v8323_v9  ;;  %v5547_v33 = vpack.i.b16 %v5546_v34, %v5545_v37  ;;  %v7197_v32 = vrot.slane %v5543_v38, 4  ;;  %v7203_v59 = vrot.slane %v5551_v0, 4  ;;  %v5539_v24 = vpack.i.b16 %v5538_v15, %v5537_v60 }
 0x3eb   : > { %8752 = vst.msk [vmem:[%s11304_s16 + $0x3e8] sm:$0xf] %vm8501_vm8, %v8339_v10  ;;  %v14931_v31 = vshrl.u32 %v13726_v5, 16  ;;  %v4561_v28 = vrot.slane %v4560_v61, 4  ;;  %v14932_v22 = vrot.slane %v13597_v6, 4  ;;  %v4448_v63 = vperm.slane %v2573_v11, %v11078_v35 }
 0x3ec   : > { %v7198_v1 = vsel %vm2869_vm7, %v7197_v32, %v5527_v56  ;;  %v7204_v27 = vsel %vm2869_vm7, %v7203_v59, %v5535_v16  ;;  %v7225_v37 = vrot.slane %v5547_v33, 4  ;;  %v4535_v51 = vrot.slane %v13940_v25, 4 }
 0x3ed   : > { %v5555_v42 = vpack.i.b16 %v5554_v23, %v14931_v31  ;;  %v4564_v21 = vsel %vm2869_vm7, %v4560_v61, %v14932_v22  ;;  %v7202_v30 = vperm.slane %v7198_v1, %v11078_v35  ;;  %v7208_v60 = vperm.slane %v7204_v27, %v11078_v35 }
 0x3ee   : > { %v13962_v14 = vperm.slane %v4564_v21, %v11103_v57  ;;  %v4562_v4 = vsel %vm2869_vm7, %v4561_v28, %v13597_v6  ;;  %v7226_v26 = vsel %vm2869_vm7, %v7225_v37, %v5531_v58  ;;  %v13980_v45 = vadd.f32 %v1523_v55, %v12821_v40 }
 0x3ef   : > { %v7231_v5 = vrot.slane %v5555_v42, 4  ;;  %v13970_v44 = vperm.slane %v4562_v4, %v11103_v57  ;;  %v7209_v19 = vrot.slane %v7208_v60, 4  ;;  %v7211_v13 = vrot.slane %v7202_v30, 4  ;;  %v10195_v4 = vld [vmem:[#allocation5 + $0x14] sm:$0xf] }
 0x3f0   : > { %v4575_v2 = vrot.slane %v13962_v14, 4  ;;  %v7230_v41 = vperm.slane %v7226_v26, %v11078_v35  ;;  %v4449_v61 = vrot.slane %v4448_v63, 4  ;;  %v14933_v28 = vrot.slane %v12519_v39, 4  ;;  %v9662_v26 = vld [vmem:[#allocation5 + $0x28] sm:$0xf0] }
 0x3f1   : > { %v7232_v62 = vsel %vm2869_vm7, %v7231_v5, %v5539_v24  ;;  %v4573_v20 = vrot.slane %v13970_v44, 4  ;;  %v7210_v56 = vsel %vm2869_vm7, %v7209_v19, %v7202_v30  ;;  %v7212_v36 = vsel %vm2869_vm7, %v7208_v60, %v7211_v13 }
 0x3f2   : > { %v7236_v6 = vperm.slane %v7232_v62, %v11078_v35  ;;  %v7239_v10 = vrot.slane %v7230_v41, 4  ;;  %v7216_v16 = vperm.slane %v7210_v56, %v11103_v57  ;;  %v7220_v15 = vperm.slane %v7212_v36, %v11103_v57 }
 0x3f3   : > { %v13988_v38 = vsel %vm2869_vm7, 0, %v4575_v2  ;;  %v13992_v0 = vsel %vm2869_vm7, 0, %v4573_v20  ;;  %v5625_v23 = vshrl.u32 %v13970_v44, 16  ;;  %v4450_v42 = vsel %vm2869_vm7, %v4449_v61, %v12519_v39 }
 0x3f4   : > { %v7237_v9 = vrot.slane %v7236_v6, 4  ;;  %v7240_v34 = vsel %vm2869_vm7, %v7236_v6, %v7239_v10  ;;  %v7221_v58 = vrot.slane %v7216_v16, 4  ;;  %v7223_v33 = vrot.slane %v7220_v15, 4  ;;  %v1612_v6 = vpop.f32.mrf.mxu1 }
 0x3f5   : > { %v7248_v59 = vperm.slane %v7240_v34, %v11103_v57  ;;  %v8345_v31 = vshrl.u32 %v7216_v16, 16  ;;  %v4452_v22 = vsel %vm2869_vm7, %v4448_v63, %v14933_v28  ;;  %v8361_v5 = vshrl.u32 %v7220_v15, 16  ;;  %v1701_v28 = vpop.f32.mrf.mxu2 }
 0x3f6   : > { %v7238_v32 = vsel %vm2869_vm7, %v7237_v9, %v7230_v41  ;;  %v7222_v21 = vsel %vm2869_vm7, 0, %v7221_v58  ;;  %v7224_v11 = vsel %vm2869_vm7, 0, %v7223_v33  ;;  %v14009_v39 = vperm.slane %v4450_v42, %v11103_v57  ;;  %v2445_v9 = vpop.permute.xlu1 %2444 }
 0x3f7   : > { %v7244_v24 = vperm.slane %v7238_v32, %v11103_v57  ;;  %v7251_v1 = vrot.slane %v7248_v59, 4  ;;  %v8359_v27 = vpack.i.b16 %v7248_v59, %v7220_v15  ;;  %v8353_v19 = vshrl.u32 %v7222_v21, 16  ;;  %v9854_v15 = vld [vmem:[#allocation5 + $0x1a8] sm:$0xf0]  ;;  %v2703_v32 = vpop.permute.xlu0 %2702 }
 0x3f8   : > { %v8362_v13 = vshrl.u32 %v7248_v59, 16  ;;  %v8369_v62 = vshrl.u32 %v7224_v11, 16  ;;  %v14015_v10 = vperm.slane %v4452_v22, %v11103_v57  ;;  %v4461_v33 = vrot.slane %v14009_v39, 4 }
 0x3f9   : > { %v7249_v37 = vrot.slane %v7244_v24, 4  ;;  %v8343_v30 = vpack.i.b16 %v7244_v24, %v7216_v16  ;;  %v8346_v60 = vshrl.u32 %v7244_v24, 16  ;;  %v7252_v2 = vsel %vm2869_vm7, 0, %v7251_v1  ;;  %8657 = vst.msk [vmem:[%s11304_s16 + $0x26c] sm:$0xf] %vm8501_vm8, %v8359_v27 }
 0x3fa   : > { %v8370_v55 = vshrl.u32 %v7252_v2, 16  ;;  %v8363_v36 = vpack.i.b16 %v8362_v13, %v8361_v5  ;;  %v10243_v16 = vld [vmem:[#allocation5 + $0x194] sm:$0xf]  ;;  %v8367_v34 = vpack.i.b16 %v7252_v2, %v7224_v11  ;;  %v9665_v42 = vor.u32 %v10195_v4, %v9662_v26  ;;  %v10198_v5 = vld [vmem:[#allocation5 + $0x24] sm:$0xf0] }
 0x3fb   : > { %v7250_v63 = vsel %vm2869_vm7, 0, %v7249_v37  ;;  %v8347_v41 = vpack.i.b16 %v8346_v60, %v8345_v31  ;;  %8529 = vst.msk [vmem:[%s11304_s16 + $0x6c] sm:$0xf] %vm8501_vm8, %v8343_v30  ;;  %v4463_v31 = vrot.slane %v14015_v10, 4  ;;  %v5561_v22 = vshrl.u32 %v14009_v39, 16  ;;  %v1525_v30 = vpop.f32.mrf.mxu0 }
 0x3fc   : > { %v8351_v20 = vpack.i.b16 %v7250_v63, %v7222_v21  ;;  %v8354_v56 = vshrl.u32 %v7250_v63, 16  ;;  %v8371_v24 = vpack.i.b16 %v8370_v55, %v8369_v62  ;;  %8689 = vst.msk [vmem:[%s11304_s16 + $0x2ec] sm:$0xf] %vm8501_vm8, %v8363_v36  ;;  %v5577_v21 = vshrl.u32 %v14015_v10, 16  ;;  %2025 = vmatpush.bf16.msra.mxu2 %v9665_v42  ;;  %v9660_v60 = vld [vmem:[#allocation5 + $0x10] sm:$0xf]  ;;  %v1790_v55 = vpop.f32.mrf.mxu3 }
 0x3fd   : > { %8561 = vst.msk [vmem:[%s11304_s16 + $0xec] sm:$0xf] %vm8501_vm8, %v8347_v41  ;;  %v9857_v11 = vor.u32 %v10243_v16, %v9854_v15  ;;  %v4470_v1 = vperm.slane %v2445_v9, %v11078_v35  ;;  %v14033_v27 = vadd.f32 %v1612_v6, %v13980_v45  ;;  %v4532_v37 = vperm.slane %v2703_v32, %v11078_v35  ;;  %v14935_v16 = vld [vmem:[#allocation13_spill] sm:$0xff]  ;;  %v14936_v32 = vld [vmem:[#allocation14_spill] sm:$0xff] }
 0x3fe   : > { %v8355_v59 = vpack.i.b16 %v8354_v56, %v8353_v19  ;;  %8593 = vst.msk [vmem:[%s11304_s16 + $0x16c] sm:$0xf] %vm8501_vm8, %v8351_v20  ;;  %v1702_v4 = vadd.f32 %v1701_v28, %v12866_v50  ;;  %v4462_v26 = vsel %vm2869_vm7, 0, %v4461_v33  ;;  %v14934_v2 = vrot.slane %v13774_v54, 4 }
 0x3ff   : > { %8721 = vst.msk [vmem:[%s11304_s16 + $0x36c] sm:$0xf] %vm8501_vm8, %v8367_v34  ;;  %2114 = vmatpush.bf16.msra.mxu3 %v9857_v11  ;;  %v4479_v13 = vrot.slane %v4470_v1, 4  ;;  %v4464_v45 = vsel %vm2869_vm7, 0, %v4463_v31  ;;  %v4533_v41 = vrot.slane %v4532_v37, 4  ;;  %v4536_v62 = vsel %vm2869_vm7, %v4532_v37, %v4535_v51  ;;  %2026 = vmatmul.bf16.vlgmr.msra.gmra.mxu2 %v14935_v16  ;;  %v1614_v31 = vpop.f32.mrf.mxu1 }
 0x400   : > { %8625 = vst.msk [vmem:[%s11304_s16 + $0x1ec] sm:$0xf] %vm8501_vm8, %v8355_v59  ;;  %v4478_v19 = vsel %vm2869_vm7, %v14934_v2, %v4470_v1  ;;  %v14053_v20 = vperm.slane %v4536_v62, %v11103_v57  ;;  %v1526_v56 = vadd.f32 %v1525_v30, %v12821_v40  ;;  %v9661_v36 = vor.u32 %v10198_v5, %v9660_v60 }
 0x401   : > { %8753 = vst.msk [vmem:[%s11304_s16 + $0x3ec] sm:$0xf] %vm8501_vm8, %v8371_v24  ;;  %v4484_v63 = vperm.slane %v4478_v19, %v11103_v57  ;;  %v4480_v6 = vsel %vm2869_vm7, %v13774_v54, %v4479_v13  ;;  %v5569_v33 = vshrl.u32 %v4462_v26, 16  ;;  %v5585_v51 = vshrl.u32 %v4464_v45, 16 }
 0x402   : > { %v4488_v15 = vperm.slane %v4480_v6, %v11103_v57  ;;  %2115 = vmatmul.bf16.vlgmr.msra.gmra.mxu3 %v14936_v32  ;;  %v14059_v59 = vadd.f32 %v1790_v55, %v1702_v4  ;;  %v4534_v54 = vsel %vm2869_vm7, %v4533_v41, %v13940_v25  ;;  %v4547_v24 = vrot.slane %v14053_v20, 4  ;;  %1847 = vmatpush.bf16.msra.mxu0 %v9661_v36  ;;  %v9852_v55 = vld [vmem:[#allocation5 + $0x190] sm:$0xf]  ;;  %v10246_v6 = vld [vmem:[#allocation5 + $0x1a4] sm:$0xf0] }
 0x403   : > { %v4489_v9 = vrot.slane %v4484_v63, 4  ;;  %v5562_v34 = vshrl.u32 %v4484_v63, 16  ;;  %v14066_v1 = vadd.f32 %v1614_v31, %v1526_v56  ;;  %v5559_v37 = vpack.i.b16 %v4484_v63, %v14009_v39  ;;  %v1703_v39 = vpop.f32.mrf.mxu2  ;;  %v2575_v63 = vpop.permute.xlu1 %2574 }
 0x404   : > { %v4491_v28 = vrot.slane %v4488_v15, 4  ;;  %v5575_v11 = vpack.i.b16 %v4488_v15, %v14015_v10  ;;  %v5578_v60 = vshrl.u32 %v4488_v15, 16  ;;  %v5610_v5 = vshrl.u32 %v14053_v20, 16 }
 0x405   : > { %v4490_v42 = vsel %vm2869_vm7, 0, %v4489_v9  ;;  %v5563_v25 = vpack.i.b16 %v5562_v34, %v5561_v22  ;;  %v14072_v19 = vperm.slane %v4534_v54, %v11103_v57  ;;  %1848 = vmatmul.bf16.vlgmr.msra.gmra.mxu0 %v14935_v16  ;;  %v14077_v15 = vsel %vm2869_vm7, 0, %v4547_v24 }
 0x406   : > { %v5570_v30 = vshrl.u32 %v4490_v42, 16  ;;  %v4492_v4 = vsel %vm2869_vm7, 0, %v4491_v28  ;;  %v7253_v2 = vrot.slane %v5575_v11, 4  ;;  %v5567_v13 = vpack.i.b16 %v4490_v42, %v4462_v26  ;;  %v1792_v11 = vpop.f32.mrf.mxu3 }
 0x407   : > { %v5579_v41 = vpack.i.b16 %v5578_v60, %v5577_v21  ;;  %v5583_v10 = vpack.i.b16 %v4492_v4, %v4464_v45  ;;  %v5586_v62 = vshrl.u32 %v4492_v4, 16  ;;  %v2240_v22 = vpack.c.bf16 %v14066_v1, %v14033_v27 }
 0x408   : > { %v5571_v56 = vpack.i.b16 %v5570_v30, %v5569_v33  ;;  %v7254_v36 = vsel %vm2869_vm7, %v7253_v2, %v5559_v37  ;;  %v4545_v45 = vrot.slane %v14072_v19, 4  ;;  %v9853_v34 = vor.u32 %v10246_v6, %v9852_v55 }
 0x409   : > { %v5587_v9 = vpack.i.b16 %v5586_v62, %v5585_v51  ;;  %v7258_v16 = vperm.slane %v7254_v36, %v11078_v35  ;;  %v7259_v26 = vrot.slane %v5583_v10, 4  ;;  %v7281_v21 = vrot.slane %v5579_v41, 4 }
 0x40a   : > { %v1704_v54 = vadd.f32 %v1703_v39, %v12866_v50  ;;  %v4504_v33 = vperm.slane %v2575_v63, %v11078_v35  ;;  %v5594_v1 = vshrl.u32 %v14072_v19, 16  ;;  %1936 = vmatpush.bf16.msra.mxu1 %v9853_v34  ;;  %v5618_v60 = vshrl.u32 %v14077_v15, 16 }
 0x40b   : > { %v7260_v31 = vsel %vm2869_vm7, %v7259_v26, %v5567_v13  ;;  %v7267_v42 = vrot.slane %v7258_v16, 4  ;;  %v7282_v24 = vsel %vm2869_vm7, %v7281_v21, %v5563_v25  ;;  %v7287_v28 = vrot.slane %v5587_v9, 4 }
 0x40c   : > { %v7264_v27 = vperm.slane %v7260_v31, %v11078_v35  ;;  %v7286_v51 = vperm.slane %v7282_v24, %v11078_v35  ;;  %v1793_v37 = vadd.f32 %v1792_v11, %v1704_v54  ;;  %v4505_v4 = vrot.slane %v4504_v33, 4  ;;  %v14115_v54 = vpop.f32.mrf.mxu0  ;;  %v14938_v24 = vld [vmem:[#allocation15_spill] sm:$0xff] }
 0x40d   : > { %v7288_v30 = vsel %vm2869_vm7, %v7287_v28, %v5571_v56  ;;  %v14937_v2 = vrot.slane %v13623_v29, 4  ;;  %1937 = vmatmul.bf16.vlgmr.msra.gmra.mxu1 %v14936_v32  ;;  %v14939_v28 = vld [vmem:[#allocation16_spill] sm:$0xff] }
 0x40e   : > { %v7265_v25 = vrot.slane %v7264_v27, 4  ;;  %v7268_v41 = vsel %vm2869_vm7, %v7264_v27, %v7267_v42  ;;  %v7292_v10 = vperm.slane %v7288_v30, %v11078_v35  ;;  %v7295_v62 = vrot.slane %v7286_v51, 4  ;;  %v2449_v30 = vpop.permute.xlu0 %2448 }
 0x40f   : > { %v4508_v13 = vsel %vm2869_vm7, %v4504_v33, %v14937_v2  ;;  %v7276_v55 = vperm.slane %v7268_v41, %v11103_v57  ;;  %v2241_v6 = vpack.c.bf16 %v1793_v37, %v14059_v59  ;;  %v4506_v39 = vsel %vm2869_vm7, %v4505_v4, %v13623_v29  ;;  %v14117_v33 = vpop.f32.mrf.mxu1  ;;  %2031 = vmatmul.bf16.gmra.mxu2 %v14938_v24 }
 0x410   : > { %v14102_v63 = vperm.slane %v4508_v13, %v11103_v57  ;;  %v7266_v56 = vsel %vm2869_vm7, %v7265_v25, %v7258_v16  ;;  %v7293_v36 = vrot.slane %v7292_v10, 4  ;;  %v7296_v9 = vsel %vm2869_vm7, %v7292_v10, %v7295_v62  ;;  %v14128_v62 = vpop.f32.mrf.mxu2 }
 0x411   : > { %v14108_v26 = vperm.slane %v4506_v39, %v11103_v57  ;;  %v7272_v21 = vperm.slane %v7266_v56, %v11103_v57  ;;  %v7279_v34 = vrot.slane %v7276_v55, 4  ;;  %v7304_v59 = vperm.slane %v7296_v9, %v11103_v57  ;;  %8764 = vxpose.binary.xlu0.c.b16.cont [7/16] %v2241_v6, %v2240_v22, 128  ;;  %v14130_v6 = vpop.f32.mrf.mxu3 }
 0x412   : > { %v14113_v29 = vsel %vm2869_vm7, 0, %v4545_v45  ;;  %v7294_v32 = vsel %vm2869_vm7, %v7293_v36, %v7286_v51  ;;  %v8393_v16 = vshrl.u32 %v7276_v55, 16  ;;  %v4519_v42 = vrot.slane %v14102_v63, 4  ;;  %2120 = vmatmul.bf16.gmra.mxu3 %v14939_v28 }
 0x413   : > { %v4517_v31 = vrot.slane %v14108_v26, 4  ;;  %v7277_v11 = vrot.slane %v7272_v21, 4  ;;  %v7280_v45 = vsel %vm2869_vm7, 0, %v7279_v34  ;;  %v7300_v27 = vperm.slane %v7294_v32, %v11103_v57 }
 0x414   : > { %v7307_v37 = vrot.slane %v7304_v59, 4  ;;  %v8377_v22 = vshrl.u32 %v7272_v21, 16  ;;  %v8391_v4 = vpack.i.b16 %v7304_v59, %v7276_v55  ;;  %v8394_v51 = vshrl.u32 %v7304_v59, 16 }
 0x415   : > { %v8401_v2 = vshrl.u32 %v7280_v45, 16  ;;  %v7278_v13 = vsel %vm2869_vm7, 0, %v7277_v11  ;;  %v7305_v25 = vrot.slane %v7300_v27, 4  ;;  %v8375_v10 = vpack.i.b16 %v7300_v27, %v7272_v21  ;;  %1853 = vmatmul.bf16.gmra.mxu0 %v14938_v24 }
 0x416   : > { %v7308_v41 = vsel %vm2869_vm7, 0, %v7307_v37  ;;  %v8378_v39 = vshrl.u32 %v7300_v27, 16  ;;  %v8385_v56 = vshrl.u32 %v7278_v13, 16  ;;  %v8395_v36 = vpack.i.b16 %v8394_v51, %v8393_v16  ;;  %8658 = vst.msk [vmem:[%s11304_s16 + $0x270] sm:$0xf] %vm8501_vm8, %v8391_v4  ;;  %v2707_v16 = vpop.permute.xlu2 %2706 }
 0x417   : > { %v8399_v9 = vpack.i.b16 %v7308_v41, %v7280_v45  ;;  %v7306_v55 = vsel %vm2869_vm7, 0, %v7305_v25  ;;  %v8402_v34 = vshrl.u32 %v7308_v41, 16  ;;  %8530 = vst.msk [vmem:[%s11304_s16 + $0x70] sm:$0xf] %vm8501_vm8, %v8375_v10  ;;  %v4518_v21 = vsel %vm2869_vm7, 0, %v4517_v31  ;;  %v14151_v4 = vpop.f32.mrf.mxu1 }
 0x418   : > { %v4520_v59 = vsel %vm2869_vm7, 0, %v4519_v42  ;;  %v8379_v32 = vpack.i.b16 %v8378_v39, %v8377_v22  ;;  %v8383_v11 = vpack.i.b16 %v7306_v55, %v7278_v13  ;;  %v8386_v27 = vshrl.u32 %v7306_v55, 16  ;;  %8690 = vst.msk [vmem:[%s11304_s16 + $0x2f0] sm:$0xf] %vm8501_vm8, %v8395_v36  ;;  %v14149_v22 = vpop.f32.mrf.mxu0 }
 0x419   : > { %v5593_v45 = vshrl.u32 %v14108_v26, 16  ;;  %v8403_v24 = vpack.i.b16 %v8402_v34, %v8401_v2  ;;  %8722 = vst.msk [vmem:[%s11304_s16 + $0x370] sm:$0xf] %vm8501_vm8, %v8399_v9  ;;  %v5591_v37 = vpack.i.b16 %v14072_v19, %v14108_v26  ;;  %v5601_v31 = vshrl.u32 %v4518_v21, 16  ;;  %v2705_v26 = vpop.permute.xlu1 %2704 }
 0x41a   : > { %v5607_v42 = vpack.i.b16 %v14053_v20, %v14102_v63  ;;  %v8387_v51 = vpack.i.b16 %v8386_v27, %v8385_v56  ;;  %8562 = vst.msk [vmem:[%s11304_s16 + $0xf0] sm:$0xf] %vm8501_vm8, %v8379_v32  ;;  %v5599_v2 = vpack.i.b16 %v14113_v29, %v4518_v21  ;;  %v5609_v13 = vshrl.u32 %v14102_v63, 16 }
 0x41b   : > { %v5615_v25 = vpack.i.b16 %v14077_v15, %v4520_v59  ;;  %8594 = vst.msk [vmem:[%s11304_s16 + $0x170] sm:$0xf] %vm8501_vm8, %v8383_v11  ;;  %v5602_v41 = vshrl.u32 %v14113_v29, 16  ;;  %v5617_v10 = vshrl.u32 %v4520_v59, 16  ;;  %v4582_v36 = vperm.slane %v2449_v30, %v11078_v35  ;;  %v2579_v59 = vpop.permute.xlu0 %2578 }
 0x41c   : > { %v7309_v39 = vrot.slane %v5607_v42, 4  ;;  %8626 = vst.msk [vmem:[%s11304_s16 + $0x1f0] sm:$0xf] %vm8501_vm8, %v8387_v51  ;;  %v14165_v56 = vperm.slane %v2707_v16, %v11078_v35  ;;  %v5595_v9 = vpack.i.b16 %v5594_v1, %v5593_v45  ;;  %v5611_v63 = vpack.i.b16 %v5610_v5, %v5609_v13  ;;  %v14186_v16 = vpop.f32.mrf.mxu3 }
 0x41d   : > { %v7315_v55 = vrot.slane %v5615_v25, 4  ;;  %8754 = vst.msk [vmem:[%s11304_s16 + $0x3f0] sm:$0xf] %vm8501_vm8, %v8403_v24  ;;  %v5603_v34 = vpack.i.b16 %v5602_v41, %v5601_v31  ;;  %v5619_v29 = vpack.i.b16 %v5618_v60, %v5617_v10  ;;  %v4588_v21 = vperm.slane %v2705_v26, %v11078_v35  ;;  %v14184_v60 = vpop.f32.mrf.mxu2  ;;  %1942 = vmatmul.bf16.gmra.mxu1 %v14939_v28 }
 0x41e   : > { %v7310_v30 = vsel %vm2869_vm7, %v7309_v39, %v5591_v37  ;;  %v7337_v1 = vrot.slane %v5611_v63, 4  ;;  %v4591_v11 = vrot.slane %v4582_v36, 4  ;;  %v14182_v27 = vadd.f32 %v14115_v54, %v12821_v40  ;;  %v14940_v39 = vld [vmem:[#allocation17_spill] sm:$0xff] }
 0x41f   : > { %v7314_v32 = vperm.slane %v7310_v30, %v11078_v35  ;;  %v7316_v19 = vsel %vm2869_vm7, %v7315_v55, %v5599_v2  ;;  %v7343_v5 = vrot.slane %v5619_v29, 4  ;;  %v4589_v15 = vrot.slane %v4588_v21, 4  ;;  %v14199_v25 = vpop.f32.mrf.mxu1  ;;  %2036 = vmatmul.bf16.gmra.mxu2 %v14940_v39 }
 0x420   : > { %v7320_v20 = vperm.slane %v7316_v19, %v11078_v35  ;;  %v7338_v24 = vsel %vm2869_vm7, %v7337_v1, %v5595_v9  ;;  %v4592_v37 = vsel %vm2869_vm7, %v4588_v21, %v4591_v11  ;;  %v14192_v31 = vperm.slane %v2579_v59, %v11078_v35  ;;  %v14197_v13 = vpop.f32.mrf.mxu0 }
 0x421   : > { %v7323_v45 = vrot.slane %v7314_v32, 4  ;;  %v7342_v51 = vperm.slane %v7338_v24, %v11078_v35  ;;  %v7344_v54 = vsel %vm2869_vm7, %v7343_v5, %v5603_v34  ;;  %v4590_v2 = vsel %vm2869_vm7, %v4589_v15, %v4582_v36  ;;  %v14941_v34 = vld [vmem:[#allocation18_spill] sm:$0xff] }
 0x422   : > { %v7321_v42 = vrot.slane %v7320_v20, 4  ;;  %v7348_v26 = vperm.slane %v7344_v54, %v11078_v35  ;;  %v14204_v41 = vperm.slane %v4590_v2, %v11103_v57  ;;  %v14207_v10 = vperm.slane %v4592_v37, %v11103_v57  ;;  %2125 = vmatmul.bf16.gmra.mxu3 %v14941_v34 }
 0x423   : > { %v7324_v28 = vsel %vm2869_vm7, %v7320_v20, %v7323_v45  ;;  %v7351_v63 = vrot.slane %v7342_v51, 4  ;;  %v14214_v55 = vadd.f32 %v14128_v62, %v12866_v50  ;;  %v4617_v11 = vrot.slane %v14192_v31, 4 }
 0x424   : > { %v7322_v9 = vsel %vm2869_vm7, %v7321_v42, %v7314_v32  ;;  %v7332_v36 = vperm.slane %v7324_v28, %v11103_v57  ;;  %v7349_v30 = vrot.slane %v7348_v26, 4  ;;  %v4601_v21 = vrot.slane %v14204_v41, 4  ;;  %v14232_v2 = vpop.f32.mrf.mxu3 }
 0x425   : > { %v7328_v29 = vperm.slane %v7322_v9, %v11103_v57  ;;  %v4603_v59 = vrot.slane %v14207_v10, 4  ;;  %v7352_v1 = vsel %vm2869_vm7, %v7348_v26, %v7351_v63  ;;  %v5623_v15 = vpack.i.b16 %v14204_v41, %v13970_v44  ;;  %1858 = vmatmul.bf16.gmra.mxu0 %v14940_v39  ;;  %v14230_v54 = vpop.f32.mrf.mxu2 }
 0x426   : > { %v7335_v19 = vrot.slane %v7332_v36, 4  ;;  %v8425_v32 = vshrl.u32 %v7332_v36, 16  ;;  %v7350_v5 = vsel %vm2869_vm7, %v7349_v30, %v7342_v51  ;;  %v7360_v62 = vperm.slane %v7352_v1, %v11103_v57 }
 0x427   : > { %v7333_v20 = vrot.slane %v7328_v29, 4  ;;  %v7356_v24 = vperm.slane %v7350_v5, %v11103_v57  ;;  %v8409_v37 = vshrl.u32 %v7328_v29, 16  ;;  %v4602_v42 = vsel %vm2869_vm7, 0, %v4601_v21  ;;  %v14238_v21 = vpop.f32.mrf.mxu1 }
 0x428   : > { %v7336_v45 = vsel %vm2869_vm7, 0, %v7335_v19  ;;  %v7363_v51 = vrot.slane %v7360_v62, 4  ;;  %v8423_v28 = vpack.i.b16 %v7360_v62, %v7332_v36  ;;  %v8426_v26 = vshrl.u32 %v7360_v62, 16  ;;  %v14236_v1 = vpop.f32.mrf.mxu0 }
 0x429   : > { %v4604_v9 = vsel %vm2869_vm7, 0, %v4603_v59  ;;  %v7334_v39 = vsel %vm2869_vm7, 0, %v7333_v20  ;;  %v7361_v63 = vrot.slane %v7356_v24, 4  ;;  %v8407_v30 = vpack.i.b16 %v7356_v24, %v7328_v29 }
 0x42a   : > { %v8410_v19 = vshrl.u32 %v7356_v24, 16  ;;  %v7364_v5 = vsel %vm2869_vm7, 0, %v7363_v51  ;;  %v8427_v58 = vpack.i.b16 %v8426_v26, %v8425_v32  ;;  %v8433_v61 = vshrl.u32 %v7336_v45, 16  ;;  %8659 = vst.msk [vmem:[%s11304_s16 + $0x274] sm:$0xf] %vm8501_vm8, %v8423_v28 }
 0x42b   : > { %v5626_v36 = vshrl.u32 %v14204_v41, 16  ;;  %v7362_v59 = vsel %vm2869_vm7, 0, %v7361_v63  ;;  %v8431_v29 = vpack.i.b16 %v7364_v5, %v7336_v45  ;;  %v8434_v62 = vshrl.u32 %v7364_v5, 16  ;;  %8531 = vst.msk [vmem:[%s11304_s16 + $0x74] sm:$0xf] %vm8501_vm8, %v8407_v30 }
 0x42c   : > { %v8411_v20 = vpack.i.b16 %v8410_v19, %v8409_v37  ;;  %v8415_v24 = vpack.i.b16 %v7362_v59, %v7334_v39  ;;  %v8417_v49 = vshrl.u32 %v7334_v39, 16  ;;  %v8418_v3 = vshrl.u32 %v7362_v59, 16  ;;  %8691 = vst.msk [vmem:[%s11304_s16 + $0x2f4] sm:$0xf] %vm8501_vm8, %v8427_v58 }
 0x42d   : > { %v5631_v32 = vpack.i.b16 %v4602_v42, %v13992_v0  ;;  %v8435_v51 = vpack.i.b16 %v8434_v62, %v8433_v61  ;;  %v5634_v41 = vshrl.u32 %v4602_v42, 16  ;;  %v5639_v37 = vpack.i.b16 %v14207_v10, %v13962_v14  ;;  %8723 = vst.msk [vmem:[%s11304_s16 + $0x374] sm:$0xf] %vm8501_vm8, %v8431_v29  ;;  %1947 = vmatmul.bf16.gmra.mxu1 %v14941_v34 }
 0x42e   : > { %8563 = vst.msk [vmem:[%s11304_s16 + $0xf4] sm:$0xf] %vm8501_vm8, %v8411_v20  ;;  %v5642_v45 = vshrl.u32 %v14207_v10, 16  ;;  %v8419_v28 = vpack.i.b16 %v8418_v3, %v8417_v49  ;;  %v5647_v26 = vpack.i.b16 %v4604_v9, %v13988_v38  ;;  %v5650_v39 = vshrl.u32 %v4604_v9, 16  ;;  %v14270_v10 = vpop.f32.mrf.mxu2  ;;  %v14272_v9 = vpop.f32.mrf.mxu3 }
 0x42f   : > { %8595 = vst.msk [vmem:[%s11304_s16 + $0x174] sm:$0xf] %vm8501_vm8, %v8415_v24  ;;  %v4618_v58 = vsel %vm2869_vm7, %v4617_v11, %v13797_v48  ;;  %v5627_v61 = vpack.i.b16 %v5626_v36, %v5625_v23  ;;  %v14942_v42 = vshrl.u32 %v13962_v14, 16  ;;  %v7365_v30 = vrot.slane %v5639_v37, 4  ;;  %v14294_v59 = vpop.f32.mrf.mxu1  ;;  %2041 = vmatmul.bf16.gmra.mxu2 %v10816_v46 }
 0x430   : > { %v14943_v49 = vrot.slane %v13797_v48, 4  ;;  %8627 = vst.msk [vmem:[%s11304_s16 + $0x1f4] sm:$0xf] %vm8501_vm8, %v8419_v28  ;;  %v14944_v44 = vshrl.u32 %v13992_v0, 16  ;;  %v14945_v14 = vshrl.u32 %v13988_v38, 16  ;;  %v7371_v19 = vrot.slane %v5647_v26, 4  ;;  %v14292_v0 = vpop.f32.mrf.mxu0 }
 0x431   : > { %v5643_v63 = vpack.i.b16 %v5642_v45, %v14942_v42  ;;  %8755 = vst.msk [vmem:[%s11304_s16 + $0x3f4] sm:$0xf] %vm8501_vm8, %v8435_v51  ;;  %v14288_v36 = vperm.slane %v4618_v58, %v11103_v57  ;;  %v1531_v34 = vadd.f32 %v14149_v22, %v12821_v40  ;;  %v1709_v62 = vadd.f32 %v14184_v60, %v12866_v50 }
 0x432   : > { %v4620_v3 = vsel %vm2869_vm7, %v14192_v31, %v14943_v49  ;;  %v5635_v23 = vpack.i.b16 %v5634_v41, %v14944_v44  ;;  %v5651_v11 = vpack.i.b16 %v5650_v39, %v14945_v14  ;;  %v7366_v31 = vsel %vm2869_vm7, %v7365_v30, %v5623_v15  ;;  %2130 = vmatmul.bf16.gmra.mxu3 %v10818_v47 }
 0x433   : > { %v14282_v48 = vperm.slane %v4620_v3, %v11103_v57  ;;  %v7393_v5 = vrot.slane %v5643_v63, 4  ;;  %v7370_v38 = vperm.slane %v7366_v31, %v11078_v35  ;;  %v7372_v20 = vsel %vm2869_vm7, %v7371_v19, %v5631_v32 }
 0x434   : > { %v7399_v29 = vrot.slane %v5651_v11, 4  ;;  %v4645_v15 = vrot.slane %v14165_v56, 4  ;;  %v7376_v24 = vperm.slane %v7372_v20, %v11078_v35  ;;  %v1618_v41 = vadd.f32 %v14117_v33, %v14182_v27  ;;  %v2451_v27 = vpop.permute.xlu1 %2450 }
 0x435   : > { %v7394_v22 = vsel %vm2869_vm7, %v7393_v5, %v5627_v61  ;;  %v4631_v51 = vrot.slane %v14282_v48, 4  ;;  %v7379_v32 = vrot.slane %v7370_v38, 4  ;;  %v1796_v45 = vadd.f32 %v14130_v6, %v14214_v55  ;;  %1863 = vmatmul.bf16.gmra.mxu0 %v10816_v46 }
 0x436   : > { %v7398_v37 = vperm.slane %v7394_v22, %v11078_v35  ;;  %v7400_v60 = vsel %vm2869_vm7, %v7399_v29, %v5635_v23  ;;  %v7377_v28 = vrot.slane %v7376_v24, 4  ;;  %v1620_v39 = vadd.f32 %v14151_v4, %v1531_v34  ;;  %v14323_v49 = vpop.f32.mrf.mxu2  ;;  %v14325_v4 = vpop.f32.mrf.mxu3 }
 0x437   : > { %v7404_v26 = vperm.slane %v7400_v60, %v11078_v35  ;;  %v7380_v58 = vsel %vm2869_vm7, %v7376_v24, %v7379_v32  ;;  %v4629_v42 = vrot.slane %v14288_v36, 4  ;;  %v1798_v33 = vadd.f32 %v14186_v16, %v1709_v62  ;;  %v14333_v5 = vpop.f32.mrf.mxu1 }
 0x438   : > { %v7407_v61 = vrot.slane %v7398_v37, 4  ;;  %v7378_v63 = vsel %vm2869_vm7, %v7377_v28, %v7370_v38  ;;  %v7388_v30 = vperm.slane %v7380_v58, %v11103_v57  ;;  %v14321_v55 = vsel %vm2869_vm7, 0, %v4631_v51  ;;  %v14331_v31 = vpop.f32.mrf.mxu0 }
 0x439   : > { %v7405_v6 = vrot.slane %v7404_v26, 4  ;;  %v7384_v3 = vperm.slane %v7378_v63, %v11103_v57  ;;  %v2242_v16 = vpack.c.bf16 %v1620_v39, %v1618_v41  ;;  %v2243_v23 = vpack.c.bf16 %v1798_v33, %v1796_v45 }
 0x43a   : > { %v7408_v44 = vsel %vm2869_vm7, %v7404_v26, %v7407_v61  ;;  %v7391_v14 = vrot.slane %v7388_v30, 4  ;;  %v8457_v19 = vshrl.u32 %v7388_v30, 16  ;;  %v4638_v29 = vperm.slane %v2451_v27, %v11078_v35 }
 0x43b   : > { %v7406_v46 = vsel %vm2869_vm7, %v7405_v6, %v7398_v37  ;;  %v7416_v11 = vperm.slane %v7408_v44, %v11103_v57  ;;  %v7389_v34 = vrot.slane %v7384_v3, 4  ;;  %v8441_v20 = vshrl.u32 %v7384_v3, 16  ;;  %8765 = vxpose.binary.xlu0.c.b16.end [8/16] %v2243_v23, %v2242_v16, 128 }
 0x43c   : > { %v7412_v38 = vperm.slane %v7406_v46, %v11103_v57  ;;  %v7392_v62 = vsel %vm2869_vm7, 0, %v7391_v14  ;;  %v4646_v6 = vsel %vm2869_vm7, %v4645_v15, %v4638_v29  ;;  %v4630_v14 = vsel %vm2869_vm7, 0, %v4629_v42 }
 0x43d   : > { %v7419_v24 = vrot.slane %v7416_v11, 4  ;;  %v8455_v22 = vpack.i.b16 %v7416_v11, %v7388_v30  ;;  %v8458_v51 = vshrl.u32 %v7416_v11, 16  ;;  %v7390_v41 = vsel %vm2869_vm7, 0, %v7389_v34  ;;  %1952 = vmatmul.bf16.gmra.mxu1 %v10818_v47 }
 0x43e   : > { %v7417_v32 = vrot.slane %v7412_v38, 4  ;;  %v8439_v37 = vpack.i.b16 %v7412_v38, %v7384_v3  ;;  %v8442_v60 = vshrl.u32 %v7412_v38, 16  ;;  %v8449_v28 = vshrl.u32 %v7390_v41, 16  ;;  %v1718_v44 = vpop.f32.mrf.mxu2  ;;  %v14348_v16 = vpop.f32.mrf.mxu3 }
 0x43f   : > { %v7420_v45 = vsel %vm2869_vm7, 0, %v7419_v24  ;;  %v8459_v26 = vpack.i.b16 %v8458_v51, %v8457_v19  ;;  %v8465_v39 = vshrl.u32 %v7392_v62, 16  ;;  %8660 = vst.msk [vmem:[%s11304_s16 + $0x278] sm:$0xf] %vm8501_vm8, %v8455_v22  ;;  %v4647_v3 = vrot.slane %v4638_v29, 4  ;;  %v14367_v38 = vpop.f32.mrf.mxu1  ;;  %2046 = vmatmul.bf16.gmra.mxu2 %v10828_v52 }
 0x440   : > { %v7418_v58 = vsel %vm2869_vm7, 0, %v7417_v32  ;;  %v8443_v61 = vpack.i.b16 %v8442_v60, %v8441_v20  ;;  %v8463_v33 = vpack.i.b16 %v7420_v45, %v7392_v62  ;;  %v8466_v27 = vshrl.u32 %v7420_v45, 16  ;;  %8532 = vst.msk [vmem:[%s11304_s16 + $0x78] sm:$0xf] %vm8501_vm8, %v8439_v37  ;;  %v14365_v42 = vpop.f32.mrf.mxu0 }
 0x441   : > { %v8447_v63 = vpack.i.b16 %v7418_v58, %v7390_v41  ;;  %v8450_v30 = vshrl.u32 %v7418_v58, 16  ;;  %8692 = vst.msk [vmem:[%s11304_s16 + $0x2f8] sm:$0xf] %vm8501_vm8, %v8459_v26  ;;  %v4652_v46 = vperm.slane %v4646_v6, %v11103_v57  ;;  %v1534_v11 = vadd.f32 %v14197_v13, %v12821_v40 }
 0x442   : > { %v8467_v23 = vpack.i.b16 %v8466_v27, %v8465_v39  ;;  %8564 = vst.msk [vmem:[%s11304_s16 + $0xf8] sm:$0xf] %vm8501_vm8, %v8443_v61  ;;  %v4648_v15 = vsel %vm2869_vm7, %v14165_v56, %v4647_v3  ;;  %v1712_v47 = vadd.f32 %v14230_v54, %v12866_v50  ;;  %v1536_v34 = vadd.f32 %v14236_v1, %v12821_v40 }
 0x443   : > { %v8451_v19 = vpack.i.b16 %v8450_v30, %v8449_v28  ;;  %8596 = vst.msk [vmem:[%s11304_s16 + $0x178] sm:$0xf] %vm8501_vm8, %v8447_v63  ;;  %v5657_v13 = vshrl.u32 %v14288_v36, 16  ;;  %v5673_v20 = vshrl.u32 %v14282_v48, 16  ;;  %v4656_v29 = vperm.slane %v4648_v15, %v11103_v57  ;;  %2135 = vmatmul.bf16.gmra.mxu3 %v10830_v53 }
 0x444   : > { %8724 = vst.msk [vmem:[%s11304_s16 + $0x378] sm:$0xf] %vm8501_vm8, %v8463_v33  ;;  %v4657_v56 = vrot.slane %v4652_v46, 4  ;;  %v5681_v54 = vshrl.u32 %v14321_v55, 16  ;;  %v5658_v1 = vshrl.u32 %v4652_v46, 16  ;;  %v5665_v62 = vshrl.u32 %v4630_v14, 16 }
 0x445   : > { %8628 = vst.msk [vmem:[%s11304_s16 + $0x1f8] sm:$0xf] %vm8501_vm8, %v8451_v19  ;;  %v1714_v24 = vadd.f32 %v14270_v10, %v12866_v50  ;;  %v4659_v51 = vrot.slane %v4656_v29, 4  ;;  %v5671_v41 = vpack.i.b16 %v4656_v29, %v14282_v48  ;;  %v1625_v32 = vadd.f32 %v14238_v21, %v1536_v34  ;;  %1868 = vmatmul.bf16.gmra.mxu0 %v10828_v52 }
 0x446   : > { %8756 = vst.msk [vmem:[%s11304_s16 + $0x3f8] sm:$0xf] %vm8501_vm8, %v8467_v23  ;;  %v4658_v22 = vsel %vm2869_vm7, 0, %v4657_v56  ;;  %v5655_v37 = vpack.i.b16 %v4652_v46, %v14288_v36  ;;  %v5674_v60 = vshrl.u32 %v4656_v29, 16  ;;  %v1623_v45 = vadd.f32 %v14199_v25, %v1534_v11  ;;  %v14393_v27 = vpop.f32.mrf.mxu2  ;;  %v14395_v36 = vpop.f32.mrf.mxu3 }
 0x447   : > { %v1801_v28 = vadd.f32 %v14232_v2, %v1712_v47  ;;  %v4660_v10 = vsel %vm2869_vm7, 0, %v4659_v51  ;;  %v5666_v26 = vshrl.u32 %v4658_v22, 16  ;;  %v7421_v39 = vrot.slane %v5671_v41, 4  ;;  %v14401_v46 = vpop.f32.mrf.mxu1 }
 0x448   : > { %v1803_v58 = vadd.f32 %v14272_v9, %v1714_v24  ;;  %v5659_v48 = vpack.i.b16 %v5658_v1, %v5657_v13  ;;  %v5675_v61 = vpack.i.b16 %v5674_v60, %v5673_v20  ;;  %v5679_v21 = vpack.i.b16 %v4660_v10, %v14321_v55  ;;  %v14399_v52 = vpop.f32.mrf.mxu0 }
 0x449   : > { %v5682_v33 = vshrl.u32 %v4660_v10, 16  ;;  %v5663_v25 = vpack.i.b16 %v4658_v22, %v4630_v14  ;;  %v7422_v2 = vsel %vm2869_vm7, %v7421_v39, %v5655_v37  ;;  %v2244_v63 = vpack.c.bf16 %v1625_v32, %v1623_v45 }
 0x44a   : > { %v2245_v30 = vpack.c.bf16 %v1803_v58, %v1801_v28  ;;  %v7426_v3 = vperm.slane %v7422_v2, %v11078_v35  ;;  %v7427_v9 = vrot.slane %v5679_v21, 4  ;;  %v7449_v23 = vrot.slane %v5675_v61, 4  ;;  %v14946_v2 = vld [vmem:[#allocation19_spill] sm:$0xff] }
 0x44b   : > { %v5683_v6 = vpack.i.b16 %v5682_v33, %v5681_v54  ;;  %v5667_v55 = vpack.i.b16 %v5666_v26, %v5665_v62  ;;  %v1719_v11 = vadd.f32 %v1718_v44, %v12866_v50  ;;  %v1539_v29 = vadd.f32 %v14292_v0, %v12821_v40 }
 0x44c   : > { %8782 = vxpose.binary.xlu1.c.b16.start [1/16] %v2245_v30, %v2244_v63, 128  ;;  %v7428_v19 = vsel %vm2869_vm7, %v7427_v9, %v5663_v25  ;;  %v7435_v14 = vrot.slane %v7426_v3, 4  ;;  %v7450_v15 = vsel %vm2869_vm7, %v7449_v23, %v5659_v48  ;;  %v1717_v56 = vadd.f32 %v14323_v49, %v12866_v50 }
 0x44d   : > { %v7455_v47 = vrot.slane %v5683_v6, 4  ;;  %v7432_v34 = vperm.slane %v7428_v19, %v11078_v35  ;;  %v7454_v13 = vperm.slane %v7450_v15, %v11078_v35  ;;  %v1541_v44 = vadd.f32 %v14331_v31, %v12821_v40  ;;  %1957 = vmatmul.bf16.gmra.mxu1 %v10830_v53 }
 0x44e   : > { %v1808_v51 = vadd.f32 %v14348_v16, %v1719_v11  ;;  %v1723_v41 = vpop.f32.mrf.mxu2  ;;  %v14419_v32 = vpop.f32.mrf.mxu3  ;;  %v1806_v45 = vadd.f32 %v14325_v4, %v1717_v56  ;;  %v1628_v53 = vadd.f32 %v14294_v59, %v1539_v29 }
 0x44f   : > { %v7456_v20 = vsel %vm2869_vm7, %v7455_v47, %v5667_v55  ;;  %v7433_v54 = vrot.slane %v7432_v34, 4  ;;  %v7436_v1 = vsel %vm2869_vm7, %v7432_v34, %v7435_v14  ;;  %v7463_v24 = vrot.slane %v7454_v13, 4  ;;  %v14429_v16 = vpop.f32.mrf.mxu1  ;;  %2051 = vmatmul.bf16.gmra.mxu2 %v10840_v8 }
 0x450   : > { %v7460_v62 = vperm.slane %v7456_v20, %v11078_v35  ;;  %v7444_v22 = vperm.slane %v7436_v1, %v11103_v57  ;;  %v14427_v28 = vpop.f32.mrf.mxu0  ;;  %v1630_v26 = vadd.f32 %v14333_v5, %v1541_v44  ;;  %v2247_v61 = vpack.c.bf16 %v1808_v51, %v1806_v45 }
 0x451   : > { %v7434_v0 = vsel %vm2869_vm7, %v7433_v54, %v7426_v3  ;;  %v1724_v54 = vadd.f32 %v1723_v41, %v12866_v50 }
 0x452   : > { %v7461_v49 = vrot.slane %v7460_v62, 4  ;;  %v7464_v31 = vsel %vm2869_vm7, %v7460_v62, %v7463_v24  ;;  %v7440_v37 = vperm.slane %v7434_v0, %v11103_v57  ;;  %v7447_v60 = vrot.slane %v7444_v22, 4 }
 0x453   : > { %v7472_v35 = vperm.slane %v7464_v31, %v11103_v57  ;;  %v8489_v33 = vshrl.u32 %v7444_v22, 16  ;;  %2140 = vmatmul.bf16.gmra.mxu3 %v14946_v2  ;;  %v2246_v19 = vpack.c.bf16 %v1630_v26, %v1628_v53  ;;  %v1722_v24 = vadd.f32 %v14393_v27, %v12866_v50 }
 0x454   : > { %v7462_v10 = vsel %vm2869_vm7, %v7461_v49, %v7454_v13  ;;  %v7445_v39 = vrot.slane %v7440_v37, 4  ;;  %v7448_v4 = vsel %vm2869_vm7, 0, %v7447_v60  ;;  %v8473_v6 = vshrl.u32 %v7440_v37, 16 }
 0x455   : > { %v7468_v58 = vperm.slane %v7462_v10, %v11103_v57  ;;  %v7475_v48 = vrot.slane %v7472_v35, 4  ;;  %v8487_v21 = vpack.i.b16 %v7472_v35, %v7444_v22  ;;  %v8490_v25 = vshrl.u32 %v7472_v35, 16  ;;  %1873 = vmatmul.bf16.gmra.mxu0 %v10840_v8  ;;  %v14948_v35 = vld [vmem:[#allocation21_spill] sm:$0xff] }
 0x456   : > { %v7446_v59 = vsel %vm2869_vm7, 0, %v7445_v39  ;;  %v8497_v55 = vshrl.u32 %v7448_v4, 16  ;;  %v1726_v14 = vpop.f32.mrf.mxu2  ;;  %v1815_v15 = vpop.f32.mrf.mxu3  ;;  %v1546_v22 = vadd.f32 %v14399_v52, %v12821_v40  ;;  %v1544_v49 = vadd.f32 %v14365_v42, %v12821_v40 }
 0x457   : > { %v7473_v63 = vrot.slane %v7468_v58, 4  ;;  %v7476_v5 = vsel %vm2869_vm7, 0, %v7475_v48  ;;  %v8471_v30 = vpack.i.b16 %v7468_v58, %v7440_v37  ;;  %v8474_v3 = vshrl.u32 %v7468_v58, 16  ;;  %8661 = vst.msk [vmem:[%s11304_s16 + $0x27c] sm:$0xf] %vm8501_vm8, %v8487_v21  ;;  %v1639_v56 = vpop.f32.mrf.mxu1  ;;  %v14947_v37 = vld [vmem:[#allocation20_spill] sm:$0xff] }
 0x458   : > { %v8491_v57 = vpack.i.b16 %v8490_v25, %v8489_v33  ;;  %v8495_v9 = vpack.i.b16 %v7476_v5, %v7448_v4  ;;  %v8498_v11 = vshrl.u32 %v7476_v5, 16  ;;  %v8481_v13 = vshrl.u32 %v7446_v59, 16  ;;  %v1550_v29 = vpop.f32.mrf.mxu0  ;;  %v14949_v21 = vld [vmem:[#allocation22_spill] sm:$0xff] }
 0x459   : > { %v7474_v23 = vsel %vm2869_vm7, 0, %v7473_v63  ;;  %8533 = vst.msk [vmem:[%s11304_s16 + $0x7c] sm:$0xf] %vm8501_vm8, %v8471_v30  ;;  %v8475_v47 = vpack.i.b16 %v8474_v3, %v8473_v6  ;;  %v1813_v31 = vadd.f32 %v14419_v32, %v1724_v54  ;;  %v1811_v41 = vadd.f32 %v14395_v36, %v1722_v24 }
 0x45a   : > { %v8479_v34 = vpack.i.b16 %v7474_v23, %v7446_v59  ;;  %v8482_v20 = vshrl.u32 %v7474_v23, 16  ;;  %8693 = vst.msk [vmem:[%s11304_s16 + $0x2fc] sm:$0xf] %vm8501_vm8, %v8491_v57  ;;  %v8499_v8 = vpack.i.b16 %v8498_v11, %v8497_v55  ;;  %v1635_v60 = vadd.f32 %v14401_v46, %v1546_v22 }
 0x45b   : > { %8725 = vst.msk [vmem:[%s11304_s16 + $0x37c] sm:$0xf] %vm8501_vm8, %v8495_v9  ;;  %v1633_v27 = vadd.f32 %v14367_v38, %v1544_v49  ;;  %v2249_v45 = vpack.c.bf16 %v1813_v31, %v1811_v41  ;;  %v1727_v36 = vadd.f32 %v1726_v14, %v12866_v50  ;;  %v1551_v46 = vadd.f32 %v1550_v29, %v12821_v40 }
 0x45c   : > { %v8483_v44 = vpack.i.b16 %v8482_v20, %v8481_v13  ;;  %8565 = vst.msk [vmem:[%s11304_s16 + $0xfc] sm:$0xf] %vm8501_vm8, %v8475_v47  ;;  %8783 = vxpose.binary.xlu1.c.b16.cont [2/16] %v2247_v61, %v2246_v19, 128  ;;  %v1549_v61 = vadd.f32 %v14427_v28, %v12821_v40  ;;  %v14951_v47 = vld [vmem:[#allocation24_spill] sm:$0xff]  ;;  %v14952_v20 = vld [vmem:[#allocation25_spill] sm:$0xff] }
 0x45d   : > { %8597 = vst.msk [vmem:[%s11304_s16 + $0x17c] sm:$0xf] %vm8501_vm8, %v8479_v34  ;;  %1962 = vmatmul.bf16.gmra.mxu1 %v14946_v2  ;;  %v2248_v53 = vpack.c.bf16 %v1635_v60, %v1633_v27  ;;  %v1816_v33 = vadd.f32 %v1815_v15, %v1727_v36  ;;  %v1640_v25 = vadd.f32 %v1639_v56, %v1551_v46  ;;  %v14950_v2 = vld [vmem:[#allocation23_spill] sm:$0xff] }
 0x45e   : > { %8629 = vst.msk [vmem:[%s11304_s16 + $0x1fc] sm:$0xf] %vm8501_vm8, %v8483_v44  ;;  %v1728_v1 = vpop.f32.mrf.mxu2  ;;  %v1817_v62 = vpop.f32.mrf.mxu3  ;;  %v1638_v59 = vadd.f32 %v14429_v16, %v1549_v61 }
 0x45f   : > { %8757 = vst.msk [vmem:[%s11304_s16 + $0x3fc] sm:$0xf] %vm8501_vm8, %v8499_v8  ;;  %v1642_v0 = vpop.f32.mrf.mxu1  ;;  %2056 = vmatmul.bf16.gmra.mxu2 %v14947_v37  ;;  %v1729_v32 = vadd.f32 %v1728_v1, %v12866_v50 }
 0x460   : > { %v1553_v51 = vpop.f32.mrf.mxu0  ;;  %v2250_v6 = vpack.c.bf16 %v1640_v25, %v1638_v59 }
 0x461   : > { %v1818_v4 = vadd.f32 %v1817_v62, %v1729_v32  ;;  %v1554_v14 = vadd.f32 %v1553_v51, %v12821_v40 }
 0x463   : > { %2145 = vmatmul.bf16.gmra.mxu3 %v14948_v35  ;;  %v2251_v63 = vpack.c.bf16 %v1818_v4, %v1816_v33  ;;  %v1643_v8 = vadd.f32 %v1642_v0, %v1554_v14 }
 0x465   : > { %1878 = vmatmul.bf16.gmra.mxu0 %v14947_v37 }
 0x466   : > { %v1731_v52 = vpop.f32.mrf.mxu2  ;;  %v1820_v10 = vpop.f32.mrf.mxu3 }
 0x467   : > { %v1644_v42 = vpop.f32.mrf.mxu1  ;;  %v1732_v55 = vadd.f32 %v1731_v52, %v12866_v50  ;;  %v14954_v52 = vld [vmem:[#allocation27_spill] sm:$0xff] }
 0x468   : > { %v1555_v26 = vpop.f32.mrf.mxu0 }
 0x469   : > { %v1556_v11 = vadd.f32 %v1555_v26, %v12821_v40  ;;  %v1821_v34 = vadd.f32 %v1820_v10, %v1732_v55  ;;  %v10387_v55 = vld [vmem:[#allocation7] sm:$0x3f] }
 0x46b   : > { %v1645_v13 = vadd.f32 %v1644_v42, %v1556_v11  ;;  %v14509_v11 = vperm.slane %v10387_v55, 4 }
 0x46c   : > { %8784 = vxpose.binary.xlu1.c.b16.cont [3/16] %v2249_v45, %v2248_v53, 128 }
 0x46d   : > { %1967 = vmatmul.bf16.gmra.mxu1 %v14948_v35  ;;  %v2252_v54 = vpack.c.bf16 %v1645_v13, %v1643_v8  ;;  %v14953_v35 = vld [vmem:[#allocation26_spill] sm:$0xff] }
 0x46e   : > { %v1733_v39 = vpop.f32.mrf.mxu2  ;;  %v1822_v58 = vpop.f32.mrf.mxu3 }
 0x46f   : > { %v1647_v48 = vpop.f32.mrf.mxu1  ;;  %2061 = vmatmul.bf16.gmra.mxu2 %v14949_v21  ;;  %v1734_v28 = vadd.f32 %v1733_v39, %v12866_v50 }
 0x470   : > { %v1558_v38 = vpop.f32.mrf.mxu0 }
 0x471   : > { %v1823_v15 = vadd.f32 %v1822_v58, %v1734_v28  ;;  %v1559_v41 = vadd.f32 %v1558_v38, %v12821_v40 }
 0x473   : > { %2150 = vmatmul.bf16.gmra.mxu3 %v14950_v2  ;;  %v2253_v29 = vpack.c.bf16 %v1823_v15, %v1821_v34  ;;  %v1648_v10 = vadd.f32 %v1647_v48, %v1559_v41 }
 0x475   : > { %1883 = vmatmul.bf16.gmra.mxu0 %v14949_v21 }
 0x476   : > { %v1736_v5 = vpop.f32.mrf.mxu2  ;;  %v1825_v30 = vpop.f32.mrf.mxu3 }
 0x477   : > { %v1649_v57 = vpop.f32.mrf.mxu1  ;;  %v1737_v49 = vadd.f32 %v1736_v5, %v12866_v50  ;;  %v14956_v5 = vld [vmem:[#allocation29_spill] sm:$0xff] }
 0x478   : > { %v1560_v3 = vpop.f32.mrf.mxu0 }
 0x479   : > { %v1561_v31 = vadd.f32 %v1560_v3, %v12821_v40  ;;  %v1826_v27 = vadd.f32 %v1825_v30, %v1737_v49  ;;  %v14957_v49 = vld [vmem:[#allocation30_spill] sm:$0xff] }
 0x47b   : > { %v1650_v45 = vadd.f32 %v1649_v57, %v1561_v31 }
 0x47c   : > { %8785 = vxpose.binary.xlu1.c.b16.cont [4/16] %v2251_v63, %v2250_v6, 128 }
 0x47d   : > { %1972 = vmatmul.bf16.gmra.mxu1 %v14950_v2  ;;  %v2254_v32 = vpack.c.bf16 %v1650_v45, %v1648_v10  ;;  %v14955_v2 = vld [vmem:[#allocation28_spill] sm:$0xff] }
 0x47e   : > { %v1738_v9 = vpop.f32.mrf.mxu2  ;;  %v1827_v23 = vpop.f32.mrf.mxu3 }
 0x47f   : > { %v1652_v19 = vpop.f32.mrf.mxu1  ;;  %2066 = vmatmul.bf16.gmra.mxu2 %v14951_v47  ;;  %v1739_v24 = vadd.f32 %v1738_v9, %v12866_v50 }
 0x480   : > { %v1563_v16 = vpop.f32.mrf.mxu0 }
 0x481   : > { %v1828_v60 = vadd.f32 %v1827_v23, %v1739_v24  ;;  %v1564_v33 = vadd.f32 %v1563_v16, %v12821_v40  ;;  %v14511_v16 = vperm.slane %v10387_v55, 5 }
 0x483   : > { %2155 = vmatmul.bf16.gmra.mxu3 %v14952_v20  ;;  %v2255_v53 = vpack.c.bf16 %v1828_v60, %v1826_v27  ;;  %v1653_v30 = vadd.f32 %v1652_v19, %v1564_v33 }
 0x485   : > { %1888 = vmatmul.bf16.gmra.mxu0 %v14951_v47 }
 0x486   : > { %v1741_v56 = vpop.f32.mrf.mxu2  ;;  %v1830_v44 = vpop.f32.mrf.mxu3 }
 0x487   : > { %v1654_v62 = vpop.f32.mrf.mxu1  ;;  %v1742_v61 = vadd.f32 %v1741_v56, %v12866_v50 }
 0x488   : > { %v1565_v1 = vpop.f32.mrf.mxu0 }
 0x489   : > { %v1566_v4 = vadd.f32 %v1565_v1, %v12821_v40  ;;  %v1831_v59 = vadd.f32 %v1830_v44, %v1742_v61 }
 0x48b   : > { %v1655_v63 = vadd.f32 %v1654_v62, %v1566_v4 }
 0x48c   : > { %8786 = vxpose.binary.xlu1.c.b16.cont [5/16] %v2253_v29, %v2252_v54, 128 }
 0x48d   : > { %1977 = vmatmul.bf16.gmra.mxu1 %v14952_v20  ;;  %v2256_v28 = vpack.c.bf16 %v1655_v63, %v1653_v30 }
 0x48e   : > { %v1743_v22 = vpop.f32.mrf.mxu2  ;;  %v1832_v51 = vpop.f32.mrf.mxu3 }
 0x48f   : > { %v14495_v37 = vpop.f32.mrf.mxu1  ;;  %2071 = vmatmul.bf16.gmra.mxu2 %v14953_v35  ;;  %v1744_v36 = vadd.f32 %v1743_v22, %v12866_v50 }
 0x490   : > { %v1568_v0 = vpop.f32.mrf.mxu0 }
 0x491   : > { %v1833_v25 = vadd.f32 %v1832_v51, %v1744_v36  ;;  %v1569_v44 = vadd.f32 %v1568_v0, %v12821_v40 }
 0x493   : > { %2160 = vmatmul.bf16.gmra.mxu3 %v14954_v52  ;;  %v2257_v6 = vpack.c.bf16 %v1833_v25, %v1831_v59  ;;  %v1658_v27 = vadd.f32 %v14495_v37, %v1569_v44 }
 0x495   : > { %1893 = vmatmul.bf16.gmra.mxu0 %v14953_v35 }
 0x496   : > { %v1746_v26 = vpop.f32.mrf.mxu2  ;;  %v1835_v42 = vpop.f32.mrf.mxu3 }
 0x497   : > { %v1659_v58 = vpop.f32.mrf.mxu1  ;;  %v1747_v20 = vadd.f32 %v1746_v26, %v12866_v50 }
 0x498   : > { %v1570_v39 = vpop.f32.mrf.mxu0 }
 0x499   : > { %v1571_v8 = vadd.f32 %v1570_v39, %v12821_v40  ;;  %v1836_v31 = vadd.f32 %v1835_v42, %v1747_v20 }
 0x49b   : > { %v1660_v41 = vadd.f32 %v1659_v58, %v1571_v8 }
 0x49c   : > { %8787 = vxpose.binary.xlu1.c.b16.cont [6/16] %v2255_v53, %v2254_v32, 128 }
 0x49d   : > { %1982 = vmatmul.bf16.gmra.mxu1 %v14954_v52  ;;  %v2258_v0 = vpack.c.bf16 %v1660_v41, %v1658_v27  ;;  %v14961_v27 = vld [vmem:[#allocation37_spill] sm:$0xff] }
 0x49e   : > { %v1748_v46 = vpop.f32.mrf.mxu2  ;;  %v1837_v38 = vpop.f32.mrf.mxu3 }
 0x49f   : > { %v1938_v21 = vpop.f32.mrf.mxu1  ;;  %2076 = vmatmul.bf16.gmra.mxu2 %v14955_v2  ;;  %v1749_v15 = vadd.f32 %v1748_v46, %v12866_v50  ;;  %v14958_v50 = vld [vmem:[#allocation31_spill] sm:$0xff] }
 0x4a0   : > { %v1849_v48 = vpop.f32.mrf.mxu0 }
 0x4a1   : > { %v1850_v19 = vadd.f32 %v1849_v48, %v14509_v11  ;;  %v1838_v62 = vadd.f32 %v1837_v38, %v1749_v15 }
 0x4a3   : > { %2165 = vmatmul.bf16.gmra.mxu3 %v14956_v5  ;;  %v1939_v24 = vadd.f32 %v1938_v21, %v1850_v19  ;;  %v2259_v45 = vpack.c.bf16 %v1838_v62, %v1836_v31  ;;  %v14959_v21 = vld [vmem:[#allocation32_spill] sm:$0xff] }
 0x4a5   : > { %1898 = vmatmul.bf16.gmra.mxu0 %v14955_v2 }
 0x4a6   : > { %v2027_v3 = vpop.f32.mrf.mxu2  ;;  %v2116_v57 = vpop.f32.mrf.mxu3 }
 0x4a7   : > { %v1940_v23 = vpop.f32.mrf.mxu1  ;;  %v2028_v47 = vadd.f32 %v2027_v3, %v14511_v16 }
 0x4a8   : > { %v1851_v9 = vpop.f32.mrf.mxu0 }
 0x4a9   : > { %v1852_v14 = vadd.f32 %v1851_v9, %v14509_v11  ;;  %v2117_v22 = vadd.f32 %v2116_v57, %v2028_v47 }
 0x4ab   : > { %v1941_v29 = vadd.f32 %v1940_v23, %v1852_v14 }
 0x4ac   : > { %8788 = vxpose.binary.xlu1.c.b16.cont [7/16] %v2257_v6, %v2256_v28, 128 }
 0x4ad   : > { %1987 = vmatmul.bf16.gmra.mxu1 %v14956_v5  ;;  %v2260_v60 = vpack.c.bf16 %v1941_v29, %v1939_v24 }
 0x4ae   : > { %v2029_v34 = vpop.f32.mrf.mxu2  ;;  %v2118_v13 = vpop.f32.mrf.mxu3 }
 0x4af   : > { %v2030_v56 = vadd.f32 %v2029_v34, %v14511_v16  ;;  %v1943_v1 = vpop.f32.mrf.mxu1  ;;  %2081 = vmatmul.bf16.gmra.mxu2 %v14957_v49 }
 0x4b0   : > { %v1854_v54 = vpop.f32.mrf.mxu0 }
 0x4b1   : > { %v2119_v51 = vadd.f32 %v2118_v13, %v2030_v56  ;;  %v1855_v42 = vadd.f32 %v1854_v54, %v14509_v11 }
 0x4b3   : > { %v2261_v35 = vpack.c.bf16 %v2119_v51, %v2117_v22  ;;  %2170 = vmatmul.bf16.gmra.mxu3 %v14958_v50  ;;  %v1944_v61 = vadd.f32 %v1943_v1, %v1855_v42 }
 0x4b5   : > { %8998 = vxpose.binary.xlu2.c.b16.start [1/16] %v2261_v35, %v2260_v60, 128  ;;  %v14960_v60 = vld [vmem:[#allocation36_spill] sm:$0xff] }
 0x4b6   : > { %v2032_v52 = vpop.f32.mrf.mxu2  ;;  %v2121_v40 = vpop.f32.mrf.mxu3  ;;  %1903 = vmatmul.bf16.gmra.mxu0 %v14957_v49 }
 0x4b7   : > { %v1945_v53 = vpop.f32.mrf.mxu1  ;;  %v2033_v32 = vadd.f32 %v2032_v52, %v14511_v16 }
 0x4b8   : > { %v1856_v10 = vpop.f32.mrf.mxu0 }
 0x4b9   : > { %v1857_v26 = vadd.f32 %v1856_v10, %v14509_v11  ;;  %v2122_v4 = vadd.f32 %v2121_v40, %v2033_v32 }
 0x4bb   : > { %v1946_v37 = vadd.f32 %v1945_v53, %v1857_v26 }
 0x4bc   : > { %8789 = vxpose.binary.xlu1.c.b16.end [8/16] %v2259_v45, %v2258_v0, 128 }
 0x4bd   : > { %1992 = vmatmul.bf16.gmra.mxu1 %v14958_v50  ;;  %v2262_v33 = vpack.c.bf16 %v1946_v37, %v1944_v61 }
 0x4be   : > { %v2034_v39 = vpop.f32.mrf.mxu2  ;;  %v2123_v58 = vpop.f32.mrf.mxu3 }
 0x4bf   : > { %v2035_v36 = vadd.f32 %v2034_v39, %v14511_v16  ;;  %v1948_v38 = vpop.f32.mrf.mxu1  ;;  %2086 = vmatmul.bf16.gmra.mxu2 %v14959_v21 }
 0x4c0   : > { %v1859_v46 = vpop.f32.mrf.mxu0 }
 0x4c1   : > { %v2124_v48 = vadd.f32 %v2123_v58, %v2035_v36  ;;  %v1860_v6 = vadd.f32 %v1859_v46, %v14509_v11 }
 0x4c3   : > { %v2263_v25 = vpack.c.bf16 %v2124_v48, %v2122_v4  ;;  %2175 = vmatmul.bf16.gmra.mxu3 %v14902_v17  ;;  %v1949_v15 = vadd.f32 %v1948_v38, %v1860_v6 }
 0x4c5   : > { %8999 = vxpose.binary.xlu2.c.b16.cont [2/16] %v2263_v25, %v2262_v33, 128 }
 0x4c6   : > { %v2037_v2 = vpop.f32.mrf.mxu2  ;;  %v2126_v59 = vpop.f32.mrf.mxu3  ;;  %1908 = vmatmul.bf16.gmra.mxu0 %v14959_v21 }
 0x4c7   : > { %v1950_v5 = vpop.f32.mrf.mxu1  ;;  %v2038_v3 = vadd.f32 %v2037_v2, %v14511_v16 }
 0x4c8   : > { %v1861_v63 = vpop.f32.mrf.mxu0 }
 0x4c9   : > { %v1862_v30 = vadd.f32 %v1861_v63, %v14509_v11  ;;  %v2127_v19 = vadd.f32 %v2126_v59, %v2038_v3 }
 0x4cb   : > { %v1951_v9 = vadd.f32 %v1950_v5, %v1862_v30 }
 0x4cd   : > { %1997 = vmatmul.bf16.gmra.mxu1 %v14902_v17  ;;  %v2264_v34 = vpack.c.bf16 %v1951_v9, %v1949_v15 }
 0x4ce   : > { %v2039_v57 = vpop.f32.mrf.mxu2  ;;  %v2128_v28 = vpop.f32.mrf.mxu3 }
 0x4cf   : > { %v2040_v23 = vadd.f32 %v2039_v57, %v14511_v16  ;;  %v1953_v14 = vpop.f32.mrf.mxu1  ;;  %2091 = vmatmul.bf16.gmra.mxu2 %v14903_v12 }
 0x4d0   : > { %v1864_v55 = vpop.f32.mrf.mxu0 }
 0x4d1   : > { %v2129_v47 = vadd.f32 %v2128_v28, %v2040_v23  ;;  %v1865_v44 = vadd.f32 %v1864_v55, %v14509_v11 }
 0x4d3   : > { %v2265_v13 = vpack.c.bf16 %v2129_v47, %v2127_v19  ;;  %2180 = vmatmul.bf16.gmra.mxu3 %v14904_v43  ;;  %v1954_v31 = vadd.f32 %v1953_v14, %v1865_v44 }
 0x4d5   : > { %9000 = vxpose.binary.xlu2.c.b16.cont [3/16] %v2265_v13, %v2264_v34, 128 }
 0x4d6   : > { %v2042_v20 = vpop.f32.mrf.mxu2  ;;  %v2131_v8 = vpop.f32.mrf.mxu3  ;;  %1913 = vmatmul.bf16.gmra.mxu0 %v14903_v12 }
 0x4d7   : > { %v1955_v29 = vpop.f32.mrf.mxu1  ;;  %v2043_v54 = vadd.f32 %v2042_v20, %v14511_v16 }
 0x4d8   : > { %v1866_v17 = vpop.f32.mrf.mxu0 }
 0x4d9   : > { %v1867_v56 = vadd.f32 %v1866_v17, %v14509_v11  ;;  %v2132_v41 = vadd.f32 %v2131_v8, %v2043_v54 }
 0x4db   : > { %v1956_v24 = vadd.f32 %v1955_v29, %v1867_v56 }
 0x4dd   : > { %2002 = vmatmul.bf16.gmra.mxu1 %v14904_v43  ;;  %v2266_v35 = vpack.c.bf16 %v1956_v24, %v1954_v31 }
 0x4de   : > { %v2044_v1 = vpop.f32.mrf.mxu2  ;;  %v2133_v62 = vpop.f32.mrf.mxu3 }
 0x4df   : > { %v2045_v22 = vadd.f32 %v2044_v1, %v14511_v16  ;;  %v1958_v49 = vpop.f32.mrf.mxu1  ;;  %2096 = vmatmul.bf16.gmra.mxu2 %v14960_v60 }
 0x4e0   : > { %v1869_v51 = vpop.f32.mrf.mxu0 }
 0x4e1   : > { %v2134_v12 = vadd.f32 %v2133_v62, %v2045_v22  ;;  %v1870_v10 = vadd.f32 %v1869_v51, %v14509_v11 }
 0x4e3   : > { %v2267_v50 = vpack.c.bf16 %v2134_v12, %v2132_v41  ;;  %2185 = vmatmul.bf16.gmra.mxu3 %v14961_v27  ;;  %v1959_v36 = vadd.f32 %v1958_v49, %v1870_v10 }
 0x4e5   : > { %9001 = vxpose.binary.xlu2.c.b16.cont [4/16] %v2267_v50, %v2266_v35, 128 }
 0x4e6   : > { %v2047_v45 = vpop.f32.mrf.mxu2  ;;  %v2136_v52 = vpop.f32.mrf.mxu3  ;;  %1918 = vmatmul.bf16.gmra.mxu0 %v14960_v60 }
 0x4e7   : > { %v1960_v40 = vpop.f32.mrf.mxu1  ;;  %v2048_v53 = vadd.f32 %v2047_v45, %v14511_v16 }
 0x4e8   : > { %v1871_v43 = vpop.f32.mrf.mxu0 }
 0x4e9   : > { %v1872_v0 = vadd.f32 %v1871_v43, %v14509_v11  ;;  %v2137_v46 = vadd.f32 %v2136_v52, %v2048_v53 }
 0x4eb   : > { %v1961_v32 = vadd.f32 %v1960_v40, %v1872_v0 }
 0x4ed   : > { %2007 = vmatmul.bf16.gmra.mxu1 %v14961_v27  ;;  %v2268_v61 = vpack.c.bf16 %v1961_v32, %v1959_v36 }
 0x4ee   : > { %v2049_v26 = vpop.f32.mrf.mxu2  ;;  %v2138_v42 = vpop.f32.mrf.mxu3 }
 0x4ef   : > { %v2050_v39 = vadd.f32 %v2049_v26, %v14511_v16  ;;  %v1963_v37 = vpop.f32.mrf.mxu1  ;;  %2101 = vmatmul.bf16.gmra.mxu2 %v14922_v7 }
 0x4f0   : > { %v1874_v58 = vpop.f32.mrf.mxu0 }
 0x4f1   : > { %v2139_v38 = vadd.f32 %v2138_v42, %v2050_v39  ;;  %v1875_v59 = vadd.f32 %v1874_v58, %v14509_v11 }
 0x4f3   : > { %v2269_v4 = vpack.c.bf16 %v2139_v38, %v2137_v46  ;;  %2190 = vmatmul.bf16.gmra.mxu3 %v14924_v18  ;;  %v1964_v9 = vadd.f32 %v1963_v37, %v1875_v59 }
 0x4f5   : > { %9002 = vxpose.binary.xlu2.c.b16.cont [5/16] %v2269_v4, %v2268_v61, 128 }
 0x4f6   : > { %v2052_v48 = vpop.f32.mrf.mxu2  ;;  %v2141_v21 = vpop.f32.mrf.mxu3  ;;  %1923 = vmatmul.bf16.gmra.mxu0 %v14922_v7 }
 0x4f7   : > { %v1965_v25 = vpop.f32.mrf.mxu1  ;;  %v2053_v63 = vadd.f32 %v2052_v48, %v14511_v16 }
 0x4f8   : > { %v1876_v33 = vpop.f32.mrf.mxu0 }
 0x4f9   : > { %v1877_v2 = vadd.f32 %v1876_v33, %v14509_v11  ;;  %v2142_v23 = vadd.f32 %v2141_v21, %v2053_v63 }
 0x4fb   : > { %v1966_v6 = vadd.f32 %v1965_v25, %v1877_v2 }
 0x4fd   : > { %2012 = vmatmul.bf16.gmra.mxu1 %v14924_v18  ;;  %v2270_v55 = vpack.c.bf16 %v1966_v6, %v1964_v9 }
 0x4fe   : > { %v2054_v5 = vpop.f32.mrf.mxu2  ;;  %v2143_v30 = vpop.f32.mrf.mxu3 }
 0x4ff   : > { %v2055_v3 = vadd.f32 %v2054_v5, %v14511_v16  ;;  %v1968_v28 = vpop.f32.mrf.mxu1 }
 0x500   : > { %v1879_v57 = vpop.f32.mrf.mxu0 }
 0x501   : > { %v2144_v7 = vadd.f32 %v2143_v30, %v2055_v3  ;;  %v1880_v20 = vadd.f32 %v1879_v57, %v14509_v11 }
 0x503   : > { %v2271_v14 = vpack.c.bf16 %v2144_v7, %v2142_v23  ;;  %v1969_v1 = vadd.f32 %v1968_v28, %v1880_v20 }
 0x505   : > { %9003 = vxpose.binary.xlu2.c.b16.cont [6/16] %v2271_v14, %v2270_v55, 128 }
 0x506   : > { %v2057_v15 = vpop.f32.mrf.mxu2  ;;  %v2146_v19 = vpop.f32.mrf.mxu3 }
 0x507   : > { %v1970_v34 = vpop.f32.mrf.mxu1  ;;  %v2058_v18 = vadd.f32 %v2057_v15, %v14511_v16 }
 0x508   : > { %v1881_v47 = vpop.f32.mrf.mxu0 }
 0x509   : > { %v1882_v13 = vadd.f32 %v1881_v47, %v14509_v11  ;;  %v2147_v62 = vadd.f32 %v2146_v19, %v2058_v18 }
 0x50b   : > { %v1971_v29 = vadd.f32 %v1970_v34, %v1882_v13 }
 0x50d   : > { %v2272_v22 = vpack.c.bf16 %v1971_v29, %v1969_v1 }
 0x50e   : > { %v2059_v8 = vpop.f32.mrf.mxu2  ;;  %v2148_v17 = vpop.f32.mrf.mxu3 }
 0x50f   : > { %v2060_v56 = vadd.f32 %v2059_v8, %v14511_v16  ;;  %v1973_v54 = vpop.f32.mrf.mxu1 }
 0x510   : > { %v1884_v44 = vpop.f32.mrf.mxu0 }
 0x511   : > { %v2149_v24 = vadd.f32 %v2148_v17, %v2060_v56  ;;  %v1885_v35 = vadd.f32 %v1884_v44, %v14509_v11  ;;  %v8790_v56 = vpop.trf.xlu1  ;;  %v8766_v44 = vpop.trf.xlu0 }
 0x512   : > { %v8841_v1 = vunpack.c.h.b16 %v8790_v56 }
 0x513   : > { %v2273_v51 = vpack.c.bf16 %v2149_v24, %v2147_v62  ;;  %v1974_v10 = vadd.f32 %v1973_v54, %v1885_v35  ;;  %v8839_v54 = vunpack.c.l.b16 %v8790_v56  ;;  %v8838_v62 = vunpack.c.l.b16 %v8766_v44 }
 0x514   : > { %v8840_v24 = vunpack.c.h.b16 %v8766_v44 }
 0x515   : > { %9004 = vxpose.binary.xlu2.c.b16.cont [7/16] %v2273_v51, %v2272_v22, 128 }
 0x516   : > { %v2062_v49 = vpop.f32.mrf.mxu2  ;;  %v2151_v31 = vpop.f32.mrf.mxu3 }
 0x517   : > { %v1975_v12 = vpop.f32.mrf.mxu1  ;;  %v2063_v50 = vadd.f32 %v2062_v49, %v14511_v16  ;;  %v8902_v49 = vpack.c.b16 %v8839_v54, %v8838_v62 }
 0x518   : > { %v1886_v41 = vpop.f32.mrf.mxu0 }
 0x519   : > { %v1887_v60 = vadd.f32 %v1886_v41, %v14509_v11  ;;  %v2152_v53 = vadd.f32 %v2151_v31, %v2063_v50  ;;  %v8903_v31 = vpack.c.b16 %v8841_v1, %v8840_v24  ;;  %8966 = vst [vmem:[%s14581_s17] sm:$0xff] %v8902_v49 }
 0x51b   : > { %v1976_v52 = vadd.f32 %v1975_v12, %v1887_v60  ;;  %8967 = vst [vmem:[%s14581_s17 + $0x8] sm:$0xff] %v8903_v31 }
 0x51d   : > { %v2274_v42 = vpack.c.bf16 %v1976_v52, %v1974_v10 }
 0x51e   : > { %v2064_v27 = vpop.f32.mrf.mxu2  ;;  %v2153_v45 = vpop.f32.mrf.mxu3 }
 0x51f   : > { %v2065_v43 = vadd.f32 %v2064_v27, %v14511_v16  ;;  %v1978_v0 = vpop.f32.mrf.mxu1  ;;  %v8791_v27 = vpop.trf.xlu1 }
 0x520   : > { %v1889_v40 = vpop.f32.mrf.mxu0 }
 0x521   : > { %v2154_v26 = vadd.f32 %v2153_v45, %v2065_v43  ;;  %v1890_v38 = vadd.f32 %v1889_v40, %v14509_v11  ;;  %v8767_v45 = vpop.trf.xlu0  ;;  %v8871_v40 = vunpack.c.l.b16 %v8791_v27 }
 0x522   : > { %v8870_v10 = vunpack.c.l.b16 %v8767_v45 }
 0x523   : > { %v2275_v32 = vpack.c.bf16 %v2154_v26, %v2152_v53  ;;  %v1979_v59 = vadd.f32 %v1978_v0, %v1890_v38  ;;  %v8873_v0 = vunpack.c.h.b16 %v8791_v27  ;;  %v8872_v53 = vunpack.c.h.b16 %v8767_v45 }
 0x525   : > { %9005 = vxpose.binary.xlu2.c.b16.end [8/16] %v2275_v32, %v2274_v42, 128 }
 0x526   : > { %v2067_v39 = vpop.f32.mrf.mxu2  ;;  %v2156_v58 = vpop.f32.mrf.mxu3 }
 0x527   : > { %v1980_v36 = vpop.f32.mrf.mxu1  ;;  %v2068_v61 = vadd.f32 %v2067_v39, %v14511_v16 }
 0x528   : > { %v1891_v37 = vpop.f32.mrf.mxu0 }
 0x529   : > { %v1892_v46 = vadd.f32 %v1891_v37, %v14509_v11  ;;  %v2157_v63 = vadd.f32 %v2156_v58, %v2068_v61  ;;  %v8918_v58 = vpack.c.b16 %v8871_v40, %v8870_v10  ;;  %v8919_v37 = vpack.c.b16 %v8873_v0, %v8872_v53 }
 0x52b   : > { %v1981_v21 = vadd.f32 %v1980_v36, %v1892_v46  ;;  %8982 = vst [vmem:[%s14581_s17 + $0x80] sm:$0xff] %v8918_v58 }
 0x52c   : > { %8983 = vst [vmem:[%s14581_s17 + $0x88] sm:$0xff] %v8919_v37 }
 0x52d   : > { %v2276_v30 = vpack.c.bf16 %v1981_v21, %v1979_v59  ;;  %v8768_v21 = vpop.trf.xlu0 }
 0x52e   : > { %v2069_v4 = vpop.f32.mrf.mxu2  ;;  %v2158_v48 = vpop.f32.mrf.mxu3 }
 0x52f   : > { %v2070_v33 = vadd.f32 %v2069_v4, %v14511_v16  ;;  %v1983_v2 = vpop.f32.mrf.mxu1 }
 0x530   : > { %v1894_v25 = vpop.f32.mrf.mxu0 }
 0x531   : > { %v2159_v5 = vadd.f32 %v2158_v48, %v2070_v33  ;;  %v1895_v7 = vadd.f32 %v1894_v25, %v14509_v11  ;;  %v8792_v48 = vpop.trf.xlu1 }
 0x532   : > { %v8845_v59 = vunpack.c.h.b16 %v8792_v48 }
 0x533   : > { %v2277_v6 = vpack.c.bf16 %v2159_v5, %v2157_v63  ;;  %v1984_v20 = vadd.f32 %v1983_v2, %v1895_v7  ;;  %v8843_v2 = vunpack.c.l.b16 %v8792_v48  ;;  %v8842_v63 = vunpack.c.l.b16 %v8768_v21 }
 0x534   : > { %v8844_v5 = vunpack.c.h.b16 %v8768_v21 }
 0x535   : > { %9022 = vxpose.binary.xlu0.c.b16.start [1/16] %v2277_v6, %v2276_v30, 128 }
 0x536   : > { %v2072_v3 = vpop.f32.mrf.mxu2  ;;  %v2161_v57 = vpop.f32.mrf.mxu3 }
 0x537   : > { %v1985_v9 = vpop.f32.mrf.mxu1  ;;  %v2073_v55 = vadd.f32 %v2072_v3, %v14511_v16  ;;  %v8904_v3 = vpack.c.b16 %v8843_v2, %v8842_v63 }
 0x538   : > { %v1896_v28 = vpop.f32.mrf.mxu0 }
 0x539   : > { %v1897_v23 = vadd.f32 %v1896_v28, %v14509_v11  ;;  %v2162_v18 = vadd.f32 %v2161_v57, %v2073_v55  ;;  %v8905_v57 = vpack.c.b16 %v8845_v59, %v8844_v5  ;;  %8968 = vst [vmem:[%s14581_s17 + $0x10] sm:$0xff] %v8904_v3  ;;  %v8793_v7 = vpop.trf.xlu1  ;;  %v8769_v55 = vpop.trf.xlu0 }
 0x53b   : > { %v1986_v19 = vadd.f32 %v1985_v9, %v1897_v23  ;;  %8969 = vst [vmem:[%s14581_s17 + $0x18] sm:$0xff] %v8905_v57 }
 0x53d   : > { %v2278_v17 = vpack.c.bf16 %v1986_v19, %v1984_v20  ;;  %v8875_v19 = vunpack.c.l.b16 %v8793_v7 }
 0x53e   : > { %v2074_v14 = vpop.f32.mrf.mxu2  ;;  %v2163_v15 = vpop.f32.mrf.mxu3 }
 0x53f   : > { %v2075_v47 = vadd.f32 %v2074_v14, %v14511_v16  ;;  %v1988_v13 = vpop.f32.mrf.mxu1 }
 0x540   : > { %v1899_v34 = vpop.f32.mrf.mxu0 }
 0x541   : > { %v2164_v8 = vadd.f32 %v2163_v15, %v2075_v47  ;;  %v1900_v35 = vadd.f32 %v1899_v34, %v14509_v11  ;;  %v8877_v47 = vunpack.c.h.b16 %v8793_v7  ;;  %v8874_v34 = vunpack.c.l.b16 %v8769_v55 }
 0x543   : > { %v2279_v29 = vpack.c.bf16 %v2164_v8, %v2162_v18  ;;  %v1989_v36 = vadd.f32 %v1988_v13, %v1900_v35  ;;  %v8876_v13 = vunpack.c.h.b16 %v8769_v55 }
 0x545   : > { %9023 = vxpose.binary.xlu0.c.b16.cont [2/16] %v2279_v29, %v2278_v17, 128  ;;  %v8920_v29 = vpack.c.b16 %v8875_v19, %v8874_v34  ;;  %v8921_v56 = vpack.c.b16 %v8877_v47, %v8876_v13 }
 0x546   : > { %v2077_v22 = vpop.f32.mrf.mxu2  ;;  %v2166_v51 = vpop.f32.mrf.mxu3 }
 0x547   : > { %v1990_v12 = vpop.f32.mrf.mxu1  ;;  %v2078_v50 = vadd.f32 %v2077_v22, %v14511_v16  ;;  %8984 = vst [vmem:[%s14581_s17 + $0x90] sm:$0xff] %v8920_v29  ;;  %v8794_v22 = vpop.trf.xlu1 }
 0x548   : > { %v1901_v41 = vpop.f32.mrf.mxu0  ;;  %8985 = vst [vmem:[%s14581_s17 + $0x98] sm:$0xff] %v8921_v56 }
 0x549   : > { %v1902_v60 = vadd.f32 %v1901_v41, %v14509_v11  ;;  %v2167_v46 = vadd.f32 %v2166_v51, %v2078_v50  ;;  %v8770_v51 = vpop.trf.xlu0  ;;  %v8847_v41 = vunpack.c.l.b16 %v8794_v22 }
 0x54a   : > { %v8848_v35 = vunpack.c.h.b16 %v8770_v51 }
 0x54b   : > { %v1991_v26 = vadd.f32 %v1990_v12, %v1902_v60  ;;  %v8849_v12 = vunpack.c.h.b16 %v8794_v22  ;;  %v8846_v60 = vunpack.c.l.b16 %v8770_v51 }
 0x54d   : > { %v2280_v61 = vpack.c.bf16 %v1991_v26, %v1989_v36  ;;  %v8906_v45 = vpack.c.b16 %v8847_v41, %v8846_v60 }
 0x54e   : > { %v2079_v52 = vpop.f32.mrf.mxu2  ;;  %v2168_v43 = vpop.f32.mrf.mxu3 }
 0x54f   : > { %v2080_v42 = vadd.f32 %v2079_v52, %v14511_v16  ;;  %v1993_v39 = vpop.f32.mrf.mxu1  ;;  %v8907_v52 = vpack.c.b16 %v8849_v12, %v8848_v35  ;;  %8970 = vst [vmem:[%s14581_s17 + $0x20] sm:$0xff] %v8906_v45  ;;  %v8795_v10 = vpop.trf.xlu1 }
 0x550   : > { %v1904_v32 = vpop.f32.mrf.mxu0 }
 0x551   : > { %v2169_v38 = vadd.f32 %v2168_v43, %v2080_v42  ;;  %v1905_v9 = vadd.f32 %v1904_v32, %v14509_v11  ;;  %8971 = vst [vmem:[%s14581_s17 + $0x28] sm:$0xff] %v8907_v52  ;;  %v8771_v53 = vpop.trf.xlu0  ;;  %v8879_v32 = vunpack.c.l.b16 %v8795_v10 }
 0x552   : > { %v8878_v58 = vunpack.c.l.b16 %v8771_v53  ;;  %v8880_v37 = vunpack.c.h.b16 %v8771_v53 }
 0x553   : > { %v2281_v4 = vpack.c.bf16 %v2169_v38, %v2167_v46  ;;  %v1994_v44 = vadd.f32 %v1993_v39, %v1905_v9  ;;  %v8881_v39 = vunpack.c.h.b16 %v8795_v10 }
 0x555   : > { %9024 = vxpose.binary.xlu0.c.b16.cont [3/16] %v2281_v4, %v2280_v61, 128  ;;  %v8922_v4 = vpack.c.b16 %v8879_v32, %v8878_v58  ;;  %v8923_v48 = vpack.c.b16 %v8881_v39, %v8880_v37 }
 0x556   : > { %v2082_v33 = vpop.f32.mrf.mxu2  ;;  %v2171_v25 = vpop.f32.mrf.mxu3 }
 0x557   : > { %v1995_v6 = vpop.f32.mrf.mxu1  ;;  %v2083_v23 = vadd.f32 %v2082_v33, %v14511_v16  ;;  %8986 = vst [vmem:[%s14581_s17 + $0xa0] sm:$0xff] %v8922_v4  ;;  %v8796_v63 = vpop.trf.xlu1 }
 0x558   : > { %v1906_v30 = vpop.f32.mrf.mxu0  ;;  %8987 = vst [vmem:[%s14581_s17 + $0xa8] sm:$0xff] %v8923_v48  ;;  %v8851_v3 = vunpack.c.l.b16 %v8796_v63  ;;  %v8853_v57 = vunpack.c.h.b16 %v8796_v63 }
 0x559   : > { %v1907_v28 = vadd.f32 %v1906_v30, %v14509_v11  ;;  %v2172_v54 = vadd.f32 %v2171_v25, %v2083_v23  ;;  %v8772_v5 = vpop.trf.xlu0 }
 0x55a   : > { %v8852_v9 = vunpack.c.h.b16 %v8772_v5 }
 0x55b   : > { %v1996_v20 = vadd.f32 %v1995_v6, %v1907_v28  ;;  %v8850_v28 = vunpack.c.l.b16 %v8772_v5 }
 0x55d   : > { %v2282_v62 = vpack.c.bf16 %v1996_v20, %v1994_v44  ;;  %v8908_v55 = vpack.c.b16 %v8851_v3, %v8850_v28 }
 0x55e   : > { %v2084_v14 = vpop.f32.mrf.mxu2  ;;  %v2173_v15 = vpop.f32.mrf.mxu3 }
 0x55f   : > { %v2085_v18 = vadd.f32 %v2084_v14, %v14511_v16  ;;  %v1998_v17 = vpop.f32.mrf.mxu1  ;;  %v8909_v14 = vpack.c.b16 %v8853_v57, %v8852_v9  ;;  %8972 = vst [vmem:[%s14581_s17 + $0x30] sm:$0xff] %v8908_v55  ;;  %v8797_v34 = vpop.trf.xlu1 }
 0x560   : > { %v1909_v8 = vpop.f32.mrf.mxu0 }
 0x561   : > { %v2174_v1 = vadd.f32 %v2173_v15, %v2085_v18  ;;  %v1910_v40 = vadd.f32 %v1909_v8, %v14509_v11  ;;  %8973 = vst [vmem:[%s14581_s17 + $0x38] sm:$0xff] %v8909_v14  ;;  %v8773_v13 = vpop.trf.xlu0  ;;  %v8883_v8 = vunpack.c.l.b16 %v8797_v34 }
 0x562   : > { %v8882_v29 = vunpack.c.l.b16 %v8773_v13  ;;  %v8884_v56 = vunpack.c.h.b16 %v8773_v13 }
 0x563   : > { %v2283_v24 = vpack.c.bf16 %v2174_v1, %v2172_v54  ;;  %v1999_v21 = vadd.f32 %v1998_v17, %v1910_v40  ;;  %v8885_v17 = vunpack.c.h.b16 %v8797_v34 }
 0x565   : > { %9025 = vxpose.binary.xlu0.c.b16.cont [4/16] %v2283_v24, %v2282_v62, 128  ;;  %v8924_v24 = vpack.c.b16 %v8883_v8, %v8882_v29  ;;  %v8925_v22 = vpack.c.b16 %v8885_v17, %v8884_v56 }
 0x566   : > { %v2087_v49 = vpop.f32.mrf.mxu2  ;;  %v2176_v31 = vpop.f32.mrf.mxu3 }
 0x567   : > { %v2000_v27 = vpop.f32.mrf.mxu1  ;;  %v2088_v0 = vadd.f32 %v2087_v49, %v14511_v16  ;;  %8988 = vst [vmem:[%s14581_s17 + $0xb0] sm:$0xff] %v8924_v24  ;;  %v8798_v60 = vpop.trf.xlu1 }
 0x568   : > { %v1911_v50 = vpop.f32.mrf.mxu0  ;;  %8989 = vst [vmem:[%s14581_s17 + $0xb8] sm:$0xff] %v8925_v22  ;;  %v8855_v45 = vunpack.c.l.b16 %v8798_v60  ;;  %v8857_v52 = vunpack.c.h.b16 %v8798_v60 }
 0x569   : > { %v1912_v43 = vadd.f32 %v1911_v50, %v14509_v11  ;;  %v2177_v33 = vadd.f32 %v2176_v31, %v2088_v0  ;;  %v8774_v35 = vpop.trf.xlu0 }
 0x56a   : > { %v8856_v40 = vunpack.c.h.b16 %v8774_v35 }
 0x56b   : > { %v2001_v36 = vadd.f32 %v2000_v27, %v1912_v43  ;;  %v8854_v43 = vunpack.c.l.b16 %v8774_v35 }
 0x56c   : > { %v8911_v53 = vpack.c.b16 %v8857_v52, %v8856_v40 }
 0x56d   : > { %v2284_v2 = vpack.c.bf16 %v2001_v36, %v1999_v21  ;;  %v8910_v10 = vpack.c.b16 %v8855_v45, %v8854_v43 }
 0x56e   : > { %v2089_v26 = vpop.f32.mrf.mxu2  ;;  %v2178_v42 = vpop.f32.mrf.mxu3  ;;  %8975 = vst [vmem:[%s14581_s17 + $0x48] sm:$0xff] %v8911_v53 }
 0x56f   : > { %v2090_v46 = vadd.f32 %v2089_v26, %v14511_v16  ;;  %v2003_v61 = vpop.f32.mrf.mxu1  ;;  %8974 = vst [vmem:[%s14581_s17 + $0x40] sm:$0xff] %v8910_v10  ;;  %v8799_v58 = vpop.trf.xlu1 }
 0x570   : > { %v1914_v38 = vpop.f32.mrf.mxu0 }
 0x571   : > { %v2179_v25 = vadd.f32 %v2178_v42, %v2090_v46  ;;  %v1915_v19 = vadd.f32 %v1914_v38, %v14509_v11  ;;  %v8775_v37 = vpop.trf.xlu0  ;;  %v8887_v38 = vunpack.c.l.b16 %v8799_v58 }
 0x572   : > { %v8886_v4 = vunpack.c.l.b16 %v8775_v37  ;;  %v8888_v48 = vunpack.c.h.b16 %v8775_v37 }
 0x573   : > { %v2285_v59 = vpack.c.bf16 %v2179_v25, %v2177_v33  ;;  %v2004_v51 = vadd.f32 %v2003_v61, %v1915_v19  ;;  %v8889_v61 = vunpack.c.h.b16 %v8799_v58 }
 0x575   : > { %9026 = vxpose.binary.xlu0.c.b16.cont [5/16] %v2285_v59, %v2284_v2, 128  ;;  %v8926_v2 = vpack.c.b16 %v8887_v38, %v8886_v4  ;;  %v8927_v59 = vpack.c.b16 %v8889_v61, %v8888_v48 }
 0x576   : > { %v2092_v30 = vpop.f32.mrf.mxu2  ;;  %v2181_v6 = vpop.f32.mrf.mxu3 }
 0x577   : > { %v2005_v7 = vpop.f32.mrf.mxu1  ;;  %v2093_v47 = vadd.f32 %v2092_v30, %v14511_v16  ;;  %8990 = vst [vmem:[%s14581_s17 + $0xc0] sm:$0xff] %v8926_v2  ;;  %v8800_v28 = vpop.trf.xlu1 }
 0x578   : > { %v1916_v23 = vpop.f32.mrf.mxu0  ;;  %8991 = vst [vmem:[%s14581_s17 + $0xc8] sm:$0xff] %v8927_v59  ;;  %v8859_v55 = vunpack.c.l.b16 %v8800_v28  ;;  %v8861_v14 = vunpack.c.h.b16 %v8800_v28 }
 0x579   : > { %v1917_v15 = vadd.f32 %v1916_v23, %v14509_v11  ;;  %v2182_v49 = vadd.f32 %v2181_v6, %v2093_v47  ;;  %v8776_v9 = vpop.trf.xlu0 }
 0x57a   : > { %v8860_v19 = vunpack.c.h.b16 %v8776_v9 }
 0x57b   : > { %v2006_v44 = vadd.f32 %v2005_v7, %v1917_v15  ;;  %v8858_v15 = vunpack.c.l.b16 %v8776_v9 }
 0x57c   : > { %v8913_v13 = vpack.c.b16 %v8861_v14, %v8860_v19 }
 0x57d   : > { %v2286_v41 = vpack.c.bf16 %v2006_v44, %v2004_v51  ;;  %v8912_v34 = vpack.c.b16 %v8859_v55, %v8858_v15 }
 0x57e   : > { %v2094_v20 = vpop.f32.mrf.mxu2  ;;  %v2183_v18 = vpop.f32.mrf.mxu3  ;;  %8977 = vst [vmem:[%s14581_s17 + $0x58] sm:$0xff] %v8913_v13 }
 0x57f   : > { %v2095_v54 = vadd.f32 %v2094_v20, %v14511_v16  ;;  %v2008_v62 = vpop.f32.mrf.mxu1  ;;  %8976 = vst [vmem:[%s14581_s17 + $0x50] sm:$0xff] %v8912_v34  ;;  %v8801_v17 = vpop.trf.xlu1 }
 0x580   : > { %v1919_v1 = vpop.f32.mrf.mxu0 }
 0x581   : > { %v2184_v31 = vadd.f32 %v2183_v18, %v2095_v54  ;;  %v1920_v32 = vadd.f32 %v1919_v1, %v14509_v11  ;;  %v8777_v29 = vpop.trf.xlu0  ;;  %v8891_v54 = vunpack.c.l.b16 %v8801_v17  ;;  %v8893_v1 = vunpack.c.h.b16 %v8801_v17 }
 0x582   : > { %v8892_v24 = vunpack.c.h.b16 %v8777_v29 }
 0x583   : > { %v2287_v12 = vpack.c.bf16 %v2184_v31, %v2182_v49  ;;  %v2009_v63 = vadd.f32 %v2008_v62, %v1920_v32  ;;  %v8890_v62 = vunpack.c.l.b16 %v8777_v29 }
 0x585   : > { %9027 = vxpose.binary.xlu0.c.b16.cont [6/16] %v2287_v12, %v2286_v41, 128  ;;  %v8928_v31 = vpack.c.b16 %v8891_v54, %v8890_v62  ;;  %v8929_v41 = vpack.c.b16 %v8893_v1, %v8892_v24 }
 0x586   : > { %v2097_v50 = vpop.f32.mrf.mxu2  ;;  %v2186_v27 = vpop.f32.mrf.mxu3 }
 0x587   : > { %v2010_v26 = vpop.f32.mrf.mxu1  ;;  %v2098_v39 = vadd.f32 %v2097_v50, %v14511_v16  ;;  %8992 = vst [vmem:[%s14581_s17 + $0xd0] sm:$0xff] %v8928_v31 }
 0x588   : > { %v1921_v0 = vpop.f32.mrf.mxu0  ;;  %8993 = vst [vmem:[%s14581_s17 + $0xd8] sm:$0xff] %v8929_v41 }
 0x589   : > { %v1922_v42 = vadd.f32 %v1921_v0, %v14509_v11  ;;  %v2187_v5 = vadd.f32 %v2186_v27, %v2098_v39  ;;  %v8802_v27 = vpop.trf.xlu1  ;;  %v8778_v45 = vpop.trf.xlu0 }
 0x58a   : > { %v8863_v52 = vunpack.c.l.b16 %v8802_v27  ;;  %v8865_v43 = vunpack.c.h.b16 %v8802_v27  ;;  %v8864_v40 = vunpack.c.h.b16 %v8778_v45 }
 0x58b   : > { %v2011_v21 = vadd.f32 %v2010_v26, %v1922_v42 }
 0x58c   : > { %v8915_v10 = vpack.c.b16 %v8865_v43, %v8864_v40 }
 0x58d   : > { %v2288_v6 = vpack.c.bf16 %v2011_v21, %v2009_v63 }
 0x58e   : > { %v2099_v36 = vpop.f32.mrf.mxu2  ;;  %v2188_v46 = vpop.f32.mrf.mxu3  ;;  %8979 = vst [vmem:[%s14581_s17 + $0x68] sm:$0xff] %v8915_v10 }
 0x58f   : > { %v2100_v33 = vadd.f32 %v2099_v36, %v14511_v16  ;;  %v2013_v57 = vpop.f32.mrf.mxu1 }
 0x590   : > { %v1924_v25 = vpop.f32.mrf.mxu0 }
 0x591   : > { %v2189_v30 = vadd.f32 %v2188_v46, %v2100_v33  ;;  %v1925_v18 = vadd.f32 %v1924_v25, %v14509_v11  ;;  %v8803_v53 = vpop.trf.xlu1  ;;  %v8779_v26 = vpop.trf.xlu0 }
 0x592   : > { %v8895_v42 = vunpack.c.l.b16 %v8803_v53  ;;  %v8897_v32 = vunpack.c.h.b16 %v8803_v53  ;;  %v8894_v39 = vunpack.c.l.b16 %v8779_v26  ;;  %v8896_v58 = vunpack.c.h.b16 %v8779_v26 }
 0x593   : > { %v2289_v3 = vpack.c.bf16 %v2189_v30, %v2187_v5  ;;  %v2014_v12 = vadd.f32 %v2013_v57, %v1925_v18 }
 0x594   : > { %v8930_v37 = vpack.c.b16 %v8895_v42, %v8894_v39  ;;  %v8931_v36 = vpack.c.b16 %v8897_v32, %v8896_v58 }
 0x595   : > { %9028 = vxpose.binary.xlu0.c.b16.cont [7/16] %v2289_v3, %v2288_v6, 128  ;;  %v9006_v3 = vpop.trf.xlu2 }
 0x596   : > { %v2102_v23 = vpop.f32.mrf.mxu2  ;;  %v2191_v7 = vpop.f32.mrf.mxu3  ;;  %8994 = vst [vmem:[%s14581_s17 + $0xe0] sm:$0xff] %v8930_v37  ;;  %v9079_v55 = vunpack.c.l.b16 %v9006_v3  ;;  %v9081_v14 = vunpack.c.h.b16 %v9006_v3 }
 0x597   : > { %v2103_v8 = vadd.f32 %v2102_v23, %v14511_v16  ;;  %v2015_v56 = vpop.f32.mrf.mxu1  ;;  %8995 = vst [vmem:[%s14581_s17 + $0xe8] sm:$0xff] %v8931_v36 }
 0x598   : > { %v1926_v47 = vpop.f32.mrf.mxu0 }
 0x599   : > { %v1927_v20 = vadd.f32 %v1926_v47, %v14509_v11  ;;  %v2192_v11 = vadd.f32 %v2191_v7, %v2103_v8  ;;  %v8804_v46 = vpop.trf.xlu1  ;;  %v8780_v38 = vpop.trf.xlu0 }
 0x59a   : > { %v8867_v61 = vunpack.c.l.b16 %v8804_v46  ;;  %v8869_v4 = vunpack.c.h.b16 %v8804_v46  ;;  %v8866_v48 = vunpack.c.l.b16 %v8780_v38  ;;  %v8868_v21 = vunpack.c.h.b16 %v8780_v38 }
 0x59b   : > { %v2016_v22 = vadd.f32 %v2015_v56, %v1927_v20 }
 0x59c   : > { %v8916_v33 = vpack.c.b16 %v8867_v61, %v8866_v48  ;;  %v8917_v25 = vpack.c.b16 %v8869_v4, %v8868_v21 }
 0x59d   : > { %v2290_v35 = vpack.c.bf16 %v2016_v22, %v2014_v12  ;;  %v9007_v9 = vpop.trf.xlu2 }
 0x59e   : > { %v2104_v44 = vpop.f32.mrf.mxu2  ;;  %v2193_v49 = vpop.f32.mrf.mxu3  ;;  %8980 = vst [vmem:[%s14581_s17 + $0x70] sm:$0xff] %v8916_v33 }
 0x59f   : > { %v2105_v51 = vadd.f32 %v2104_v44, %v14511_v16  ;;  %v8862_v16 = vunpack.c.l.b16 %v8778_v45  ;;  %8981 = vst [vmem:[%s14581_s17 + $0x78] sm:$0xff] %v8917_v25 }
 0x5a1   : > { %v2194_v60 = vadd.f32 %v2193_v49, %v2105_v51  ;;  %v8914_v0 = vpack.c.b16 %v8863_v52, %v8862_v16  ;;  %v8805_v2 = vpop.trf.xlu1  ;;  %v8781_v59 = vpop.trf.xlu0 }
 0x5a2   : > { %v8899_v63 = vunpack.c.l.b16 %v8805_v2  ;;  %v8901_v5 = vunpack.c.h.b16 %v8805_v2  ;;  %v8898_v30 = vunpack.c.l.b16 %v8781_v59  ;;  %v8900_v6 = vunpack.c.h.b16 %v8781_v59 }
 0x5a3   : > { %v2291_v50 = vpack.c.bf16 %v2194_v60, %v2192_v11  ;;  %8978 = vst [vmem:[%s14581_s17 + $0x60] sm:$0xff] %v8914_v0 }
 0x5a4   : > { %v8932_v57 = vpack.c.b16 %v8899_v63, %v8898_v30  ;;  %v8933_v28 = vpack.c.b16 %v8901_v5, %v8900_v6 }
 0x5a5   : > { %9029 = vxpose.binary.xlu0.c.b16.end [8/16] %v2291_v50, %v2290_v35, 128  ;;  %v9008_v23 = vpop.trf.xlu2 }
 0x5a6   : > { %8996 = vst [vmem:[%s14581_s17 + $0xf0] sm:$0xff] %v8932_v57 }
 0x5a7   : > { %8997 = vst [vmem:[%s14581_s17 + $0xf8] sm:$0xff] %v8933_v28 }
 0x5ad   : > { %v9009_v7 = vpop.trf.xlu2 }
 0x5e1   : > { %v9030_v15 = vpop.trf.xlu0 }
 0x5e2   : > { %v9080_v19 = vunpack.c.l.b16 %v9030_v15  ;;  %v9082_v47 = vunpack.c.h.b16 %v9030_v15 }
 0x5e4   : > { %v9144_v34 = vpack.c.b16 %v9080_v19, %v9079_v55  ;;  %v9145_v13 = vpack.c.b16 %v9082_v47, %v9081_v14 }
 0x5e5   : > { %10505 = shalt.err (!%p10502_p3)
}
 0x5e6   : > { %s10578_s25 = smov 128   ;;  %s10579_s15 = smov 8   ;;  %9210 = vst [vmem:[%s10742_s8] sm:$0xff] %v9144_v34  ;;  %v9010_v20 = vpop.trf.xlu2  ;;  %v9112_v18 = vunpack.c.l.b16 %v9007_v9  ;;  %v9114_v8 = vunpack.c.h.b16 %v9007_v9  ;;  %v9083_v1 = vunpack.c.l.b16 %v9008_v23  ;;  %v9085_v62 = vunpack.c.h.b16 %v9008_v23 }
 0x5e7   : > { %10301 = dma.vmem_to_hbm [thread:$0]  (%p10693_p7), %s9311_s1, 4096, %s9313_s2, %s9283_s26, %s10578_s25, %s10578_s25, %s10579_s15   ;;  %v9116_v12 = vunpack.c.l.b16 %v9009_v7  ;;  %v9118_v11 = vunpack.c.h.b16 %v9009_v7  ;;  %v9088_v43 = vunpack.c.l.b16 %v9010_v20  ;;  %v9090_v16 = vunpack.c.h.b16 %v9010_v20 }
 0x5e8   : > { %9211 = vst [vmem:[%s10742_s8 + $0x8] sm:$0xff] %v9145_v13 }
 0x5e9   : > { %v9031_v17 = vpop.trf.xlu0 }
 0x5ea   : > { %v9113_v29 = vunpack.c.l.b16 %v9031_v17  ;;  %v9115_v56 = vunpack.c.h.b16 %v9031_v17 }
 0x5ec   : > { %v9161_v44 = vpack.c.b16 %v9113_v29, %v9112_v18  ;;  %v9162_v54 = vpack.c.b16 %v9115_v56, %v9114_v8 }
 0x5ee   : > { %9245 = vst [vmem:[%s10742_s8 + $0xa0] sm:$0xff] %v9161_v44  ;;  %v9011_v22 = vpop.trf.xlu2 }
 0x5ef   : > { %9246 = vst [vmem:[%s10742_s8 + $0xa8] sm:$0xff] %v9162_v54  ;;  %v9120_v32 = vunpack.c.l.b16 %v9011_v22  ;;  %v9122_v39 = vunpack.c.h.b16 %v9011_v22 }
 0x5f1   : > { %v9032_v24 = vpop.trf.xlu0 }
 0x5f2   : > { %v9084_v51 = vunpack.c.l.b16 %v9032_v24  ;;  %v9086_v49 = vunpack.c.h.b16 %v9032_v24 }
 0x5f4   : > { %v9146_v31 = vpack.c.b16 %v9084_v51, %v9083_v1  ;;  %v9147_v41 = vpack.c.b16 %v9086_v49, %v9085_v62 }
 0x5f6   : > { %9212 = vst [vmem:[%s10742_s8 + $0x10] sm:$0xff] %v9146_v31  ;;  %v9012_v27 = vpop.trf.xlu2 }
 0x5f7   : > { %9213 = vst [vmem:[%s10742_s8 + $0x18] sm:$0xff] %v9147_v41  ;;  %v9092_v4 = vunpack.c.l.b16 %v9012_v27  ;;  %v9094_v48 = vunpack.c.h.b16 %v9012_v27 }
 0x5f9   : > { %v9033_v60 = vpop.trf.xlu0 }
 0x5fa   : > { %v9117_v35 = vunpack.c.l.b16 %v9033_v60  ;;  %v9119_v50 = vunpack.c.h.b16 %v9033_v60 }
 0x5fc   : > { %v9163_v45 = vpack.c.b16 %v9117_v35, %v9116_v12  ;;  %v9164_v52 = vpack.c.b16 %v9119_v50, %v9118_v11 }
 0x5fe   : > { %9247 = vst [vmem:[%s10742_s8 + $0xb0] sm:$0xff] %v9163_v45  ;;  %v9013_v42 = vpop.trf.xlu2 }
 0x5ff   : > { %9248 = vst [vmem:[%s10742_s8 + $0xb8] sm:$0xff] %v9164_v52  ;;  %v9124_v63 = vunpack.c.l.b16 %v9013_v42  ;;  %v9126_v5 = vunpack.c.h.b16 %v9013_v42 }
 0x601   : > { %v9034_v40 = vpop.trf.xlu0 }
 0x602   : > { %v9089_v0 = vunpack.c.l.b16 %v9034_v40  ;;  %v9091_v10 = vunpack.c.h.b16 %v9034_v40 }
 0x604   : > { %v9149_v53 = vpack.c.b16 %v9089_v0, %v9088_v43  ;;  %v9150_v26 = vpack.c.b16 %v9091_v10, %v9090_v16 }
 0x606   : > { %9224 = vst [vmem:[%s10742_s8 + $0x28] sm:$0xff] %v9149_v53  ;;  %v9014_v61 = vpop.trf.xlu2 }
 0x607   : > { %9225 = vst [vmem:[%s10742_s8 + $0x30] sm:$0xff] %v9150_v26  ;;  %v9096_v23 = vunpack.c.l.b16 %v9014_v61  ;;  %v9098_v7 = vunpack.c.h.b16 %v9014_v61 }
 0x609   : > { %v9035_v58 = vpop.trf.xlu0 }
 0x60a   : > { %v9121_v37 = vunpack.c.l.b16 %v9035_v58  ;;  %v9123_v36 = vunpack.c.h.b16 %v9035_v58 }
 0x60c   : > { %v9165_v46 = vpack.c.b16 %v9121_v37, %v9120_v32  ;;  %v9166_v38 = vpack.c.b16 %v9123_v36, %v9122_v39 }
 0x60e   : > { %9252 = vst [vmem:[%s10742_s8 + $0xc8] sm:$0xff] %v9165_v46  ;;  %v9015_v6 = vpop.trf.xlu2 }
 0x60f   : > { %9253 = vst [vmem:[%s10742_s8 + $0xd0] sm:$0xff] %v9166_v38  ;;  %v9128_v13 = vunpack.c.l.b16 %v9015_v6  ;;  %v9130_v20 = vunpack.c.h.b16 %v9015_v6 }
 0x611   : > { %v9036_v21 = vpop.trf.xlu0 }
 0x612   : > { %v9093_v33 = vunpack.c.l.b16 %v9036_v21  ;;  %v9095_v25 = vunpack.c.h.b16 %v9036_v21 }
 0x614   : > { %v9151_v2 = vpack.c.b16 %v9093_v33, %v9092_v4  ;;  %v9152_v59 = vpack.c.b16 %v9095_v25, %v9094_v48 }
 0x616   : > { %9226 = vst [vmem:[%s10742_s8 + $0x38] sm:$0xff] %v9151_v2  ;;  %v9016_v19 = vpop.trf.xlu2 }
 0x617   : > { %9227 = vst [vmem:[%s10742_s8 + $0x40] sm:$0xff] %v9152_v59  ;;  %v9100_v54 = vunpack.c.l.b16 %v9016_v19  ;;  %v9102_v1 = vunpack.c.h.b16 %v9016_v19 }
 0x619   : > { %v9037_v30 = vpop.trf.xlu0 }
 0x61a   : > { %v9125_v3 = vunpack.c.l.b16 %v9037_v30  ;;  %v9127_v57 = vunpack.c.h.b16 %v9037_v30 }
 0x61c   : > { %v9167_v28 = vpack.c.b16 %v9125_v3, %v9124_v63  ;;  %v9168_v9 = vpack.c.b16 %v9127_v57, %v9126_v5 }
 0x61e   : > { %9254 = vst [vmem:[%s10742_s8 + $0xd8] sm:$0xff] %v9167_v28  ;;  %v9017_v44 = vpop.trf.xlu2 }
 0x61f   : > { %9255 = vst [vmem:[%s10742_s8 + $0xe0] sm:$0xff] %v9168_v9  ;;  %v9132_v41 = vunpack.c.l.b16 %v9017_v44  ;;  %v9134_v12 = vunpack.c.h.b16 %v9017_v44 }
 0x621   : > { %v9038_v55 = vpop.trf.xlu0 }
 0x622   : > { %v9097_v14 = vunpack.c.l.b16 %v9038_v55  ;;  %v9099_v15 = vunpack.c.h.b16 %v9038_v55 }
 0x624   : > { %v9153_v47 = vpack.c.b16 %v9097_v14, %v9096_v23  ;;  %v9154_v34 = vpack.c.b16 %v9099_v15, %v9098_v7 }
 0x626   : > { %9231 = vst [vmem:[%s10742_s8 + $0x50] sm:$0xff] %v9153_v47  ;;  %v9018_v31 = vpop.trf.xlu2 }
 0x627   : > { %9232 = vst [vmem:[%s10742_s8 + $0x58] sm:$0xff] %v9154_v34  ;;  %v9104_v45 = vunpack.c.l.b16 %v9018_v31  ;;  %v9106_v52 = vunpack.c.h.b16 %v9018_v31 }
 0x629   : > { %v9039_v18 = vpop.trf.xlu0 }
 0x62a   : > { %v9129_v8 = vunpack.c.l.b16 %v9039_v18  ;;  %v9131_v17 = vunpack.c.h.b16 %v9039_v18 }
 0x62c   : > { %v9169_v29 = vpack.c.b16 %v9129_v8, %v9128_v13  ;;  %v9170_v56 = vpack.c.b16 %v9131_v17, %v9130_v20 }
 0x62e   : > { %9259 = vst [vmem:[%s10742_s8 + $0xf0] sm:$0xff] %v9169_v29  ;;  %v9019_v16 = vpop.trf.xlu2 }
 0x62f   : > { %9260 = vst [vmem:[%s10742_s8 + $0xf8] sm:$0xff] %v9170_v56  ;;  %v9136_v26 = vunpack.c.l.b16 %v9019_v16  ;;  %v9138_v42 = vunpack.c.h.b16 %v9019_v16 }
 0x631   : > { %v9040_v62 = vpop.trf.xlu0 }
 0x632   : > { %v9101_v24 = vunpack.c.l.b16 %v9040_v62  ;;  %v9103_v22 = vunpack.c.h.b16 %v9040_v62 }
 0x634   : > { %v9155_v51 = vpack.c.b16 %v9101_v24, %v9100_v54  ;;  %v9156_v49 = vpack.c.b16 %v9103_v22, %v9102_v1 }
 0x636   : > { %9233 = vst [vmem:[%s10742_s8 + $0x60] sm:$0xff] %v9155_v51  ;;  %v9020_v37 = vpop.trf.xlu2 }
 0x637   : > { %9234 = vst [vmem:[%s10742_s8 + $0x68] sm:$0xff] %v9156_v49  ;;  %v9108_v38 = vunpack.c.l.b16 %v9020_v37  ;;  %v9110_v61 = vunpack.c.h.b16 %v9020_v37 }
 0x639   : > { %v9041_v11 = vpop.trf.xlu0 }
 0x63a   : > { %v9133_v60 = vunpack.c.l.b16 %v9041_v11  ;;  %v9135_v35 = vunpack.c.h.b16 %v9041_v11 }
 0x63c   : > { %v9171_v50 = vpack.c.b16 %v9133_v60, %v9132_v41  ;;  %v9172_v27 = vpack.c.b16 %v9135_v35, %v9134_v12 }
 0x63e   : > { %9261 = vst [vmem:[%s10742_s8 + $0x100] sm:$0xff] %v9171_v50  ;;  %v9021_v2 = vpop.trf.xlu2 }
 0x63f   : > { %9262 = vst [vmem:[%s10742_s8 + $0x108] sm:$0xff] %v9172_v27  ;;  %v9140_v59 = vunpack.c.l.b16 %v9021_v2  ;;  %v9142_v63 = vunpack.c.h.b16 %v9021_v2 }
 0x641   : > { %v9042_v43 = vpop.trf.xlu0 }
 0x642   : > { %v9105_v40 = vunpack.c.l.b16 %v9042_v43  ;;  %v9107_v0 = vunpack.c.h.b16 %v9042_v43 }
 0x644   : > { %v9157_v10 = vpack.c.b16 %v9105_v40, %v9104_v45  ;;  %v9158_v53 = vpack.c.b16 %v9107_v0, %v9106_v52 }
 0x646   : > { %9238 = vst [vmem:[%s10742_s8 + $0x78] sm:$0xff] %v9157_v10 }
 0x647   : > { %9239 = vst [vmem:[%s10742_s8 + $0x80] sm:$0xff] %v9158_v53 }
 0x649   : > { %v9043_v32 = vpop.trf.xlu0 }
 0x64a   : > { %v9137_v39 = vunpack.c.l.b16 %v9043_v32  ;;  %v9139_v58 = vunpack.c.h.b16 %v9043_v32 }
 0x64c   : > { %v9173_v36 = vpack.c.b16 %v9137_v39, %v9136_v26  ;;  %v9174_v46 = vpack.c.b16 %v9139_v58, %v9138_v42 }
 0x64e   : > { %9266 = vst [vmem:[%s10742_s8 + $0x118] sm:$0xff] %v9173_v36 }
 0x64f   : > { %9267 = vst [vmem:[%s10742_s8 + $0x120] sm:$0xff] %v9174_v46 }
 0x651   : > { %v9044_v4 = vpop.trf.xlu0 }
 0x652   : > { %v9109_v48 = vunpack.c.l.b16 %v9044_v4  ;;  %v9111_v21 = vunpack.c.h.b16 %v9044_v4 }
 0x654   : > { %v9159_v33 = vpack.c.b16 %v9109_v48, %v9108_v38  ;;  %v9160_v25 = vpack.c.b16 %v9111_v21, %v9110_v61 }
 0x656   : > { %9240 = vst [vmem:[%s10742_s8 + $0x88] sm:$0xff] %v9159_v33 }
 0x657   : > { %9241 = vst [vmem:[%s10742_s8 + $0x90] sm:$0xff] %v9160_v25 }
 0x659   : > { %v9045_v5 = vpop.trf.xlu0 }
 0x65a   : > { %v9141_v30 = vunpack.c.l.b16 %v9045_v5  ;;  %v9143_v6 = vunpack.c.h.b16 %v9045_v5 }
 0x65c   : > { %v9175_v3 = vpack.c.b16 %v9141_v30, %v9140_v59  ;;  %v9176_v57 = vpack.c.b16 %v9143_v6, %v9142_v63 }
 0x65e   : > { %9268 = vst [vmem:[%s10742_s8 + $0x128] sm:$0xff] %v9175_v3 }
 0x65f   : > { %9269 = vst [vmem:[%s10742_s8 + $0x130] sm:$0xff] %v9176_v57 }
 0x660 PF: > { %s9343_s6 = sand.u32 1, %s10544_s18   ;;  %p10315_p5 = pnand %p9502_p11, %p10659_p6 }
 0x661   : > { %s9344_s16 = scalar_lea.sflag [#allocation4], %s9343_s6 }
 0x662   : > { %p10316_p7 = pneg %p10315_p5 }
 0x664   : > { %10539 = dma.done.wait (%p10316_p7), %s9344_s16, 4096  }
 0x665   : > { %10541 = vsyncadd (%p10316_p7), %s9344_s16, 4294963200  ;;  %s23_s23 = sadd.s32 1, %s10564_s23   ;;  %s14962_s8 = sld [smem:[#allocation12_spill]] }
 0x666   : > { %p20_p9 = scmp.ge.s32.totalorder %s23_s23, 4   ;;  %s14963_s18 = smov %s10548_s19 }
 0x667   : > { %s14964_s19 = smov %s10552_s20  ;;  %s14965_s20 = smov %s10702_s12 }
 0x668   : > { %s14966_s21 = smov %s10560_s22  ;;  %22 = sbr.rel (!%p20_p9) target bundleno = 10 (0xa), region = 109 }
 0x66b   : > { %s14967_s22 = smov %s14962_s8 }
 0x66d   :  { %9362 = vsyncpa [#allocation3], 1 }
 0x66e   :  { %9364 = vsyncpa [#allocation3 + $0x1], 1 }
 0x66f   :  { %9365 = vsyncpa [#allocation6], 1 }
 0x670   :  { %9366 = vsyncpa [#allocation4], 1 }
 0x671   :  { %9368 = vsyncpa [#allocation4 + $0x1], 1 }

</bundles_post_ra>
